<compile_context>
chip_gen: v6e
topology: v6e:2x2x1
jax: 0.10.0
libtpu: 0.0.40
codegen_flags: <defaults>
</compile_context>

<pallas_src>
import functools

import jax
import jax.numpy as jnp
import numpy as np
from jax import lax
from jax.experimental import pallas as pl
from jax.experimental.pallas import tpu as pltpu


# ------------------------------ Fused kernel -------------------------------- #

def _encoder_kernel(x_ref,
                    w_ih0_ref, b_ih0_ref, w_hh0_ref, b_hh0_ref,
                    b_ih1_ref, b_hh1_ref,
                    b_p1_ref, ln_g_ref, ln_b_ref, b_p2_ref,
                    w_ih1_hbm, w_hh1_hbm, w_p1_hbm, w_p2_hbm,
                    norm_ref, out_ref,
                    w_ih1_v, w_hh1_v, w_p1_v, w_p2_v, dma_sems,
                    *, temperature, ln_eps):
    B, T, F_in = x_ref.shape
    H2 = w_hh0_ref.shape[0]          # 2H (fwd+bwd hidden, lane-concatenated)
    H = H2 // 2
    H6 = 3 * H2                      # 6H = all gates, both directions
    f32 = jnp.float32
    bf16 = jnp.bfloat16

    # ---- Kick off DMA of layer-1 / head weights immediately. They are not needed
    # ---- until after the layer-0 recurrence, so the copies hide behind compute.
    cp_ih1 = pltpu.make_async_copy(w_ih1_hbm, w_ih1_v, dma_sems.at[0])
    cp_hh1 = pltpu.make_async_copy(w_hh1_hbm, w_hh1_v, dma_sems.at[1])
    cp_p1 = pltpu.make_async_copy(w_p1_hbm, w_p1_v, dma_sems.at[2])
    cp_p2 = pltpu.make_async_copy(w_p2_hbm, w_p2_v, dma_sems.at[3])
    cp_ih1.start(); cp_hh1.start(); cp_p1.start(); cp_p2.start()

    # Lane mask: inside each 2H-wide gate block, first H lanes = forward direction.
    col = lax.broadcasted_iota(jnp.int32, (1, H6), 1)
    fwd_cols = (col % H2) < H

    def swizzle(xg_all):
        # Per-step gate tensor: fwd lanes consume original time s, bwd lanes T-1-s.
        # Hoisted out of the recurrence -- no dependence on h, so these selects are
        # off the serial critical path.
        return [jnp.where(fwd_cols, xg_all[:, s, :], xg_all[:, T - 1 - s, :])
                for s in range(T)]

    def run_layer(xg_steps, w_hh, b_hh):
        """Fused fwd+bwd GRU recurrence. Hidden lanes = [fwd H | bwd H]."""
        h = jnp.zeros((B, H2), f32)
        hs = []
        for s in range(T):                                   # statically unrolled
            xg = xg_steps[s]
            hg = jnp.dot(h.astype(bf16), w_hh, preferred_element_type=f32) + b_hh
            rz = jax.nn.sigmoid(xg[:, :2 * H2] + hg[:, :2 * H2])   # one EUP slab: [r|z]
            r = rz[:, 0:H2]
            z = rz[:, H2:2 * H2]
            n = jnp.tanh(xg[:, 2 * H2:] + r * hg[:, 2 * H2:])      # b_hn inside r*(...)
            h = (1.0 - z) * n + z * h
            hs.append(h)
        return hs

    def assemble(hs):
        # (B, T, 2H): time t keeps fwd output of step t and bwd output of step T-1-t.
        return jnp.stack(
            [jnp.concatenate([hs[t][:, :H], hs[T - 1 - t][:, H:]], axis=-1)
             for t in range(T)], axis=1)

    # --------------- GRU layer 0 (both directions, one input-gate matmul) --------- #
    xg0 = (jnp.dot(x_ref[...].reshape(B * T, F_in), w_ih0_ref[...],
                   preferred_element_type=f32) + b_ih0_ref[...]).reshape(B, T, H6)
    hs0 = run_layer(swizzle(xg0), w_hh0_ref[...], b_hh0_ref[...])
    seq0 = assemble(hs0)                                   # stays in registers

    # --------------- GRU layer 1 (input = in-register layer-0 sequence) ----------- #
    cp_ih1.wait()
    cp_hh1.wait()
    xg1 = (jnp.dot(seq0.reshape(B * T, H2).astype(bf16), w_ih1_v[...],
                   preferred_element_type=f32) + b_ih1_ref[...]).reshape(B, T, H6)
    hs1 = run_layer(swizzle(xg1), w_hh1_v[...], b_hh1_ref[...])
    out_ref[...] = assemble(hs1)                           # single lane-dense store
    h1 = hs1[-1]                                           # cat(h_fwd_final, h_bwd_final)

    # ---- projection head: Linear -> LayerNorm -> ReLU -> Linear -> /T -> L2 ------ #
    cp_p1.wait()
    cp_p2.wait()
    y = jnp.dot(h1.astype(bf16), w_p1_v[...], preferred_element_type=f32) + b_p1_ref[...]
    mu = jnp.mean(y, axis=-1, keepdims=True)
    var = jnp.mean(jnp.square(y - mu), axis=-1, keepdims=True)
    y = (y - mu) * lax.rsqrt(var + ln_eps) * ln_g_ref[...] + ln_b_ref[...]
    y = jnp.maximum(y, 0.0)
    p = jnp.dot(y.astype(bf16), w_p2_v[...], preferred_element_type=f32) + b_p2_ref[...]
    p = p * (1.0 / temperature)
    sumsq = jnp.sum(p * p, axis=-1, keepdims=True)
    # F.normalize(eps=1e-12):  p / max(||p||, 1e-12)  ==  p * rsqrt(max(||p||^2, 1e-24))
    norm_ref[...] = p * lax.rsqrt(jnp.maximum(sumsq, 1e-24))


# ------------------------------- Wrappers ------------------------------------ #

def pack_params(params):
    """One-time packing of PyTorch-layout weights into the fused-kernel layout.

    Combined gate/lane layout per layer (width 6H): [r_f r_b z_f z_b n_f n_b], each H
    wide. Weight matrices are cast to bf16 (halves DMA; MXU-native); biases stay f32.
    """
    H = params["w_hh_l0"].shape[1]
    bf16 = jnp.bfloat16

    def pack_ih(w_f, w_b):
        wf, wb = w_f.T, w_b.T                              # (K, 3H), cols [r|z|n]
        return jnp.concatenate(
            [wf[:, 0:H], wb[:, 0:H],
             wf[:, H:2 * H], wb[:, H:2 * H],
             wf[:, 2 * H:], wb[:, 2 * H:]], axis=1).astype(bf16)   # (K, 6H)

    def pack_bias(b_f, b_b):
        return jnp.concatenate(
            [b_f[0:H], b_b[0:H], b_f[H:2 * H], b_b[H:2 * H],
             b_f[2 * H:], b_b[2 * H:]])[None, :].astype(jnp.float32)   # (1, 6H)

    def pack_hh(w_f, w_b):
        wf, wb = w_f.T, w_b.T                              # (H, 3H)
        z = jnp.zeros((H, H), jnp.float32)
        top = jnp.concatenate([wf[:, 0:H], z, wf[:, H:2 * H], z, wf[:, 2 * H:], z], axis=1)
        bot = jnp.concatenate([z, wb[:, 0:H], z, wb[:, H:2 * H], z, wb[:, 2 * H:]], axis=1)
        return jnp.concatenate([top, bot], axis=0).astype(bf16)   # block-diag (2H, 6H)

    return {
        "w_ih0": pack_ih(params["w_ih_l0"], params["w_ih_l0_rev"]),
        "b_ih0": pack_bias(params["b_ih_l0"], params["b_ih_l0_rev"]),
        "w_hh0": pack_hh(params["w_hh_l0"], params["w_hh_l0_rev"]),
        "b_hh0": pack_bias(params["b_hh_l0"], params["b_hh_l0_rev"]),
        "w_ih1": pack_ih(params["w_ih_l1"], params["w_ih_l1_rev"]),
        "b_ih1": pack_bias(params["b_ih_l1"], params["b_ih_l1_rev"]),
        "w_hh1": pack_hh(params["w_hh_l1"], params["w_hh_l1_rev"]),
        "b_hh1": pack_bias(params["b_hh_l1"], params["b_hh_l1_rev"]),
        "w_p1": params["w_p1"].T.astype(bf16), "b_p1": params["b_p1"][None, :],
        "ln_g": params["ln_g"][None, :], "ln_b": params["ln_b"][None, :],
        "w_p2": params["w_p2"].T.astype(bf16), "b_p2": params["b_p2"][None, :],
    }


@functools.partial(jax.jit, static_argnames=("temperature",))
def encoder_forward(x, packed, temperature=0.07):
    """Mirrors HypersphericalEncoder.forward(x, lengths=None). One fused pallas_call."""
    B, T, _ = x.shape
    H2 = packed["w_hh0"].shape[0]          # 2H = 4 * projection_dim
    P = packed["w_p2"].shape[1]
    x = x.astype(jnp.bfloat16)
    kernel = functools.partial(_encoder_kernel, temperature=temperature, ln_eps=1e-5)
    vmem = pl.BlockSpec(memory_space=pltpu.MemorySpace.VMEM)
    hbm = pl.BlockSpec(memory_space=pl.ANY)      # DMA'd manually behind layer-0 compute
    normalized, output = pl.pallas_call(
        kernel,
        out_shape=(jax.ShapeDtypeStruct((B, P), jnp.float32),
                   jax.ShapeDtypeStruct((B, T, H2), jnp.float32)),
        in_specs=[vmem] * 11 + [hbm] * 4,
        out_specs=(vmem, vmem),
        scratch_shapes=[
            pltpu.VMEM(packed["w_ih1"].shape, jnp.bfloat16),
            pltpu.VMEM(packed["w_hh1"].shape, jnp.bfloat16),
            pltpu.VMEM(packed["w_p1"].shape, jnp.bfloat16),
            pltpu.VMEM(packed["w_p2"].shape, jnp.bfloat16),
            pltpu.SemaphoreType.DMA((4,)),
        ],
    )(x,
      packed["w_ih0"], packed["b_ih0"], packed["w_hh0"], packed["b_hh0"],
      packed["b_ih1"], packed["b_hh1"],
      packed["b_p1"], packed["ln_g"], packed["ln_b"], packed["b_p2"],
      packed["w_ih1"], packed["w_hh1"], packed["w_p1"], packed["w_p2"])
    return normalized, output


# ------------------------- Deterministic parameters ------------------------- #

def init_params(key, projection_dim=64, n_in=12):
    P = projection_dim
    H = 2 * P                      # GRU hidden size
    keys = iter(jax.random.split(key, 32))

    def uni(shape, bound):
        return jax.random.uniform(next(keys), shape, jnp.float32, -bound, bound)

    params = {}
    std = 1.0 / np.sqrt(H)
    for layer, fin in ((0, n_in), (1, 2 * H)):
        for suffix in ("", "_rev"):
            params[f"w_ih_l{layer}{suffix}"] = uni((3 * H, fin), std)
            params[f"w_hh_l{layer}{suffix}"] = uni((3 * H, H), std)
            params[f"b_ih_l{layer}{suffix}"] = uni((3 * H,), std)
            params[f"b_hh_l{layer}{suffix}"] = uni((3 * H,), std)

    def xavier(shape):  # (out, in) PyTorch Linear layout
        bound = np.sqrt(6.0 / (shape[0] + shape[1]))
        return uni(shape, bound)

    params["w_p1"] = xavier((2 * P, 4 * P))
    params["b_p1"] = jnp.zeros((2 * P,), jnp.float32)
    params["ln_g"] = jnp.ones((2 * P,), jnp.float32)
    params["ln_b"] = jnp.zeros((2 * P,), jnp.float32)
    params["w_p2"] = xavier((P, 2 * P))
    params["b_p2"] = jnp.zeros((P,), jnp.float32)
    return params


# --------------------------- Pure-JAX reference (f32) ----------------------- #

def _gru_dir_ref(x_seq, w_ih, b_ih, w_hh, b_hh, reverse):
    B, T, _ = x_seq.shape
    H = w_hh.shape[1]
    ts = range(T - 1, -1, -1) if reverse else range(T)
    h = jnp.zeros((B, H), jnp.float32)
    outs = [None] * T
    for t in ts:
        xg = x_seq[:, t, :] @ w_ih.T + b_ih
        hg = h @ w_hh.T + b_hh
        r = jax.nn.sigmoid(xg[:, :H] + hg[:, :H])
        z = jax.nn.sigmoid(xg[:, H:2 * H] + hg[:, H:2 * H])
        n = jnp.tanh(xg[:, 2 * H:] + r * hg[:, 2 * H:])
        h = (1.0 - z) * n + z * h
        outs[t] = h
    return jnp.stack(outs, axis=1), h


def encoder_forward_ref(x, p, temperature=0.07):
    of0, _ = _gru_dir_ref(x, p["w_ih_l0"], p["b_ih_l0"], p["w_hh_l0"], p["b_hh_l0"], False)
    ob0, _ = _gru_dir_ref(x, p["w_ih_l0_rev"], p["b_ih_l0_rev"], p["w_hh_l0_rev"],
                          p["b_hh_l0_rev"], True)
    l0 = jnp.concatenate([of0, ob0], axis=-1)
    of1, hf1 = _gru_dir_ref(l0, p["w_ih_l1"], p["b_ih_l1"], p["w_hh_l1"], p["b_hh_l1"], False)
    ob1, hb1 = _gru_dir_ref(l0, p["w_ih_l1_rev"], p["b_ih_l1_rev"], p["w_hh_l1_rev"],
                            p["b_hh_l1_rev"], True)
    output = jnp.concatenate([of1, ob1], axis=-1)
    gh = jnp.concatenate([hf1, hb1], axis=-1)
    y = gh @ p["w_p1"].T + p["b_p1"]
    mu = jnp.mean(y, axis=-1, keepdims=True)
    var = jnp.mean(jnp.square(y - mu), axis=-1, keepdims=True)
    y = (y - mu) / jnp.sqrt(var + 1e-5) * p["ln_g"] + p["ln_b"]
    y = jnp.maximum(y, 0.0)
    proj = (y @ p["w_p2"].T + p["b_p2"]) / temperature
    nrm = jnp.sqrt(jnp.sum(proj * proj, axis=-1, keepdims=True))
    return proj / jnp.maximum(nrm, 1e-12), output


# ----------------------------------- Main ------------------------------------ #

if __name__ == "__main__":
    # Small shapes consistent with the module: projection_dim=64 -> GRU hidden 128,
    # n_price_features + n_indicator_features = 12, batch=2, seq=8.
    B, T, F_IN, P = 2, 8, 12, 64
    key = jax.random.PRNGKey(0)
    k_x, k_p = jax.random.split(key)
    x = jax.random.normal(k_x, (B, T, F_IN), jnp.float32)
    params = init_params(k_p, projection_dim=P, n_in=F_IN)
    packed = pack_params(params)                      # one-time weight packing (bf16)

    normalized, output = jax.block_until_ready(
        encoder_forward(x, packed, temperature=0.07))

    # bf16 matmuls vs. f32 reference -> looser tolerance (mirrors autocast-fp16 model).
    ref_norm, ref_out = encoder_forward_ref(x, params, temperature=0.07)
    np.testing.assert_allclose(np.asarray(normalized), np.asarray(ref_norm),
                               rtol=2e-2, atol=2e-2)
    np.testing.assert_allclose(np.asarray(output), np.asarray(ref_out),
                               rtol=2e-2, atol=2e-2)

    assert normalized.shape == (B, P) and output.shape == (B, T, 4 * P)
    print("KERNEL_OK")
</pallas_src>

<mosaic_0001>
module attributes {stable_mosaic.version = 11 : i64} {
  func.func @_encoder_kernel(%arg0: memref<2x8x12xbf16, #tpu.memory_space<vmem>>, %arg1: memref<12x768xbf16, #tpu.memory_space<vmem>>, %arg2: memref<1x768xf32, #tpu.memory_space<vmem>>, %arg3: memref<256x768xbf16, #tpu.memory_space<vmem>>, %arg4: memref<1x768xf32, #tpu.memory_space<vmem>>, %arg5: memref<1x768xf32, #tpu.memory_space<vmem>>, %arg6: memref<1x768xf32, #tpu.memory_space<vmem>>, %arg7: memref<1x128xf32, #tpu.memory_space<vmem>>, %arg8: memref<1x128xf32, #tpu.memory_space<vmem>>, %arg9: memref<1x128xf32, #tpu.memory_space<vmem>>, %arg10: memref<1x64xf32, #tpu.memory_space<vmem>>, %arg11: memref<256x768xbf16, #tpu.memory_space<any>>, %arg12: memref<256x768xbf16, #tpu.memory_space<any>>, %arg13: memref<256x128xbf16, #tpu.memory_space<any>>, %arg14: memref<128x64xbf16, #tpu.memory_space<any>>, %arg15: memref<2x64xf32, #tpu.memory_space<vmem>>, %arg16: memref<2x8x256xf32, #tpu.memory_space<vmem>>, %arg17: memref<256x768xbf16, #tpu.memory_space<vmem>>, %arg18: memref<256x768xbf16, #tpu.memory_space<vmem>>, %arg19: memref<256x128xbf16, #tpu.memory_space<vmem>>, %arg20: memref<128x64xbf16, #tpu.memory_space<vmem>>, %arg21: memref<4x!tpu.dma_semaphore, #tpu.memory_space<semaphore_mem>>) attributes {dimension_semantics = [], scalar_prefetch = 0 : i64, scratch_operands = 5 : i64, tpu.core_type = #tpu.core_type<tc>} {
    %c0_i32 = arith.constant 0 : i32
    %0 = tpu.memref_slice %arg21[%c0_i32] : memref<4x!tpu.dma_semaphore, #tpu.memory_space<semaphore_mem>> -> memref<1x!tpu.dma_semaphore, #tpu.memory_space<semaphore_mem>>
    %1 = tpu.memref_squeeze %0 : memref<1x!tpu.dma_semaphore, #tpu.memory_space<semaphore_mem>> -> memref<!tpu.dma_semaphore, #tpu.memory_space<semaphore_mem>>
    tpu.enqueue_dma source(%arg11 : memref<256x768xbf16, #tpu.memory_space<any>>) target(%arg17 : memref<256x768xbf16, #tpu.memory_space<vmem>>) target_semaphore(%1 : memref<!tpu.dma_semaphore, #tpu.memory_space<semaphore_mem>>)
    %c1_i32 = arith.constant 1 : i32
    %2 = tpu.memref_slice %arg21[%c1_i32] : memref<4x!tpu.dma_semaphore, #tpu.memory_space<semaphore_mem>> -> memref<1x!tpu.dma_semaphore, #tpu.memory_space<semaphore_mem>>
    %3 = tpu.memref_squeeze %2 : memref<1x!tpu.dma_semaphore, #tpu.memory_space<semaphore_mem>> -> memref<!tpu.dma_semaphore, #tpu.memory_space<semaphore_mem>>
    tpu.enqueue_dma source(%arg12 : memref<256x768xbf16, #tpu.memory_space<any>>) target(%arg18 : memref<256x768xbf16, #tpu.memory_space<vmem>>) target_semaphore(%3 : memref<!tpu.dma_semaphore, #tpu.memory_space<semaphore_mem>>)
    %c2_i32 = arith.constant 2 : i32
    %4 = tpu.memref_slice %arg21[%c2_i32] : memref<4x!tpu.dma_semaphore, #tpu.memory_space<semaphore_mem>> -> memref<1x!tpu.dma_semaphore, #tpu.memory_space<semaphore_mem>>
    %5 = tpu.memref_squeeze %4 : memref<1x!tpu.dma_semaphore, #tpu.memory_space<semaphore_mem>> -> memref<!tpu.dma_semaphore, #tpu.memory_space<semaphore_mem>>
    tpu.enqueue_dma source(%arg13 : memref<256x128xbf16, #tpu.memory_space<any>>) target(%arg19 : memref<256x128xbf16, #tpu.memory_space<vmem>>) target_semaphore(%5 : memref<!tpu.dma_semaphore, #tpu.memory_space<semaphore_mem>>)
    %c3_i32 = arith.constant 3 : i32
    %6 = tpu.memref_slice %arg21[%c3_i32] : memref<4x!tpu.dma_semaphore, #tpu.memory_space<semaphore_mem>> -> memref<1x!tpu.dma_semaphore, #tpu.memory_space<semaphore_mem>>
    %7 = tpu.memref_squeeze %6 : memref<1x!tpu.dma_semaphore, #tpu.memory_space<semaphore_mem>> -> memref<!tpu.dma_semaphore, #tpu.memory_space<semaphore_mem>>
    tpu.enqueue_dma source(%arg14 : memref<128x64xbf16, #tpu.memory_space<any>>) target(%arg20 : memref<128x64xbf16, #tpu.memory_space<vmem>>) target_semaphore(%7 : memref<!tpu.dma_semaphore, #tpu.memory_space<semaphore_mem>>)
    %8 = tpu.iota {dimensions = array<i32: 1>} : vector<1x768xi32>
    %c256_i32 = arith.constant 256 : i32
    %c0_i32_0 = arith.constant 0 : i32
    %9 = arith.cmpi eq, %c256_i32, %c0_i32_0 : i32
    %c1_i32_1 = arith.constant 1 : i32
    %10 = arith.select %9, %c1_i32_1, %c256_i32 : i32
    %11 = vector.broadcast %10 : i32 to vector<1x768xi32>
    %12 = arith.remsi %8, %11 : vector<1x768xi32>
    %c0_i32_2 = arith.constant 0 : i32
    %13 = vector.broadcast %c0_i32_2 : i32 to vector<1x768xi32>
    %14 = arith.cmpi ne, %12, %13 : vector<1x768xi32>
    %c0_i32_3 = arith.constant 0 : i32
    %15 = vector.broadcast %c0_i32_3 : i32 to vector<1x768xi32>
    %16 = arith.cmpi slt, %12, %15 : vector<1x768xi32>
    %c0_i32_4 = arith.constant 0 : i32
    %17 = arith.cmpi slt, %10, %c0_i32_4 : i32
    %18 = vector.broadcast %17 : i1 to vector<1x768xi1>
    %19 = vector.broadcast %18 : vector<1x768xi1> to vector<1x768xi1>
    %20 = arith.xori %16, %19 : vector<1x768xi1>
    %21 = arith.andi %20, %14 : vector<1x768xi1>
    %22 = vector.broadcast %10 : i32 to vector<1x768xi32>
    %23 = arith.addi %12, %22 : vector<1x768xi32>
    %24 = arith.select %21, %23, %12 : vector<1x768xi1>, vector<1x768xi32>
    %c128_i32 = arith.constant 128 : i32
    %25 = vector.broadcast %c128_i32 : i32 to vector<1x768xi32>
    %26 = arith.cmpi slt, %24, %25 : vector<1x768xi32>
    %c0 = arith.constant 0 : index
    %c0_5 = arith.constant 0 : index
    %c0_6 = arith.constant 0 : index
    %27 = vector.load %arg0[%c0, %c0_5, %c0_6] : memref<2x8x12xbf16, #tpu.memory_space<vmem>>, vector<2x8x12xbf16>
    %28 = vector.shape_cast %27 : vector<2x8x12xbf16> to vector<16x12xbf16>
    %c0_7 = arith.constant 0 : index
    %c0_8 = arith.constant 0 : index
    %29 = vector.load %arg1[%c0_7, %c0_8] : memref<12x768xbf16, #tpu.memory_space<vmem>>, vector<12x768xbf16>
    %cst = arith.constant dense<0.000000e+00> : vector<16x768xf32>
    %30 = tpu.matmul %28, %29, %cst {dimension_numbers = #tpu.dot_dimension_numbers<[1], [0], [0], [1], [0, 0, 1, 1], [], []>} : vector<16x12xbf16>, vector<12x768xbf16>, vector<16x768xf32> -> vector<16x768xf32>
    %c0_9 = arith.constant 0 : index
    %c0_10 = arith.constant 0 : index
    %31 = vector.load %arg2[%c0_9, %c0_10] : memref<1x768xf32, #tpu.memory_space<vmem>>, vector<1x768xf32>
    %32 = vector.broadcast %31 : vector<1x768xf32> to vector<16x768xf32>
    %33 = arith.addf %30, %32 : vector<16x768xf32>
    %34 = vector.shape_cast %33 : vector<16x768xf32> to vector<2x8x768xf32>
    %35 = vector.extract_strided_slice %34 {offsets = [0, 0, 0], sizes = [2, 1, 768], strides = [1, 1, 1]} : vector<2x8x768xf32> to vector<2x1x768xf32>
    %36 = vector.shape_cast %35 : vector<2x1x768xf32> to vector<2x768xf32>
    %37 = vector.extract_strided_slice %34 {offsets = [0, 7, 0], sizes = [2, 1, 768], strides = [1, 1, 1]} : vector<2x8x768xf32> to vector<2x1x768xf32>
    %38 = vector.shape_cast %37 : vector<2x1x768xf32> to vector<2x768xf32>
    %39 = vector.shape_cast %26 : vector<1x768xi1> to vector<1x768xi1>
    %40 = vector.broadcast %39 : vector<1x768xi1> to vector<2x768xi1>
    %41 = arith.select %40, %36, %38 : vector<2x768xi1>, vector<2x768xf32>
    %42 = vector.extract_strided_slice %34 {offsets = [0, 1, 0], sizes = [2, 1, 768], strides = [1, 1, 1]} : vector<2x8x768xf32> to vector<2x1x768xf32>
    %43 = vector.shape_cast %42 : vector<2x1x768xf32> to vector<2x768xf32>
    %44 = vector.extract_strided_slice %34 {offsets = [0, 6, 0], sizes = [2, 1, 768], strides = [1, 1, 1]} : vector<2x8x768xf32> to vector<2x1x768xf32>
    %45 = vector.shape_cast %44 : vector<2x1x768xf32> to vector<2x768xf32>
    %46 = vector.shape_cast %26 : vector<1x768xi1> to vector<1x768xi1>
    %47 = vector.broadcast %46 : vector<1x768xi1> to vector<2x768xi1>
    %48 = arith.select %47, %43, %45 : vector<2x768xi1>, vector<2x768xf32>
    %49 = vector.extract_strided_slice %34 {offsets = [0, 2, 0], sizes = [2, 1, 768], strides = [1, 1, 1]} : vector<2x8x768xf32> to vector<2x1x768xf32>
    %50 = vector.shape_cast %49 : vector<2x1x768xf32> to vector<2x768xf32>
    %51 = vector.extract_strided_slice %34 {offsets = [0, 5, 0], sizes = [2, 1, 768], strides = [1, 1, 1]} : vector<2x8x768xf32> to vector<2x1x768xf32>
    %52 = vector.shape_cast %51 : vector<2x1x768xf32> to vector<2x768xf32>
    %53 = vector.shape_cast %26 : vector<1x768xi1> to vector<1x768xi1>
    %54 = vector.broadcast %53 : vector<1x768xi1> to vector<2x768xi1>
    %55 = arith.select %54, %50, %52 : vector<2x768xi1>, vector<2x768xf32>
    %56 = vector.extract_strided_slice %34 {offsets = [0, 3, 0], sizes = [2, 1, 768], strides = [1, 1, 1]} : vector<2x8x768xf32> to vector<2x1x768xf32>
    %57 = vector.shape_cast %56 : vector<2x1x768xf32> to vector<2x768xf32>
    %58 = vector.extract_strided_slice %34 {offsets = [0, 4, 0], sizes = [2, 1, 768], strides = [1, 1, 1]} : vector<2x8x768xf32> to vector<2x1x768xf32>
    %59 = vector.shape_cast %58 : vector<2x1x768xf32> to vector<2x768xf32>
    %60 = vector.shape_cast %26 : vector<1x768xi1> to vector<1x768xi1>
    %61 = vector.broadcast %60 : vector<1x768xi1> to vector<2x768xi1>
    %62 = arith.select %61, %57, %59 : vector<2x768xi1>, vector<2x768xf32>
    %63 = vector.extract_strided_slice %34 {offsets = [0, 4, 0], sizes = [2, 1, 768], strides = [1, 1, 1]} : vector<2x8x768xf32> to vector<2x1x768xf32>
    %64 = vector.shape_cast %63 : vector<2x1x768xf32> to vector<2x768xf32>
    %65 = vector.extract_strided_slice %34 {offsets = [0, 3, 0], sizes = [2, 1, 768], strides = [1, 1, 1]} : vector<2x8x768xf32> to vector<2x1x768xf32>
    %66 = vector.shape_cast %65 : vector<2x1x768xf32> to vector<2x768xf32>
    %67 = vector.shape_cast %26 : vector<1x768xi1> to vector<1x768xi1>
    %68 = vector.broadcast %67 : vector<1x768xi1> to vector<2x768xi1>
    %69 = arith.select %68, %64, %66 : vector<2x768xi1>, vector<2x768xf32>
    %70 = vector.extract_strided_slice %34 {offsets = [0, 5, 0], sizes = [2, 1, 768], strides = [1, 1, 1]} : vector<2x8x768xf32> to vector<2x1x768xf32>
    %71 = vector.shape_cast %70 : vector<2x1x768xf32> to vector<2x768xf32>
    %72 = vector.extract_strided_slice %34 {offsets = [0, 2, 0], sizes = [2, 1, 768], strides = [1, 1, 1]} : vector<2x8x768xf32> to vector<2x1x768xf32>
    %73 = vector.shape_cast %72 : vector<2x1x768xf32> to vector<2x768xf32>
    %74 = vector.shape_cast %26 : vector<1x768xi1> to vector<1x768xi1>
    %75 = vector.broadcast %74 : vector<1x768xi1> to vector<2x768xi1>
    %76 = arith.select %75, %71, %73 : vector<2x768xi1>, vector<2x768xf32>
    %77 = vector.extract_strided_slice %34 {offsets = [0, 6, 0], sizes = [2, 1, 768], strides = [1, 1, 1]} : vector<2x8x768xf32> to vector<2x1x768xf32>
    %78 = vector.shape_cast %77 : vector<2x1x768xf32> to vector<2x768xf32>
    %79 = vector.extract_strided_slice %34 {offsets = [0, 1, 0], sizes = [2, 1, 768], strides = [1, 1, 1]} : vector<2x8x768xf32> to vector<2x1x768xf32>
    %80 = vector.shape_cast %79 : vector<2x1x768xf32> to vector<2x768xf32>
    %81 = vector.shape_cast %26 : vector<1x768xi1> to vector<1x768xi1>
    %82 = vector.broadcast %81 : vector<1x768xi1> to vector<2x768xi1>
    %83 = arith.select %82, %78, %80 : vector<2x768xi1>, vector<2x768xf32>
    %84 = vector.extract_strided_slice %34 {offsets = [0, 7, 0], sizes = [2, 1, 768], strides = [1, 1, 1]} : vector<2x8x768xf32> to vector<2x1x768xf32>
    %85 = vector.shape_cast %84 : vector<2x1x768xf32> to vector<2x768xf32>
    %86 = vector.extract_strided_slice %34 {offsets = [0, 0, 0], sizes = [2, 1, 768], strides = [1, 1, 1]} : vector<2x8x768xf32> to vector<2x1x768xf32>
    %87 = vector.shape_cast %86 : vector<2x1x768xf32> to vector<2x768xf32>
    %88 = vector.shape_cast %26 : vector<1x768xi1> to vector<1x768xi1>
    %89 = vector.broadcast %88 : vector<1x768xi1> to vector<2x768xi1>
    %90 = arith.select %89, %85, %87 : vector<2x768xi1>, vector<2x768xf32>
    %c0_11 = arith.constant 0 : index
    %c0_12 = arith.constant 0 : index
    %91 = vector.load %arg3[%c0_11, %c0_12] : memref<256x768xbf16, #tpu.memory_space<vmem>>, vector<256x768xbf16>
    %c0_13 = arith.constant 0 : index
    %c0_14 = arith.constant 0 : index
    %92 = vector.load %arg4[%c0_13, %c0_14] : memref<1x768xf32, #tpu.memory_space<vmem>>, vector<1x768xf32>
    %cst_15 = arith.constant 0.000000e+00 : f32
    %93 = vector.broadcast %cst_15 : f32 to vector<2x256xf32>
    %94 = arith.truncf %93 : vector<2x256xf32> to vector<2x256xbf16>
    %cst_16 = arith.constant dense<0.000000e+00> : vector<2x768xf32>
    %95 = tpu.matmul %94, %91, %cst_16 {dimension_numbers = #tpu.dot_dimension_numbers<[1], [0], [0], [1], [0, 0, 1, 1], [], []>} : vector<2x256xbf16>, vector<256x768xbf16>, vector<2x768xf32> -> vector<2x768xf32>
    %96 = vector.broadcast %92 : vector<1x768xf32> to vector<2x768xf32>
    %97 = arith.addf %95, %96 : vector<2x768xf32>
    %98 = vector.extract_strided_slice %41 {offsets = [0, 0], sizes = [2, 512], strides = [1, 1]} : vector<2x768xf32> to vector<2x512xf32>
    %99 = vector.extract_strided_slice %97 {offsets = [0, 0], sizes = [2, 512], strides = [1, 1]} : vector<2x768xf32> to vector<2x512xf32>
    %100 = arith.addf %98, %99 : vector<2x512xf32>
    %101 = arith.negf %100 : vector<2x512xf32>
    %102 = math.exp %101 : vector<2x512xf32>
    %cst_17 = arith.constant 1.000000e+00 : f32
    %103 = vector.broadcast %cst_17 : f32 to vector<2x512xf32>
    %104 = arith.addf %103, %102 : vector<2x512xf32>
    %105 = arith.divf %103, %104 : vector<2x512xf32>
    %106 = vector.extract_strided_slice %105 {offsets = [0, 0], sizes = [2, 256], strides = [1, 1]} : vector<2x512xf32> to vector<2x256xf32>
    %107 = vector.extract_strided_slice %105 {offsets = [0, 256], sizes = [2, 256], strides = [1, 1]} : vector<2x512xf32> to vector<2x256xf32>
    %108 = vector.extract_strided_slice %41 {offsets = [0, 512], sizes = [2, 256], strides = [1, 1]} : vector<2x768xf32> to vector<2x256xf32>
    %109 = vector.extract_strided_slice %97 {offsets = [0, 512], sizes = [2, 256], strides = [1, 1]} : vector<2x768xf32> to vector<2x256xf32>
    %110 = arith.mulf %106, %109 : vector<2x256xf32>
    %111 = arith.addf %108, %110 : vector<2x256xf32>
    %112 = math.tanh %111 : vector<2x256xf32>
    %cst_18 = arith.constant 1.000000e+00 : f32
    %113 = vector.broadcast %cst_18 : f32 to vector<2x256xf32>
    %114 = arith.subf %113, %107 : vector<2x256xf32>
    %115 = arith.mulf %114, %112 : vector<2x256xf32>
    %116 = arith.mulf %107, %93 : vector<2x256xf32>
    %117 = arith.addf %115, %116 : vector<2x256xf32>
    %118 = arith.truncf %117 : vector<2x256xf32> to vector<2x256xbf16>
    %cst_19 = arith.constant dense<0.000000e+00> : vector<2x768xf32>
    %119 = tpu.matmul %118, %91, %cst_19 {dimension_numbers = #tpu.dot_dimension_numbers<[1], [0], [0], [1], [0, 0, 1, 1], [], []>} : vector<2x256xbf16>, vector<256x768xbf16>, vector<2x768xf32> -> vector<2x768xf32>
    %120 = vector.broadcast %92 : vector<1x768xf32> to vector<2x768xf32>
    %121 = arith.addf %119, %120 : vector<2x768xf32>
    %122 = vector.extract_strided_slice %48 {offsets = [0, 0], sizes = [2, 512], strides = [1, 1]} : vector<2x768xf32> to vector<2x512xf32>
    %123 = vector.extract_strided_slice %121 {offsets = [0, 0], sizes = [2, 512], strides = [1, 1]} : vector<2x768xf32> to vector<2x512xf32>
    %124 = arith.addf %122, %123 : vector<2x512xf32>
    %125 = arith.negf %124 : vector<2x512xf32>
    %126 = math.exp %125 : vector<2x512xf32>
    %cst_20 = arith.constant 1.000000e+00 : f32
    %127 = vector.broadcast %cst_20 : f32 to vector<2x512xf32>
    %128 = arith.addf %127, %126 : vector<2x512xf32>
    %129 = arith.divf %127, %128 : vector<2x512xf32>
    %130 = vector.extract_strided_slice %129 {offsets = [0, 0], sizes = [2, 256], strides = [1, 1]} : vector<2x512xf32> to vector<2x256xf32>
    %131 = vector.extract_strided_slice %129 {offsets = [0, 256], sizes = [2, 256], strides = [1, 1]} : vector<2x512xf32> to vector<2x256xf32>
    %132 = vector.extract_strided_slice %48 {offsets = [0, 512], sizes = [2, 256], strides = [1, 1]} : vector<2x768xf32> to vector<2x256xf32>
    %133 = vector.extract_strided_slice %121 {offsets = [0, 512], sizes = [2, 256], strides = [1, 1]} : vector<2x768xf32> to vector<2x256xf32>
    %134 = arith.mulf %130, %133 : vector<2x256xf32>
    %135 = arith.addf %132, %134 : vector<2x256xf32>
    %136 = math.tanh %135 : vector<2x256xf32>
    %cst_21 = arith.constant 1.000000e+00 : f32
    %137 = vector.broadcast %cst_21 : f32 to vector<2x256xf32>
    %138 = arith.subf %137, %131 : vector<2x256xf32>
    %139 = arith.mulf %138, %136 : vector<2x256xf32>
    %140 = arith.mulf %131, %117 : vector<2x256xf32>
    %141 = arith.addf %139, %140 : vector<2x256xf32>
    %142 = arith.truncf %141 : vector<2x256xf32> to vector<2x256xbf16>
    %cst_22 = arith.constant dense<0.000000e+00> : vector<2x768xf32>
    %143 = tpu.matmul %142, %91, %cst_22 {dimension_numbers = #tpu.dot_dimension_numbers<[1], [0], [0], [1], [0, 0, 1, 1], [], []>} : vector<2x256xbf16>, vector<256x768xbf16>, vector<2x768xf32> -> vector<2x768xf32>
    %144 = vector.broadcast %92 : vector<1x768xf32> to vector<2x768xf32>
    %145 = arith.addf %143, %144 : vector<2x768xf32>
    %146 = vector.extract_strided_slice %55 {offsets = [0, 0], sizes = [2, 512], strides = [1, 1]} : vector<2x768xf32> to vector<2x512xf32>
    %147 = vector.extract_strided_slice %145 {offsets = [0, 0], sizes = [2, 512], strides = [1, 1]} : vector<2x768xf32> to vector<2x512xf32>
    %148 = arith.addf %146, %147 : vector<2x512xf32>
    %149 = arith.negf %148 : vector<2x512xf32>
    %150 = math.exp %149 : vector<2x512xf32>
    %cst_23 = arith.constant 1.000000e+00 : f32
    %151 = vector.broadcast %cst_23 : f32 to vector<2x512xf32>
    %152 = arith.addf %151, %150 : vector<2x512xf32>
    %153 = arith.divf %151, %152 : vector<2x512xf32>
    %154 = vector.extract_strided_slice %153 {offsets = [0, 0], sizes = [2, 256], strides = [1, 1]} : vector<2x512xf32> to vector<2x256xf32>
    %155 = vector.extract_strided_slice %153 {offsets = [0, 256], sizes = [2, 256], strides = [1, 1]} : vector<2x512xf32> to vector<2x256xf32>
    %156 = vector.extract_strided_slice %55 {offsets = [0, 512], sizes = [2, 256], strides = [1, 1]} : vector<2x768xf32> to vector<2x256xf32>
    %157 = vector.extract_strided_slice %145 {offsets = [0, 512], sizes = [2, 256], strides = [1, 1]} : vector<2x768xf32> to vector<2x256xf32>
    %158 = arith.mulf %154, %157 : vector<2x256xf32>
    %159 = arith.addf %156, %158 : vector<2x256xf32>
    %160 = math.tanh %159 : vector<2x256xf32>
    %cst_24 = arith.constant 1.000000e+00 : f32
    %161 = vector.broadcast %cst_24 : f32 to vector<2x256xf32>
    %162 = arith.subf %161, %155 : vector<2x256xf32>
    %163 = arith.mulf %162, %160 : vector<2x256xf32>
    %164 = arith.mulf %155, %141 : vector<2x256xf32>
    %165 = arith.addf %163, %164 : vector<2x256xf32>
    %166 = arith.truncf %165 : vector<2x256xf32> to vector<2x256xbf16>
    %cst_25 = arith.constant dense<0.000000e+00> : vector<2x768xf32>
    %167 = tpu.matmul %166, %91, %cst_25 {dimension_numbers = #tpu.dot_dimension_numbers<[1], [0], [0], [1], [0, 0, 1, 1], [], []>} : vector<2x256xbf16>, vector<256x768xbf16>, vector<2x768xf32> -> vector<2x768xf32>
    %168 = vector.broadcast %92 : vector<1x768xf32> to vector<2x768xf32>
    %169 = arith.addf %167, %168 : vector<2x768xf32>
    %170 = vector.extract_strided_slice %62 {offsets = [0, 0], sizes = [2, 512], strides = [1, 1]} : vector<2x768xf32> to vector<2x512xf32>
    %171 = vector.extract_strided_slice %169 {offsets = [0, 0], sizes = [2, 512], strides = [1, 1]} : vector<2x768xf32> to vector<2x512xf32>
    %172 = arith.addf %170, %171 : vector<2x512xf32>
    %173 = arith.negf %172 : vector<2x512xf32>
    %174 = math.exp %173 : vector<2x512xf32>
    %cst_26 = arith.constant 1.000000e+00 : f32
    %175 = vector.broadcast %cst_26 : f32 to vector<2x512xf32>
    %176 = arith.addf %175, %174 : vector<2x512xf32>
    %177 = arith.divf %175, %176 : vector<2x512xf32>
    %178 = vector.extract_strided_slice %177 {offsets = [0, 0], sizes = [2, 256], strides = [1, 1]} : vector<2x512xf32> to vector<2x256xf32>
    %179 = vector.extract_strided_slice %177 {offsets = [0, 256], sizes = [2, 256], strides = [1, 1]} : vector<2x512xf32> to vector<2x256xf32>
    %180 = vector.extract_strided_slice %62 {offsets = [0, 512], sizes = [2, 256], strides = [1, 1]} : vector<2x768xf32> to vector<2x256xf32>
    %181 = vector.extract_strided_slice %169 {offsets = [0, 512], sizes = [2, 256], strides = [1, 1]} : vector<2x768xf32> to vector<2x256xf32>
    %182 = arith.mulf %178, %181 : vector<2x256xf32>
    %183 = arith.addf %180, %182 : vector<2x256xf32>
    %184 = math.tanh %183 : vector<2x256xf32>
    %cst_27 = arith.constant 1.000000e+00 : f32
    %185 = vector.broadcast %cst_27 : f32 to vector<2x256xf32>
    %186 = arith.subf %185, %179 : vector<2x256xf32>
    %187 = arith.mulf %186, %184 : vector<2x256xf32>
    %188 = arith.mulf %179, %165 : vector<2x256xf32>
    %189 = arith.addf %187, %188 : vector<2x256xf32>
    %190 = arith.truncf %189 : vector<2x256xf32> to vector<2x256xbf16>
    %cst_28 = arith.constant dense<0.000000e+00> : vector<2x768xf32>
    %191 = tpu.matmul %190, %91, %cst_28 {dimension_numbers = #tpu.dot_dimension_numbers<[1], [0], [0], [1], [0, 0, 1, 1], [], []>} : vector<2x256xbf16>, vector<256x768xbf16>, vector<2x768xf32> -> vector<2x768xf32>
    %192 = vector.broadcast %92 : vector<1x768xf32> to vector<2x768xf32>
    %193 = arith.addf %191, %192 : vector<2x768xf32>
    %194 = vector.extract_strided_slice %69 {offsets = [0, 0], sizes = [2, 512], strides = [1, 1]} : vector<2x768xf32> to vector<2x512xf32>
    %195 = vector.extract_strided_slice %193 {offsets = [0, 0], sizes = [2, 512], strides = [1, 1]} : vector<2x768xf32> to vector<2x512xf32>
    %196 = arith.addf %194, %195 : vector<2x512xf32>
    %197 = arith.negf %196 : vector<2x512xf32>
    %198 = math.exp %197 : vector<2x512xf32>
    %cst_29 = arith.constant 1.000000e+00 : f32
    %199 = vector.broadcast %cst_29 : f32 to vector<2x512xf32>
    %200 = arith.addf %199, %198 : vector<2x512xf32>
    %201 = arith.divf %199, %200 : vector<2x512xf32>
    %202 = vector.extract_strided_slice %201 {offsets = [0, 0], sizes = [2, 256], strides = [1, 1]} : vector<2x512xf32> to vector<2x256xf32>
    %203 = vector.extract_strided_slice %201 {offsets = [0, 256], sizes = [2, 256], strides = [1, 1]} : vector<2x512xf32> to vector<2x256xf32>
    %204 = vector.extract_strided_slice %69 {offsets = [0, 512], sizes = [2, 256], strides = [1, 1]} : vector<2x768xf32> to vector<2x256xf32>
    %205 = vector.extract_strided_slice %193 {offsets = [0, 512], sizes = [2, 256], strides = [1, 1]} : vector<2x768xf32> to vector<2x256xf32>
    %206 = arith.mulf %202, %205 : vector<2x256xf32>
    %207 = arith.addf %204, %206 : vector<2x256xf32>
    %208 = math.tanh %207 : vector<2x256xf32>
    %cst_30 = arith.constant 1.000000e+00 : f32
    %209 = vector.broadcast %cst_30 : f32 to vector<2x256xf32>
    %210 = arith.subf %209, %203 : vector<2x256xf32>
    %211 = arith.mulf %210, %208 : vector<2x256xf32>
    %212 = arith.mulf %203, %189 : vector<2x256xf32>
    %213 = arith.addf %211, %212 : vector<2x256xf32>
    %214 = arith.truncf %213 : vector<2x256xf32> to vector<2x256xbf16>
    %cst_31 = arith.constant dense<0.000000e+00> : vector<2x768xf32>
    %215 = tpu.matmul %214, %91, %cst_31 {dimension_numbers = #tpu.dot_dimension_numbers<[1], [0], [0], [1], [0, 0, 1, 1], [], []>} : vector<2x256xbf16>, vector<256x768xbf16>, vector<2x768xf32> -> vector<2x768xf32>
    %216 = vector.broadcast %92 : vector<1x768xf32> to vector<2x768xf32>
    %217 = arith.addf %215, %216 : vector<2x768xf32>
    %218 = vector.extract_strided_slice %76 {offsets = [0, 0], sizes = [2, 512], strides = [1, 1]} : vector<2x768xf32> to vector<2x512xf32>
    %219 = vector.extract_strided_slice %217 {offsets = [0, 0], sizes = [2, 512], strides = [1, 1]} : vector<2x768xf32> to vector<2x512xf32>
    %220 = arith.addf %218, %219 : vector<2x512xf32>
    %221 = arith.negf %220 : vector<2x512xf32>
    %222 = math.exp %221 : vector<2x512xf32>
    %cst_32 = arith.constant 1.000000e+00 : f32
    %223 = vector.broadcast %cst_32 : f32 to vector<2x512xf32>
    %224 = arith.addf %223, %222 : vector<2x512xf32>
    %225 = arith.divf %223, %224 : vector<2x512xf32>
    %226 = vector.extract_strided_slice %225 {offsets = [0, 0], sizes = [2, 256], strides = [1, 1]} : vector<2x512xf32> to vector<2x256xf32>
    %227 = vector.extract_strided_slice %225 {offsets = [0, 256], sizes = [2, 256], strides = [1, 1]} : vector<2x512xf32> to vector<2x256xf32>
    %228 = vector.extract_strided_slice %76 {offsets = [0, 512], sizes = [2, 256], strides = [1, 1]} : vector<2x768xf32> to vector<2x256xf32>
    %229 = vector.extract_strided_slice %217 {offsets = [0, 512], sizes = [2, 256], strides = [1, 1]} : vector<2x768xf32> to vector<2x256xf32>
    %230 = arith.mulf %226, %229 : vector<2x256xf32>
    %231 = arith.addf %228, %230 : vector<2x256xf32>
    %232 = math.tanh %231 : vector<2x256xf32>
    %cst_33 = arith.constant 1.000000e+00 : f32
    %233 = vector.broadcast %cst_33 : f32 to vector<2x256xf32>
    %234 = arith.subf %233, %227 : vector<2x256xf32>
    %235 = arith.mulf %234, %232 : vector<2x256xf32>
    %236 = arith.mulf %227, %213 : vector<2x256xf32>
    %237 = arith.addf %235, %236 : vector<2x256xf32>
    %238 = arith.truncf %237 : vector<2x256xf32> to vector<2x256xbf16>
    %cst_34 = arith.constant dense<0.000000e+00> : vector<2x768xf32>
    %239 = tpu.matmul %238, %91, %cst_34 {dimension_numbers = #tpu.dot_dimension_numbers<[1], [0], [0], [1], [0, 0, 1, 1], [], []>} : vector<2x256xbf16>, vector<256x768xbf16>, vector<2x768xf32> -> vector<2x768xf32>
    %240 = vector.broadcast %92 : vector<1x768xf32> to vector<2x768xf32>
    %241 = arith.addf %239, %240 : vector<2x768xf32>
    %242 = vector.extract_strided_slice %83 {offsets = [0, 0], sizes = [2, 512], strides = [1, 1]} : vector<2x768xf32> to vector<2x512xf32>
    %243 = vector.extract_strided_slice %241 {offsets = [0, 0], sizes = [2, 512], strides = [1, 1]} : vector<2x768xf32> to vector<2x512xf32>
    %244 = arith.addf %242, %243 : vector<2x512xf32>
    %245 = arith.negf %244 : vector<2x512xf32>
    %246 = math.exp %245 : vector<2x512xf32>
    %cst_35 = arith.constant 1.000000e+00 : f32
    %247 = vector.broadcast %cst_35 : f32 to vector<2x512xf32>
    %248 = arith.addf %247, %246 : vector<2x512xf32>
    %249 = arith.divf %247, %248 : vector<2x512xf32>
    %250 = vector.extract_strided_slice %249 {offsets = [0, 0], sizes = [2, 256], strides = [1, 1]} : vector<2x512xf32> to vector<2x256xf32>
    %251 = vector.extract_strided_slice %249 {offsets = [0, 256], sizes = [2, 256], strides = [1, 1]} : vector<2x512xf32> to vector<2x256xf32>
    %252 = vector.extract_strided_slice %83 {offsets = [0, 512], sizes = [2, 256], strides = [1, 1]} : vector<2x768xf32> to vector<2x256xf32>
    %253 = vector.extract_strided_slice %241 {offsets = [0, 512], sizes = [2, 256], strides = [1, 1]} : vector<2x768xf32> to vector<2x256xf32>
    %254 = arith.mulf %250, %253 : vector<2x256xf32>
    %255 = arith.addf %252, %254 : vector<2x256xf32>
    %256 = math.tanh %255 : vector<2x256xf32>
    %cst_36 = arith.constant 1.000000e+00 : f32
    %257 = vector.broadcast %cst_36 : f32 to vector<2x256xf32>
    %258 = arith.subf %257, %251 : vector<2x256xf32>
    %259 = arith.mulf %258, %256 : vector<2x256xf32>
    %260 = arith.mulf %251, %237 : vector<2x256xf32>
    %261 = arith.addf %259, %260 : vector<2x256xf32>
    %262 = arith.truncf %261 : vector<2x256xf32> to vector<2x256xbf16>
    %cst_37 = arith.constant dense<0.000000e+00> : vector<2x768xf32>
    %263 = tpu.matmul %262, %91, %cst_37 {dimension_numbers = #tpu.dot_dimension_numbers<[1], [0], [0], [1], [0, 0, 1, 1], [], []>} : vector<2x256xbf16>, vector<256x768xbf16>, vector<2x768xf32> -> vector<2x768xf32>
    %264 = vector.broadcast %92 : vector<1x768xf32> to vector<2x768xf32>
    %265 = arith.addf %263, %264 : vector<2x768xf32>
    %266 = vector.extract_strided_slice %90 {offsets = [0, 0], sizes = [2, 512], strides = [1, 1]} : vector<2x768xf32> to vector<2x512xf32>
    %267 = vector.extract_strided_slice %265 {offsets = [0, 0], sizes = [2, 512], strides = [1, 1]} : vector<2x768xf32> to vector<2x512xf32>
    %268 = arith.addf %266, %267 : vector<2x512xf32>
    %269 = arith.negf %268 : vector<2x512xf32>
    %270 = math.exp %269 : vector<2x512xf32>
    %cst_38 = arith.constant 1.000000e+00 : f32
    %271 = vector.broadcast %cst_38 : f32 to vector<2x512xf32>
    %272 = arith.addf %271, %270 : vector<2x512xf32>
    %273 = arith.divf %271, %272 : vector<2x512xf32>
    %274 = vector.extract_strided_slice %273 {offsets = [0, 0], sizes = [2, 256], strides = [1, 1]} : vector<2x512xf32> to vector<2x256xf32>
    %275 = vector.extract_strided_slice %273 {offsets = [0, 256], sizes = [2, 256], strides = [1, 1]} : vector<2x512xf32> to vector<2x256xf32>
    %276 = vector.extract_strided_slice %90 {offsets = [0, 512], sizes = [2, 256], strides = [1, 1]} : vector<2x768xf32> to vector<2x256xf32>
    %277 = vector.extract_strided_slice %265 {offsets = [0, 512], sizes = [2, 256], strides = [1, 1]} : vector<2x768xf32> to vector<2x256xf32>
    %278 = arith.mulf %274, %277 : vector<2x256xf32>
    %279 = arith.addf %276, %278 : vector<2x256xf32>
    %280 = math.tanh %279 : vector<2x256xf32>
    %cst_39 = arith.constant 1.000000e+00 : f32
    %281 = vector.broadcast %cst_39 : f32 to vector<2x256xf32>
    %282 = arith.subf %281, %275 : vector<2x256xf32>
    %283 = arith.mulf %282, %280 : vector<2x256xf32>
    %284 = arith.mulf %275, %261 : vector<2x256xf32>
    %285 = arith.addf %283, %284 : vector<2x256xf32>
    %286 = vector.extract_strided_slice %117 {offsets = [0, 0], sizes = [2, 128], strides = [1, 1]} : vector<2x256xf32> to vector<2x128xf32>
    %287 = vector.extract_strided_slice %285 {offsets = [0, 128], sizes = [2, 128], strides = [1, 1]} : vector<2x256xf32> to vector<2x128xf32>
    %288 = tpu.concatenate %286, %287 in 1 : vector<2x128xf32>, vector<2x128xf32> -> vector<2x256xf32>
    %289 = vector.extract_strided_slice %141 {offsets = [0, 0], sizes = [2, 128], strides = [1, 1]} : vector<2x256xf32> to vector<2x128xf32>
    %290 = vector.extract_strided_slice %261 {offsets = [0, 128], sizes = [2, 128], strides = [1, 1]} : vector<2x256xf32> to vector<2x128xf32>
    %291 = tpu.concatenate %289, %290 in 1 : vector<2x128xf32>, vector<2x128xf32> -> vector<2x256xf32>
    %292 = vector.extract_strided_slice %165 {offsets = [0, 0], sizes = [2, 128], strides = [1, 1]} : vector<2x256xf32> to vector<2x128xf32>
    %293 = vector.extract_strided_slice %237 {offsets = [0, 128], sizes = [2, 128], strides = [1, 1]} : vector<2x256xf32> to vector<2x128xf32>
    %294 = tpu.concatenate %292, %293 in 1 : vector<2x128xf32>, vector<2x128xf32> -> vector<2x256xf32>
    %295 = vector.extract_strided_slice %189 {offsets = [0, 0], sizes = [2, 128], strides = [1, 1]} : vector<2x256xf32> to vector<2x128xf32>
    %296 = vector.extract_strided_slice %213 {offsets = [0, 128], sizes = [2, 128], strides = [1, 1]} : vector<2x256xf32> to vector<2x128xf32>
    %297 = tpu.concatenate %295, %296 in 1 : vector<2x128xf32>, vector<2x128xf32> -> vector<2x256xf32>
    %298 = vector.extract_strided_slice %213 {offsets = [0, 0], sizes = [2, 128], strides = [1, 1]} : vector<2x256xf32> to vector<2x128xf32>
    %299 = vector.extract_strided_slice %189 {offsets = [0, 128], sizes = [2, 128], strides = [1, 1]} : vector<2x256xf32> to vector<2x128xf32>
    %300 = tpu.concatenate %298, %299 in 1 : vector<2x128xf32>, vector<2x128xf32> -> vector<2x256xf32>
    %301 = vector.extract_strided_slice %237 {offsets = [0, 0], sizes = [2, 128], strides = [1, 1]} : vector<2x256xf32> to vector<2x128xf32>
    %302 = vector.extract_strided_slice %165 {offsets = [0, 128], sizes = [2, 128], strides = [1, 1]} : vector<2x256xf32> to vector<2x128xf32>
    %303 = tpu.concatenate %301, %302 in 1 : vector<2x128xf32>, vector<2x128xf32> -> vector<2x256xf32>
    %304 = vector.extract_strided_slice %261 {offsets = [0, 0], sizes = [2, 128], strides = [1, 1]} : vector<2x256xf32> to vector<2x128xf32>
    %305 = vector.extract_strided_slice %141 {offsets = [0, 128], sizes = [2, 128], strides = [1, 1]} : vector<2x256xf32> to vector<2x128xf32>
    %306 = tpu.concatenate %304, %305 in 1 : vector<2x128xf32>, vector<2x128xf32> -> vector<2x256xf32>
    %307 = vector.extract_strided_slice %285 {offsets = [0, 0], sizes = [2, 128], strides = [1, 1]} : vector<2x256xf32> to vector<2x128xf32>
    %308 = vector.extract_strided_slice %117 {offsets = [0, 128], sizes = [2, 128], strides = [1, 1]} : vector<2x256xf32> to vector<2x128xf32>
    %309 = tpu.concatenate %307, %308 in 1 : vector<2x128xf32>, vector<2x128xf32> -> vector<2x256xf32>
    %310 = vector.shape_cast %288 : vector<2x256xf32> to vector<2x1x256xf32>
    %311 = vector.shape_cast %291 : vector<2x256xf32> to vector<2x1x256xf32>
    %312 = vector.shape_cast %294 : vector<2x256xf32> to vector<2x1x256xf32>
    %313 = vector.shape_cast %297 : vector<2x256xf32> to vector<2x1x256xf32>
    %314 = vector.shape_cast %300 : vector<2x256xf32> to vector<2x1x256xf32>
    %315 = vector.shape_cast %303 : vector<2x256xf32> to vector<2x1x256xf32>
    %316 = vector.shape_cast %306 : vector<2x256xf32> to vector<2x1x256xf32>
    %317 = vector.shape_cast %309 : vector<2x256xf32> to vector<2x1x256xf32>
    %318 = tpu.concatenate %310, %311, %312, %313, %314, %315, %316, %317 in 1 : vector<2x1x256xf32>, vector<2x1x256xf32>, vector<2x1x256xf32>, vector<2x1x256xf32>, vector<2x1x256xf32>, vector<2x1x256xf32>, vector<2x1x256xf32>, vector<2x1x256xf32> -> vector<2x8x256xf32>
    %c0_i32_40 = arith.constant 0 : i32
    %319 = tpu.memref_slice %arg21[%c0_i32_40] : memref<4x!tpu.dma_semaphore, #tpu.memory_space<semaphore_mem>> -> memref<1x!tpu.dma_semaphore, #tpu.memory_space<semaphore_mem>>
    %320 = tpu.memref_squeeze %319 : memref<1x!tpu.dma_semaphore, #tpu.memory_space<semaphore_mem>> -> memref<!tpu.dma_semaphore, #tpu.memory_space<semaphore_mem>>
    tpu.wait_dma2 semaphore(%320 : memref<!tpu.dma_semaphore, #tpu.memory_space<semaphore_mem>>) src(%arg11 : memref<256x768xbf16, #tpu.memory_space<any>>) dst(%arg17 : memref<256x768xbf16, #tpu.memory_space<vmem>>)
    %c1_i32_41 = arith.constant 1 : i32
    %321 = tpu.memref_slice %arg21[%c1_i32_41] : memref<4x!tpu.dma_semaphore, #tpu.memory_space<semaphore_mem>> -> memref<1x!tpu.dma_semaphore, #tpu.memory_space<semaphore_mem>>
    %322 = tpu.memref_squeeze %321 : memref<1x!tpu.dma_semaphore, #tpu.memory_space<semaphore_mem>> -> memref<!tpu.dma_semaphore, #tpu.memory_space<semaphore_mem>>
    tpu.wait_dma2 semaphore(%322 : memref<!tpu.dma_semaphore, #tpu.memory_space<semaphore_mem>>) src(%arg12 : memref<256x768xbf16, #tpu.memory_space<any>>) dst(%arg18 : memref<256x768xbf16, #tpu.memory_space<vmem>>)
    %323 = vector.shape_cast %318 : vector<2x8x256xf32> to vector<16x256xf32>
    %324 = arith.truncf %323 : vector<16x256xf32> to vector<16x256xbf16>
    %c0_42 = arith.constant 0 : index
    %c0_43 = arith.constant 0 : index
    %325 = vector.load %arg17[%c0_42, %c0_43] : memref<256x768xbf16, #tpu.memory_space<vmem>>, vector<256x768xbf16>
    %cst_44 = arith.constant dense<0.000000e+00> : vector<16x768xf32>
    %326 = tpu.matmul %324, %325, %cst_44 {dimension_numbers = #tpu.dot_dimension_numbers<[1], [0], [0], [1], [0, 0, 1, 1], [], []>} : vector<16x256xbf16>, vector<256x768xbf16>, vector<16x768xf32> -> vector<16x768xf32>
    %c0_45 = arith.constant 0 : index
    %c0_46 = arith.constant 0 : index
    %327 = vector.load %arg5[%c0_45, %c0_46] : memref<1x768xf32, #tpu.memory_space<vmem>>, vector<1x768xf32>
    %328 = vector.broadcast %327 : vector<1x768xf32> to vector<16x768xf32>
    %329 = arith.addf %326, %328 : vector<16x768xf32>
    %330 = vector.shape_cast %329 : vector<16x768xf32> to vector<2x8x768xf32>
    %331 = vector.extract_strided_slice %330 {offsets = [0, 0, 0], sizes = [2, 1, 768], strides = [1, 1, 1]} : vector<2x8x768xf32> to vector<2x1x768xf32>
    %332 = vector.shape_cast %331 : vector<2x1x768xf32> to vector<2x768xf32>
    %333 = vector.extract_strided_slice %330 {offsets = [0, 7, 0], sizes = [2, 1, 768], strides = [1, 1, 1]} : vector<2x8x768xf32> to vector<2x1x768xf32>
    %334 = vector.shape_cast %333 : vector<2x1x768xf32> to vector<2x768xf32>
    %335 = vector.shape_cast %26 : vector<1x768xi1> to vector<1x768xi1>
    %336 = vector.broadcast %335 : vector<1x768xi1> to vector<2x768xi1>
    %337 = arith.select %336, %332, %334 : vector<2x768xi1>, vector<2x768xf32>
    %338 = vector.extract_strided_slice %330 {offsets = [0, 1, 0], sizes = [2, 1, 768], strides = [1, 1, 1]} : vector<2x8x768xf32> to vector<2x1x768xf32>
    %339 = vector.shape_cast %338 : vector<2x1x768xf32> to vector<2x768xf32>
    %340 = vector.extract_strided_slice %330 {offsets = [0, 6, 0], sizes = [2, 1, 768], strides = [1, 1, 1]} : vector<2x8x768xf32> to vector<2x1x768xf32>
    %341 = vector.shape_cast %340 : vector<2x1x768xf32> to vector<2x768xf32>
    %342 = vector.shape_cast %26 : vector<1x768xi1> to vector<1x768xi1>
    %343 = vector.broadcast %342 : vector<1x768xi1> to vector<2x768xi1>
    %344 = arith.select %343, %339, %341 : vector<2x768xi1>, vector<2x768xf32>
    %345 = vector.extract_strided_slice %330 {offsets = [0, 2, 0], sizes = [2, 1, 768], strides = [1, 1, 1]} : vector<2x8x768xf32> to vector<2x1x768xf32>
    %346 = vector.shape_cast %345 : vector<2x1x768xf32> to vector<2x768xf32>
    %347 = vector.extract_strided_slice %330 {offsets = [0, 5, 0], sizes = [2, 1, 768], strides = [1, 1, 1]} : vector<2x8x768xf32> to vector<2x1x768xf32>
    %348 = vector.shape_cast %347 : vector<2x1x768xf32> to vector<2x768xf32>
    %349 = vector.shape_cast %26 : vector<1x768xi1> to vector<1x768xi1>
    %350 = vector.broadcast %349 : vector<1x768xi1> to vector<2x768xi1>
    %351 = arith.select %350, %346, %348 : vector<2x768xi1>, vector<2x768xf32>
    %352 = vector.extract_strided_slice %330 {offsets = [0, 3, 0], sizes = [2, 1, 768], strides = [1, 1, 1]} : vector<2x8x768xf32> to vector<2x1x768xf32>
    %353 = vector.shape_cast %352 : vector<2x1x768xf32> to vector<2x768xf32>
    %354 = vector.extract_strided_slice %330 {offsets = [0, 4, 0], sizes = [2, 1, 768], strides = [1, 1, 1]} : vector<2x8x768xf32> to vector<2x1x768xf32>
    %355 = vector.shape_cast %354 : vector<2x1x768xf32> to vector<2x768xf32>
    %356 = vector.shape_cast %26 : vector<1x768xi1> to vector<1x768xi1>
    %357 = vector.broadcast %356 : vector<1x768xi1> to vector<2x768xi1>
    %358 = arith.select %357, %353, %355 : vector<2x768xi1>, vector<2x768xf32>
    %359 = vector.extract_strided_slice %330 {offsets = [0, 4, 0], sizes = [2, 1, 768], strides = [1, 1, 1]} : vector<2x8x768xf32> to vector<2x1x768xf32>
    %360 = vector.shape_cast %359 : vector<2x1x768xf32> to vector<2x768xf32>
    %361 = vector.extract_strided_slice %330 {offsets = [0, 3, 0], sizes = [2, 1, 768], strides = [1, 1, 1]} : vector<2x8x768xf32> to vector<2x1x768xf32>
    %362 = vector.shape_cast %361 : vector<2x1x768xf32> to vector<2x768xf32>
    %363 = vector.shape_cast %26 : vector<1x768xi1> to vector<1x768xi1>
    %364 = vector.broadcast %363 : vector<1x768xi1> to vector<2x768xi1>
    %365 = arith.select %364, %360, %362 : vector<2x768xi1>, vector<2x768xf32>
    %366 = vector.extract_strided_slice %330 {offsets = [0, 5, 0], sizes = [2, 1, 768], strides = [1, 1, 1]} : vector<2x8x768xf32> to vector<2x1x768xf32>
    %367 = vector.shape_cast %366 : vector<2x1x768xf32> to vector<2x768xf32>
    %368 = vector.extract_strided_slice %330 {offsets = [0, 2, 0], sizes = [2, 1, 768], strides = [1, 1, 1]} : vector<2x8x768xf32> to vector<2x1x768xf32>
    %369 = vector.shape_cast %368 : vector<2x1x768xf32> to vector<2x768xf32>
    %370 = vector.shape_cast %26 : vector<1x768xi1> to vector<1x768xi1>
    %371 = vector.broadcast %370 : vector<1x768xi1> to vector<2x768xi1>
    %372 = arith.select %371, %367, %369 : vector<2x768xi1>, vector<2x768xf32>
    %373 = vector.extract_strided_slice %330 {offsets = [0, 6, 0], sizes = [2, 1, 768], strides = [1, 1, 1]} : vector<2x8x768xf32> to vector<2x1x768xf32>
    %374 = vector.shape_cast %373 : vector<2x1x768xf32> to vector<2x768xf32>
    %375 = vector.extract_strided_slice %330 {offsets = [0, 1, 0], sizes = [2, 1, 768], strides = [1, 1, 1]} : vector<2x8x768xf32> to vector<2x1x768xf32>
    %376 = vector.shape_cast %375 : vector<2x1x768xf32> to vector<2x768xf32>
    %377 = vector.shape_cast %26 : vector<1x768xi1> to vector<1x768xi1>
    %378 = vector.broadcast %377 : vector<1x768xi1> to vector<2x768xi1>
    %379 = arith.select %378, %374, %376 : vector<2x768xi1>, vector<2x768xf32>
    %380 = vector.extract_strided_slice %330 {offsets = [0, 7, 0], sizes = [2, 1, 768], strides = [1, 1, 1]} : vector<2x8x768xf32> to vector<2x1x768xf32>
    %381 = vector.shape_cast %380 : vector<2x1x768xf32> to vector<2x768xf32>
    %382 = vector.extract_strided_slice %330 {offsets = [0, 0, 0], sizes = [2, 1, 768], strides = [1, 1, 1]} : vector<2x8x768xf32> to vector<2x1x768xf32>
    %383 = vector.shape_cast %382 : vector<2x1x768xf32> to vector<2x768xf32>
    %384 = vector.shape_cast %26 : vector<1x768xi1> to vector<1x768xi1>
    %385 = vector.broadcast %384 : vector<1x768xi1> to vector<2x768xi1>
    %386 = arith.select %385, %381, %383 : vector<2x768xi1>, vector<2x768xf32>
    %c0_47 = arith.constant 0 : index
    %c0_48 = arith.constant 0 : index
    %387 = vector.load %arg18[%c0_47, %c0_48] : memref<256x768xbf16, #tpu.memory_space<vmem>>, vector<256x768xbf16>
    %c0_49 = arith.constant 0 : index
    %c0_50 = arith.constant 0 : index
    %388 = vector.load %arg6[%c0_49, %c0_50] : memref<1x768xf32, #tpu.memory_space<vmem>>, vector<1x768xf32>
    %cst_51 = arith.constant 0.000000e+00 : f32
    %389 = vector.broadcast %cst_51 : f32 to vector<2x256xf32>
    %390 = arith.truncf %389 : vector<2x256xf32> to vector<2x256xbf16>
    %cst_52 = arith.constant dense<0.000000e+00> : vector<2x768xf32>
    %391 = tpu.matmul %390, %387, %cst_52 {dimension_numbers = #tpu.dot_dimension_numbers<[1], [0], [0], [1], [0, 0, 1, 1], [], []>} : vector<2x256xbf16>, vector<256x768xbf16>, vector<2x768xf32> -> vector<2x768xf32>
    %392 = vector.broadcast %388 : vector<1x768xf32> to vector<2x768xf32>
    %393 = arith.addf %391, %392 : vector<2x768xf32>
    %394 = vector.extract_strided_slice %337 {offsets = [0, 0], sizes = [2, 512], strides = [1, 1]} : vector<2x768xf32> to vector<2x512xf32>
    %395 = vector.extract_strided_slice %393 {offsets = [0, 0], sizes = [2, 512], strides = [1, 1]} : vector<2x768xf32> to vector<2x512xf32>
    %396 = arith.addf %394, %395 : vector<2x512xf32>
    %397 = arith.negf %396 : vector<2x512xf32>
    %398 = math.exp %397 : vector<2x512xf32>
    %cst_53 = arith.constant 1.000000e+00 : f32
    %399 = vector.broadcast %cst_53 : f32 to vector<2x512xf32>
    %400 = arith.addf %399, %398 : vector<2x512xf32>
    %401 = arith.divf %399, %400 : vector<2x512xf32>
    %402 = vector.extract_strided_slice %401 {offsets = [0, 0], sizes = [2, 256], strides = [1, 1]} : vector<2x512xf32> to vector<2x256xf32>
    %403 = vector.extract_strided_slice %401 {offsets = [0, 256], sizes = [2, 256], strides = [1, 1]} : vector<2x512xf32> to vector<2x256xf32>
    %404 = vector.extract_strided_slice %337 {offsets = [0, 512], sizes = [2, 256], strides = [1, 1]} : vector<2x768xf32> to vector<2x256xf32>
    %405 = vector.extract_strided_slice %393 {offsets = [0, 512], sizes = [2, 256], strides = [1, 1]} : vector<2x768xf32> to vector<2x256xf32>
    %406 = arith.mulf %402, %405 : vector<2x256xf32>
    %407 = arith.addf %404, %406 : vector<2x256xf32>
    %408 = math.tanh %407 : vector<2x256xf32>
    %cst_54 = arith.constant 1.000000e+00 : f32
    %409 = vector.broadcast %cst_54 : f32 to vector<2x256xf32>
    %410 = arith.subf %409, %403 : vector<2x256xf32>
    %411 = arith.mulf %410, %408 : vector<2x256xf32>
    %412 = arith.mulf %403, %389 : vector<2x256xf32>
    %413 = arith.addf %411, %412 : vector<2x256xf32>
    %414 = arith.truncf %413 : vector<2x256xf32> to vector<2x256xbf16>
    %cst_55 = arith.constant dense<0.000000e+00> : vector<2x768xf32>
    %415 = tpu.matmul %414, %387, %cst_55 {dimension_numbers = #tpu.dot_dimension_numbers<[1], [0], [0], [1], [0, 0, 1, 1], [], []>} : vector<2x256xbf16>, vector<256x768xbf16>, vector<2x768xf32> -> vector<2x768xf32>
    %416 = vector.broadcast %388 : vector<1x768xf32> to vector<2x768xf32>
    %417 = arith.addf %415, %416 : vector<2x768xf32>
    %418 = vector.extract_strided_slice %344 {offsets = [0, 0], sizes = [2, 512], strides = [1, 1]} : vector<2x768xf32> to vector<2x512xf32>
    %419 = vector.extract_strided_slice %417 {offsets = [0, 0], sizes = [2, 512], strides = [1, 1]} : vector<2x768xf32> to vector<2x512xf32>
    %420 = arith.addf %418, %419 : vector<2x512xf32>
    %421 = arith.negf %420 : vector<2x512xf32>
    %422 = math.exp %421 : vector<2x512xf32>
    %cst_56 = arith.constant 1.000000e+00 : f32
    %423 = vector.broadcast %cst_56 : f32 to vector<2x512xf32>
    %424 = arith.addf %423, %422 : vector<2x512xf32>
    %425 = arith.divf %423, %424 : vector<2x512xf32>
    %426 = vector.extract_strided_slice %425 {offsets = [0, 0], sizes = [2, 256], strides = [1, 1]} : vector<2x512xf32> to vector<2x256xf32>
    %427 = vector.extract_strided_slice %425 {offsets = [0, 256], sizes = [2, 256], strides = [1, 1]} : vector<2x512xf32> to vector<2x256xf32>
    %428 = vector.extract_strided_slice %344 {offsets = [0, 512], sizes = [2, 256], strides = [1, 1]} : vector<2x768xf32> to vector<2x256xf32>
    %429 = vector.extract_strided_slice %417 {offsets = [0, 512], sizes = [2, 256], strides = [1, 1]} : vector<2x768xf32> to vector<2x256xf32>
    %430 = arith.mulf %426, %429 : vector<2x256xf32>
    %431 = arith.addf %428, %430 : vector<2x256xf32>
    %432 = math.tanh %431 : vector<2x256xf32>
    %cst_57 = arith.constant 1.000000e+00 : f32
    %433 = vector.broadcast %cst_57 : f32 to vector<2x256xf32>
    %434 = arith.subf %433, %427 : vector<2x256xf32>
    %435 = arith.mulf %434, %432 : vector<2x256xf32>
    %436 = arith.mulf %427, %413 : vector<2x256xf32>
    %437 = arith.addf %435, %436 : vector<2x256xf32>
    %438 = arith.truncf %437 : vector<2x256xf32> to vector<2x256xbf16>
    %cst_58 = arith.constant dense<0.000000e+00> : vector<2x768xf32>
    %439 = tpu.matmul %438, %387, %cst_58 {dimension_numbers = #tpu.dot_dimension_numbers<[1], [0], [0], [1], [0, 0, 1, 1], [], []>} : vector<2x256xbf16>, vector<256x768xbf16>, vector<2x768xf32> -> vector<2x768xf32>
    %440 = vector.broadcast %388 : vector<1x768xf32> to vector<2x768xf32>
    %441 = arith.addf %439, %440 : vector<2x768xf32>
    %442 = vector.extract_strided_slice %351 {offsets = [0, 0], sizes = [2, 512], strides = [1, 1]} : vector<2x768xf32> to vector<2x512xf32>
    %443 = vector.extract_strided_slice %441 {offsets = [0, 0], sizes = [2, 512], strides = [1, 1]} : vector<2x768xf32> to vector<2x512xf32>
    %444 = arith.addf %442, %443 : vector<2x512xf32>
    %445 = arith.negf %444 : vector<2x512xf32>
    %446 = math.exp %445 : vector<2x512xf32>
    %cst_59 = arith.constant 1.000000e+00 : f32
    %447 = vector.broadcast %cst_59 : f32 to vector<2x512xf32>
    %448 = arith.addf %447, %446 : vector<2x512xf32>
    %449 = arith.divf %447, %448 : vector<2x512xf32>
    %450 = vector.extract_strided_slice %449 {offsets = [0, 0], sizes = [2, 256], strides = [1, 1]} : vector<2x512xf32> to vector<2x256xf32>
    %451 = vector.extract_strided_slice %449 {offsets = [0, 256], sizes = [2, 256], strides = [1, 1]} : vector<2x512xf32> to vector<2x256xf32>
    %452 = vector.extract_strided_slice %351 {offsets = [0, 512], sizes = [2, 256], strides = [1, 1]} : vector<2x768xf32> to vector<2x256xf32>
    %453 = vector.extract_strided_slice %441 {offsets = [0, 512], sizes = [2, 256], strides = [1, 1]} : vector<2x768xf32> to vector<2x256xf32>
    %454 = arith.mulf %450, %453 : vector<2x256xf32>
    %455 = arith.addf %452, %454 : vector<2x256xf32>
    %456 = math.tanh %455 : vector<2x256xf32>
    %cst_60 = arith.constant 1.000000e+00 : f32
    %457 = vector.broadcast %cst_60 : f32 to vector<2x256xf32>
    %458 = arith.subf %457, %451 : vector<2x256xf32>
    %459 = arith.mulf %458, %456 : vector<2x256xf32>
    %460 = arith.mulf %451, %437 : vector<2x256xf32>
    %461 = arith.addf %459, %460 : vector<2x256xf32>
    %462 = arith.truncf %461 : vector<2x256xf32> to vector<2x256xbf16>
    %cst_61 = arith.constant dense<0.000000e+00> : vector<2x768xf32>
    %463 = tpu.matmul %462, %387, %cst_61 {dimension_numbers = #tpu.dot_dimension_numbers<[1], [0], [0], [1], [0, 0, 1, 1], [], []>} : vector<2x256xbf16>, vector<256x768xbf16>, vector<2x768xf32> -> vector<2x768xf32>
    %464 = vector.broadcast %388 : vector<1x768xf32> to vector<2x768xf32>
    %465 = arith.addf %463, %464 : vector<2x768xf32>
    %466 = vector.extract_strided_slice %358 {offsets = [0, 0], sizes = [2, 512], strides = [1, 1]} : vector<2x768xf32> to vector<2x512xf32>
    %467 = vector.extract_strided_slice %465 {offsets = [0, 0], sizes = [2, 512], strides = [1, 1]} : vector<2x768xf32> to vector<2x512xf32>
    %468 = arith.addf %466, %467 : vector<2x512xf32>
    %469 = arith.negf %468 : vector<2x512xf32>
    %470 = math.exp %469 : vector<2x512xf32>
    %cst_62 = arith.constant 1.000000e+00 : f32
    %471 = vector.broadcast %cst_62 : f32 to vector<2x512xf32>
    %472 = arith.addf %471, %470 : vector<2x512xf32>
    %473 = arith.divf %471, %472 : vector<2x512xf32>
    %474 = vector.extract_strided_slice %473 {offsets = [0, 0], sizes = [2, 256], strides = [1, 1]} : vector<2x512xf32> to vector<2x256xf32>
    %475 = vector.extract_strided_slice %473 {offsets = [0, 256], sizes = [2, 256], strides = [1, 1]} : vector<2x512xf32> to vector<2x256xf32>
    %476 = vector.extract_strided_slice %358 {offsets = [0, 512], sizes = [2, 256], strides = [1, 1]} : vector<2x768xf32> to vector<2x256xf32>
    %477 = vector.extract_strided_slice %465 {offsets = [0, 512], sizes = [2, 256], strides = [1, 1]} : vector<2x768xf32> to vector<2x256xf32>
    %478 = arith.mulf %474, %477 : vector<2x256xf32>
    %479 = arith.addf %476, %478 : vector<2x256xf32>
    %480 = math.tanh %479 : vector<2x256xf32>
    %cst_63 = arith.constant 1.000000e+00 : f32
    %481 = vector.broadcast %cst_63 : f32 to vector<2x256xf32>
    %482 = arith.subf %481, %475 : vector<2x256xf32>
    %483 = arith.mulf %482, %480 : vector<2x256xf32>
    %484 = arith.mulf %475, %461 : vector<2x256xf32>
    %485 = arith.addf %483, %484 : vector<2x256xf32>
    %486 = arith.truncf %485 : vector<2x256xf32> to vector<2x256xbf16>
    %cst_64 = arith.constant dense<0.000000e+00> : vector<2x768xf32>
    %487 = tpu.matmul %486, %387, %cst_64 {dimension_numbers = #tpu.dot_dimension_numbers<[1], [0], [0], [1], [0, 0, 1, 1], [], []>} : vector<2x256xbf16>, vector<256x768xbf16>, vector<2x768xf32> -> vector<2x768xf32>
    %488 = vector.broadcast %388 : vector<1x768xf32> to vector<2x768xf32>
    %489 = arith.addf %487, %488 : vector<2x768xf32>
    %490 = vector.extract_strided_slice %365 {offsets = [0, 0], sizes = [2, 512], strides = [1, 1]} : vector<2x768xf32> to vector<2x512xf32>
    %491 = vector.extract_strided_slice %489 {offsets = [0, 0], sizes = [2, 512], strides = [1, 1]} : vector<2x768xf32> to vector<2x512xf32>
    %492 = arith.addf %490, %491 : vector<2x512xf32>
    %493 = arith.negf %492 : vector<2x512xf32>
    %494 = math.exp %493 : vector<2x512xf32>
    %cst_65 = arith.constant 1.000000e+00 : f32
    %495 = vector.broadcast %cst_65 : f32 to vector<2x512xf32>
    %496 = arith.addf %495, %494 : vector<2x512xf32>
    %497 = arith.divf %495, %496 : vector<2x512xf32>
    %498 = vector.extract_strided_slice %497 {offsets = [0, 0], sizes = [2, 256], strides = [1, 1]} : vector<2x512xf32> to vector<2x256xf32>
    %499 = vector.extract_strided_slice %497 {offsets = [0, 256], sizes = [2, 256], strides = [1, 1]} : vector<2x512xf32> to vector<2x256xf32>
    %500 = vector.extract_strided_slice %365 {offsets = [0, 512], sizes = [2, 256], strides = [1, 1]} : vector<2x768xf32> to vector<2x256xf32>
    %501 = vector.extract_strided_slice %489 {offsets = [0, 512], sizes = [2, 256], strides = [1, 1]} : vector<2x768xf32> to vector<2x256xf32>
    %502 = arith.mulf %498, %501 : vector<2x256xf32>
    %503 = arith.addf %500, %502 : vector<2x256xf32>
    %504 = math.tanh %503 : vector<2x256xf32>
    %cst_66 = arith.constant 1.000000e+00 : f32
    %505 = vector.broadcast %cst_66 : f32 to vector<2x256xf32>
    %506 = arith.subf %505, %499 : vector<2x256xf32>
    %507 = arith.mulf %506, %504 : vector<2x256xf32>
    %508 = arith.mulf %499, %485 : vector<2x256xf32>
    %509 = arith.addf %507, %508 : vector<2x256xf32>
    %510 = arith.truncf %509 : vector<2x256xf32> to vector<2x256xbf16>
    %cst_67 = arith.constant dense<0.000000e+00> : vector<2x768xf32>
    %511 = tpu.matmul %510, %387, %cst_67 {dimension_numbers = #tpu.dot_dimension_numbers<[1], [0], [0], [1], [0, 0, 1, 1], [], []>} : vector<2x256xbf16>, vector<256x768xbf16>, vector<2x768xf32> -> vector<2x768xf32>
    %512 = vector.broadcast %388 : vector<1x768xf32> to vector<2x768xf32>
    %513 = arith.addf %511, %512 : vector<2x768xf32>
    %514 = vector.extract_strided_slice %372 {offsets = [0, 0], sizes = [2, 512], strides = [1, 1]} : vector<2x768xf32> to vector<2x512xf32>
    %515 = vector.extract_strided_slice %513 {offsets = [0, 0], sizes = [2, 512], strides = [1, 1]} : vector<2x768xf32> to vector<2x512xf32>
    %516 = arith.addf %514, %515 : vector<2x512xf32>
    %517 = arith.negf %516 : vector<2x512xf32>
    %518 = math.exp %517 : vector<2x512xf32>
    %cst_68 = arith.constant 1.000000e+00 : f32
    %519 = vector.broadcast %cst_68 : f32 to vector<2x512xf32>
    %520 = arith.addf %519, %518 : vector<2x512xf32>
    %521 = arith.divf %519, %520 : vector<2x512xf32>
    %522 = vector.extract_strided_slice %521 {offsets = [0, 0], sizes = [2, 256], strides = [1, 1]} : vector<2x512xf32> to vector<2x256xf32>
    %523 = vector.extract_strided_slice %521 {offsets = [0, 256], sizes = [2, 256], strides = [1, 1]} : vector<2x512xf32> to vector<2x256xf32>
    %524 = vector.extract_strided_slice %372 {offsets = [0, 512], sizes = [2, 256], strides = [1, 1]} : vector<2x768xf32> to vector<2x256xf32>
    %525 = vector.extract_strided_slice %513 {offsets = [0, 512], sizes = [2, 256], strides = [1, 1]} : vector<2x768xf32> to vector<2x256xf32>
    %526 = arith.mulf %522, %525 : vector<2x256xf32>
    %527 = arith.addf %524, %526 : vector<2x256xf32>
    %528 = math.tanh %527 : vector<2x256xf32>
    %cst_69 = arith.constant 1.000000e+00 : f32
    %529 = vector.broadcast %cst_69 : f32 to vector<2x256xf32>
    %530 = arith.subf %529, %523 : vector<2x256xf32>
    %531 = arith.mulf %530, %528 : vector<2x256xf32>
    %532 = arith.mulf %523, %509 : vector<2x256xf32>
    %533 = arith.addf %531, %532 : vector<2x256xf32>
    %534 = arith.truncf %533 : vector<2x256xf32> to vector<2x256xbf16>
    %cst_70 = arith.constant dense<0.000000e+00> : vector<2x768xf32>
    %535 = tpu.matmul %534, %387, %cst_70 {dimension_numbers = #tpu.dot_dimension_numbers<[1], [0], [0], [1], [0, 0, 1, 1], [], []>} : vector<2x256xbf16>, vector<256x768xbf16>, vector<2x768xf32> -> vector<2x768xf32>
    %536 = vector.broadcast %388 : vector<1x768xf32> to vector<2x768xf32>
    %537 = arith.addf %535, %536 : vector<2x768xf32>
    %538 = vector.extract_strided_slice %379 {offsets = [0, 0], sizes = [2, 512], strides = [1, 1]} : vector<2x768xf32> to vector<2x512xf32>
    %539 = vector.extract_strided_slice %537 {offsets = [0, 0], sizes = [2, 512], strides = [1, 1]} : vector<2x768xf32> to vector<2x512xf32>
    %540 = arith.addf %538, %539 : vector<2x512xf32>
    %541 = arith.negf %540 : vector<2x512xf32>
    %542 = math.exp %541 : vector<2x512xf32>
    %cst_71 = arith.constant 1.000000e+00 : f32
    %543 = vector.broadcast %cst_71 : f32 to vector<2x512xf32>
    %544 = arith.addf %543, %542 : vector<2x512xf32>
    %545 = arith.divf %543, %544 : vector<2x512xf32>
    %546 = vector.extract_strided_slice %545 {offsets = [0, 0], sizes = [2, 256], strides = [1, 1]} : vector<2x512xf32> to vector<2x256xf32>
    %547 = vector.extract_strided_slice %545 {offsets = [0, 256], sizes = [2, 256], strides = [1, 1]} : vector<2x512xf32> to vector<2x256xf32>
    %548 = vector.extract_strided_slice %379 {offsets = [0, 512], sizes = [2, 256], strides = [1, 1]} : vector<2x768xf32> to vector<2x256xf32>
    %549 = vector.extract_strided_slice %537 {offsets = [0, 512], sizes = [2, 256], strides = [1, 1]} : vector<2x768xf32> to vector<2x256xf32>
    %550 = arith.mulf %546, %549 : vector<2x256xf32>
    %551 = arith.addf %548, %550 : vector<2x256xf32>
    %552 = math.tanh %551 : vector<2x256xf32>
    %cst_72 = arith.constant 1.000000e+00 : f32
    %553 = vector.broadcast %cst_72 : f32 to vector<2x256xf32>
    %554 = arith.subf %553, %547 : vector<2x256xf32>
    %555 = arith.mulf %554, %552 : vector<2x256xf32>
    %556 = arith.mulf %547, %533 : vector<2x256xf32>
    %557 = arith.addf %555, %556 : vector<2x256xf32>
    %558 = arith.truncf %557 : vector<2x256xf32> to vector<2x256xbf16>
    %cst_73 = arith.constant dense<0.000000e+00> : vector<2x768xf32>
    %559 = tpu.matmul %558, %387, %cst_73 {dimension_numbers = #tpu.dot_dimension_numbers<[1], [0], [0], [1], [0, 0, 1, 1], [], []>} : vector<2x256xbf16>, vector<256x768xbf16>, vector<2x768xf32> -> vector<2x768xf32>
    %560 = vector.broadcast %388 : vector<1x768xf32> to vector<2x768xf32>
    %561 = arith.addf %559, %560 : vector<2x768xf32>
    %562 = vector.extract_strided_slice %386 {offsets = [0, 0], sizes = [2, 512], strides = [1, 1]} : vector<2x768xf32> to vector<2x512xf32>
    %563 = vector.extract_strided_slice %561 {offsets = [0, 0], sizes = [2, 512], strides = [1, 1]} : vector<2x768xf32> to vector<2x512xf32>
    %564 = arith.addf %562, %563 : vector<2x512xf32>
    %565 = arith.negf %564 : vector<2x512xf32>
    %566 = math.exp %565 : vector<2x512xf32>
    %cst_74 = arith.constant 1.000000e+00 : f32
    %567 = vector.broadcast %cst_74 : f32 to vector<2x512xf32>
    %568 = arith.addf %567, %566 : vector<2x512xf32>
    %569 = arith.divf %567, %568 : vector<2x512xf32>
    %570 = vector.extract_strided_slice %569 {offsets = [0, 0], sizes = [2, 256], strides = [1, 1]} : vector<2x512xf32> to vector<2x256xf32>
    %571 = vector.extract_strided_slice %569 {offsets = [0, 256], sizes = [2, 256], strides = [1, 1]} : vector<2x512xf32> to vector<2x256xf32>
    %572 = vector.extract_strided_slice %386 {offsets = [0, 512], sizes = [2, 256], strides = [1, 1]} : vector<2x768xf32> to vector<2x256xf32>
    %573 = vector.extract_strided_slice %561 {offsets = [0, 512], sizes = [2, 256], strides = [1, 1]} : vector<2x768xf32> to vector<2x256xf32>
    %574 = arith.mulf %570, %573 : vector<2x256xf32>
    %575 = arith.addf %572, %574 : vector<2x256xf32>
    %576 = math.tanh %575 : vector<2x256xf32>
    %cst_75 = arith.constant 1.000000e+00 : f32
    %577 = vector.broadcast %cst_75 : f32 to vector<2x256xf32>
    %578 = arith.subf %577, %571 : vector<2x256xf32>
    %579 = arith.mulf %578, %576 : vector<2x256xf32>
    %580 = arith.mulf %571, %557 : vector<2x256xf32>
    %581 = arith.addf %579, %580 : vector<2x256xf32>
    %582 = vector.extract_strided_slice %413 {offsets = [0, 0], sizes = [2, 128], strides = [1, 1]} : vector<2x256xf32> to vector<2x128xf32>
    %583 = vector.extract_strided_slice %581 {offsets = [0, 128], sizes = [2, 128], strides = [1, 1]} : vector<2x256xf32> to vector<2x128xf32>
    %584 = tpu.concatenate %582, %583 in 1 : vector<2x128xf32>, vector<2x128xf32> -> vector<2x256xf32>
    %585 = vector.extract_strided_slice %437 {offsets = [0, 0], sizes = [2, 128], strides = [1, 1]} : vector<2x256xf32> to vector<2x128xf32>
    %586 = vector.extract_strided_slice %557 {offsets = [0, 128], sizes = [2, 128], strides = [1, 1]} : vector<2x256xf32> to vector<2x128xf32>
    %587 = tpu.concatenate %585, %586 in 1 : vector<2x128xf32>, vector<2x128xf32> -> vector<2x256xf32>
    %588 = vector.extract_strided_slice %461 {offsets = [0, 0], sizes = [2, 128], strides = [1, 1]} : vector<2x256xf32> to vector<2x128xf32>
    %589 = vector.extract_strided_slice %533 {offsets = [0, 128], sizes = [2, 128], strides = [1, 1]} : vector<2x256xf32> to vector<2x128xf32>
    %590 = tpu.concatenate %588, %589 in 1 : vector<2x128xf32>, vector<2x128xf32> -> vector<2x256xf32>
    %591 = vector.extract_strided_slice %485 {offsets = [0, 0], sizes = [2, 128], strides = [1, 1]} : vector<2x256xf32> to vector<2x128xf32>
    %592 = vector.extract_strided_slice %509 {offsets = [0, 128], sizes = [2, 128], strides = [1, 1]} : vector<2x256xf32> to vector<2x128xf32>
    %593 = tpu.concatenate %591, %592 in 1 : vector<2x128xf32>, vector<2x128xf32> -> vector<2x256xf32>
    %594 = vector.extract_strided_slice %509 {offsets = [0, 0], sizes = [2, 128], strides = [1, 1]} : vector<2x256xf32> to vector<2x128xf32>
    %595 = vector.extract_strided_slice %485 {offsets = [0, 128], sizes = [2, 128], strides = [1, 1]} : vector<2x256xf32> to vector<2x128xf32>
    %596 = tpu.concatenate %594, %595 in 1 : vector<2x128xf32>, vector<2x128xf32> -> vector<2x256xf32>
    %597 = vector.extract_strided_slice %533 {offsets = [0, 0], sizes = [2, 128], strides = [1, 1]} : vector<2x256xf32> to vector<2x128xf32>
    %598 = vector.extract_strided_slice %461 {offsets = [0, 128], sizes = [2, 128], strides = [1, 1]} : vector<2x256xf32> to vector<2x128xf32>
    %599 = tpu.concatenate %597, %598 in 1 : vector<2x128xf32>, vector<2x128xf32> -> vector<2x256xf32>
    %600 = vector.extract_strided_slice %557 {offsets = [0, 0], sizes = [2, 128], strides = [1, 1]} : vector<2x256xf32> to vector<2x128xf32>
    %601 = vector.extract_strided_slice %437 {offsets = [0, 128], sizes = [2, 128], strides = [1, 1]} : vector<2x256xf32> to vector<2x128xf32>
    %602 = tpu.concatenate %600, %601 in 1 : vector<2x128xf32>, vector<2x128xf32> -> vector<2x256xf32>
    %603 = vector.extract_strided_slice %581 {offsets = [0, 0], sizes = [2, 128], strides = [1, 1]} : vector<2x256xf32> to vector<2x128xf32>
    %604 = vector.extract_strided_slice %413 {offsets = [0, 128], sizes = [2, 128], strides = [1, 1]} : vector<2x256xf32> to vector<2x128xf32>
    %605 = tpu.concatenate %603, %604 in 1 : vector<2x128xf32>, vector<2x128xf32> -> vector<2x256xf32>
    %606 = vector.shape_cast %584 : vector<2x256xf32> to vector<2x1x256xf32>
    %607 = vector.shape_cast %587 : vector<2x256xf32> to vector<2x1x256xf32>
    %608 = vector.shape_cast %590 : vector<2x256xf32> to vector<2x1x256xf32>
    %609 = vector.shape_cast %593 : vector<2x256xf32> to vector<2x1x256xf32>
    %610 = vector.shape_cast %596 : vector<2x256xf32> to vector<2x1x256xf32>
    %611 = vector.shape_cast %599 : vector<2x256xf32> to vector<2x1x256xf32>
    %612 = vector.shape_cast %602 : vector<2x256xf32> to vector<2x1x256xf32>
    %613 = vector.shape_cast %605 : vector<2x256xf32> to vector<2x1x256xf32>
    %614 = tpu.concatenate %606, %607, %608, %609, %610, %611, %612, %613 in 1 : vector<2x1x256xf32>, vector<2x1x256xf32>, vector<2x1x256xf32>, vector<2x1x256xf32>, vector<2x1x256xf32>, vector<2x1x256xf32>, vector<2x1x256xf32>, vector<2x1x256xf32> -> vector<2x8x256xf32>
    %c0_76 = arith.constant 0 : index
    %c0_77 = arith.constant 0 : index
    %c0_78 = arith.constant 0 : index
    %615 = vector.load %arg16[%c0_76, %c0_77, %c0_78] : memref<2x8x256xf32, #tpu.memory_space<vmem>>, vector<2x8x256xf32>
    tpu.vector_store %arg16[%c0_76, %c0_77, %c0_78], %614 {strides = array<i32>} : memref<2x8x256xf32, #tpu.memory_space<vmem>>, vector<2x8x256xf32>,
    %c2_i32_79 = arith.constant 2 : i32
    %616 = tpu.memref_slice %arg21[%c2_i32_79] : memref<4x!tpu.dma_semaphore, #tpu.memory_space<semaphore_mem>> -> memref<1x!tpu.dma_semaphore, #tpu.memory_space<semaphore_mem>>
    %617 = tpu.memref_squeeze %616 : memref<1x!tpu.dma_semaphore, #tpu.memory_space<semaphore_mem>> -> memref<!tpu.dma_semaphore, #tpu.memory_space<semaphore_mem>>
    tpu.wait_dma2 semaphore(%617 : memref<!tpu.dma_semaphore, #tpu.memory_space<semaphore_mem>>) src(%arg13 : memref<256x128xbf16, #tpu.memory_space<any>>) dst(%arg19 : memref<256x128xbf16, #tpu.memory_space<vmem>>)
    %c3_i32_80 = arith.constant 3 : i32
    %618 = tpu.memref_slice %arg21[%c3_i32_80] : memref<4x!tpu.dma_semaphore, #tpu.memory_space<semaphore_mem>> -> memref<1x!tpu.dma_semaphore, #tpu.memory_space<semaphore_mem>>
    %619 = tpu.memref_squeeze %618 : memref<1x!tpu.dma_semaphore, #tpu.memory_space<semaphore_mem>> -> memref<!tpu.dma_semaphore, #tpu.memory_space<semaphore_mem>>
    tpu.wait_dma2 semaphore(%619 : memref<!tpu.dma_semaphore, #tpu.memory_space<semaphore_mem>>) src(%arg14 : memref<128x64xbf16, #tpu.memory_space<any>>) dst(%arg20 : memref<128x64xbf16, #tpu.memory_space<vmem>>)
    %620 = arith.truncf %581 : vector<2x256xf32> to vector<2x256xbf16>
    %c0_81 = arith.constant 0 : index
    %c0_82 = arith.constant 0 : index
    %621 = vector.load %arg19[%c0_81, %c0_82] : memref<256x128xbf16, #tpu.memory_space<vmem>>, vector<256x128xbf16>
    %cst_83 = arith.constant dense<0.000000e+00> : vector<2x128xf32>
    %622 = tpu.matmul %620, %621, %cst_83 {dimension_numbers = #tpu.dot_dimension_numbers<[1], [0], [0], [1], [0, 0, 1, 1], [], []>} : vector<2x256xbf16>, vector<256x128xbf16>, vector<2x128xf32> -> vector<2x128xf32>
    %c0_84 = arith.constant 0 : index
    %c0_85 = arith.constant 0 : index
    %623 = vector.load %arg7[%c0_84, %c0_85] : memref<1x128xf32, #tpu.memory_space<vmem>>, vector<1x128xf32>
    %624 = vector.broadcast %623 : vector<1x128xf32> to vector<2x128xf32>
    %625 = arith.addf %622, %624 : vector<2x128xf32>
    %cst_86 = arith.constant dense<0.000000e+00> : vector<2xf32>
    %626 = vector.multi_reduction <add>, %625, %cst_86 [1] : vector<2x128xf32> to vector<2xf32>
    %627 = vector.shape_cast %626 : vector<2xf32> to vector<2x1xf32>
    %cst_87 = arith.constant 1.280000e+02 : f32
    %628 = vector.broadcast %cst_87 : f32 to vector<2x1xf32>
    %629 = arith.divf %627, %628 : vector<2x1xf32>
    %630 = vector.broadcast %629 : vector<2x1xf32> to vector<2x128xf32>
    %631 = arith.subf %625, %630 : vector<2x128xf32>
    %632 = arith.mulf %631, %631 : vector<2x128xf32>
    %cst_88 = arith.constant dense<0.000000e+00> : vector<2xf32>
    %633 = vector.multi_reduction <add>, %632, %cst_88 [1] : vector<2x128xf32> to vector<2xf32>
    %634 = vector.shape_cast %633 : vector<2xf32> to vector<2x1xf32>
    %cst_89 = arith.constant 1.280000e+02 : f32
    %635 = vector.broadcast %cst_89 : f32 to vector<2x1xf32>
    %636 = arith.divf %634, %635 : vector<2x1xf32>
    %637 = vector.broadcast %629 : vector<2x1xf32> to vector<2x128xf32>
    %638 = arith.subf %625, %637 : vector<2x128xf32>
    %cst_90 = arith.constant 9.99999974E-6 : f32
    %639 = vector.broadcast %cst_90 : f32 to vector<2x1xf32>
    %640 = arith.addf %636, %639 : vector<2x1xf32>
    %641 = math.rsqrt %640 : vector<2x1xf32>
    %642 = vector.broadcast %641 : vector<2x1xf32> to vector<2x128xf32>
    %643 = arith.mulf %638, %642 : vector<2x128xf32>
    %c0_91 = arith.constant 0 : index
    %c0_92 = arith.constant 0 : index
    %644 = vector.load %arg8[%c0_91, %c0_92] : memref<1x128xf32, #tpu.memory_space<vmem>>, vector<1x128xf32>
    %645 = vector.broadcast %644 : vector<1x128xf32> to vector<2x128xf32>
    %646 = arith.mulf %643, %645 : vector<2x128xf32>
    %c0_93 = arith.constant 0 : index
    %c0_94 = arith.constant 0 : index
    %647 = vector.load %arg9[%c0_93, %c0_94] : memref<1x128xf32, #tpu.memory_space<vmem>>, vector<1x128xf32>
    %648 = vector.broadcast %647 : vector<1x128xf32> to vector<2x128xf32>
    %649 = arith.addf %646, %648 : vector<2x128xf32>
    %cst_95 = arith.constant 0.000000e+00 : f32
    %650 = vector.broadcast %cst_95 : f32 to vector<2x128xf32>
    %651 = arith.maximumf %649, %650 : vector<2x128xf32>
    %652 = arith.truncf %651 : vector<2x128xf32> to vector<2x128xbf16>
    %c0_96 = arith.constant 0 : index
    %c0_97 = arith.constant 0 : index
    %653 = vector.load %arg20[%c0_96, %c0_97] : memref<128x64xbf16, #tpu.memory_space<vmem>>, vector<128x64xbf16>
    %cst_98 = arith.constant dense<0.000000e+00> : vector<2x64xf32>
    %654 = tpu.matmul %652, %653, %cst_98 {dimension_numbers = #tpu.dot_dimension_numbers<[1], [0], [0], [1], [0, 0, 1, 1], [], []>} : vector<2x128xbf16>, vector<128x64xbf16>, vector<2x64xf32> -> vector<2x64xf32>
    %c0_99 = arith.constant 0 : index
    %c0_100 = arith.constant 0 : index
    %655 = vector.load %arg10[%c0_99, %c0_100] : memref<1x64xf32, #tpu.memory_space<vmem>>, vector<1x64xf32>
    %656 = vector.broadcast %655 : vector<1x64xf32> to vector<2x64xf32>
    %657 = arith.addf %654, %656 : vector<2x64xf32>
    %cst_101 = arith.constant 14.2857141 : f32
    %658 = vector.broadcast %cst_101 : f32 to vector<2x64xf32>
    %659 = arith.mulf %657, %658 : vector<2x64xf32>
    %660 = arith.mulf %659, %659 : vector<2x64xf32>
    %cst_102 = arith.constant dense<0.000000e+00> : vector<2xf32>
    %661 = vector.multi_reduction <add>, %660, %cst_102 [1] : vector<2x64xf32> to vector<2xf32>
    %662 = vector.shape_cast %661 : vector<2xf32> to vector<2x1xf32>
    %cst_103 = arith.constant 1.000000e-24 : f32
    %663 = vector.broadcast %cst_103 : f32 to vector<2x1xf32>
    %664 = arith.maximumf %662, %663 : vector<2x1xf32>
    %665 = math.rsqrt %664 : vector<2x1xf32>
    %666 = vector.broadcast %665 : vector<2x1xf32> to vector<2x64xf32>
    %667 = arith.mulf %659, %666 : vector<2x64xf32>
    %c0_104 = arith.constant 0 : index
    %c0_105 = arith.constant 0 : index
    %668 = vector.load %arg15[%c0_104, %c0_105] : memref<2x64xf32, #tpu.memory_space<vmem>>, vector<2x64xf32>
    tpu.vector_store %arg15[%c0_104, %c0_105], %667 {strides = array<i32>} : memref<2x64xf32, #tpu.memory_space<vmem>>, vector<2x64xf32>,
    return
  }
}

</mosaic_0001>

<bundles_post_ra>
// kernel: encoder_forward.1
= control target key start
LH: loop header
LB: loop body
LE: loop exit
PB: predicated region body
PF: predicated region fallthrough
CT: control target
= control target key end

     0   :  { %s12778_s0 = inlined_call_operand.vmem [shape: bf16[2,8,12], index: 0, kind: input, shape index: {}]   ;;  %s12779_s1 = inlined_call_operand.hbm [shape: bf16[12,768], index: 1, kind: input, shape index: {}]   ;;  %s12780_s2 = inlined_call_operand.vmem [shape: f32[1,768], index: 2, kind: input, shape index: {}]   ;;  %s12781_s3 = inlined_call_operand.hbm [shape: bf16[256,768], index: 3, kind: input, shape index: {}]   ;;  %s12782_s4 = inlined_call_operand.vmem [shape: f32[1,768], index: 4, kind: input, shape index: {}]   ;;  %s12783_s5 = inlined_call_operand.hbm [shape: f32[1,768], index: 5, kind: input, shape index: {}]   ;;  %s12784_s6 = inlined_call_operand.hbm [shape: f32[1,768], index: 6, kind: input, shape index: {}]   ;;  %s12785_s7 = inlined_call_operand.vmem [shape: f32[1,128], index: 7, kind: input, shape index: {}]   ;;  %s12786_s8 = inlined_call_operand.vmem [shape: f32[1,128], index: 8, kind: input, shape index: {}]   ;;  %s12787_s9 = inlined_call_operand.vmem [shape: f32[1,128], index: 9, kind: input, shape index: {}]   ;;  %s12788_s10 = inlined_call_operand.hbm [shape: f32[1,64], index: 10, kind: input, shape index: {}]   ;;  %s12789_s11 = inlined_call_operand.hbm [shape: bf16[256,768], index: 11, kind: input, shape index: {}]   ;;  %s12790_s12 = inlined_call_operand.hbm [shape: bf16[256,768], index: 12, kind: input, shape index: {}]   ;;  %s12791_s13 = inlined_call_operand.vmem [shape: bf16[256,128], index: 13, kind: input, shape index: {}]   ;;  %s12792_s14 = inlined_call_operand.vmem [shape: bf16[128,64], index: 14, kind: input, shape index: {}]   ;;  %s12793_s15 = inlined_call_operand.hbm [shape: f32[2,64], index: 15, kind: output, shape index: {0}]   ;;  %s12794_s16 = inlined_call_operand.hbm [shape: f32[2,8,256], index: 16, kind: output, shape index: {1}]  }
   0x1   :  { %13163 = sst [smem:[#allocation147_spill]] %s12778_s0 }
   0x2   :  { %22 = vsyncpa [#allocation8], 0 }
   0x3   :  { %23 = vsyncpa [#allocation11], 0 }
   0x4   :  { %24 = vsyncpa [#allocation14], 0 }
   0x5   :  { %25 = vsyncpa [#allocation9], 0 }
   0x6   :  { %26 = vsyncpa [#allocation18], 0  ;;  %s8728_s21 = smov [#allocation10]   ;;  %s8729_s23 = smov [#allocation13]  }
   0x7   :  { %s48_s22 = sshll.u32 %s8728_s21, 4  ;;  %s73_s24 = sshll.u32 %s8729_s23, 4  ;;  %s49_s22 = int_to_ptr.vmem [resolvable:$true] %s48_s22  ;;  %s74_s24 = int_to_ptr.vmem [resolvable:$true] %s73_s24 }
   0x8   :  { %s8538_s25 = scalar_lea.vmem %s49_s22, 12288  ;;  %p8543_p1 = scmp.lt.s32.totalorder %s49_s22, %s49_s22 }
   0x9   :  { %p8539_p0 = scmp.ne.s32.totalorder %s49_s22, %s8538_s25  ;;  %p8544_p2 = scmp.lt.s32.totalorder %s8538_s25, %s8538_s25 }
   0xb   :  { %p8545_p3 = por %p8544_p2, %p8543_p1 }
   0xd   :  { %p8546_p4 = pnand %p8545_p3, %p8539_p0 }
   0xf   :  { %8549 = shalt.err (!%p8546_p4)
}
  0x10   :  { %s8730_s26 = smov 384   ;;  %s8731_s27 = smov 24  }
  0x11   :  { %54 = dma.hbm_to_vmem [thread:$0]  %s12781_s3, 12288, %s49_s22, [#allocation11], %s8730_s26, %s8730_s26, %s8731_s27  }
  0x12   :  { %s8558_s30 = scalar_lea.vmem %s74_s24, 96  ;;  %p8563_p6 = scmp.lt.s32.totalorder %s74_s24, %s74_s24 }
  0x13   :  { %p8559_p5 = scmp.ne.s32.totalorder %s74_s24, %s8558_s30  ;;  %p8564_p7 = scmp.lt.s32.totalorder %s8558_s30, %s8558_s30 }
  0x15   :  { %p8565_p8 = por %p8564_p7, %p8563_p6 }
  0x17   :  { %p8566_p9 = pnand %p8565_p8, %p8559_p5 }
  0x19   :  { %8569 = shalt.err (!%p8566_p9)
}
  0x1a   :  { %76 = dma.hbm_to_vmem [thread:$0]  %s12784_s6, 96, %s74_s24, [#allocation14]  }
  0x1b   :  { %s8732_s18 = smov [#allocation7]   ;;  %s8733_s20 = smov [#allocation12]  }
  0x1c   :  { %s34_s19 = sshll.u32 %s8732_s18, 4  ;;  %s63_s21 = sshll.u32 %s8733_s20, 4  ;;  %s35_s19 = int_to_ptr.vmem [resolvable:$true] %s34_s19  ;;  %s64_s21 = int_to_ptr.vmem [resolvable:$true] %s63_s21 }
  0x1d   :  { %s8578_s23 = scalar_lea.vmem %s35_s19, 768  ;;  %p8583_p11 = scmp.lt.s32.totalorder %s35_s19, %s35_s19 }
  0x1e   :  { %p8579_p10 = scmp.ne.s32.totalorder %s35_s19, %s8578_s23  ;;  %p8584_p12 = scmp.lt.s32.totalorder %s8578_s23, %s8578_s23 }
  0x20   :  { %p8585_p13 = por %p8584_p12, %p8583_p11 }
  0x22   :  { %p8586_p0 = pnand %p8585_p13, %p8579_p10 }
  0x24   :  { %8589 = shalt.err (!%p8586_p0)
}
  0x25   :  { %40 = dma.hbm_to_vmem [thread:$0]  %s12779_s1, 768, %s35_s19, [#allocation8], %s8730_s26, %s8730_s26, %s8731_s27  }
  0x26   :  { %s8598_s25 = scalar_lea.vmem %s64_s21, 96  ;;  %p8603_p2 = scmp.lt.s32.totalorder %s64_s21, %s64_s21 }
  0x27   :  { %p8599_p1 = scmp.ne.s32.totalorder %s64_s21, %s8598_s25  ;;  %p8604_p3 = scmp.lt.s32.totalorder %s8598_s25, %s8598_s25 }
  0x29   :  { %p8605_p4 = por %p8604_p3, %p8603_p2 }
  0x2b   :  { %p8606_p5 = pnand %p8605_p4, %p8599_p1 }
  0x2d   :  { %8609 = shalt.err (!%p8606_p5)
}
  0x2e   :  { %66 = dma.hbm_to_vmem [thread:$0]  %s12783_s5, 96, %s64_s21, [#allocation11]  }
  0x2f   :  { %s8734_s28 = smov [#allocation15]  }
  0x30   :  { %s89_s29 = sshll.u32 %s8734_s28, 4  ;;  %s90_s29 = int_to_ptr.vmem [resolvable:$true] %s89_s29 }
  0x31   :  { %s8618_s30 = scalar_lea.vmem %s90_s29, 16  ;;  %s8622_s0 = scalar_lea.vmem %s90_s29, 32 }
  0x32   :  { %p8619_p6 = scmp.ne.s32.totalorder %s90_s29, %s8618_s30  ;;  %p8623_p7 = scmp.lt.s32.totalorder %s90_s29, %s90_s29 }
  0x33   :  { %p8624_p8 = scmp.lt.s32.totalorder %s8622_s0, %s8618_s30 }
  0x35   :  { %p8625_p9 = por %p8624_p8, %p8623_p7 }
  0x37   :  { %p8626_p10 = pnand %p8625_p9, %p8619_p6 }
  0x39   :  { %8629 = shalt.err (!%p8626_p10)
}
  0x3a   :  { %92 = dma.hbm_to_vmem [thread:$0]  %s12788_s10, 16, %s90_s29, [#allocation14]  }
  0x3b   :  { %8710 = dma.done.wait [#allocation8], 768  }
  0x3c   :  { %8711 = vsyncadd [#allocation8], 4294966528 }
  0x3d   :  { %8712 = dma.done.wait [#allocation11], 12384  }
  0x3e   :  { %8713 = vsyncadd [#allocation11], 4294954912 }
  0x3f   :  { %8714 = dma.done.wait [#allocation14], 112  }
  0x40   :  { %8715 = vsyncadd [#allocation14], 4294967184  ;;  %s8735_s5 = smov [#allocation2]   ;;  %s8736_s17 = smov [#allocation3]  }
  0x41   :  { %s116_s27 = sshll.u32 %s8735_s5, 4  ;;  %s128_s18 = sshll.u32 %s8736_s17, 4  ;;  %s117_s27 = int_to_ptr.vmem [resolvable:$true] %s116_s27  ;;  %s129_s18 = int_to_ptr.vmem [resolvable:$true] %s128_s18 }
  0x42   :  { %s8638_s19 = scalar_lea.vmem %s117_s27, 12288  ;;  %p8643_p12 = scmp.lt.s32.totalorder %s117_s27, %s117_s27 }
  0x43   :  { %p8639_p11 = scmp.ne.s32.totalorder %s117_s27, %s8638_s19  ;;  %p8644_p13 = scmp.lt.s32.totalorder %s8638_s19, %s8638_s19 }
  0x45   :  { %p8645_p0 = por %p8644_p13, %p8643_p12 }
  0x47   :  { %p8646_p1 = pnand %p8645_p0, %p8639_p11 }
  0x49   :  { %8649 = shalt.err (!%p8646_p1)  }
  0x4a   :  { %119 = dma.hbm_to_vmem [thread:$0]  %s12789_s11, 12288, %s117_s27, [#allocation6] }
  0x4b   :  { %s8658_s21 = scalar_lea.vmem %s129_s18, 12288  ;;  %p8663_p3 = scmp.lt.s32.totalorder %s129_s18, %s129_s18 }
  0x4c   :  { %p8659_p2 = scmp.ne.s32.totalorder %s129_s18, %s8658_s21  ;;  %p8664_p4 = scmp.lt.s32.totalorder %s8658_s21, %s8658_s21 }
  0x4e   :  { %p8665_p5 = por %p8664_p4, %p8663_p3 }
  0x50   :  { %p8666_p6 = pnand %p8665_p5, %p8659_p2 }
  0x52   :  { %8669 = shalt.err (!%p8666_p6)  }
  0x53   :  { %131 = dma.hbm_to_vmem [thread:$0]  %s12790_s12, 12288, %s129_s18, [#allocation6 + $0x1]  ;;  %v166_v0 = vld [vmem:[%s12791_s13] sm:$0xff]  ;;  %v168_v1 = vld [vmem:[%s12791_s13 + $0x8] sm:$0xff]  ;;  %v170_v2 = vld [vmem:[%s12791_s13 + $0x10] sm:$0xff] }
  0x54   :  { %167 = vst [vmem:[#allocation4] sm:$0xff] %v166_v0  ;;  %169 = vst [vmem:[#allocation4 + $0x8] sm:$0xff] %v168_v1  ;;  %v172_v3 = vld [vmem:[%s12791_s13 + $0x18] sm:$0xff]  ;;  %v174_v4 = vld [vmem:[%s12791_s13 + $0x20] sm:$0xff] }
  0x55   :  { %171 = vst [vmem:[#allocation4 + $0x10] sm:$0xff] %v170_v2  ;;  %v176_v5 = vld [vmem:[%s12791_s13 + $0x28] sm:$0xff]  ;;  %173 = vst [vmem:[#allocation4 + $0x18] sm:$0xff] %v172_v3  ;;  %v178_v6 = vld [vmem:[%s12791_s13 + $0x30] sm:$0xff] }
  0x56   :  { %175 = vst [vmem:[#allocation4 + $0x20] sm:$0xff] %v174_v4  ;;  %177 = vst [vmem:[#allocation4 + $0x28] sm:$0xff] %v176_v5  ;;  %v180_v7 = vld [vmem:[%s12791_s13 + $0x38] sm:$0xff]  ;;  %v182_v8 = vld [vmem:[%s12791_s13 + $0x40] sm:$0xff] }
  0x57   :  { %179 = vst [vmem:[#allocation4 + $0x30] sm:$0xff] %v178_v6  ;;  %181 = vst [vmem:[#allocation4 + $0x38] sm:$0xff] %v180_v7  ;;  %v184_v9 = vld [vmem:[%s12791_s13 + $0x48] sm:$0xff]  ;;  %v186_v10 = vld [vmem:[%s12791_s13 + $0x50] sm:$0xff] }
  0x58   :  { %183 = vst [vmem:[#allocation4 + $0x40] sm:$0xff] %v182_v8  ;;  %v188_v11 = vld [vmem:[%s12791_s13 + $0x58] sm:$0xff]  ;;  %185 = vst [vmem:[#allocation4 + $0x48] sm:$0xff] %v184_v9  ;;  %v190_v12 = vld [vmem:[%s12791_s13 + $0x60] sm:$0xff] }
  0x59   :  { %187 = vst [vmem:[#allocation4 + $0x50] sm:$0xff] %v186_v10  ;;  %189 = vst [vmem:[#allocation4 + $0x58] sm:$0xff] %v188_v11  ;;  %v192_v13 = vld [vmem:[%s12791_s13 + $0x68] sm:$0xff]  ;;  %v194_v14 = vld [vmem:[%s12791_s13 + $0x70] sm:$0xff] }
  0x5a   :  { %191 = vst [vmem:[#allocation4 + $0x60] sm:$0xff] %v190_v12  ;;  %193 = vst [vmem:[#allocation4 + $0x68] sm:$0xff] %v192_v13  ;;  %v196_v15 = vld [vmem:[%s12791_s13 + $0x78] sm:$0xff] }
  0x5b   :  { %195 = vst [vmem:[#allocation4 + $0x70] sm:$0xff] %v194_v14  ;;  %197 = vst [vmem:[#allocation4 + $0x78] sm:$0xff] %v196_v15 }
  0x5c   :  { %205 = vsyncadd [#allocation6 + $0x2], 2048  ;;  %v240_v16 = vld [vmem:[%s12792_s14] sm:$0xff]  ;;  %v242_v17 = vld [vmem:[%s12792_s14 + $0x8] sm:$0xff] }
  0x5d   :  { %241 = vst [vmem:[#allocation5] sm:$0xff] %v240_v16  ;;  %243 = vst [vmem:[#allocation5 + $0x8] sm:$0xff] %v242_v17  ;;  %v244_v18 = vld [vmem:[%s12792_s14 + $0x10] sm:$0xff]  ;;  %v246_v19 = vld [vmem:[%s12792_s14 + $0x18] sm:$0xff] }
  0x5e   :  { %v248_v20 = vld [vmem:[%s12792_s14 + $0x20] sm:$0xff]  ;;  %245 = vst [vmem:[#allocation5 + $0x10] sm:$0xff] %v244_v18  ;;  %247 = vst [vmem:[#allocation5 + $0x18] sm:$0xff] %v246_v19  ;;  %v250_v21 = vld [vmem:[%s12792_s14 + $0x28] sm:$0xff] }
  0x5f   :  { %249 = vst [vmem:[#allocation5 + $0x20] sm:$0xff] %v248_v20  ;;  %v252_v22 = vld [vmem:[%s12792_s14 + $0x30] sm:$0xff]  ;;  %v254_v23 = vld [vmem:[%s12792_s14 + $0x38] sm:$0xff]  ;;  %251 = vst [vmem:[#allocation5 + $0x28] sm:$0xff] %v250_v21 }
  0x60   :  { %253 = vst [vmem:[#allocation5 + $0x30] sm:$0xff] %v252_v22  ;;  %255 = vst [vmem:[#allocation5 + $0x38] sm:$0xff] %v254_v23 }
  0x61   :  { %263 = vsyncadd [#allocation6 + $0x3], 1024  ;;  %vm422_vm0 = vcmask 1045504   ;;  %v7356_v24 = vld [vmem:[#allocation7 + $0x4] ss:$24 sps:$4 sm:$0x3f]  }
  0x62   :  { %v7358_v25 = vld [vmem:[#allocation7 + $0xc] ss:$24 sps:$4 sm:$0x3f]   ;;  %v7360_v26 = vld [vmem:[#allocation7] ss:$24 sps:$4 sm:$0x3f]   ;;  %6898 = vmatprep.subr.msk.bf16.mxu0 %vm422_vm0, %v7356_v24 }
  0x63   :  { %v7361_v27 = vld [vmem:[#allocation7 + $0x8] ss:$24 sps:$4 sm:$0x3f]   ;;  %6900 = vmatprep.subr.msk.bf16.mxu1 %vm422_vm0, %v7358_v25  ;;  %v424_v28 = vsel %vm422_vm0, %v7360_v26, 0  ;;  %v12795_v29 = vmov 0   ;;  %s13164_s11 = sld [smem:[#allocation147_spill]] }
  0x64   :  { %473 = vmatprep.mubr.bf16.mxu0 %v12795_v29  ;;  %vm418_vm1 = vcmask 97280   ;;  %456 = vmatpush1.bf16.msra.mxu0 %v424_v28  ;;  %v430_v31 = vsel %vm422_vm0, %v7361_v27, 0  ;;  %v8932_v32 = vld [vmem:[#allocation10 + $0x154] ss:$24 sps:$4 sm:$0xff]   ;;  %v8934_v33 = vld [vmem:[#allocation10 + $0x150] ss:$24 sps:$4 sm:$0xff]  }
  0x65   :  { %516 = vmatprep.mubr.bf16.mxu1 %v12795_v29  ;;  %499 = vmatpush1.bf16.msra.mxu1 %v430_v31  ;;  %v7366_v34 = vld [vmem:[#allocation7 + $0x14] ss:$24 sps:$4 sm:$0x3f]   ;;  %v7368_v35 = vld [vmem:[#allocation7 + $0x10] ss:$24 sps:$4 sm:$0x3f]  }
  0x66   :  { %1431 = vmatprep.subr.bf16.mxu1 %v8932_v32  ;;  %6902 = vmatprep.subr.msk.bf16.mxu0 %vm422_vm0, %v7366_v34  ;;  %v8939_v36 = vld [vmem:[#allocation10 + $0x124] ss:$24 sps:$4 sm:$0xff]   ;;  %v436_v37 = vsel %vm422_vm0, %v7368_v35, 0  ;;  %v8947_v39 = vld [vmem:[#allocation10 + $0x120] ss:$24 sps:$4 sm:$0xff]   ;;  %vm595_vm2 = vcmask 1041409  }
  0x67   :  { %v8944_v38 = vld [vmem:[#allocation10 + $0x15c] ss:$24 sps:$4 sm:$0xff]   ;;  %v8954_v41 = vld [vmem:[#allocation10 + $0x158] ss:$24 sps:$4 sm:$0xff]   ;;  %v8959_v43 = vld [vmem:[#allocation10 + $0x12c] ss:$24 sps:$4 sm:$0xff]  }
  0x68   :  { %v8951_v40 = vld [vmem:[#allocation10 + $0xf4] ss:$24 sps:$4 sm:$0xff]   ;;  %v8956_v42 = vld [vmem:[#allocation10 + $0xf0] ss:$24 sps:$4 sm:$0xff]   ;;  %v8962_v44 = vld [vmem:[#allocation10 + $0xc4] ss:$24 sps:$4 sm:$0xff]  }
  0x69   :  { %v7362_v30 = vld [vmem:[%s13164_s11] sm:$0xff]   ;;  %v8966_v45 = vld [vmem:[#allocation10 + $0x128] ss:$24 sps:$4 sm:$0xff]   ;;  %v8985_v51 = vld [vmem:[#allocation10 + $0xcc] ss:$24 sps:$4 sm:$0xff]   ;;  %vm3125_vm3 = vcmask 1040384  }
  0x6a   :  { %6899 = vmatmul.mubr.msk.bf16.vlgmr.msra.gmra.mxu0 %vm418_vm1, %v7362_v30  ;;  %6901 = vmatmul.mubr.msk.bf16.vlgmr.msra.gmra.mxu1 %vm418_vm1, %v7362_v30  ;;  %v8971_v46 = vld [vmem:[#allocation10 + $0xc0] ss:$24 sps:$4 sm:$0xff]   ;;  %v8973_v47 = vld [vmem:[#allocation10 + $0xfc] ss:$24 sps:$4 sm:$0xff]   ;;  %v8981_v50 = vld [vmem:[#allocation10 + $0x90] ss:$24 sps:$4 sm:$0xff]  }
  0x6b   :  { %559 = vmatprep.mubr.bf16.mxu0 %v12795_v29  ;;  %1432 = vmatpush1.bf16.msra.mxu1 %v8934_v33  ;;  %v8976_v48 = vld [vmem:[#allocation10 + $0x94] ss:$24 sps:$4 sm:$0xff]   ;;  %v8979_v49 = vld [vmem:[#allocation10 + $0xf8] ss:$24 sps:$4 sm:$0xff]   ;;  %v8988_v52 = vld [vmem:[#allocation10 + $0x64] ss:$24 sps:$4 sm:$0xff]  }
  0x6c   :  { %542 = vmatpush1.bf16.msra.mxu0 %v436_v37  ;;  %1433 = vmatprep.subr.bf16.mxu1 %v8939_v36  ;;  %v8991_v53 = vld [vmem:[#allocation10 + $0xc8] ss:$24 sps:$4 sm:$0xff]   ;;  %v8997_v55 = vld [vmem:[#allocation10 + $0x9c] ss:$24 sps:$4 sm:$0xff]   ;;  %v9003_v57 = vld [vmem:[#allocation10 + $0x98] ss:$24 sps:$4 sm:$0xff]  }
  0x6d   :  { %1472 = vmatprep.subr.bf16.mxu0 %v8944_v38  ;;  %1463 = vmatprep.mubr.bf16.mxu1 %v12795_v29  ;;  %v8995_v54 = vld [vmem:[#allocation10 + $0x60] ss:$24 sps:$4 sm:$0xff]   ;;  %v9000_v56 = vld [vmem:[#allocation10 + $0x34] ss:$24 sps:$4 sm:$0xff]   ;;  %v9005_v58 = vld [vmem:[#allocation10 + $0x30] ss:$24 sps:$4 sm:$0xff]  }
  0x6e   :  { %v9009_v59 = vld [vmem:[#allocation10 + $0x6c] ss:$24 sps:$4 sm:$0xff]   ;;  %v9015_v61 = vld [vmem:[#allocation10 + $0x68] ss:$24 sps:$4 sm:$0xff]   ;;  %v9021_v63 = vld [vmem:[#allocation10 + $0x3c] ss:$24 sps:$4 sm:$0xff]  }
  0x6f   :  { %1434 = vmatpush1.bf16.msra.mxu1 %v8947_v39  ;;  %v9012_v60 = vld [vmem:[#allocation10 + $0x4] ss:$24 sps:$4 sm:$0xff]   ;;  %v9019_v62 = vld [vmem:[#allocation10] ss:$24 sps:$4 sm:$0xff]   ;;  %v9024_v0 = vld [vmem:[#allocation10 + $0x2d4] ss:$24 sps:$4 sm:$0xff]  }
  0x70   :  { %1435 = vmatprep.subr.bf16.mxu1 %v8951_v40  ;;  %v9027_v1 = vld [vmem:[#allocation10 + $0x38] ss:$24 sps:$4 sm:$0xff]   ;;  %v9033_v3 = vld [vmem:[#allocation10 + $0xc] ss:$24 sps:$4 sm:$0xff]   ;;  %v9039_v5 = vld [vmem:[#allocation10 + $0x8] ss:$24 sps:$4 sm:$0xff]  }
  0x71   :  { %v9029_v2 = vld [vmem:[#allocation10 + $0x2d0] ss:$24 sps:$4 sm:$0xff]   ;;  %v9036_v4 = vld [vmem:[#allocation10 + $0x2a4] ss:$24 sps:$4 sm:$0xff]   ;;  %v9043_v6 = vld [vmem:[#allocation10 + $0x2a0] ss:$24 sps:$4 sm:$0xff]  }
  0x72   :  { %6903 = vmatmul.mubr.msk.bf16.vlgmr.msra.gmra.mxu0 %vm418_vm1, %v7362_v30  ;;  %v9045_v7 = vld [vmem:[#allocation10 + $0x2dc] ss:$24 sps:$4 sm:$0xff]   ;;  %v9051_v9 = vld [vmem:[#allocation10 + $0x2d8] ss:$24 sps:$4 sm:$0xff]   ;;  %v9057_v11 = vld [vmem:[#allocation10 + $0x2ac] ss:$24 sps:$4 sm:$0xff]  }
  0x73   :  { %1473 = vmatpush1.bf16.msra.mxu0 %v8954_v41  ;;  %1504 = vmatprep.mubr.bf16.mxu0 %v12795_v29  ;;  %v9048_v8 = vld [vmem:[#allocation10 + $0x274] ss:$24 sps:$4 sm:$0xff]   ;;  %v9053_v10 = vld [vmem:[#allocation10 + $0x270] ss:$24 sps:$4 sm:$0xff]   ;;  %v9060_v12 = vld [vmem:[#allocation10 + $0x244] ss:$24 sps:$4 sm:$0xff]  }
  0x74   :  { %1436 = vmatpush1.bf16.msra.mxu1 %v8956_v42  ;;  %1474 = vmatprep.subr.bf16.mxu0 %v8959_v43  ;;  %v9063_v13 = vld [vmem:[#allocation10 + $0x2a8] ss:$24 sps:$4 sm:$0xff]   ;;  %v9069_v15 = vld [vmem:[#allocation10 + $0x27c] ss:$24 sps:$4 sm:$0xff]   ;;  %v9075_v17 = vld [vmem:[#allocation10 + $0x278] ss:$24 sps:$4 sm:$0xff]  }
  0x75   :  { %1437 = vmatprep.subr.bf16.mxu1 %v8962_v44  ;;  %v9065_v14 = vld [vmem:[#allocation10 + $0x240] ss:$24 sps:$4 sm:$0xff]   ;;  %v9072_v16 = vld [vmem:[#allocation10 + $0x214] ss:$24 sps:$4 sm:$0xff]   ;;  %v9077_v18 = vld [vmem:[#allocation10 + $0x210] ss:$24 sps:$4 sm:$0xff]  }
  0x76   :  { %v9081_v19 = vld [vmem:[#allocation10 + $0x24c] ss:$24 sps:$4 sm:$0xff]   ;;  %v9087_v21 = vld [vmem:[#allocation10 + $0x248] ss:$24 sps:$4 sm:$0xff]   ;;  %v9093_v23 = vld [vmem:[#allocation10 + $0x21c] ss:$24 sps:$4 sm:$0xff]  }
  0x77   :  { %1475 = vmatpush1.bf16.msra.mxu0 %v8966_v45  ;;  %13165 = vst [vmem:[#allocation36_spill] sm:$0xff] %v9081_v19  ;;  %v9084_v20 = vld [vmem:[#allocation10 + $0x1e4] ss:$24 sps:$4 sm:$0xff]   ;;  %13166 = vst [vmem:[#allocation37_spill] sm:$0xff] %v9087_v21  ;;  %v9089_v22 = vld [vmem:[#allocation10 + $0x1e0] ss:$24 sps:$4 sm:$0xff]  }
  0x78   :  { %1438 = vmatpush1.bf16.msra.mxu1 %v8971_v46  ;;  %1476 = vmatprep.subr.bf16.mxu0 %v8973_v47  ;;  %13167 = vst [vmem:[#allocation38_spill] sm:$0xff] %v9089_v22  ;;  %13168 = vst [vmem:[#allocation39_spill] sm:$0xff] %v9093_v23  ;;  %v9096_v24 = vld [vmem:[#allocation10 + $0x1b4] ss:$24 sps:$4 sm:$0xff]   ;;  %v9099_v25 = vld [vmem:[#allocation10 + $0x218] ss:$24 sps:$4 sm:$0xff]  }
  0x79   :  { %1439 = vmatprep.subr.bf16.mxu1 %v8976_v48  ;;  %13169 = vst [vmem:[#allocation40_spill] sm:$0xff] %v9096_v24  ;;  %13170 = vst [vmem:[#allocation41_spill] sm:$0xff] %v9099_v25  ;;  %v9101_v26 = vld [vmem:[#allocation10 + $0x1b0] ss:$24 sps:$4 sm:$0xff]   ;;  %v9105_v27 = vld [vmem:[#allocation10 + $0x1ec] ss:$24 sps:$4 sm:$0xff]  }
  0x7a   :  { %13171 = vst [vmem:[#allocation42_spill] sm:$0xff] %v9101_v26  ;;  %13172 = vst [vmem:[#allocation43_spill] sm:$0xff] %v9105_v27  ;;  %v9108_v28 = vld [vmem:[#allocation10 + $0x184] ss:$24 sps:$4 sm:$0xff]   ;;  %v9111_v30 = vld [vmem:[#allocation10 + $0x1e8] ss:$24 sps:$4 sm:$0xff]  }
  0x7b   :  { %1477 = vmatpush1.bf16.msra.mxu0 %v8979_v49  ;;  %13173 = vst [vmem:[#allocation44_spill] sm:$0xff] %v9108_v28  ;;  %13174 = vst [vmem:[#allocation45_spill] sm:$0xff] %v9111_v30  ;;  %v9113_v31 = vld [vmem:[#allocation10 + $0x180] ss:$24 sps:$4 sm:$0xff]   ;;  %v9117_v34 = vld [vmem:[#allocation10 + $0x1bc] ss:$24 sps:$4 sm:$0xff]  }
  0x7c   :  { %1440 = vmatpush1.bf16.msra.mxu1 %v8981_v50  ;;  %1478 = vmatprep.subr.bf16.mxu0 %v8985_v51  ;;  %13175 = vst [vmem:[#allocation46_spill] sm:$0xff] %v9113_v31  ;;  %13176 = vst [vmem:[#allocation47_spill] sm:$0xff] %v9117_v34  ;;  %v9120_v35 = vld [vmem:[#allocation10 + $0x164] ss:$24 sps:$4 sm:$0xff]   ;;  %v9123_v37 = vld [vmem:[#allocation10 + $0x1b8] ss:$24 sps:$4 sm:$0xff]  }
  0x7d   :  { %1441 = vmatprep.subr.bf16.mxu1 %v8988_v52  ;;  %13177 = vst [vmem:[#allocation48_spill] sm:$0xff] %v9120_v35  ;;  %13178 = vst [vmem:[#allocation49_spill] sm:$0xff] %v9123_v37  ;;  %v9127_v29 = vld [vmem:[#allocation10 + $0x160] ss:$24 sps:$4 sm:$0xff]   ;;  %vm3130_vm4 = vcmask 1041408   ;;  %vm3135_vm5 = vcmask 1042432  }
  0x7e   :  { %13179 = vst [vmem:[#allocation50_spill] sm:$0xff] %v9127_v29  ;;  %vm3140_vm6 = vcmask 1043456   ;;  %vm3145_vm7 = vcmask 1044480   ;;  %vm3154_vm8 = vcmask 1046528  }
  0x7f   :  { %1479 = vmatpush1.bf16.msra.mxu0 %v8991_v53 }
  0x80   :  { %1442 = vmatpush1.bf16.msra.mxu1 %v8995_v54  ;;  %1480 = vmatprep.subr.bf16.mxu0 %v8997_v55 }
  0x81   :  { %1443 = vmatprep.subr.bf16.mxu1 %v9000_v56 }
  0x83   :  { %1481 = vmatpush1.bf16.msra.mxu0 %v9003_v57 }
  0x84   :  { %1444 = vmatpush1.bf16.msra.mxu1 %v9005_v58  ;;  %1482 = vmatprep.subr.bf16.mxu0 %v9009_v59 }
  0x85   :  { %1445 = vmatprep.subr.bf16.mxu1 %v9012_v60 }
  0x87   :  { %1483 = vmatpush1.bf16.msra.mxu0 %v9015_v61 }
  0x88   :  { %1446 = vmatpush1.bf16.msra.mxu1 %v9019_v62  ;;  %1484 = vmatprep.subr.bf16.mxu0 %v9021_v63 }
  0x89   :  { %1447 = vmatprep.subr.bf16.mxu1 %v9024_v0 }
  0x8b   :  { %1485 = vmatpush1.bf16.msra.mxu0 %v9027_v1 }
  0x8c   :  { %1448 = vmatpush2.bf16.msra.mxu1 %v9029_v2  ;;  %1486 = vmatprep.subr.bf16.mxu0 %v9033_v3 }
  0x8d   :  { %1449 = vmatprep.subr.bf16.mxu1 %v9036_v4 }
  0x8f   :  { %1487 = vmatpush1.bf16.msra.mxu0 %v9039_v5 }
  0x90   :  { %1450 = vmatpush2.bf16.msra.mxu1 %v9043_v6  ;;  %1488 = vmatprep.subr.bf16.mxu0 %v9045_v7 }
  0x91   :  { %1451 = vmatprep.subr.bf16.mxu1 %v9048_v8 }
  0x93   :  { %1489 = vmatpush2.bf16.msra.mxu0 %v9051_v9 }
  0x94   :  { %1452 = vmatpush2.bf16.msra.mxu1 %v9053_v10  ;;  %1490 = vmatprep.subr.bf16.mxu0 %v9057_v11 }
  0x95   :  { %1453 = vmatprep.subr.bf16.mxu1 %v9060_v12 }
  0x97   :  { %1491 = vmatpush2.bf16.msra.mxu0 %v9063_v13 }
  0x98   :  { %1454 = vmatpush2.bf16.msra.mxu1 %v9065_v14  ;;  %1492 = vmatprep.subr.bf16.mxu0 %v9069_v15 }
  0x99   :  { %1455 = vmatprep.subr.bf16.mxu1 %v9072_v16 }
  0x9b   :  { %1493 = vmatpush2.bf16.msra.mxu0 %v9075_v17 }
  0x9c   :  { %1456 = vmatpush2.bf16.msra.mxu1 %v9077_v18  ;;  %1494 = vmatprep.subr.bf16.mxu0 %v9081_v19  ;;  %v9148_v19 = vld [vmem:[#allocation10 + $0x100] ss:$24 sps:$4 sm:$0xff]  }
  0x9d   :  { %1457 = vmatprep.subr.bf16.mxu1 %v9084_v20 }
  0x9f   :  { %1495 = vmatpush2.bf16.msra.mxu0 %v9087_v21  ;;  %v9136_v21 = vld [vmem:[#allocation10 + $0x188] ss:$24 sps:$4 sm:$0xff]  }
  0xa0   :  { %1458 = vmatpush2.bf16.msra.mxu1 %v9089_v22  ;;  %1496 = vmatprep.subr.bf16.mxu0 %v9093_v23  ;;  %v13182_v23 = vmov 0   ;;  %13183 = vst [vmem:[#allocation53_spill] sm:$0xff] %v9136_v21 }
  0xa1   :  { %1459 = vmatprep.subr.bf16.mxu1 %v9096_v24 }
  0xa3   :  { %1497 = vmatpush2.bf16.msra.mxu0 %v9099_v25  ;;  %v9129_v25 = vld [vmem:[#allocation10 + $0x18c] ss:$24 sps:$4 sm:$0xff]  }
  0xa4   :  { %1460 = vmatpush2.bf16.msra.mxu1 %v9101_v26  ;;  %1498 = vmatprep.subr.bf16.mxu0 %v9105_v27  ;;  %13180 = vst [vmem:[#allocation51_spill] sm:$0xff] %v9129_v25  ;;  %v9132_v27 = vld [vmem:[#allocation10 + $0x134] ss:$24 sps:$4 sm:$0xff]  }
  0xa5   :  { %1461 = vmatprep.subr.bf16.mxu1 %v9108_v28  ;;  %13181 = vst [vmem:[#allocation52_spill] sm:$0xff] %v9132_v27 }
  0xa7   :  { %1499 = vmatpush2.bf16.msra.mxu0 %v9111_v30  ;;  %v9140_v30 = vld [vmem:[#allocation10 + $0x130] ss:$24 sps:$4 sm:$0xff]  }
  0xa8   :  { %1462 = vmatpush2.bf16.msra.mxu1 %v9113_v31  ;;  %1500 = vmatprep.subr.bf16.mxu0 %v9117_v34  ;;  %13184 = vst [vmem:[#allocation54_spill] sm:$0xff] %v9140_v30  ;;  %v9143_v34 = vld [vmem:[#allocation10 + $0x104] ss:$24 sps:$4 sm:$0xff]  }
  0xa9   :  { %1513 = vmatprep.subr.bf16.mxu1 %v9120_v35  ;;  %13185 = vst [vmem:[#allocation55_spill] sm:$0xff] %v9143_v34 }
  0xab   :  { %1464 = vmatmul.mubr.bf16.vlgmr.msra.gmra.mxu1 %v13182_v23  ;;  %1501 = vmatpush2.bf16.msra.mxu0 %v9123_v37 }
  0xac   :  { %1514 = vmatpush1.bf16.msra.mxu1 %v9127_v29  ;;  %1502 = vmatprep.subr.bf16.mxu0 %v9129_v25  ;;  %v9152_v29 = vld [vmem:[#allocation10 + $0xd4] ss:$24 sps:$4 sm:$0xff]  }
  0xad   :  { %1515 = vmatprep.subr.bf16.mxu1 %v9132_v27  ;;  %1545 = vmatprep.mubr.bf16.mxu1 %v13182_v23  ;;  %v9157_v27 = vld [vmem:[#allocation10 + $0xd0] ss:$24 sps:$4 sm:$0xff]  }
  0xaf   :  { %1503 = vmatpush2.bf16.msra.mxu0 %v9136_v21 }
  0xb0   :  { %1516 = vmatpush1.bf16.msra.mxu1 %v9140_v30  ;;  %1598 = vmatprep.subr.bf16.mxu0 %v8932_v32  ;;  %v9161_v30 = vld [vmem:[#allocation10 + $0xa4] ss:$24 sps:$4 sm:$0xff]  }
  0xb1   :  { %1517 = vmatprep.subr.bf16.mxu1 %v9143_v34  ;;  %v9165_v34 = vld [vmem:[#allocation10 + $0xa0] ss:$24 sps:$4 sm:$0xff]  }
  0xb2   :  { %1505 = vmatmul.mubr.bf16.vlgmr.msra.gmra.mxu0 %v13182_v23 }
  0xb3   :  { %1599 = vmatpush1.bf16.msra.mxu0 %v8934_v33  ;;  %v9169_v33 = vld [vmem:[#allocation10 + $0x74] ss:$24 sps:$4 sm:$0xff]  }
  0xb4   :  { %1518 = vmatpush1.bf16.msra.mxu1 %v9148_v19  ;;  %1600 = vmatprep.subr.bf16.mxu0 %v8939_v36  ;;  %v9173_v36 = vld [vmem:[#allocation10 + $0x70] ss:$24 sps:$4 sm:$0xff]  }
  0xb5   :  { %1519 = vmatprep.subr.bf16.mxu1 %v9152_v29 }
  0xb7   :  { %1601 = vmatpush1.bf16.msra.mxu0 %v8947_v39  ;;  %v9177_v39 = vld [vmem:[#allocation10 + $0x44] ss:$24 sps:$4 sm:$0xff]  }
  0xb8   :  { %1520 = vmatpush1.bf16.msra.mxu1 %v9157_v27  ;;  %1602 = vmatprep.subr.bf16.mxu0 %v8951_v40  ;;  %v9181_v40 = vld [vmem:[#allocation10 + $0x40] ss:$24 sps:$4 sm:$0xff]  }
  0xb9   :  { %1521 = vmatprep.subr.bf16.mxu1 %v9161_v30 }
  0xbb   :  { %1603 = vmatpush1.bf16.msra.mxu0 %v8956_v42  ;;  %v9185_v42 = vld [vmem:[#allocation10 + $0x14] ss:$24 sps:$4 sm:$0xff]  }
  0xbc   :  { %1522 = vmatpush1.bf16.msra.mxu1 %v9165_v34  ;;  %1604 = vmatprep.subr.bf16.mxu0 %v8962_v44  ;;  %v9189_v44 = vld [vmem:[#allocation10 + $0x10] ss:$24 sps:$4 sm:$0xff]  }
  0xbd   :  { %1523 = vmatprep.subr.bf16.mxu1 %v9169_v33 }
  0xbf   :  { %1605 = vmatpush1.bf16.msra.mxu0 %v8971_v46  ;;  %v9193_v46 = vld [vmem:[#allocation10 + $0x2e4] ss:$24 sps:$4 sm:$0xff]  }
  0xc0   :  { %1524 = vmatpush1.bf16.msra.mxu1 %v9173_v36  ;;  %1606 = vmatprep.subr.bf16.mxu0 %v8976_v48  ;;  %v9197_v48 = vld [vmem:[#allocation10 + $0x2e0] ss:$24 sps:$4 sm:$0xff]  }
  0xc1   :  { %1525 = vmatprep.subr.bf16.mxu1 %v9177_v39 }
  0xc3   :  { %1607 = vmatpush1.bf16.msra.mxu0 %v8981_v50  ;;  %v9201_v50 = vld [vmem:[#allocation10 + $0x2b4] ss:$24 sps:$4 sm:$0xff]  }
  0xc4   :  { %1526 = vmatpush1.bf16.msra.mxu1 %v9181_v40  ;;  %1608 = vmatprep.subr.bf16.mxu0 %v8988_v52  ;;  %v9205_v52 = vld [vmem:[#allocation10 + $0x2b0] ss:$24 sps:$4 sm:$0xff]  }
  0xc5   :  { %1527 = vmatprep.subr.bf16.mxu1 %v9185_v42 }
  0xc7   :  { %1609 = vmatpush1.bf16.msra.mxu0 %v8995_v54  ;;  %v9209_v54 = vld [vmem:[#allocation10 + $0x284] ss:$24 sps:$4 sm:$0xff]  }
  0xc8   :  { %1528 = vmatpush1.bf16.msra.mxu1 %v9189_v44  ;;  %1610 = vmatprep.subr.bf16.mxu0 %v9000_v56  ;;  %v9213_v56 = vld [vmem:[#allocation10 + $0x280] ss:$24 sps:$4 sm:$0xff]  }
  0xc9   :  { %1529 = vmatprep.subr.bf16.mxu1 %v9193_v46 }
  0xcb   :  { %1611 = vmatpush1.bf16.msra.mxu0 %v9005_v58  ;;  %v9217_v58 = vld [vmem:[#allocation10 + $0x254] ss:$24 sps:$4 sm:$0xff]  }
  0xcc   :  { %1530 = vmatpush2.bf16.msra.mxu1 %v9197_v48  ;;  %1612 = vmatprep.subr.bf16.mxu0 %v9012_v60  ;;  %v9221_v60 = vld [vmem:[#allocation10 + $0x250] ss:$24 sps:$4 sm:$0xff]  }
  0xcd   :  { %1531 = vmatprep.subr.bf16.mxu1 %v9201_v50 }
  0xcf   :  { %1613 = vmatpush1.bf16.msra.mxu0 %v9019_v62  ;;  %v9225_v62 = vld [vmem:[#allocation10 + $0x224] ss:$24 sps:$4 sm:$0xff]  }
  0xd0   :  { %1532 = vmatpush2.bf16.msra.mxu1 %v9205_v52  ;;  %1614 = vmatprep.subr.bf16.mxu0 %v9024_v0  ;;  %v9229_v0 = vld [vmem:[#allocation10 + $0x220] ss:$24 sps:$4 sm:$0xff]  }
  0xd1   :  { %1533 = vmatprep.subr.bf16.mxu1 %v9209_v54  ;;  %13186 = vst [vmem:[#allocation56_spill] sm:$0xff] %v9229_v0 }
  0xd3   :  { %1615 = vmatpush2.bf16.msra.mxu0 %v9029_v2  ;;  %v9233_v2 = vld [vmem:[#allocation10 + $0x1f4] ss:$24 sps:$4 sm:$0xff]  }
  0xd4   :  { %1534 = vmatpush2.bf16.msra.mxu1 %v9213_v56  ;;  %1616 = vmatprep.subr.bf16.mxu0 %v9036_v4  ;;  %v9237_v4 = vld [vmem:[#allocation10 + $0x1f0] ss:$24 sps:$4 sm:$0xff]  }
  0xd5   :  { %1535 = vmatprep.subr.bf16.mxu1 %v9217_v58 }
  0xd7   :  { %1617 = vmatpush2.bf16.msra.mxu0 %v9043_v6  ;;  %v9241_v6 = vld [vmem:[#allocation10 + $0x1c4] ss:$24 sps:$4 sm:$0xff]  }
  0xd8   :  { %1536 = vmatpush2.bf16.msra.mxu1 %v9221_v60  ;;  %1618 = vmatprep.subr.bf16.mxu0 %v9048_v8  ;;  %v9245_v8 = vld [vmem:[#allocation10 + $0x1c0] ss:$24 sps:$4 sm:$0xff]  }
  0xd9   :  { %1537 = vmatprep.subr.bf16.mxu1 %v9225_v62  ;;  %13187 = vst [vmem:[#allocation57_spill] sm:$0xff] %v9245_v8 }
  0xdb   :  { %1619 = vmatpush2.bf16.msra.mxu0 %v9053_v10  ;;  %v9249_v10 = vld [vmem:[#allocation10 + $0x194] ss:$24 sps:$4 sm:$0xff]  }
  0xdc   :  { %1538 = vmatpush2.bf16.msra.mxu1 %v9229_v0  ;;  %1620 = vmatprep.subr.bf16.mxu0 %v9060_v12  ;;  %13188 = vst [vmem:[#allocation58_spill] sm:$0xff] %v9249_v10  ;;  %v9253_v0 = vld [vmem:[#allocation10 + $0x190] ss:$24 sps:$4 sm:$0xff]  }
  0xdd   :  { %1539 = vmatprep.subr.bf16.mxu1 %v9233_v2  ;;  %13189 = vst [vmem:[#allocation59_spill] sm:$0xff] %v9253_v0 }
  0xdf   :  { %1621 = vmatpush2.bf16.msra.mxu0 %v9065_v14 }
  0xe0   :  { %1540 = vmatpush2.bf16.msra.mxu1 %v9237_v4  ;;  %1622 = vmatprep.subr.bf16.mxu0 %v9072_v16 }
  0xe1   :  { %1541 = vmatprep.subr.bf16.mxu1 %v9241_v6 }
  0xe3   :  { %1623 = vmatpush2.bf16.msra.mxu0 %v9077_v18 }
  0xe4   :  { %1542 = vmatpush2.bf16.msra.mxu1 %v9245_v8  ;;  %1624 = vmatprep.subr.bf16.mxu0 %v9084_v20 }
  0xe5   :  { %1543 = vmatprep.subr.bf16.mxu1 %v9249_v10 }
  0xe7   :  { %1625 = vmatpush2.bf16.msra.mxu0 %v9089_v22 }
  0xe8   :  { %1544 = vmatpush2.bf16.msra.mxu1 %v9253_v0  ;;  %1626 = vmatprep.subr.bf16.mxu0 %v9096_v24 }
  0xe9   :  { %1639 = vmatprep.subr.bf16.mxu1 %v8944_v38  ;;  %v13190_v38 = vld [vmem:[#allocation36_spill] sm:$0xff] }
  0xeb   :  { %1546 = vmatmul.mubr.bf16.vlgmr.msra.gmra.mxu1 %v13182_v23  ;;  %1627 = vmatpush2.bf16.msra.mxu0 %v9101_v26 }
  0xec   :  { %1640 = vmatpush1.bf16.msra.mxu1 %v8954_v41  ;;  %1628 = vmatprep.subr.bf16.mxu0 %v9108_v28  ;;  %v13191_v41 = vld [vmem:[#allocation37_spill] sm:$0xff] }
  0xed   :  { %1641 = vmatprep.subr.bf16.mxu1 %v8959_v43  ;;  %v13192_v43 = vld [vmem:[#allocation39_spill] sm:$0xff] }
  0xef   :  { %1629 = vmatpush2.bf16.msra.mxu0 %v9113_v31 }
  0xf0   :  { %1642 = vmatpush1.bf16.msra.mxu1 %v8966_v45  ;;  %1680 = vmatprep.subr.bf16.mxu0 %v9120_v35  ;;  %v359_v45 = vlaneseq }
  0xf1   :  { %1643 = vmatprep.subr.bf16.mxu1 %v8973_v47  ;;  %v13193_v47 = vld [vmem:[#allocation41_spill] sm:$0xff] }
  0xf4   :  { %1644 = vmatpush1.bf16.msra.mxu1 %v8979_v49  ;;  %v13194_v49 = vld [vmem:[#allocation43_spill] sm:$0xff] }
  0xf5   :  { %1645 = vmatprep.subr.bf16.mxu1 %v8985_v51  ;;  %v9292_v51 = vshrl.u32 %v359_v45, 7 }
  0xf7   :  { %13195 = vst [vmem:[#allocation36_spill] sm:$0xff] %v9292_v51 }
  0xf8   :  { %1646 = vmatpush1.bf16.msra.mxu1 %v8991_v53  ;;  %v13196_v53 = vld [vmem:[#allocation45_spill] sm:$0xff] }
  0xf9   :  { %1647 = vmatprep.subr.bf16.mxu1 %v8997_v55  ;;  %v13197_v55 = vld [vmem:[#allocation47_spill] sm:$0xff] }
  0xfc   :  { %1648 = vmatpush1.bf16.msra.mxu1 %v9003_v57  ;;  %v9297_v57 = vsub.s32 0, %v9292_v51 }
  0xfd   :  { %1649 = vmatprep.subr.bf16.mxu1 %v9009_v59  ;;  %v9300_v59 = vsub.s32 2, %v9292_v51 }
  0xfe   :  { %13198 = vst [vmem:[#allocation37_spill] sm:$0xff] %v9297_v57 }
  0xff   :  { %13199 = vst [vmem:[#allocation39_spill] sm:$0xff] %v9300_v59 }
 0x100   :  { %1650 = vmatpush1.bf16.msra.mxu1 %v9015_v61  ;;  %v357_v61 = vld [vmem:[%s12780_s2] sm:$0x3f] }
 0x101   :  { %1651 = vmatprep.subr.bf16.mxu1 %v9021_v63  ;;  %v9308_v63 = vsub.s32 1, %v9292_v51 }
 0x103   :  { %13200 = vst [vmem:[#allocation60_spill] sm:$0xff] %v9308_v63 }
 0x104   :  { %1652 = vmatpush1.bf16.msra.mxu1 %v9027_v1  ;;  %v362_v1 = vrot.slane %v357_v61, %v9297_v57 }
 0x105   :  { %1653 = vmatprep.subr.bf16.mxu1 %v9033_v3  ;;  %v370_v3 = vrot.slane %v357_v61, %v9300_v59 }
 0x108   :  { %1654 = vmatpush1.bf16.msra.mxu1 %v9039_v5  ;;  %v9313_v5 = vsub.s32 3, %v9292_v51 }
 0x109   :  { %1655 = vmatprep.subr.bf16.mxu1 %v9045_v7 }
 0x10a   :  { %13201 = vst [vmem:[#allocation61_spill] sm:$0xff] %v9313_v5 }
 0x10c   :  { %1656 = vmatpush2.bf16.msra.mxu1 %v9051_v9 }
 0x10d   :  { %1657 = vmatprep.subr.bf16.mxu1 %v9057_v11 }
 0x110   :  { %1658 = vmatpush2.bf16.msra.mxu1 %v9063_v13  ;;  %v366_v13 = vrot.slane %v357_v61, %v9308_v63 }
 0x111   :  { %1659 = vmatprep.subr.bf16.mxu1 %v9069_v15  ;;  %v9321_v15 = vsub.s32 4, %v9292_v51 }
 0x113   :  { %13202 = vst [vmem:[#allocation62_spill] sm:$0xff] %v9321_v15 }
 0x114   :  { %1660 = vmatpush2.bf16.msra.mxu1 %v9075_v17 }
 0x115   :  { %1661 = vmatprep.subr.bf16.mxu1 %v13190_v38  ;;  %v374_v38 = vrot.slane %v357_v61, %v9313_v5 }
 0x118   :  { %1662 = vmatpush2.bf16.msra.mxu1 %v13191_v41 }
 0x119   :  { %1663 = vmatprep.subr.bf16.mxu1 %v13192_v43 }
 0x11c   :  { %1664 = vmatpush2.bf16.msra.mxu1 %v13193_v47 }
 0x11d   :  { %1665 = vmatprep.subr.bf16.mxu1 %v13194_v49 }
 0x120   :  { %1666 = vmatpush2.bf16.msra.mxu1 %v13196_v53 }
 0x121   :  { %1667 = vmatprep.subr.bf16.mxu1 %v13197_v55 }
 0x124   :  { %1668 = vmatpush2.bf16.msra.mxu1 %v9123_v37 }
 0x125   :  { %1669 = vmatprep.subr.bf16.mxu1 %v9129_v25 }
 0x128   :  { %1670 = vmatpush2.bf16.msra.mxu1 %v9136_v21 }
 0x129   :  { %1765 = vmatprep.subr.bf16.mxu1 %v8932_v32  ;;  %v9328_v32 = vsub.s32 5, %v9292_v51 }
 0x12a   :  { %v475_v7 = vpop.f32.mrf.mxu0  ;;  %v518_v9 = vpop.f32.mrf.mxu1 }
 0x12b   :  { %v9317_v11 = vadd.f32 %v475_v7, %v362_v1  ;;  %v9323_v17 = vadd.f32 %v518_v9, %v370_v3  ;;  %13203 = vst [vmem:[#allocation63_spill] sm:$0xff] %v9328_v32  ;;  %v378_v9 = vrot.slane %v357_v61, %v9321_v15 }
 0x12c   :  { %v477_v41 = vpop.f32.mrf.mxu0  ;;  %v520_v43 = vpop.f32.mrf.mxu1 }
 0x12d   :  { %v643_v45 = vrot.slane %v9317_v11, 1  ;;  %v647_v7 = vrot.slane %v9323_v17, 1  ;;  %v9331_v25 = vadd.f32 %v477_v41, %v366_v13  ;;  %v9336_v55 = vadd.f32 %v520_v43, %v374_v38 }
 0x12e   :  { %v479_v23 = vpop.f32.mrf.mxu0  ;;  %v522_v21 = vpop.f32.mrf.mxu1  ;;  %v691_v47 = vrot.slane %v9317_v11, 2 }
 0x12f   :  { %v9333_v37 = vadd.f32 %v479_v23, %v362_v1  ;;  %v9338_v53 = vadd.f32 %v522_v21, %v370_v3  ;;  %v664_v23 = vrot.slane %v9331_v25, 6  ;;  %v382_v21 = vrot.slane %v357_v61, %v9328_v32 }
 0x130   :  { %v481_v49 = vpop.f32.mrf.mxu0  ;;  %v524_v35 = vpop.f32.mrf.mxu1  ;;  %v670_v28 = vrot.slane %v9336_v55, 6  ;;  %v718_v61 = vrot.slane %v9331_v25, 5 }
 0x131   :  { %v9341_v51 = vadd.f32 %v481_v49, %v366_v13  ;;  %v9345_v31 = vsel %vm595_vm2, %v9333_v37, %v643_v45  ;;  %v692_v1 = vrot.slane %v9333_v37, 1  ;;  %v9349_v41 = vadd.f32 %v524_v35, %v374_v38 }
 0x132   :  { %13204 = vst [vmem:[#allocation64_spill] sm:$0xff] %v9345_v31  ;;  %v561_v43 = vpop.f32.mrf.mxu0  ;;  %v9354_v3 = vsel %vm595_vm2, %v9338_v53, %v647_v7  ;;  %v698_v49 = vrot.slane %v9338_v53, 1  ;;  %v697_v31 = vrot.slane %v9323_v17, 2 }
 0x133   :  { %13205 = vst [vmem:[#allocation65_spill] sm:$0xff] %v9354_v3  ;;  %v9357_v13 = vadd.f32 %v561_v43, %v378_v9  ;;  %v665_v45 = vrot.slane %v9341_v51, 5  ;;  %v671_v35 = vrot.slane %v9349_v41, 5  ;;  %v9364_v38 = vsel %vm595_vm2, %v692_v1, %v691_v47 }
 0x134   :  { %v563_v0 = vpop.f32.mrf.mxu0  ;;  %13206 = vst [vmem:[#allocation66_spill] sm:$0xff] %v9364_v38  ;;  %v745_v3 = vrot.slane %v9317_v11, 3  ;;  %v9378_v24 = vsel %vm595_vm2, %v698_v49, %v697_v31  ;;  %v719_v47 = vrot.slane %v9341_v51, 4  ;;  %v751_v38 = vrot.slane %v9323_v17, 3 }
 0x135   :  { %v9368_v7 = vsel %vm595_vm2, %v665_v45, %v664_v23  ;;  %v651_v43 = vrot.slane %v9357_v13, 1  ;;  %v9372_v26 = vadd.f32 %v563_v0, %v382_v21  ;;  %v9375_v8 = vsel %vm595_vm2, %v671_v35, %v670_v28  ;;  %13208 = vst [vmem:[#allocation68_spill] sm:$0xff] %v9378_v24 }
 0x136   :  { %13207 = vst [vmem:[#allocation67_spill] sm:$0xff] %v9368_v7  ;;  %v565_v10 = vpop.f32.mrf.mxu0  ;;  %v724_v23 = vrot.slane %v9336_v55, 5  ;;  %v725_v45 = vrot.slane %v9349_v41, 4  ;;  %v9388_v22 = vsel %vm595_vm2, %v719_v47, %v718_v61  ;;  %v703_v28 = vrot.slane %v9357_v13, 2 }
 0x137   :  { %v9381_v1 = vadd.f32 %v565_v10, %v378_v9  ;;  %v676_v0 = vrot.slane %v9372_v26, 6  ;;  %13209 = vst [vmem:[#allocation69_spill] sm:$0xff] %v9388_v22  ;;  %v746_v31 = vrot.slane %v9333_v37, 2  ;;  %v730_v35 = vrot.slane %v9372_v26, 5 }
 0x138   :  { %v567_v7 = vpop.f32.mrf.mxu0  ;;  %v9399_v9 = vsel %vm595_vm2, %v725_v45, %v724_v23  ;;  %v752_v47 = vrot.slane %v9338_v53, 2  ;;  %v772_v22 = vrot.slane %v9331_v25, 4  ;;  %v773_v45 = vrot.slane %v9341_v51, 3 }
 0x139   :  { %v9392_v49 = vadd.f32 %v567_v7, %v382_v21  ;;  %v9396_v10 = vsel %vm595_vm2, %v9381_v1, %v651_v43  ;;  %13211 = vst [vmem:[#allocation71_spill] sm:$0xff] %v9399_v9  ;;  %v704_v24 = vrot.slane %v9381_v1, 1  ;;  %v9404_v61 = vsel %vm595_vm2, %v746_v31, %v745_v3 }
 0x13a   :  { %13210 = vst [vmem:[#allocation70_spill] sm:$0xff] %v9396_v10  ;;  %13212 = vst [vmem:[#allocation72_spill] sm:$0xff] %v9404_v61  ;;  %v9414_v23 = vsel %vm595_vm2, %v752_v47, %v751_v38  ;;  %v778_v31 = vrot.slane %v9336_v55, 4  ;;  %v779_v61 = vrot.slane %v9349_v41, 3  ;;  %v9426_v10 = vsel %vm595_vm2, %v773_v45, %v772_v22 }
 0x13b   :  { %v677_v21 = vrot.slane %v9392_v49, 5  ;;  %v731_v7 = vrot.slane %v9392_v49, 4  ;;  %v9411_v43 = vsel %vm595_vm2, %v704_v24, %v703_v28  ;;  %13214 = vst [vmem:[#allocation74_spill] sm:$0xff] %v9414_v23  ;;  %13216 = vst [vmem:[#allocation76_spill] sm:$0xff] %v9426_v10  ;;  %v757_v24 = vrot.slane %v9357_v13, 3 }
 0x13c   :  { %13213 = vst [vmem:[#allocation73_spill] sm:$0xff] %v9411_v43  ;;  %v758_v38 = vrot.slane %v9381_v1, 2  ;;  %v784_v28 = vrot.slane %v9372_v26, 4  ;;  %v9432_v47 = vsel %vm595_vm2, %v779_v61, %v778_v31  ;;  %v775_v22 = vrot.slane %v9323_v17, 4 }
 0x13d   :  { %v9418_v9 = vsel %vm595_vm2, %v677_v21, %v676_v0  ;;  %v9421_v3 = vsel %vm595_vm2, %v731_v7, %v730_v35  ;;  %13217 = vst [vmem:[#allocation77_spill] sm:$0xff] %v9432_v47  ;;  %v785_v0 = vrot.slane %v9392_v49, 3  ;;  %v769_v35 = vrot.slane %v9317_v11, 4 }
 0x13e   :  { %13215 = vst [vmem:[#allocation75_spill] sm:$0xff] %v9421_v3  ;;  %v770_v21 = vrot.slane %v9333_v37, 3  ;;  %v9438_v7 = vsel %vm595_vm2, %v758_v38, %v757_v24  ;;  %v776_v45 = vrot.slane %v9338_v53, 3  ;;  %v748_v23 = vrot.slane %v9331_v25, 3 }
 0x13f   :  { %13218 = vst [vmem:[#allocation78_spill] sm:$0xff] %v9438_v7  ;;  %v9444_v10 = vsel %vm595_vm2, %v785_v0, %v784_v28  ;;  %v749_v31 = vrot.slane %v9341_v51, 2  ;;  %v754_v47 = vrot.slane %v9336_v55, 3  ;;  %v755_v24 = vrot.slane %v9349_v41, 2 }
 0x140   :  { %13219 = vst [vmem:[#allocation79_spill] sm:$0xff] %v9444_v10  ;;  %v9447_v61 = vsel %vm595_vm2, %v770_v21, %v769_v35  ;;  %v9452_v3 = vsel %vm595_vm2, %v776_v45, %v775_v22  ;;  %v781_v38 = vrot.slane %v9357_v13, 4  ;;  %v782_v7 = vrot.slane %v9381_v1, 3 }
 0x141   :  { %13220 = vst [vmem:[#allocation80_spill] sm:$0xff] %v9447_v61  ;;  %13221 = vst [vmem:[#allocation81_spill] sm:$0xff] %v9452_v3  ;;  %v9458_v43 = vsel %vm595_vm2, %v749_v31, %v748_v23  ;;  %v760_v28 = vrot.slane %v9372_v26, 3  ;;  %v761_v0 = vrot.slane %v9392_v49, 2  ;;  %v715_v35 = vrot.slane %v9317_v11, 5 }
 0x142   :  { %13222 = vst [vmem:[#allocation82_spill] sm:$0xff] %v9458_v43  ;;  %v9464_v21 = vsel %vm595_vm2, %v755_v24, %v754_v47  ;;  %v9467_v22 = vsel %vm595_vm2, %v782_v7, %v781_v38  ;;  %v716_v45 = vrot.slane %v9333_v37, 4  ;;  %v721_v3 = vrot.slane %v9323_v17, 5 }
 0x143   :  { %13223 = vst [vmem:[#allocation83_spill] sm:$0xff] %v9464_v21  ;;  %13224 = vst [vmem:[#allocation84_spill] sm:$0xff] %v9467_v22  ;;  %v9472_v61 = vsel %vm595_vm2, %v761_v0, %v760_v28  ;;  %v722_v23 = vrot.slane %v9338_v53, 4  ;;  %v694_v31 = vrot.slane %v9331_v25, 2  ;;  %v695_v43 = vrot.slane %v9341_v51, 1 }
 0x144   :  { %13225 = vst [vmem:[#allocation85_spill] sm:$0xff] %v9472_v61  ;;  %v9478_v10 = vsel %vm595_vm2, %v716_v45, %v715_v35  ;;  %v700_v47 = vrot.slane %v9336_v55, 2  ;;  %v701_v7 = vrot.slane %v9349_v41, 1  ;;  %v727_v24 = vrot.slane %v9357_v13, 5 }
 0x145   :  { %13226 = vst [vmem:[#allocation86_spill] sm:$0xff] %v9478_v10  ;;  %v9484_v38 = vsel %vm595_vm2, %v722_v23, %v721_v3  ;;  %v9487_v28 = vsel %vm595_vm2, %v695_v43, %v694_v31  ;;  %v728_v0 = vrot.slane %v9381_v1, 4  ;;  %v706_v61 = vrot.slane %v9372_v26, 2 }
 0x146   :  { %13227 = vst [vmem:[#allocation87_spill] sm:$0xff] %v9484_v38  ;;  %13228 = vst [vmem:[#allocation88_spill] sm:$0xff] %v9487_v28  ;;  %v9492_v22 = vsel %vm595_vm2, %v701_v7, %v700_v47  ;;  %v707_v35 = vrot.slane %v9392_v49, 1  ;;  %v661_v45 = vrot.slane %v9317_v11, 6  ;;  %v662_v10 = vrot.slane %v9333_v37, 5 }
 0x147   :  { %13229 = vst [vmem:[#allocation89_spill] sm:$0xff] %v9492_v22  ;;  %v9498_v21 = vsel %vm595_vm2, %v728_v0, %v727_v24  ;;  %v667_v3 = vrot.slane %v9323_v17, 6  ;;  %v668_v43 = vrot.slane %v9338_v53, 5  ;;  %v645_v23 = vrot.slane %v9331_v25, 1 }
 0x148   :  { %13230 = vst [vmem:[#allocation90_spill] sm:$0xff] %v9498_v21  ;;  %v9504_v31 = vsel %vm595_vm2, %v707_v35, %v706_v61  ;;  %v9507_v47 = vsel %vm595_vm2, %v662_v10, %v661_v45  ;;  %v649_v7 = vrot.slane %v9336_v55, 1  ;;  %v673_v22 = vrot.slane %v9357_v13, 6 }
 0x149   :  { %13231 = vst [vmem:[#allocation91_spill] sm:$0xff] %v9504_v31  ;;  %13232 = vst [vmem:[#allocation92_spill] sm:$0xff] %v9507_v47  ;;  %v9512_v38 = vsel %vm595_vm2, %v668_v43, %v667_v3  ;;  %v9516_v24 = vsel %vm595_vm2, %v9341_v51, %v645_v23  ;;  %v674_v0 = vrot.slane %v9381_v1, 5  ;;  %v653_v21 = vrot.slane %v9372_v26, 1 }
 0x14a   :  { %13233 = vst [vmem:[#allocation93_spill] sm:$0xff] %v9512_v38  ;;  %13234 = vst [vmem:[#allocation94_spill] sm:$0xff] %v9516_v24  ;;  %v9522_v61 = vsel %vm595_vm2, %v9349_v41, %v649_v7  ;;  %v613_v10 = vrot.slane %v9317_v11, 7  ;;  %v614_v35 = vrot.slane %v9333_v37, 6  ;;  %v619_v45 = vrot.slane %v9323_v17, 7 }
 0x14b   :  { %13235 = vst [vmem:[#allocation95_spill] sm:$0xff] %v9522_v61  ;;  %v9528_v3 = vsel %vm595_vm2, %v674_v0, %v673_v22  ;;  %v9532_v43 = vsel %vm595_vm2, %v9392_v49, %v653_v21  ;;  %v620_v23 = vrot.slane %v9338_v53, 6  ;;  %v597_v38 = vrot.slane %v9341_v51, 7 }
 0x14c   :  { %13236 = vst [vmem:[#allocation96_spill] sm:$0xff] %v9528_v3  ;;  %13237 = vst [vmem:[#allocation97_spill] sm:$0xff] %v9532_v43  ;;  %v9537_v7 = vsel %vm595_vm2, %v614_v35, %v613_v10  ;;  %v601_v61 = vrot.slane %v9349_v41, 7  ;;  %v625_v24 = vrot.slane %v9357_v13, 7  ;;  %v626_v47 = vrot.slane %v9381_v1, 6 }
 0x14d   :  { %13238 = vst [vmem:[#allocation98_spill] sm:$0xff] %v9537_v7  ;;  %v9543_v22 = vsel %vm595_vm2, %v620_v23, %v619_v45  ;;  %v9547_v21 = vsel %vm595_vm2, %v597_v38, %v9331_v25  ;;  %v605_v0 = vrot.slane %v9392_v49, 7 }
 0x14e   :  { %13239 = vst [vmem:[#allocation99_spill] sm:$0xff] %v9543_v22  ;;  %13240 = vst [vmem:[#allocation100_spill] sm:$0xff] %v9547_v21  ;;  %v9552_v43 = vsel %vm595_vm2, %v601_v61, %v9336_v55  ;;  %v9555_v10 = vsel %vm595_vm2, %v626_v47, %v625_v24  ;;  %v919_v61 = vld [vmem:[%s12782_s4] sm:$0x3f]  ;;  %v594_v24 = vrot.slane %v9333_v37, 7 }
 0x14f   :  { %13241 = vst [vmem:[#allocation101_spill] sm:$0xff] %v9552_v43  ;;  %13242 = vst [vmem:[#allocation102_spill] sm:$0xff] %v9555_v10  ;;  %v9559_v35 = vsel %vm595_vm2, %v605_v0, %v9372_v26  ;;  %v9565_v43 = vrot.slane %v919_v61, %v9297_v57  ;;  %v9568_v47 = vrot.slane %v919_v61, %v9308_v63 }
 0x150   :  { %13243 = vst [vmem:[#allocation103_spill] sm:$0xff] %v9559_v35  ;;  %v9579_v63 = vrot.slane %v919_v61, %v9300_v59  ;;  %v9806_v59 = vld [vmem:[#allocation10 + $0x154] ss:$24 sps:$4 sm:$0xff]  }
 0x151   :  { %13244 = vst [vmem:[#allocation104_spill] sm:$0xff] %v9565_v43 }
 0x16b   :  { %v1465_v7 = vpop.f32.mrf.mxu1 }
 0x16c   :  { %v1466_v0 = vadd.f32 %v1465_v7, %v9565_v43  ;;  %v9582_v7 = vrot.slane %v919_v61, %v9313_v5  ;;  %v13296_v5 = vld [vmem:[#allocation53_spill] sm:$0xff] }
 0x16d   :  { %v1467_v45 = vpop.f32.mrf.mxu1 }
 0x16f   :  { %v1469_v23 = vpop.f32.mrf.mxu1 }
 0x170   :  { %v617_v23 = vrot.slane %v9341_v51, 6 }
 0x171   :  { %v1470_v22 = vpop.f32.mrf.mxu1 }
 0x172   :  { %v1506_v3 = vpop.f32.mrf.mxu0  ;;  %v616_v22 = vrot.slane %v9331_v25, 7  ;;  %v599_v25 = vrot.slane %v9338_v53, 7 }
 0x173   :  { %v1507_v51 = vadd.f32 %v1506_v3, %v9579_v63 }
 0x174   :  { %v1508_v38 = vpop.f32.mrf.mxu0  ;;  %v618_v57 = vsel %vm595_vm2, %v617_v23, %v616_v22 }
 0x176   :  { %v1510_v21 = vpop.f32.mrf.mxu0 }
 0x177   :  { %v596_v21 = vsel %vm595_vm2, %v594_v24, %v9317_v11  ;;  %v623_v11 = vrot.slane %v9349_v41, 6 }
 0x178   :  { %v1511_v31 = vpop.f32.mrf.mxu0  ;;  %v1554_v35 = vadd.f32 %v1466_v0, %v596_v21 }
 0x179   :  { %v1468_v31 = vadd.f32 %v1467_v45, %v9568_v47  ;;  %v1509_v45 = vadd.f32 %v1508_v38, %v9582_v7  ;;  %v9593_v38 = vrot.slane %v919_v61, %v9321_v15  ;;  %v13295_v15 = vld [vmem:[#allocation51_spill] sm:$0xff] }
 0x17a   :  { %v7000_v28 = vmul.f32 -1.442695, %v1554_v35  ;;  %v622_v35 = vrot.slane %v9336_v55, 7  ;;  %v9596_v55 = vrot.slane %v919_v61, %v9328_v32  ;;  %v13294_v32 = vld [vmem:[#allocation49_spill] sm:$0xff] }
 0x17b   :  { %v1555_v10 = vadd.f32 %v1468_v31, %v618_v57  ;;  %v600_v57 = vsel %vm595_vm2, %v599_v25, %v9323_v17 }
 0x17c   :  { %7510 = vpow2.f32 %v7000_v28  ;;  %v1556_v24 = vadd.f32 %v1507_v51, %v600_v57  ;;  %v628_v57 = vrot.slane %v9372_v26, 7 }
 0x17d   :  { %v7001_v37 = vmul.f32 -1.442695, %v1555_v10  ;;  %v624_v10 = vsel %vm595_vm2, %v623_v11, %v622_v35  ;;  %v629_v35 = vrot.slane %v9392_v49, 6 }
 0x17e   :  { %v1557_v0 = vadd.f32 %v1509_v45, %v624_v10  ;;  %v7002_v22 = vmul.f32 -1.442695, %v1556_v24 }
 0x17f   :  { %7512 = vpow2.f32 %v7001_v37  ;;  %v603_v37 = vrot.slane %v9381_v1, 7 }
 0x180   :  { %v7003_v28 = vmul.f32 -1.442695, %v1557_v0  ;;  %7514 = vpow2.f32 %v7002_v22 }
 0x181   :  { %v604_v61 = vsel %vm595_vm2, %v603_v37, %v9357_v13 }
 0x182   :  { %7516 = vpow2.f32 %v7003_v28 }
 0x189   :  { %v7511_v23 = vpop.eup %7510 }
 0x18a   :  { %v1570_v31 = vadd.f32 1.0, %v7511_v23 }
 0x18c   :  { %v7513_v53 = vpop.eup %7512  ;;  %7518 = vrcp.f32 %v1570_v31 }
 0x18d   :  { %v1571_v3 = vadd.f32 1.0, %v7513_v53  ;;  %v7515_v41 = vpop.eup %7514  ;;  %v630_v53 = vsel %vm595_vm2, %v629_v35, %v628_v57 }
 0x18e   :  { %v1572_v21 = vadd.f32 1.0, %v7515_v41 }
 0x18f   :  { %7520 = vrcp.f32 %v1571_v3  ;;  %v7517_v17 = vpop.eup %7516 }
 0x190   :  { %v1573_v51 = vadd.f32 1.0, %v7517_v17  ;;  %7522 = vrcp.f32 %v1572_v21 }
 0x192   :  { %7524 = vrcp.f32 %v1573_v51 }
 0x199   :  { %v7519_v45 = vpop.eup %7518 }
 0x19c   :  { %v7521_v22 = vpop.eup %7520 }
 0x19d   :  { %v7523_v49 = vpop.eup %7522 }
 0x19e   :  { %v1588_v41 = vsub.f32 1.0, %v7523_v49 }
 0x19f   :  { %v7525_v3 = vpop.eup %7524 }
 0x1a0   :  { %v1589_v21 = vsub.f32 1.0, %v7525_v3  ;;  %v1593_v13 = vmul.f32 0.0, %v7525_v3  ;;  %v9647_v3 = vld [vmem:[#allocation10 + $0x94] ss:$24 sps:$4 sm:$0xff]  }
 0x1ab   :  { %v1547_v25 = vpop.f32.mrf.mxu1 }
 0x1ac   :  { %v1548_v11 = vadd.f32 %v1547_v25, %v9593_v38 }
 0x1ad   :  { %v1549_v24 = vpop.f32.mrf.mxu1 }
 0x1ae   :  { %v1582_v10 = vmul.f32 %v7519_v45, %v1548_v11  ;;  %v1550_v0 = vadd.f32 %v1549_v24, %v9596_v55  ;;  %v1592_v45 = vmul.f32 0.0, %v7523_v49  ;;  %v9644_v49 = vld [vmem:[#allocation10 + $0xc0] ss:$24 sps:$4 sm:$0xff]  }
 0x1af   :  { %v1551_v28 = vpop.f32.mrf.mxu1 }
 0x1b0   :  { %v1584_v1 = vadd.f32 %v1582_v10, %v604_v61  ;;  %v1583_v23 = vmul.f32 %v7521_v22, %v1550_v0  ;;  %v13247_v10 = vld [vmem:[#allocation50_spill] sm:$0xff]  ;;  %v13248_v0 = vld [vmem:[#allocation52_spill] sm:$0xff] }
 0x1b1   :  { %v1552_v31 = vpop.f32.mrf.mxu1  ;;  %v9620_v22 = vld [vmem:[#allocation10 + $0x150] ss:$24 sps:$4 sm:$0xff]   ;;  %v9623_v61 = vld [vmem:[#allocation10 + $0x124] ss:$24 sps:$4 sm:$0xff]  }
 0x1b2   :  { %7526 = vtanh.f32 %v1584_v1  ;;  %v1585_v26 = vadd.f32 %v1583_v23, %v630_v53  ;;  %v13249_v28 = vld [vmem:[#allocation54_spill] sm:$0xff]  ;;  %v13250_v1 = vld [vmem:[#allocation55_spill] sm:$0xff] }
 0x1b3   :  { %v9628_v23 = vld [vmem:[#allocation10 + $0x120] ss:$24 sps:$4 sm:$0xff]   ;;  %v9631_v53 = vld [vmem:[#allocation10 + $0xf4] ss:$24 sps:$4 sm:$0xff]   ;;  %v9636_v31 = vld [vmem:[#allocation10 + $0xf0] ss:$24 sps:$4 sm:$0xff]  }
 0x1b4   :  { %7528 = vtanh.f32 %v1585_v26  ;;  %v9639_v26 = vld [vmem:[#allocation10 + $0xc4] ss:$24 sps:$4 sm:$0xff]  }
 0x1bf   :  { %v7527_v17 = vpop.eup %7526 }
 0x1c0   :  { %v1590_v25 = vmul.f32 %v7527_v17, %v1588_v41  ;;  %v9739_v41 = vld [vmem:[#allocation10 + $0xf8] ss:$24 sps:$4 sm:$0xff]   ;;  %v9742_v17 = vld [vmem:[#allocation10 + $0xcc] ss:$24 sps:$4 sm:$0xff]  }
 0x1c1   :  { %v7529_v11 = vpop.eup %7528 }
 0x1c2   :  { %v1591_v24 = vmul.f32 %v7529_v11, %v1589_v21  ;;  %v9606_v37 = vadd.f32 %v1592_v45, %v1590_v25  ;;  %v9745_v21 = vld [vmem:[#allocation10 + $0xc8] ss:$24 sps:$4 sm:$0xff]   ;;  %v9748_v25 = vld [vmem:[#allocation10 + $0x9c] ss:$24 sps:$4 sm:$0xff]   ;;  %v9751_v11 = vld [vmem:[#allocation10 + $0x98] ss:$24 sps:$4 sm:$0xff]  }
 0x1c3   :  { %v9754_v45 = vld [vmem:[#allocation10 + $0x6c] ss:$24 sps:$4 sm:$0xff]  }
 0x1c4   :  { %13245 = vst [vmem:[#allocation105_spill] sm:$0xff] %v9606_v37  ;;  %v9608_v51 = vadd.f32 %v1593_v13, %v1591_v24  ;;  %v9614_v35 = vpack.c.bf16 %v9606_v37, %v9606_v37  ;;  %13275 = vst [vmem:[#allocation107_spill] sm:$0xff] %v9754_v45  ;;  %v9757_v24 = vld [vmem:[#allocation10 + $0x68] ss:$24 sps:$4 sm:$0xff]   ;;  %v9760_v13 = vld [vmem:[#allocation10 + $0x3c] ss:$24 sps:$4 sm:$0xff]  }
 0x1c5   :  { %13276 = vst [vmem:[#allocation108_spill] sm:$0xff] %v9757_v24  ;;  %13277 = vst [vmem:[#allocation109_spill] sm:$0xff] %v9760_v13 }
 0x1c6   :  { %13246 = vst [vmem:[#allocation106_spill] sm:$0xff] %v9608_v51  ;;  %v1597_v57 = vpack.c.bf16 %v9608_v51, %v9608_v51 }
 0x1c8   :  { %1630 = vmatprep.mubr.bf16.mxu0 %v1597_v57  ;;  %1671 = vmatprep.mubr.bf16.mxu1 %v1597_v57 }
 0x1c9   :  { %1631 = vmatmul.mubr.bf16.vlgmr.msra.gmra.mxu0 %v9614_v35  ;;  %1672 = vmatmul.mubr.bf16.vlgmr.msra.gmra.mxu1 %v9614_v35 }
 0x1ca   :  { %1681 = vmatpush1.bf16.msra.mxu0 %v13247_v10  ;;  %1712 = vmatprep.mubr.bf16.mxu0 %v1597_v57  ;;  %v9763_v57 = vld [vmem:[#allocation10 + $0x38] ss:$24 sps:$4 sm:$0xff]   ;;  %v9769_v10 = vld [vmem:[#allocation10 + $0x8] ss:$24 sps:$4 sm:$0xff]  }
 0x1cb   :  { %1682 = vmatprep.subr.bf16.mxu0 %v13248_v0  ;;  %1766 = vmatpush1.bf16.msra.mxu1 %v9620_v22  ;;  %13278 = vst [vmem:[#allocation110_spill] sm:$0xff] %v9763_v57  ;;  %13280 = vst [vmem:[#allocation112_spill] sm:$0xff] %v9769_v10  ;;  %v9772_v0 = vld [vmem:[#allocation10 + $0x2dc] ss:$24 sps:$4 sm:$0xff]  }
 0x1cc   :  { %1767 = vmatprep.subr.bf16.mxu1 %v9623_v61  ;;  %13281 = vst [vmem:[#allocation113_spill] sm:$0xff] %v9772_v0 }
 0x1ce   :  { %1683 = vmatpush1.bf16.msra.mxu0 %v13249_v28  ;;  %v9775_v28 = vld [vmem:[#allocation10 + $0x2d8] ss:$24 sps:$4 sm:$0xff]  }
 0x1cf   :  { %1684 = vmatprep.subr.bf16.mxu0 %v13250_v1  ;;  %1768 = vmatpush1.bf16.msra.mxu1 %v9628_v23  ;;  %13282 = vst [vmem:[#allocation114_spill] sm:$0xff] %v9775_v28  ;;  %v9778_v1 = vld [vmem:[#allocation10 + $0x2ac] ss:$24 sps:$4 sm:$0xff]  }
 0x1d0   :  { %1769 = vmatprep.subr.bf16.mxu1 %v9631_v53  ;;  %13283 = vst [vmem:[#allocation115_spill] sm:$0xff] %v9778_v1 }
 0x1d2   :  { %1685 = vmatpush1.bf16.msra.mxu0 %v9148_v19  ;;  %v9655_v19 = vld [vmem:[#allocation10 + $0x64] ss:$24 sps:$4 sm:$0xff]  }
 0x1d3   :  { %1686 = vmatprep.subr.bf16.mxu0 %v9152_v29  ;;  %1770 = vmatpush1.bf16.msra.mxu1 %v9636_v31  ;;  %v9652_v29 = vld [vmem:[#allocation10 + $0x90] ss:$24 sps:$4 sm:$0xff]  }
 0x1d4   :  { %1771 = vmatprep.subr.bf16.mxu1 %v9639_v26 }
 0x1d6   :  { %1687 = vmatpush1.bf16.msra.mxu0 %v9157_v27  ;;  %v9660_v27 = vld [vmem:[#allocation10 + $0x60] ss:$24 sps:$4 sm:$0xff]  }
 0x1d7   :  { %1688 = vmatprep.subr.bf16.mxu0 %v9161_v30  ;;  %1772 = vmatpush1.bf16.msra.mxu1 %v9644_v49  ;;  %v9663_v30 = vld [vmem:[#allocation10 + $0x34] ss:$24 sps:$4 sm:$0xff]  }
 0x1d8   :  { %1773 = vmatprep.subr.bf16.mxu1 %v9647_v3 }
 0x1da   :  { %1689 = vmatpush1.bf16.msra.mxu0 %v9165_v34  ;;  %v9668_v34 = vld [vmem:[#allocation10 + $0x30] ss:$24 sps:$4 sm:$0xff]  }
 0x1db   :  { %1690 = vmatprep.subr.bf16.mxu0 %v9169_v33  ;;  %1774 = vmatpush1.bf16.msra.mxu1 %v9652_v29  ;;  %v9671_v33 = vld [vmem:[#allocation10 + $0x4] ss:$24 sps:$4 sm:$0xff]  }
 0x1dc   :  { %1775 = vmatprep.subr.bf16.mxu1 %v9655_v19 }
 0x1de   :  { %1691 = vmatpush1.bf16.msra.mxu0 %v9173_v36  ;;  %v9676_v36 = vld [vmem:[#allocation10] ss:$24 sps:$4 sm:$0xff]  }
 0x1df   :  { %1692 = vmatprep.subr.bf16.mxu0 %v9177_v39  ;;  %1776 = vmatpush1.bf16.msra.mxu1 %v9660_v27  ;;  %v9679_v39 = vld [vmem:[#allocation10 + $0x2d4] ss:$24 sps:$4 sm:$0xff]  }
 0x1e0   :  { %1777 = vmatprep.subr.bf16.mxu1 %v9663_v30 }
 0x1e2   :  { %1693 = vmatpush1.bf16.msra.mxu0 %v9181_v40  ;;  %v9684_v40 = vld [vmem:[#allocation10 + $0x2d0] ss:$24 sps:$4 sm:$0xff]  }
 0x1e3   :  { %1694 = vmatprep.subr.bf16.mxu0 %v9185_v42  ;;  %1778 = vmatpush1.bf16.msra.mxu1 %v9668_v34  ;;  %v9687_v42 = vld [vmem:[#allocation10 + $0x2a4] ss:$24 sps:$4 sm:$0xff]  }
 0x1e4   :  { %1779 = vmatprep.subr.bf16.mxu1 %v9671_v33  ;;  %13251 = vst [vmem:[#allocation50_spill] sm:$0xff] %v9687_v42 }
 0x1e6   :  { %1695 = vmatpush1.bf16.msra.mxu0 %v9189_v44  ;;  %v9692_v44 = vld [vmem:[#allocation10 + $0x2a0] ss:$24 sps:$4 sm:$0xff]  }
 0x1e7   :  { %1696 = vmatprep.subr.bf16.mxu0 %v9193_v46  ;;  %1780 = vmatpush1.bf16.msra.mxu1 %v9676_v36  ;;  %13252 = vst [vmem:[#allocation52_spill] sm:$0xff] %v9692_v44  ;;  %v9695_v46 = vld [vmem:[#allocation10 + $0x274] ss:$24 sps:$4 sm:$0xff]  }
 0x1e8   :  { %1781 = vmatprep.subr.bf16.mxu1 %v9679_v39  ;;  %13253 = vst [vmem:[#allocation54_spill] sm:$0xff] %v9695_v46 }
 0x1ea   :  { %1697 = vmatpush2.bf16.msra.mxu0 %v9197_v48  ;;  %v9700_v48 = vld [vmem:[#allocation10 + $0x270] ss:$24 sps:$4 sm:$0xff]  }
 0x1eb   :  { %1698 = vmatprep.subr.bf16.mxu0 %v9201_v50  ;;  %1782 = vmatpush2.bf16.msra.mxu1 %v9684_v40  ;;  %13254 = vst [vmem:[#allocation55_spill] sm:$0xff] %v9700_v48  ;;  %v13255_v50 = vld [vmem:[#allocation56_spill] sm:$0xff] }
 0x1ec   :  { %1783 = vmatprep.subr.bf16.mxu1 %v9687_v42 }
 0x1ee   :  { %1699 = vmatpush2.bf16.msra.mxu0 %v9205_v52  ;;  %v13257_v52 = vld [vmem:[#allocation40_spill] sm:$0xff] }
 0x1ef   :  { %1700 = vmatprep.subr.bf16.mxu0 %v9209_v54  ;;  %1784 = vmatpush2.bf16.msra.mxu1 %v9692_v44  ;;  %v13258_v54 = vld [vmem:[#allocation57_spill] sm:$0xff] }
 0x1f0   :  { %1785 = vmatprep.subr.bf16.mxu1 %v9695_v46 }
 0x1f2   :  { %1701 = vmatpush2.bf16.msra.mxu0 %v9213_v56  ;;  %v13261_v56 = vld [vmem:[#allocation44_spill] sm:$0xff] }
 0x1f3   :  { %1702 = vmatprep.subr.bf16.mxu0 %v9217_v58  ;;  %1786 = vmatpush2.bf16.msra.mxu1 %v9700_v48  ;;  %v13262_v58 = vld [vmem:[#allocation59_spill] sm:$0xff]  ;;  %13271 = vst [vmem:[#allocation44_spill] sm:$0xff] %v9742_v17 }
 0x1f4   :  { %1787 = vmatprep.subr.bf16.mxu1 %v9060_v12  ;;  %v13256_v12 = vld [vmem:[#allocation38_spill] sm:$0xff]  ;;  %13272 = vst [vmem:[#allocation59_spill] sm:$0xff] %v9745_v21 }
 0x1f6   :  { %1703 = vmatpush2.bf16.msra.mxu0 %v9221_v60  ;;  %v13265_v60 = vld [vmem:[#allocation48_spill] sm:$0xff] }
 0x1f7   :  { %1704 = vmatprep.subr.bf16.mxu0 %v9225_v62  ;;  %1788 = vmatpush2.bf16.msra.mxu1 %v9065_v14  ;;  %v13259_v14 = vld [vmem:[#allocation58_spill] sm:$0xff]  ;;  %v9727_v62 = vld [vmem:[#allocation10 + $0x158] ss:$24 sps:$4 sm:$0xff]   ;;  %13274 = vst [vmem:[#allocation48_spill] sm:$0xff] %v9751_v11 }
 0x1f8   :  { %1789 = vmatprep.subr.bf16.mxu1 %v9072_v16  ;;  %v13260_v16 = vld [vmem:[#allocation42_spill] sm:$0xff]  ;;  %13266 = vst [vmem:[#allocation38_spill] sm:$0xff] %v9727_v62 }
 0x1f9   :  { %13270 = vst [vmem:[#allocation42_spill] sm:$0xff] %v9739_v41 }
 0x1fa   :  { %1705 = vmatpush2.bf16.msra.mxu0 %v13255_v50  ;;  %v9781_v50 = vld [vmem:[#allocation10 + $0x2a8] ss:$24 sps:$4 sm:$0xff]  }
 0x1fb   :  { %1706 = vmatprep.subr.bf16.mxu0 %v9233_v2  ;;  %1790 = vmatpush2.bf16.msra.mxu1 %v9077_v18  ;;  %v9721_v18 = vld [vmem:[#allocation10 + $0x15c] ss:$24 sps:$4 sm:$0xff]   ;;  %v9730_v2 = vld [vmem:[#allocation10 + $0x12c] ss:$24 sps:$4 sm:$0xff]   ;;  %13284 = vst [vmem:[#allocation116_spill] sm:$0xff] %v9781_v50 }
 0x1fc   :  { %1791 = vmatprep.subr.bf16.mxu1 %v9084_v20  ;;  %13263 = vst [vmem:[#allocation56_spill] sm:$0xff] %v9721_v18  ;;  %v13264_v20 = vld [vmem:[#allocation46_spill] sm:$0xff]  ;;  %13267 = vst [vmem:[#allocation40_spill] sm:$0xff] %v9730_v2 }
 0x1fd   :  { %13273 = vst [vmem:[#allocation46_spill] sm:$0xff] %v9748_v25 }
 0x1fe   :  { %1707 = vmatpush2.bf16.msra.mxu0 %v9237_v4  ;;  %v9733_v4 = vld [vmem:[#allocation10 + $0x128] ss:$24 sps:$4 sm:$0xff]  }
 0x1ff   :  { %1708 = vmatprep.subr.bf16.mxu0 %v9241_v6  ;;  %1792 = vmatpush2.bf16.msra.mxu1 %v13256_v12  ;;  %13268 = vst [vmem:[#allocation57_spill] sm:$0xff] %v9733_v4  ;;  %v9736_v6 = vld [vmem:[#allocation10 + $0xfc] ss:$24 sps:$4 sm:$0xff]  }
 0x200   :  { %1793 = vmatprep.subr.bf16.mxu1 %v13257_v52  ;;  %13269 = vst [vmem:[#allocation58_spill] sm:$0xff] %v9736_v6  ;;  %v9784_v12 = vld [vmem:[#allocation10 + $0x27c] ss:$24 sps:$4 sm:$0xff]   ;;  %v9787_v52 = vld [vmem:[#allocation10 + $0x278] ss:$24 sps:$4 sm:$0xff]  }
 0x201   :  { %13285 = vst [vmem:[#allocation117_spill] sm:$0xff] %v9784_v12  ;;  %13286 = vst [vmem:[#allocation118_spill] sm:$0xff] %v9787_v52 }
 0x202   :  { %1709 = vmatpush2.bf16.msra.mxu0 %v13258_v54  ;;  %v9790_v54 = vld [vmem:[#allocation10 + $0x24c] ss:$24 sps:$4 sm:$0xff]  }
 0x203   :  { %1710 = vmatprep.subr.bf16.mxu0 %v13259_v14  ;;  %1794 = vmatpush2.bf16.msra.mxu1 %v13260_v16  ;;  %13287 = vst [vmem:[#allocation119_spill] sm:$0xff] %v9790_v54  ;;  %v9793_v14 = vld [vmem:[#allocation10 + $0x248] ss:$24 sps:$4 sm:$0xff]   ;;  %v9796_v16 = vld [vmem:[#allocation10 + $0x21c] ss:$24 sps:$4 sm:$0xff]  }
 0x204   :  { %1795 = vmatprep.subr.bf16.mxu1 %v13261_v56  ;;  %13288 = vst [vmem:[#allocation120_spill] sm:$0xff] %v9793_v14  ;;  %13289 = vst [vmem:[#allocation121_spill] sm:$0xff] %v9796_v16  ;;  %v13290_v56 = vld [vmem:[#allocation41_spill] sm:$0xff] }
 0x205   :  { %13297 = vst [vmem:[#allocation41_spill] sm:$0xff] %v9806_v59 }
 0x206   :  { %1711 = vmatpush2.bf16.msra.mxu0 %v13262_v58  ;;  %v13291_v58 = vld [vmem:[#allocation43_spill] sm:$0xff] }
 0x207   :  { %1806 = vmatprep.subr.bf16.mxu0 %v9721_v18  ;;  %1796 = vmatpush2.bf16.msra.mxu1 %v13264_v20  ;;  %v13292_v20 = vld [vmem:[#allocation45_spill] sm:$0xff] }
 0x208   :  { %1847 = vmatprep.subr.bf16.mxu1 %v13265_v60  ;;  %v13293_v60 = vld [vmem:[#allocation47_spill] sm:$0xff] }
 0x209   :  { %1713 = vmatmul.mubr.bf16.vlgmr.msra.gmra.mxu0 %v9614_v35  ;;  %v9766_v35 = vld [vmem:[#allocation10 + $0xc] ss:$24 sps:$4 sm:$0xff]  }
 0x20a   :  { %1807 = vmatpush1.bf16.msra.mxu0 %v9727_v62  ;;  %13279 = vst [vmem:[#allocation111_spill] sm:$0xff] %v9766_v35 }
 0x20b   :  { %1808 = vmatprep.subr.bf16.mxu0 %v9730_v2 }
 0x20e   :  { %1809 = vmatpush1.bf16.msra.mxu0 %v9733_v4 }
 0x20f   :  { %1810 = vmatprep.subr.bf16.mxu0 %v9736_v6 }
 0x212   :  { %1811 = vmatpush1.bf16.msra.mxu0 %v9739_v41 }
 0x213   :  { %1812 = vmatprep.subr.bf16.mxu0 %v9742_v17 }
 0x216   :  { %1813 = vmatpush1.bf16.msra.mxu0 %v9745_v21 }
 0x217   :  { %1814 = vmatprep.subr.bf16.mxu0 %v9748_v25 }
 0x21a   :  { %1815 = vmatpush1.bf16.msra.mxu0 %v9751_v11 }
 0x21b   :  { %1816 = vmatprep.subr.bf16.mxu0 %v9754_v45 }
 0x21e   :  { %1817 = vmatpush1.bf16.msra.mxu0 %v9757_v24 }
 0x21f   :  { %1818 = vmatprep.subr.bf16.mxu0 %v9760_v13 }
 0x222   :  { %1819 = vmatpush1.bf16.msra.mxu0 %v9763_v57 }
 0x223   :  { %1820 = vmatprep.subr.bf16.mxu0 %v9766_v35 }
 0x226   :  { %1821 = vmatpush1.bf16.msra.mxu0 %v9769_v10 }
 0x227   :  { %1822 = vmatprep.subr.bf16.mxu0 %v9772_v0 }
 0x22a   :  { %1823 = vmatpush2.bf16.msra.mxu0 %v9775_v28 }
 0x22b   :  { %1824 = vmatprep.subr.bf16.mxu0 %v9778_v1  ;;  %v13299_v1 = vld [vmem:[#allocation67_spill] sm:$0xff] }
 0x22e   :  { %1825 = vmatpush2.bf16.msra.mxu0 %v9781_v50  ;;  %v13298_v50 = vld [vmem:[#allocation64_spill] sm:$0xff] }
 0x22f   :  { %1826 = vmatprep.subr.bf16.mxu0 %v9784_v12 }
 0x232   :  { %1827 = vmatpush2.bf16.msra.mxu0 %v9787_v52 }
 0x233   :  { %1828 = vmatprep.subr.bf16.mxu0 %v9790_v54 }
 0x236   :  { %1829 = vmatpush2.bf16.msra.mxu0 %v9793_v14 }
 0x237   :  { %1830 = vmatprep.subr.bf16.mxu0 %v9796_v16 }
 0x23a   :  { %1831 = vmatpush2.bf16.msra.mxu0 %v13290_v56 }
 0x23b   :  { %1832 = vmatprep.subr.bf16.mxu0 %v13291_v58 }
 0x23e   :  { %1833 = vmatpush2.bf16.msra.mxu0 %v13292_v20 }
 0x23f   :  { %1834 = vmatprep.subr.bf16.mxu0 %v13293_v60 }
 0x242   :  { %1835 = vmatpush2.bf16.msra.mxu0 %v13294_v32 }
 0x243   :  { %1836 = vmatprep.subr.bf16.mxu0 %v13295_v15 }
 0x246   :  { %1837 = vmatpush2.bf16.msra.mxu0 %v13296_v5 }
 0x247   :  { %1932 = vmatprep.subr.bf16.mxu0 %v9806_v59 }
 0x289   :  { %v1632_v14 = vpop.f32.mrf.mxu0  ;;  %v1673_v16 = vpop.f32.mrf.mxu1 }
 0x28a   :  { %v1633_v60 = vadd.f32 %v1632_v14, %v9565_v43  ;;  %v1674_v59 = vadd.f32 %v1673_v16, %v9579_v63 }
 0x28b   :  { %v1634_v54 = vpop.f32.mrf.mxu0  ;;  %v1675_v56 = vpop.f32.mrf.mxu1 }
 0x28c   :  { %v1635_v32 = vadd.f32 %v1634_v54, %v9568_v47  ;;  %v1721_v15 = vadd.f32 %v1633_v60, %v13298_v50  ;;  %v1676_v10 = vadd.f32 %v1675_v56, %v9582_v7 }
 0x28d   :  { %v1636_v52 = vpop.f32.mrf.mxu0  ;;  %v1677_v58 = vpop.f32.mrf.mxu1 }
 0x28e   :  { %v1722_v5 = vadd.f32 %v1635_v32, %v13299_v1  ;;  %v7004_v28 = vmul.f32 -1.442695, %v1721_v15  ;;  %v13300_v52 = vld [vmem:[#allocation65_spill] sm:$0xff] }
 0x28f   :  { %v1637_v12 = vpop.f32.mrf.mxu0  ;;  %v1678_v20 = vpop.f32.mrf.mxu1  ;;  %v1723_v58 = vadd.f32 %v1674_v59, %v13300_v52 }
 0x290   :  { %v7005_v0 = vmul.f32 -1.442695, %v1722_v5  ;;  %7530 = vpow2.f32 %v7004_v28  ;;  %v1724_v12 = vadd.f32 %v1676_v10, %v9375_v8 }
 0x291   :  { %v7006_v20 = vmul.f32 -1.442695, %v1723_v58 }
 0x292   :  { %7532 = vpow2.f32 %v7005_v0  ;;  %v7007_v14 = vmul.f32 -1.442695, %v1724_v12 }
 0x293   :  { %7534 = vpow2.f32 %v7006_v20 }
 0x294   :  { %7536 = vpow2.f32 %v7007_v14 }
 0x29d   :  { %v7531_v43 = vpop.eup %7530 }
 0x29e   :  { %v1737_v50 = vadd.f32 1.0, %v7531_v43  ;;  %v13301_v43 = vld [vmem:[#allocation70_spill] sm:$0xff] }
 0x29f   :  { %v7533_v54 = vpop.eup %7532 }
 0x2a0   :  { %v1738_v1 = vadd.f32 1.0, %v7533_v54  ;;  %7538 = vrcp.f32 %v1737_v50  ;;  %v7535_v28 = vpop.eup %7534 }
 0x2a1   :  { %v7537_v60 = vpop.eup %7536  ;;  %v1739_v16 = vadd.f32 1.0, %v7535_v28 }
 0x2a2   :  { %7540 = vrcp.f32 %v1738_v1  ;;  %v1740_v32 = vadd.f32 1.0, %v7537_v60 }
 0x2a3   :  { %7542 = vrcp.f32 %v1739_v16 }
 0x2a4   :  { %7544 = vrcp.f32 %v1740_v32 }
 0x2ad   :  { %v7539_v59 = vpop.eup %7538 }
 0x2af   :  { %v7541_v5 = vpop.eup %7540 }
 0x2b0   :  { %v7543_v54 = vpop.eup %7542 }
 0x2b1   :  { %v7545_v50 = vpop.eup %7544  ;;  %v1755_v1 = vsub.f32 1.0, %v7543_v54 }
 0x2b2   :  { %v1756_v60 = vsub.f32 1.0, %v7545_v50  ;;  %v1760_v32 = vmul.f32 %v7545_v50, %v9608_v51  ;;  %v9867_v50 = vld [vmem:[#allocation10 + $0xa0] ss:$24 sps:$4 sm:$0xff]   ;;  %v9910_v51 = vld [vmem:[#allocation10 + $0x284] ss:$24 sps:$4 sm:$0xff]  }
 0x2b3   :  { %13307 = vst [vmem:[#allocation53_spill] sm:$0xff] %v9910_v51 }
 0x2c9   :  { %v1714_v0 = vpop.f32.mrf.mxu0 }
 0x2ca   :  { %v1715_v56 = vadd.f32 %v1714_v0, %v9593_v38  ;;  %v1759_v0 = vmul.f32 %v7543_v54, %v9606_v37  ;;  %v9862_v54 = vld [vmem:[#allocation10 + $0xa4] ss:$24 sps:$4 sm:$0xff]   ;;  %v9907_v37 = vld [vmem:[#allocation10 + $0x2b0] ss:$24 sps:$4 sm:$0xff]  }
 0x2cb   :  { %v1716_v15 = vpop.f32.mrf.mxu0  ;;  %13306 = vst [vmem:[#allocation51_spill] sm:$0xff] %v9907_v37 }
 0x2cc   :  { %v1749_v8 = vmul.f32 %v7539_v59, %v1715_v56  ;;  %v1717_v10 = vadd.f32 %v1716_v15, %v9596_v55 }
 0x2cd   :  { %v1718_v52 = vpop.f32.mrf.mxu0 }
 0x2ce   :  { %v1751_v58 = vadd.f32 %v1749_v8, %v13301_v43  ;;  %v1750_v12 = vmul.f32 %v7541_v5, %v1717_v10  ;;  %v9835_v5 = vld [vmem:[#allocation10 + $0x160] ss:$24 sps:$4 sm:$0xff]   ;;  %v9838_v52 = vld [vmem:[#allocation10 + $0x134] ss:$24 sps:$4 sm:$0xff]   ;;  %v9843_v43 = vld [vmem:[#allocation10 + $0x130] ss:$24 sps:$4 sm:$0xff]  }
 0x2cf   :  { %v1719_v20 = vpop.f32.mrf.mxu0 }
 0x2d0   :  { %7546 = vtanh.f32 %v1751_v58  ;;  %v1752_v14 = vadd.f32 %v1750_v12, %v9418_v9  ;;  %v9846_v58 = vld [vmem:[#allocation10 + $0x104] ss:$24 sps:$4 sm:$0xff]   ;;  %v9851_v12 = vld [vmem:[#allocation10 + $0x100] ss:$24 sps:$4 sm:$0xff]   ;;  %v9854_v20 = vld [vmem:[#allocation10 + $0xd4] ss:$24 sps:$4 sm:$0xff]  }
 0x2d2   :  { %7548 = vtanh.f32 %v1752_v14  ;;  %v9859_v14 = vld [vmem:[#allocation10 + $0xd0] ss:$24 sps:$4 sm:$0xff]  }
 0x2dd   :  { %v7547_v28 = vpop.eup %7546 }
 0x2de   :  { %v1757_v16 = vmul.f32 %v7547_v28, %v1755_v1  ;;  %v9870_v1 = vld [vmem:[#allocation10 + $0x74] ss:$24 sps:$4 sm:$0xff]   ;;  %v9875_v28 = vld [vmem:[#allocation10 + $0x70] ss:$24 sps:$4 sm:$0xff]  }
 0x2df   :  { %v7549_v56 = vpop.eup %7548 }
 0x2e0   :  { %v1758_v59 = vmul.f32 %v7549_v56, %v1756_v60  ;;  %v9823_v15 = vadd.f32 %v1759_v0, %v1757_v16  ;;  %v9878_v60 = vld [vmem:[#allocation10 + $0x44] ss:$24 sps:$4 sm:$0xff]   ;;  %v9883_v16 = vld [vmem:[#allocation10 + $0x40] ss:$24 sps:$4 sm:$0xff]   ;;  %v9886_v0 = vld [vmem:[#allocation10 + $0x14] ss:$24 sps:$4 sm:$0xff]  }
 0x2e1   :  { %v9891_v56 = vld [vmem:[#allocation10 + $0x10] ss:$24 sps:$4 sm:$0xff]  }
 0x2e2   :  { %13302 = vst [vmem:[#allocation43_spill] sm:$0xff] %v9823_v15  ;;  %v9825_v8 = vadd.f32 %v1760_v32, %v1758_v59  ;;  %v9831_v10 = vpack.c.bf16 %v9823_v15, %v9823_v15  ;;  %v9894_v59 = vld [vmem:[#allocation10 + $0x2e4] ss:$24 sps:$4 sm:$0xff]   ;;  %v9899_v32 = vld [vmem:[#allocation10 + $0x2e0] ss:$24 sps:$4 sm:$0xff]  }
 0x2e3   :  { %13304 = vst [vmem:[#allocation47_spill] sm:$0xff] %v9899_v32 }
 0x2e4   :  { %13303 = vst [vmem:[#allocation45_spill] sm:$0xff] %v9825_v8  ;;  %v1764_v9 = vpack.c.bf16 %v9825_v8, %v9825_v8 }
 0x2e6   :  { %1797 = vmatprep.mubr.bf16.mxu1 %v1764_v9  ;;  %1838 = vmatprep.mubr.bf16.mxu0 %v1764_v9 }
 0x2e7   :  { %1798 = vmatmul.mubr.bf16.vlgmr.msra.gmra.mxu1 %v9831_v10  ;;  %1839 = vmatmul.mubr.bf16.vlgmr.msra.gmra.mxu0 %v9831_v10 }
 0x2e8   :  { %1848 = vmatpush1.bf16.msra.mxu1 %v9835_v5  ;;  %1879 = vmatprep.mubr.bf16.mxu1 %v1764_v9  ;;  %v9902_v9 = vld [vmem:[#allocation10 + $0x2b4] ss:$24 sps:$4 sm:$0xff]  }
 0x2e9   :  { %1849 = vmatprep.subr.bf16.mxu1 %v9838_v52  ;;  %1933 = vmatpush1.bf16.msra.mxu0 %v9620_v22  ;;  %13305 = vst [vmem:[#allocation49_spill] sm:$0xff] %v9902_v9 }
 0x2ea   :  { %1934 = vmatprep.subr.bf16.mxu0 %v9623_v61 }
 0x2ec   :  { %1850 = vmatpush1.bf16.msra.mxu1 %v9843_v43 }
 0x2ed   :  { %1851 = vmatprep.subr.bf16.mxu1 %v9846_v58  ;;  %1935 = vmatpush1.bf16.msra.mxu0 %v9628_v23 }
 0x2ee   :  { %1936 = vmatprep.subr.bf16.mxu0 %v9631_v53 }
 0x2f0   :  { %1852 = vmatpush1.bf16.msra.mxu1 %v9851_v12 }
 0x2f1   :  { %1853 = vmatprep.subr.bf16.mxu1 %v9854_v20  ;;  %1937 = vmatpush1.bf16.msra.mxu0 %v9636_v31 }
 0x2f2   :  { %1938 = vmatprep.subr.bf16.mxu0 %v9639_v26 }
 0x2f4   :  { %1854 = vmatpush1.bf16.msra.mxu1 %v9859_v14 }
 0x2f5   :  { %1855 = vmatprep.subr.bf16.mxu1 %v9862_v54  ;;  %1939 = vmatpush1.bf16.msra.mxu0 %v9644_v49 }
 0x2f6   :  { %1940 = vmatprep.subr.bf16.mxu0 %v9647_v3 }
 0x2f8   :  { %1856 = vmatpush1.bf16.msra.mxu1 %v9867_v50 }
 0x2f9   :  { %1857 = vmatprep.subr.bf16.mxu1 %v9870_v1  ;;  %1941 = vmatpush1.bf16.msra.mxu0 %v9652_v29 }
 0x2fa   :  { %1942 = vmatprep.subr.bf16.mxu0 %v9655_v19 }
 0x2fc   :  { %1858 = vmatpush1.bf16.msra.mxu1 %v9875_v28 }
 0x2fd   :  { %1859 = vmatprep.subr.bf16.mxu1 %v9878_v60  ;;  %1943 = vmatpush1.bf16.msra.mxu0 %v9660_v27 }
 0x2fe   :  { %1944 = vmatprep.subr.bf16.mxu0 %v9663_v30 }
 0x300   :  { %1860 = vmatpush1.bf16.msra.mxu1 %v9883_v16 }
 0x301   :  { %1861 = vmatprep.subr.bf16.mxu1 %v9886_v0  ;;  %1945 = vmatpush1.bf16.msra.mxu0 %v9668_v34 }
 0x302   :  { %1946 = vmatprep.subr.bf16.mxu0 %v9671_v33 }
 0x304   :  { %1862 = vmatpush1.bf16.msra.mxu1 %v9891_v56 }
 0x305   :  { %1863 = vmatprep.subr.bf16.mxu1 %v9894_v59  ;;  %1947 = vmatpush1.bf16.msra.mxu0 %v9676_v36 }
 0x306   :  { %1948 = vmatprep.subr.bf16.mxu0 %v9679_v39 }
 0x308   :  { %1864 = vmatpush2.bf16.msra.mxu1 %v9899_v32  ;;  %v9915_v32 = vld [vmem:[#allocation10 + $0x280] ss:$24 sps:$4 sm:$0xff]  }
 0x309   :  { %1865 = vmatprep.subr.bf16.mxu1 %v9902_v9  ;;  %1949 = vmatpush2.bf16.msra.mxu0 %v9684_v40  ;;  %13308 = vst [vmem:[#allocation64_spill] sm:$0xff] %v9915_v32  ;;  %v9918_v9 = vld [vmem:[#allocation10 + $0x254] ss:$24 sps:$4 sm:$0xff]  }
 0x30a   :  { %1950 = vmatprep.subr.bf16.mxu0 %v9687_v42  ;;  %13309 = vst [vmem:[#allocation67_spill] sm:$0xff] %v9918_v9  ;;  %v9922_v42 = vld [vmem:[#allocation10 + $0x244] ss:$24 sps:$4 sm:$0xff]  }
 0x30b   :  { %13310 = vst [vmem:[#allocation65_spill] sm:$0xff] %v9922_v42 }
 0x30c   :  { %1866 = vmatpush2.bf16.msra.mxu1 %v9907_v37  ;;  %v9925_v37 = vld [vmem:[#allocation10 + $0x250] ss:$24 sps:$4 sm:$0xff]  }
 0x30d   :  { %1867 = vmatprep.subr.bf16.mxu1 %v9910_v51  ;;  %1951 = vmatpush2.bf16.msra.mxu0 %v9692_v44  ;;  %13311 = vst [vmem:[#allocation70_spill] sm:$0xff] %v9925_v37  ;;  %v9928_v44 = vld [vmem:[#allocation10 + $0x224] ss:$24 sps:$4 sm:$0xff]  }
 0x30e   :  { %1952 = vmatprep.subr.bf16.mxu0 %v9695_v46  ;;  %13312 = vst [vmem:[#allocation122_spill] sm:$0xff] %v9928_v44  ;;  %v9931_v46 = vld [vmem:[#allocation10 + $0x240] ss:$24 sps:$4 sm:$0xff]  }
 0x30f   :  { %13313 = vst [vmem:[#allocation123_spill] sm:$0xff] %v9931_v46 }
 0x310   :  { %1868 = vmatpush2.bf16.msra.mxu1 %v9915_v32  ;;  %v9934_v32 = vld [vmem:[#allocation10 + $0x214] ss:$24 sps:$4 sm:$0xff]  }
 0x311   :  { %1869 = vmatprep.subr.bf16.mxu1 %v9918_v9  ;;  %1953 = vmatpush2.bf16.msra.mxu0 %v9700_v48  ;;  %13314 = vst [vmem:[#allocation124_spill] sm:$0xff] %v9934_v32  ;;  %v9937_v48 = vld [vmem:[#allocation10 + $0x220] ss:$24 sps:$4 sm:$0xff]  }
 0x312   :  { %1954 = vmatprep.subr.bf16.mxu0 %v9922_v42  ;;  %13315 = vst [vmem:[#allocation125_spill] sm:$0xff] %v9937_v48  ;;  %v9940_v42 = vld [vmem:[#allocation10 + $0x1f4] ss:$24 sps:$4 sm:$0xff]  }
 0x313   :  { %13316 = vst [vmem:[#allocation126_spill] sm:$0xff] %v9940_v42 }
 0x314   :  { %1870 = vmatpush2.bf16.msra.mxu1 %v9925_v37  ;;  %v9943_v37 = vld [vmem:[#allocation10 + $0x210] ss:$24 sps:$4 sm:$0xff]  }
 0x315   :  { %1871 = vmatprep.subr.bf16.mxu1 %v9928_v44  ;;  %1955 = vmatpush2.bf16.msra.mxu0 %v9931_v46  ;;  %13317 = vst [vmem:[#allocation127_spill] sm:$0xff] %v9943_v37  ;;  %v9946_v44 = vld [vmem:[#allocation10 + $0x1e4] ss:$24 sps:$4 sm:$0xff]   ;;  %v9949_v46 = vld [vmem:[#allocation10 + $0x1f0] ss:$24 sps:$4 sm:$0xff]  }
 0x316   :  { %1956 = vmatprep.subr.bf16.mxu0 %v9934_v32  ;;  %13318 = vst [vmem:[#allocation128_spill] sm:$0xff] %v9946_v44  ;;  %13319 = vst [vmem:[#allocation129_spill] sm:$0xff] %v9949_v46  ;;  %v9952_v32 = vld [vmem:[#allocation10 + $0x1c4] ss:$24 sps:$4 sm:$0xff]  }
 0x317   :  { %13320 = vst [vmem:[#allocation130_spill] sm:$0xff] %v9952_v32 }
 0x318   :  { %1872 = vmatpush2.bf16.msra.mxu1 %v9937_v48  ;;  %v9955_v48 = vld [vmem:[#allocation10 + $0x1e0] ss:$24 sps:$4 sm:$0xff]  }
 0x319   :  { %1873 = vmatprep.subr.bf16.mxu1 %v9940_v42  ;;  %1957 = vmatpush2.bf16.msra.mxu0 %v9943_v37  ;;  %13321 = vst [vmem:[#allocation131_spill] sm:$0xff] %v9955_v48  ;;  %v9958_v42 = vld [vmem:[#allocation10 + $0x1b4] ss:$24 sps:$4 sm:$0xff]   ;;  %v9961_v37 = vld [vmem:[#allocation10 + $0x1c0] ss:$24 sps:$4 sm:$0xff]  }
 0x31a   :  { %1958 = vmatprep.subr.bf16.mxu0 %v9946_v44  ;;  %13322 = vst [vmem:[#allocation132_spill] sm:$0xff] %v9958_v42  ;;  %13323 = vst [vmem:[#allocation133_spill] sm:$0xff] %v9961_v37  ;;  %v9964_v44 = vld [vmem:[#allocation10 + $0x194] ss:$24 sps:$4 sm:$0xff]  }
 0x31b   :  { %13324 = vst [vmem:[#allocation134_spill] sm:$0xff] %v9964_v44 }
 0x31c   :  { %1874 = vmatpush2.bf16.msra.mxu1 %v9949_v46  ;;  %v9967_v46 = vld [vmem:[#allocation10 + $0x1b0] ss:$24 sps:$4 sm:$0xff]  }
 0x31d   :  { %1875 = vmatprep.subr.bf16.mxu1 %v9952_v32  ;;  %1959 = vmatpush2.bf16.msra.mxu0 %v9955_v48  ;;  %13325 = vst [vmem:[#allocation135_spill] sm:$0xff] %v9967_v46  ;;  %v9970_v32 = vld [vmem:[#allocation10 + $0x184] ss:$24 sps:$4 sm:$0xff]   ;;  %v9973_v48 = vld [vmem:[#allocation10 + $0x190] ss:$24 sps:$4 sm:$0xff]  }
 0x31e   :  { %1960 = vmatprep.subr.bf16.mxu0 %v9958_v42  ;;  %13326 = vst [vmem:[#allocation136_spill] sm:$0xff] %v9970_v32  ;;  %13327 = vst [vmem:[#allocation137_spill] sm:$0xff] %v9973_v48  ;;  %v9977_v42 = vld [vmem:[#allocation10 + $0x180] ss:$24 sps:$4 sm:$0xff]  }
 0x31f   :  { %13328 = vst [vmem:[#allocation138_spill] sm:$0xff] %v9977_v42 }
 0x320   :  { %1876 = vmatpush2.bf16.msra.mxu1 %v9961_v37  ;;  %v9980_v37 = vld [vmem:[#allocation10 + $0x164] ss:$24 sps:$4 sm:$0xff]  }
 0x321   :  { %1877 = vmatprep.subr.bf16.mxu1 %v9964_v44  ;;  %1961 = vmatpush2.bf16.msra.mxu0 %v9967_v46  ;;  %13329 = vst [vmem:[#allocation139_spill] sm:$0xff] %v9980_v37 }
 0x322   :  { %1962 = vmatprep.subr.bf16.mxu0 %v9970_v32 }
 0x324   :  { %1878 = vmatpush2.bf16.msra.mxu1 %v9973_v48 }
 0x325   :  { %1973 = vmatprep.subr.bf16.mxu1 %v9721_v18  ;;  %1963 = vmatpush2.bf16.msra.mxu0 %v9977_v42 }
 0x326   :  { %2014 = vmatprep.subr.bf16.mxu0 %v9980_v37  ;;  %v13350_v37 = vld [vmem:[#allocation69_spill] sm:$0xff] }
 0x327   :  { %1880 = vmatmul.mubr.bf16.vlgmr.msra.gmra.mxu1 %v9831_v10  ;;  %v13330_v10 = vld [vmem:[#allocation112_spill] sm:$0xff] }
 0x328   :  { %1974 = vmatpush1.bf16.msra.mxu1 %v9727_v62  ;;  %v13349_v62 = vld [vmem:[#allocation66_spill] sm:$0xff] }
 0x329   :  { %1975 = vmatprep.subr.bf16.mxu1 %v9730_v2 }
 0x32c   :  { %1976 = vmatpush1.bf16.msra.mxu1 %v9733_v4  ;;  %v13348_v4 = vld [vmem:[#allocation104_spill] sm:$0xff] }
 0x32d   :  { %1977 = vmatprep.subr.bf16.mxu1 %v9736_v6 }
 0x330   :  { %1978 = vmatpush1.bf16.msra.mxu1 %v9739_v41  ;;  %v13331_v41 = vld [vmem:[#allocation113_spill] sm:$0xff] }
 0x331   :  { %1979 = vmatprep.subr.bf16.mxu1 %v9742_v17  ;;  %v13332_v17 = vld [vmem:[#allocation114_spill] sm:$0xff] }
 0x334   :  { %1980 = vmatpush1.bf16.msra.mxu1 %v9745_v21  ;;  %v13333_v21 = vld [vmem:[#allocation115_spill] sm:$0xff] }
 0x335   :  { %1981 = vmatprep.subr.bf16.mxu1 %v9748_v25  ;;  %v13334_v25 = vld [vmem:[#allocation116_spill] sm:$0xff] }
 0x338   :  { %1982 = vmatpush1.bf16.msra.mxu1 %v9751_v11  ;;  %v13335_v11 = vld [vmem:[#allocation117_spill] sm:$0xff] }
 0x339   :  { %1983 = vmatprep.subr.bf16.mxu1 %v9754_v45  ;;  %v13336_v45 = vld [vmem:[#allocation118_spill] sm:$0xff] }
 0x33c   :  { %1984 = vmatpush1.bf16.msra.mxu1 %v9757_v24  ;;  %v13337_v24 = vld [vmem:[#allocation119_spill] sm:$0xff] }
 0x33d   :  { %1985 = vmatprep.subr.bf16.mxu1 %v9760_v13  ;;  %v13338_v13 = vld [vmem:[#allocation120_spill] sm:$0xff] }
 0x340   :  { %1986 = vmatpush1.bf16.msra.mxu1 %v9763_v57  ;;  %v13339_v57 = vld [vmem:[#allocation121_spill] sm:$0xff] }
 0x341   :  { %1987 = vmatprep.subr.bf16.mxu1 %v9766_v35  ;;  %v10008_v35 = vld [vmem:[#allocation10 + $0x218] ss:$24 sps:$4 sm:$0xff]  }
 0x342   :  { %13340 = vst [vmem:[#allocation140_spill] sm:$0xff] %v10008_v35 }
 0x344   :  { %1988 = vmatpush1.bf16.msra.mxu1 %v13330_v10 }
 0x345   :  { %1989 = vmatprep.subr.bf16.mxu1 %v13331_v41  ;;  %v10011_v41 = vld [vmem:[#allocation10 + $0x1ec] ss:$24 sps:$4 sm:$0xff]  }
 0x346   :  { %13341 = vst [vmem:[#allocation141_spill] sm:$0xff] %v10011_v41 }
 0x348   :  { %1990 = vmatpush2.bf16.msra.mxu1 %v13332_v17 }
 0x349   :  { %1991 = vmatprep.subr.bf16.mxu1 %v13333_v21  ;;  %v10014_v21 = vld [vmem:[#allocation10 + $0x1e8] ss:$24 sps:$4 sm:$0xff]  }
 0x34a   :  { %13342 = vst [vmem:[#allocation142_spill] sm:$0xff] %v10014_v21 }
 0x34c   :  { %1992 = vmatpush2.bf16.msra.mxu1 %v13334_v25 }
 0x34d   :  { %1993 = vmatprep.subr.bf16.mxu1 %v13335_v11  ;;  %v10017_v11 = vld [vmem:[#allocation10 + $0x1bc] ss:$24 sps:$4 sm:$0xff]  }
 0x34e   :  { %13343 = vst [vmem:[#allocation143_spill] sm:$0xff] %v10017_v11 }
 0x350   :  { %1994 = vmatpush2.bf16.msra.mxu1 %v13336_v45 }
 0x351   :  { %1995 = vmatprep.subr.bf16.mxu1 %v13337_v24  ;;  %v10020_v24 = vld [vmem:[#allocation10 + $0x1b8] ss:$24 sps:$4 sm:$0xff]  }
 0x352   :  { %13344 = vst [vmem:[#allocation144_spill] sm:$0xff] %v10020_v24 }
 0x354   :  { %1996 = vmatpush2.bf16.msra.mxu1 %v13338_v13 }
 0x355   :  { %1997 = vmatprep.subr.bf16.mxu1 %v13339_v57  ;;  %v10023_v57 = vld [vmem:[#allocation10 + $0x18c] ss:$24 sps:$4 sm:$0xff]  }
 0x356   :  { %13345 = vst [vmem:[#allocation145_spill] sm:$0xff] %v10023_v57 }
 0x358   :  { %1998 = vmatpush2.bf16.msra.mxu1 %v10008_v35  ;;  %v10026_v35 = vld [vmem:[#allocation10 + $0x188] ss:$24 sps:$4 sm:$0xff]  }
 0x359   :  { %1999 = vmatprep.subr.bf16.mxu1 %v10011_v41  ;;  %13346 = vst [vmem:[#allocation146_spill] sm:$0xff] %v10026_v35  ;;  %v13347_v41 = vld [vmem:[#allocation41_spill] sm:$0xff] }
 0x35c   :  { %2000 = vmatpush2.bf16.msra.mxu1 %v10014_v21 }
 0x35d   :  { %2001 = vmatprep.subr.bf16.mxu1 %v10017_v11 }
 0x360   :  { %2002 = vmatpush2.bf16.msra.mxu1 %v10020_v24 }
 0x361   :  { %2003 = vmatprep.subr.bf16.mxu1 %v10023_v57 }
 0x364   :  { %2004 = vmatpush2.bf16.msra.mxu1 %v10026_v35 }
 0x365   :  { %2099 = vmatprep.subr.bf16.mxu1 %v13347_v41 }
 0x3a7   :  { %v1799_v13 = vpop.f32.mrf.mxu1  ;;  %v1840_v21 = vpop.f32.mrf.mxu0 }
 0x3a8   :  { %v1800_v24 = vadd.f32 %v1799_v13, %v13348_v4  ;;  %v1841_v41 = vadd.f32 %v1840_v21, %v9579_v63 }
 0x3a9   :  { %v1801_v45 = vpop.f32.mrf.mxu1  ;;  %v1842_v25 = vpop.f32.mrf.mxu0 }
 0x3aa   :  { %v1802_v2 = vadd.f32 %v1801_v45, %v9568_v47  ;;  %v1888_v57 = vadd.f32 %v1800_v24, %v13349_v62  ;;  %v1843_v48 = vadd.f32 %v1842_v25, %v9582_v7 }
 0x3ab   :  { %v1803_v17 = vpop.f32.mrf.mxu1  ;;  %v1844_v11 = vpop.f32.mrf.mxu0 }
 0x3ac   :  { %v1889_v42 = vadd.f32 %v1802_v2, %v13350_v37  ;;  %v7008_v18 = vmul.f32 -1.442695, %v1888_v57  ;;  %v13351_v17 = vld [vmem:[#allocation68_spill] sm:$0xff] }
 0x3ad   :  { %v1804_v10 = vpop.f32.mrf.mxu1  ;;  %v1845_v6 = vpop.f32.mrf.mxu0  ;;  %v1890_v11 = vadd.f32 %v1841_v41, %v13351_v17 }
 0x3ae   :  { %v7009_v35 = vmul.f32 -1.442695, %v1889_v42  ;;  %7550 = vpow2.f32 %v7008_v18  ;;  %v13352_v10 = vld [vmem:[#allocation71_spill] sm:$0xff] }
 0x3af   :  { %v1891_v6 = vadd.f32 %v1843_v48, %v13352_v10  ;;  %v7010_v32 = vmul.f32 -1.442695, %v1890_v11 }
 0x3b0   :  { %7552 = vpow2.f32 %v7009_v35 }
 0x3b1   :  { %v7011_v13 = vmul.f32 -1.442695, %v1891_v6  ;;  %7554 = vpow2.f32 %v7010_v32 }
 0x3b3   :  { %7556 = vpow2.f32 %v7011_v13  ;;  %v13354_v13 = vld [vmem:[#allocation75_spill] sm:$0xff] }
 0x3bb   :  { %v7551_v4 = vpop.eup %7550 }
 0x3bc   :  { %v1904_v62 = vadd.f32 1.0, %v7551_v4  ;;  %v13353_v4 = vld [vmem:[#allocation73_spill] sm:$0xff] }
 0x3bd   :  { %v7553_v45 = vpop.eup %7552 }
 0x3be   :  { %v1905_v37 = vadd.f32 1.0, %v7553_v45  ;;  %7558 = vrcp.f32 %v1904_v62  ;;  %v7555_v42 = vpop.eup %7554 }
 0x3bf   :  { %v1906_v2 = vadd.f32 1.0, %v7555_v42 }
 0x3c0   :  { %7560 = vrcp.f32 %v1905_v37  ;;  %v7557_v18 = vpop.eup %7556 }
 0x3c1   :  { %v1907_v24 = vadd.f32 1.0, %v7557_v18  ;;  %7562 = vrcp.f32 %v1906_v2 }
 0x3c3   :  { %7564 = vrcp.f32 %v1907_v24 }
 0x3cb   :  { %v7559_v41 = vpop.eup %7558 }
 0x3cd   :  { %v7561_v32 = vpop.eup %7560 }
 0x3ce   :  { %v7563_v62 = vpop.eup %7562 }
 0x3cf   :  { %v1922_v42 = vsub.f32 1.0, %v7563_v62 }
 0x3d0   :  { %v7565_v37 = vpop.eup %7564 }
 0x3d1   :  { %v1927_v24 = vmul.f32 %v7565_v37, %v9825_v8  ;;  %v13375_v8 = vld [vmem:[#allocation130_spill] sm:$0xff] }
 0x3e7   :  { %v1881_v21 = vpop.f32.mrf.mxu1 }
 0x3e8   :  { %v1882_v25 = vadd.f32 %v1881_v21, %v9593_v38  ;;  %v1923_v21 = vsub.f32 1.0, %v7565_v37  ;;  %v13364_v37 = vld [vmem:[#allocation55_spill] sm:$0xff] }
 0x3e9   :  { %v1883_v57 = vpop.f32.mrf.mxu1 }
 0x3ea   :  { %v1916_v48 = vmul.f32 %v7559_v41, %v1882_v25  ;;  %v1884_v35 = vadd.f32 %v1883_v57, %v9596_v55  ;;  %v1926_v25 = vmul.f32 %v7563_v62, %v9823_v15  ;;  %v13363_v62 = vld [vmem:[#allocation64_spill] sm:$0xff]  ;;  %v13374_v15 = vld [vmem:[#allocation129_spill] sm:$0xff] }
 0x3eb   :  { %v1885_v17 = vpop.f32.mrf.mxu1 }
 0x3ec   :  { %v1918_v11 = vadd.f32 %v1916_v48, %v13353_v4  ;;  %v1917_v10 = vmul.f32 %v7561_v32, %v1884_v35  ;;  %v13357_v4 = vld [vmem:[#allocation47_spill] sm:$0xff] }
 0x3ed   :  { %v1886_v6 = vpop.f32.mrf.mxu1 }
 0x3ee   :  { %7566 = vtanh.f32 %v1918_v11  ;;  %v1919_v45 = vadd.f32 %v1917_v10, %v13354_v13  ;;  %v13358_v11 = vld [vmem:[#allocation49_spill] sm:$0xff]  ;;  %v13359_v10 = vld [vmem:[#allocation50_spill] sm:$0xff]  ;;  %v13360_v6 = vld [vmem:[#allocation51_spill] sm:$0xff] }
 0x3ef   :  { %v13361_v13 = vld [vmem:[#allocation52_spill] sm:$0xff] }
 0x3f0   :  { %7568 = vtanh.f32 %v1919_v45  ;;  %v13362_v45 = vld [vmem:[#allocation54_spill] sm:$0xff] }
 0x3fb   :  { %v7567_v18 = vpop.eup %7566 }
 0x3fc   :  { %v1924_v2 = vmul.f32 %v7567_v18, %v1922_v42  ;;  %v13365_v42 = vld [vmem:[#allocation65_spill] sm:$0xff]  ;;  %v13366_v18 = vld [vmem:[#allocation70_spill] sm:$0xff] }
 0x3fd   :  { %v7569_v41 = vpop.eup %7568 }
 0x3fe   :  { %v1925_v57 = vmul.f32 %v7569_v41, %v1923_v21  ;;  %v10044_v17 = vadd.f32 %v1926_v25, %v1924_v2  ;;  %v13367_v21 = vld [vmem:[#allocation122_spill] sm:$0xff]  ;;  %v13368_v2 = vld [vmem:[#allocation123_spill] sm:$0xff]  ;;  %v13369_v25 = vld [vmem:[#allocation124_spill] sm:$0xff] }
 0x3ff   :  { %v13370_v41 = vld [vmem:[#allocation125_spill] sm:$0xff] }
 0x400   :  { %13355 = vst [vmem:[#allocation66_spill] sm:$0xff] %v10044_v17  ;;  %v10046_v48 = vadd.f32 %v1927_v24, %v1925_v57  ;;  %v10052_v32 = vpack.c.bf16 %v10044_v17, %v10044_v17  ;;  %v13371_v57 = vld [vmem:[#allocation126_spill] sm:$0xff]  ;;  %v13372_v24 = vld [vmem:[#allocation127_spill] sm:$0xff] }
 0x402   :  { %13356 = vst [vmem:[#allocation69_spill] sm:$0xff] %v10046_v48  ;;  %v1931_v35 = vpack.c.bf16 %v10046_v48, %v10046_v48 }
 0x404   :  { %1964 = vmatprep.mubr.bf16.mxu0 %v1931_v35  ;;  %2005 = vmatprep.mubr.bf16.mxu1 %v1931_v35 }
 0x405   :  { %1965 = vmatmul.mubr.bf16.vlgmr.msra.gmra.mxu0 %v10052_v32  ;;  %2006 = vmatmul.mubr.bf16.vlgmr.msra.gmra.mxu1 %v10052_v32 }
 0x406   :  { %2015 = vmatpush1.bf16.msra.mxu0 %v9835_v5  ;;  %2046 = vmatprep.mubr.bf16.mxu0 %v1931_v35  ;;  %v13373_v35 = vld [vmem:[#allocation128_spill] sm:$0xff] }
 0x407   :  { %2016 = vmatprep.subr.bf16.mxu0 %v9838_v52  ;;  %2100 = vmatpush1.bf16.msra.mxu1 %v9620_v22 }
 0x408   :  { %2101 = vmatprep.subr.bf16.mxu1 %v9623_v61 }
 0x40a   :  { %2017 = vmatpush1.bf16.msra.mxu0 %v9843_v43 }
 0x40b   :  { %2018 = vmatprep.subr.bf16.mxu0 %v9846_v58  ;;  %2102 = vmatpush1.bf16.msra.mxu1 %v9628_v23 }
 0x40c   :  { %2103 = vmatprep.subr.bf16.mxu1 %v9631_v53 }
 0x40e   :  { %2019 = vmatpush1.bf16.msra.mxu0 %v9851_v12 }
 0x40f   :  { %2020 = vmatprep.subr.bf16.mxu0 %v9854_v20  ;;  %2104 = vmatpush1.bf16.msra.mxu1 %v9636_v31 }
 0x410   :  { %2105 = vmatprep.subr.bf16.mxu1 %v9639_v26 }
 0x412   :  { %2021 = vmatpush1.bf16.msra.mxu0 %v9859_v14 }
 0x413   :  { %2022 = vmatprep.subr.bf16.mxu0 %v9862_v54  ;;  %2106 = vmatpush1.bf16.msra.mxu1 %v9644_v49 }
 0x414   :  { %2107 = vmatprep.subr.bf16.mxu1 %v9647_v3 }
 0x416   :  { %2023 = vmatpush1.bf16.msra.mxu0 %v9867_v50 }
 0x417   :  { %2024 = vmatprep.subr.bf16.mxu0 %v9870_v1  ;;  %2108 = vmatpush1.bf16.msra.mxu1 %v9652_v29 }
 0x418   :  { %2109 = vmatprep.subr.bf16.mxu1 %v9655_v19 }
 0x41a   :  { %2025 = vmatpush1.bf16.msra.mxu0 %v9875_v28 }
 0x41b   :  { %2026 = vmatprep.subr.bf16.mxu0 %v9878_v60  ;;  %2110 = vmatpush1.bf16.msra.mxu1 %v9660_v27 }
 0x41c   :  { %2111 = vmatprep.subr.bf16.mxu1 %v9663_v30 }
 0x41e   :  { %2027 = vmatpush1.bf16.msra.mxu0 %v9883_v16 }
 0x41f   :  { %2028 = vmatprep.subr.bf16.mxu0 %v9886_v0  ;;  %2112 = vmatpush1.bf16.msra.mxu1 %v9668_v34 }
 0x420   :  { %2113 = vmatprep.subr.bf16.mxu1 %v9671_v33 }
 0x422   :  { %2029 = vmatpush1.bf16.msra.mxu0 %v9891_v56 }
 0x423   :  { %2030 = vmatprep.subr.bf16.mxu0 %v9894_v59  ;;  %2114 = vmatpush1.bf16.msra.mxu1 %v9676_v36 }
 0x424   :  { %2115 = vmatprep.subr.bf16.mxu1 %v9679_v39 }
 0x426   :  { %2031 = vmatpush2.bf16.msra.mxu0 %v13357_v4 }
 0x427   :  { %2032 = vmatprep.subr.bf16.mxu0 %v13358_v11  ;;  %2116 = vmatpush2.bf16.msra.mxu1 %v9684_v40 }
 0x428   :  { %2117 = vmatprep.subr.bf16.mxu1 %v13359_v10 }
 0x42a   :  { %2033 = vmatpush2.bf16.msra.mxu0 %v13360_v6 }
 0x42b   :  { %2034 = vmatprep.subr.bf16.mxu0 %v9910_v51  ;;  %2118 = vmatpush2.bf16.msra.mxu1 %v13361_v13 }
 0x42c   :  { %2119 = vmatprep.subr.bf16.mxu1 %v13362_v45 }
 0x42e   :  { %2035 = vmatpush2.bf16.msra.mxu0 %v13363_v62  ;;  %v13418_v62 = vld [vmem:[#allocation76_spill] sm:$0xff] }
 0x42f   :  { %2036 = vmatprep.subr.bf16.mxu0 %v9918_v9  ;;  %2120 = vmatpush2.bf16.msra.mxu1 %v13364_v37  ;;  %v13416_v37 = vld [vmem:[#allocation104_spill] sm:$0xff] }
 0x430   :  { %2121 = vmatprep.subr.bf16.mxu1 %v13365_v42  ;;  %v13376_v42 = vld [vmem:[#allocation131_spill] sm:$0xff]  ;;  %v13417_v9 = vld [vmem:[#allocation72_spill] sm:$0xff] }
 0x432   :  { %2037 = vmatpush2.bf16.msra.mxu0 %v13366_v18  ;;  %v13377_v18 = vld [vmem:[#allocation132_spill] sm:$0xff] }
 0x433   :  { %2038 = vmatprep.subr.bf16.mxu0 %v13367_v21  ;;  %2122 = vmatpush2.bf16.msra.mxu1 %v13368_v2  ;;  %v13378_v21 = vld [vmem:[#allocation133_spill] sm:$0xff] }
 0x434   :  { %2123 = vmatprep.subr.bf16.mxu1 %v13369_v25 }
 0x436   :  { %2039 = vmatpush2.bf16.msra.mxu0 %v13370_v41  ;;  %v13379_v41 = vld [vmem:[#allocation136_spill] sm:$0xff] }
 0x437   :  { %2040 = vmatprep.subr.bf16.mxu0 %v13371_v57  ;;  %2124 = vmatpush2.bf16.msra.mxu1 %v13372_v24  ;;  %v13380_v57 = vld [vmem:[#allocation137_spill] sm:$0xff]  ;;  %v13381_v24 = vld [vmem:[#allocation56_spill] sm:$0xff] }
 0x438   :  { %2125 = vmatprep.subr.bf16.mxu1 %v13373_v35  ;;  %v13382_v35 = vld [vmem:[#allocation138_spill] sm:$0xff] }
 0x43a   :  { %2041 = vmatpush2.bf16.msra.mxu0 %v13374_v15  ;;  %v13383_v15 = vld [vmem:[#allocation139_spill] sm:$0xff] }
 0x43b   :  { %2042 = vmatprep.subr.bf16.mxu0 %v13375_v8  ;;  %2126 = vmatpush2.bf16.msra.mxu1 %v13376_v42  ;;  %v13384_v42 = vld [vmem:[#allocation38_spill] sm:$0xff] }
 0x43c   :  { %2127 = vmatprep.subr.bf16.mxu1 %v13377_v18  ;;  %v13385_v18 = vld [vmem:[#allocation40_spill] sm:$0xff] }
 0x43e   :  { %2043 = vmatpush2.bf16.msra.mxu0 %v13378_v21  ;;  %v13386_v21 = vld [vmem:[#allocation57_spill] sm:$0xff] }
 0x43f   :  { %2044 = vmatprep.subr.bf16.mxu0 %v9964_v44  ;;  %2128 = vmatpush2.bf16.msra.mxu1 %v9967_v46  ;;  %v13387_v44 = vld [vmem:[#allocation58_spill] sm:$0xff] }
 0x440   :  { %2129 = vmatprep.subr.bf16.mxu1 %v13379_v41  ;;  %v13388_v46 = vld [vmem:[#allocation42_spill] sm:$0xff]  ;;  %v13389_v41 = vld [vmem:[#allocation44_spill] sm:$0xff] }
 0x442   :  { %2045 = vmatpush2.bf16.msra.mxu0 %v13380_v57  ;;  %v13390_v57 = vld [vmem:[#allocation59_spill] sm:$0xff] }
 0x443   :  { %2140 = vmatprep.subr.bf16.mxu0 %v13381_v24  ;;  %2130 = vmatpush2.bf16.msra.mxu1 %v13382_v35  ;;  %v13391_v24 = vld [vmem:[#allocation46_spill] sm:$0xff]  ;;  %v13392_v35 = vld [vmem:[#allocation48_spill] sm:$0xff] }
 0x444   :  { %2181 = vmatprep.subr.bf16.mxu1 %v13383_v15  ;;  %v13393_v15 = vld [vmem:[#allocation107_spill] sm:$0xff] }
 0x445   :  { %2047 = vmatmul.mubr.bf16.vlgmr.msra.gmra.mxu0 %v10052_v32  ;;  %v13394_v32 = vld [vmem:[#allocation108_spill] sm:$0xff] }
 0x446   :  { %2141 = vmatpush1.bf16.msra.mxu0 %v13384_v42  ;;  %v13395_v42 = vld [vmem:[#allocation109_spill] sm:$0xff] }
 0x447   :  { %2142 = vmatprep.subr.bf16.mxu0 %v13385_v18  ;;  %v13396_v18 = vld [vmem:[#allocation110_spill] sm:$0xff] }
 0x44a   :  { %2143 = vmatpush1.bf16.msra.mxu0 %v13386_v21  ;;  %v13397_v21 = vld [vmem:[#allocation111_spill] sm:$0xff] }
 0x44b   :  { %2144 = vmatprep.subr.bf16.mxu0 %v13387_v44  ;;  %v13398_v44 = vld [vmem:[#allocation112_spill] sm:$0xff] }
 0x44e   :  { %2145 = vmatpush1.bf16.msra.mxu0 %v13388_v46  ;;  %v13399_v46 = vld [vmem:[#allocation113_spill] sm:$0xff] }
 0x44f   :  { %2146 = vmatprep.subr.bf16.mxu0 %v13389_v41  ;;  %v13400_v41 = vld [vmem:[#allocation114_spill] sm:$0xff] }
 0x452   :  { %2147 = vmatpush1.bf16.msra.mxu0 %v13390_v57  ;;  %v13401_v57 = vld [vmem:[#allocation115_spill] sm:$0xff] }
 0x453   :  { %2148 = vmatprep.subr.bf16.mxu0 %v13391_v24  ;;  %v13402_v24 = vld [vmem:[#allocation116_spill] sm:$0xff] }
 0x456   :  { %2149 = vmatpush1.bf16.msra.mxu0 %v13392_v35  ;;  %v13403_v35 = vld [vmem:[#allocation117_spill] sm:$0xff] }
 0x457   :  { %2150 = vmatprep.subr.bf16.mxu0 %v13393_v15  ;;  %v13404_v15 = vld [vmem:[#allocation118_spill] sm:$0xff] }
 0x45a   :  { %2151 = vmatpush1.bf16.msra.mxu0 %v13394_v32  ;;  %v13405_v32 = vld [vmem:[#allocation119_spill] sm:$0xff] }
 0x45b   :  { %2152 = vmatprep.subr.bf16.mxu0 %v13395_v42  ;;  %v13406_v42 = vld [vmem:[#allocation120_spill] sm:$0xff] }
 0x45e   :  { %2153 = vmatpush1.bf16.msra.mxu0 %v13396_v18  ;;  %v13407_v18 = vld [vmem:[#allocation121_spill] sm:$0xff] }
 0x45f   :  { %2154 = vmatprep.subr.bf16.mxu0 %v13397_v21  ;;  %v13408_v21 = vld [vmem:[#allocation140_spill] sm:$0xff] }
 0x462   :  { %2155 = vmatpush1.bf16.msra.mxu0 %v13398_v44  ;;  %v13409_v44 = vld [vmem:[#allocation141_spill] sm:$0xff] }
 0x463   :  { %2156 = vmatprep.subr.bf16.mxu0 %v13399_v46  ;;  %v13410_v46 = vld [vmem:[#allocation142_spill] sm:$0xff] }
 0x466   :  { %2157 = vmatpush2.bf16.msra.mxu0 %v13400_v41  ;;  %v13411_v41 = vld [vmem:[#allocation143_spill] sm:$0xff] }
 0x467   :  { %2158 = vmatprep.subr.bf16.mxu0 %v13401_v57  ;;  %v13412_v57 = vld [vmem:[#allocation144_spill] sm:$0xff] }
 0x46a   :  { %2159 = vmatpush2.bf16.msra.mxu0 %v13402_v24  ;;  %v13413_v24 = vld [vmem:[#allocation145_spill] sm:$0xff] }
 0x46b   :  { %2160 = vmatprep.subr.bf16.mxu0 %v13403_v35  ;;  %v13414_v35 = vld [vmem:[#allocation146_spill] sm:$0xff] }
 0x46e   :  { %2161 = vmatpush2.bf16.msra.mxu0 %v13404_v15  ;;  %v13415_v15 = vld [vmem:[#allocation41_spill] sm:$0xff] }
 0x46f   :  { %2162 = vmatprep.subr.bf16.mxu0 %v13405_v32 }
 0x472   :  { %2163 = vmatpush2.bf16.msra.mxu0 %v13406_v42 }
 0x473   :  { %2164 = vmatprep.subr.bf16.mxu0 %v13407_v18 }
 0x476   :  { %2165 = vmatpush2.bf16.msra.mxu0 %v13408_v21 }
 0x477   :  { %2166 = vmatprep.subr.bf16.mxu0 %v13409_v44 }
 0x47a   :  { %2167 = vmatpush2.bf16.msra.mxu0 %v13410_v46 }
 0x47b   :  { %2168 = vmatprep.subr.bf16.mxu0 %v13411_v41 }
 0x47e   :  { %2169 = vmatpush2.bf16.msra.mxu0 %v13412_v57 }
 0x47f   :  { %2170 = vmatprep.subr.bf16.mxu0 %v13413_v24 }
 0x482   :  { %2171 = vmatpush2.bf16.msra.mxu0 %v13414_v35 }
 0x483   :  { %2266 = vmatprep.subr.bf16.mxu0 %v13415_v15 }
 0x4c5   :  { %v1966_v32 = vpop.f32.mrf.mxu0  ;;  %v2007_v42 = vpop.f32.mrf.mxu1 }
 0x4c6   :  { %v1967_v46 = vadd.f32 %v1966_v32, %v13416_v37  ;;  %v2008_v15 = vadd.f32 %v2007_v42, %v9579_v63 }
 0x4c7   :  { %v1968_v8 = vpop.f32.mrf.mxu0  ;;  %v2009_v18 = vpop.f32.mrf.mxu1 }
 0x4c8   :  { %v1969_v41 = vadd.f32 %v1968_v8, %v9568_v47  ;;  %v2055_v57 = vadd.f32 %v1967_v46, %v13417_v9  ;;  %v2010_v13 = vadd.f32 %v2009_v18, %v9582_v7 }
 0x4c9   :  { %v1970_v25 = vpop.f32.mrf.mxu0  ;;  %v2011_v21 = vpop.f32.mrf.mxu1 }
 0x4ca   :  { %v2056_v24 = vadd.f32 %v1969_v41, %v13418_v62  ;;  %v7012_v45 = vmul.f32 -1.442695, %v2055_v57  ;;  %v13419_v25 = vld [vmem:[#allocation74_spill] sm:$0xff] }
 0x4cb   :  { %v1971_v2 = vpop.f32.mrf.mxu0  ;;  %v2012_v44 = vpop.f32.mrf.mxu1  ;;  %v2057_v21 = vadd.f32 %v2008_v15, %v13419_v25 }
 0x4cc   :  { %v7013_v35 = vmul.f32 -1.442695, %v2056_v24  ;;  %7570 = vpow2.f32 %v7012_v45  ;;  %v13420_v2 = vld [vmem:[#allocation77_spill] sm:$0xff] }
 0x4cd   :  { %v2058_v44 = vadd.f32 %v2010_v13, %v13420_v2  ;;  %v7014_v51 = vmul.f32 -1.442695, %v2057_v21 }
 0x4ce   :  { %7572 = vpow2.f32 %v7013_v35 }
 0x4cf   :  { %v7015_v32 = vmul.f32 -1.442695, %v2058_v44  ;;  %7574 = vpow2.f32 %v7014_v51 }
 0x4d1   :  { %7576 = vpow2.f32 %v7015_v32  ;;  %v13422_v32 = vld [vmem:[#allocation79_spill] sm:$0xff] }
 0x4d9   :  { %v7571_v37 = vpop.eup %7570 }
 0x4da   :  { %v2071_v46 = vadd.f32 1.0, %v7571_v37  ;;  %v13421_v37 = vld [vmem:[#allocation78_spill] sm:$0xff] }
 0x4db   :  { %v7573_v8 = vpop.eup %7572 }
 0x4dc   :  { %v2072_v9 = vadd.f32 1.0, %v7573_v8  ;;  %7578 = vrcp.f32 %v2071_v46  ;;  %v7575_v45 = vpop.eup %7574 }
 0x4dd   :  { %v2073_v42 = vadd.f32 1.0, %v7575_v45 }
 0x4de   :  { %7580 = vrcp.f32 %v2072_v9  ;;  %v7577_v62 = vpop.eup %7576 }
 0x4df   :  { %v2074_v57 = vadd.f32 1.0, %v7577_v62  ;;  %7582 = vrcp.f32 %v2073_v42 }
 0x4e1   :  { %7584 = vrcp.f32 %v2074_v57 }
 0x4e9   :  { %v7579_v15 = vpop.eup %7578 }
 0x4eb   :  { %v7581_v51 = vpop.eup %7580 }
 0x4ec   :  { %v7583_v46 = vpop.eup %7582 }
 0x4ed   :  { %v2089_v45 = vsub.f32 1.0, %v7583_v46 }
 0x4ee   :  { %v7585_v9 = vpop.eup %7584 }
 0x4ef   :  { %v2094_v57 = vmul.f32 %v7585_v9, %v10046_v48 }
 0x505   :  { %v2048_v41 = vpop.f32.mrf.mxu0 }
 0x506   :  { %v2049_v18 = vadd.f32 %v2048_v41, %v9593_v38  ;;  %v2090_v41 = vsub.f32 1.0, %v7585_v9  ;;  %v13450_v9 = vld [vmem:[#allocation138_spill] sm:$0xff] }
 0x507   :  { %v2050_v24 = vpop.f32.mrf.mxu0 }
 0x508   :  { %v2083_v13 = vmul.f32 %v7579_v15, %v2049_v18  ;;  %v2051_v35 = vadd.f32 %v2050_v24, %v9596_v55  ;;  %v2093_v18 = vmul.f32 %v7583_v46, %v10044_v17  ;;  %v13449_v46 = vld [vmem:[#allocation56_spill] sm:$0xff] }
 0x509   :  { %v2052_v25 = vpop.f32.mrf.mxu0 }
 0x50a   :  { %v2085_v21 = vadd.f32 %v2083_v13, %v13421_v37  ;;  %v2084_v2 = vmul.f32 %v7581_v51, %v2051_v35  ;;  %v13443_v37 = vld [vmem:[#allocation132_spill] sm:$0xff] }
 0x50b   :  { %v2053_v44 = vpop.f32.mrf.mxu0 }
 0x50c   :  { %7586 = vtanh.f32 %v2085_v21  ;;  %v2086_v8 = vadd.f32 %v2084_v2, %v13422_v32  ;;  %v13444_v21 = vld [vmem:[#allocation133_spill] sm:$0xff]  ;;  %v13445_v2 = vld [vmem:[#allocation134_spill] sm:$0xff]  ;;  %v13446_v44 = vld [vmem:[#allocation135_spill] sm:$0xff] }
 0x50d   :  { %v13447_v32 = vld [vmem:[#allocation136_spill] sm:$0xff] }
 0x50e   :  { %7588 = vtanh.f32 %v2086_v8  ;;  %v13448_v8 = vld [vmem:[#allocation137_spill] sm:$0xff] }
 0x519   :  { %v7587_v62 = vpop.eup %7586 }
 0x51a   :  { %v2091_v42 = vmul.f32 %v7587_v62, %v2089_v45  ;;  %v13451_v45 = vld [vmem:[#allocation139_spill] sm:$0xff]  ;;  %v13452_v62 = vld [vmem:[#allocation38_spill] sm:$0xff] }
 0x51b   :  { %v7589_v15 = vpop.eup %7588 }
 0x51c   :  { %v2092_v24 = vmul.f32 %v7589_v15, %v2090_v41  ;;  %v10167_v25 = vadd.f32 %v2093_v18, %v2091_v42  ;;  %v13453_v41 = vld [vmem:[#allocation40_spill] sm:$0xff]  ;;  %v13454_v42 = vld [vmem:[#allocation57_spill] sm:$0xff]  ;;  %v13455_v18 = vld [vmem:[#allocation58_spill] sm:$0xff] }
 0x51d   :  { %v13456_v15 = vld [vmem:[#allocation42_spill] sm:$0xff] }
 0x51e   :  { %13423 = vst [vmem:[#allocation68_spill] sm:$0xff] %v10167_v25  ;;  %v10169_v13 = vadd.f32 %v2094_v57, %v2092_v24  ;;  %v10175_v51 = vpack.c.bf16 %v10167_v25, %v10167_v25  ;;  %v13457_v24 = vld [vmem:[#allocation44_spill] sm:$0xff]  ;;  %v13458_v57 = vld [vmem:[#allocation59_spill] sm:$0xff] }
 0x520   :  { %13424 = vst [vmem:[#allocation71_spill] sm:$0xff] %v10169_v13  ;;  %v2098_v35 = vpack.c.bf16 %v10169_v13, %v10169_v13 }
 0x522   :  { %2131 = vmatprep.mubr.bf16.mxu1 %v2098_v35  ;;  %2172 = vmatprep.mubr.bf16.mxu0 %v2098_v35 }
 0x523   :  { %2132 = vmatmul.mubr.bf16.vlgmr.msra.gmra.mxu1 %v10175_v51  ;;  %2173 = vmatmul.mubr.bf16.vlgmr.msra.gmra.mxu0 %v10175_v51 }
 0x524   :  { %2182 = vmatpush1.bf16.msra.mxu1 %v9835_v5  ;;  %2213 = vmatprep.mubr.bf16.mxu1 %v2098_v35  ;;  %v13459_v35 = vld [vmem:[#allocation46_spill] sm:$0xff] }
 0x525   :  { %2183 = vmatprep.subr.bf16.mxu1 %v9838_v52  ;;  %2267 = vmatpush1.bf16.msra.mxu0 %v9620_v22  ;;  %v13425_v22 = vld [vmem:[#allocation53_spill] sm:$0xff] }
 0x526   :  { %2268 = vmatprep.subr.bf16.mxu0 %v9623_v61  ;;  %v13426_v61 = vld [vmem:[#allocation52_spill] sm:$0xff] }
 0x528   :  { %2184 = vmatpush1.bf16.msra.mxu1 %v9843_v43 }
 0x529   :  { %2185 = vmatprep.subr.bf16.mxu1 %v9846_v58  ;;  %2269 = vmatpush1.bf16.msra.mxu0 %v9628_v23  ;;  %v13427_v23 = vld [vmem:[#allocation54_spill] sm:$0xff] }
 0x52a   :  { %2270 = vmatprep.subr.bf16.mxu0 %v9631_v53  ;;  %v13428_v53 = vld [vmem:[#allocation64_spill] sm:$0xff] }
 0x52c   :  { %2186 = vmatpush1.bf16.msra.mxu1 %v9851_v12 }
 0x52d   :  { %2187 = vmatprep.subr.bf16.mxu1 %v9854_v20  ;;  %2271 = vmatpush1.bf16.msra.mxu0 %v9636_v31  ;;  %v13429_v31 = vld [vmem:[#allocation67_spill] sm:$0xff] }
 0x52e   :  { %2272 = vmatprep.subr.bf16.mxu0 %v9639_v26  ;;  %v13430_v26 = vld [vmem:[#allocation55_spill] sm:$0xff] }
 0x530   :  { %2188 = vmatpush1.bf16.msra.mxu1 %v9859_v14 }
 0x531   :  { %2189 = vmatprep.subr.bf16.mxu1 %v9862_v54  ;;  %2273 = vmatpush1.bf16.msra.mxu0 %v9644_v49  ;;  %v13431_v49 = vld [vmem:[#allocation65_spill] sm:$0xff] }
 0x532   :  { %2274 = vmatprep.subr.bf16.mxu0 %v9647_v3  ;;  %v13432_v3 = vld [vmem:[#allocation70_spill] sm:$0xff] }
 0x534   :  { %2190 = vmatpush1.bf16.msra.mxu1 %v9867_v50 }
 0x535   :  { %2191 = vmatprep.subr.bf16.mxu1 %v9870_v1  ;;  %2275 = vmatpush1.bf16.msra.mxu0 %v9652_v29  ;;  %v13433_v29 = vld [vmem:[#allocation122_spill] sm:$0xff] }
 0x536   :  { %2276 = vmatprep.subr.bf16.mxu0 %v9655_v19  ;;  %v13434_v19 = vld [vmem:[#allocation123_spill] sm:$0xff] }
 0x538   :  { %2192 = vmatpush1.bf16.msra.mxu1 %v9875_v28 }
 0x539   :  { %2193 = vmatprep.subr.bf16.mxu1 %v9878_v60  ;;  %2277 = vmatpush1.bf16.msra.mxu0 %v9660_v27  ;;  %v13435_v27 = vld [vmem:[#allocation124_spill] sm:$0xff] }
 0x53a   :  { %2278 = vmatprep.subr.bf16.mxu0 %v9663_v30  ;;  %v13436_v30 = vld [vmem:[#allocation125_spill] sm:$0xff] }
 0x53c   :  { %2194 = vmatpush1.bf16.msra.mxu1 %v9883_v16 }
 0x53d   :  { %2195 = vmatprep.subr.bf16.mxu1 %v9886_v0  ;;  %2279 = vmatpush1.bf16.msra.mxu0 %v9668_v34  ;;  %v13437_v34 = vld [vmem:[#allocation126_spill] sm:$0xff] }
 0x53e   :  { %2280 = vmatprep.subr.bf16.mxu0 %v9671_v33  ;;  %v13438_v33 = vld [vmem:[#allocation127_spill] sm:$0xff] }
 0x540   :  { %2196 = vmatpush1.bf16.msra.mxu1 %v9891_v56 }
 0x541   :  { %2197 = vmatprep.subr.bf16.mxu1 %v9894_v59  ;;  %2281 = vmatpush1.bf16.msra.mxu0 %v9676_v36  ;;  %v13439_v36 = vld [vmem:[#allocation128_spill] sm:$0xff] }
 0x542   :  { %2282 = vmatprep.subr.bf16.mxu0 %v9679_v39  ;;  %v13440_v39 = vld [vmem:[#allocation129_spill] sm:$0xff] }
 0x544   :  { %2198 = vmatpush2.bf16.msra.mxu1 %v13357_v4 }
 0x545   :  { %2199 = vmatprep.subr.bf16.mxu1 %v13358_v11  ;;  %2283 = vmatpush2.bf16.msra.mxu0 %v9684_v40  ;;  %v13441_v40 = vld [vmem:[#allocation130_spill] sm:$0xff] }
 0x546   :  { %2284 = vmatprep.subr.bf16.mxu0 %v13359_v10  ;;  %v13442_v10 = vld [vmem:[#allocation131_spill] sm:$0xff] }
 0x548   :  { %2200 = vmatpush2.bf16.msra.mxu1 %v13360_v6 }
 0x549   :  { %2201 = vmatprep.subr.bf16.mxu1 %v13425_v22  ;;  %2285 = vmatpush2.bf16.msra.mxu0 %v13426_v61  ;;  %v13460_v61 = vld [vmem:[#allocation48_spill] sm:$0xff] }
 0x54a   :  { %2286 = vmatprep.subr.bf16.mxu0 %v13427_v23  ;;  %v13461_v23 = vld [vmem:[#allocation107_spill] sm:$0xff] }
 0x54c   :  { %2202 = vmatpush2.bf16.msra.mxu1 %v13428_v53 }
 0x54d   :  { %2203 = vmatprep.subr.bf16.mxu1 %v13429_v31  ;;  %2287 = vmatpush2.bf16.msra.mxu0 %v13430_v26  ;;  %v13463_v26 = vld [vmem:[#allocation109_spill] sm:$0xff] }
 0x54e   :  { %2288 = vmatprep.subr.bf16.mxu0 %v13431_v49 }
 0x550   :  { %2204 = vmatpush2.bf16.msra.mxu1 %v13432_v3 }
 0x551   :  { %2205 = vmatprep.subr.bf16.mxu1 %v13433_v29  ;;  %2289 = vmatpush2.bf16.msra.mxu0 %v13434_v19 }
 0x552   :  { %2290 = vmatprep.subr.bf16.mxu0 %v13435_v27 }
 0x554   :  { %2206 = vmatpush2.bf16.msra.mxu1 %v13436_v30 }
 0x555   :  { %2207 = vmatprep.subr.bf16.mxu1 %v13437_v34  ;;  %2291 = vmatpush2.bf16.msra.mxu0 %v13438_v33 }
 0x556   :  { %2292 = vmatprep.subr.bf16.mxu0 %v13439_v36 }
 0x558   :  { %2208 = vmatpush2.bf16.msra.mxu1 %v13440_v39 }
 0x559   :  { %2209 = vmatprep.subr.bf16.mxu1 %v13441_v40  ;;  %2293 = vmatpush2.bf16.msra.mxu0 %v13442_v10 }
 0x55a   :  { %2294 = vmatprep.subr.bf16.mxu0 %v13443_v37 }
 0x55c   :  { %2210 = vmatpush2.bf16.msra.mxu1 %v13444_v21 }
 0x55d   :  { %2211 = vmatprep.subr.bf16.mxu1 %v13445_v2  ;;  %2295 = vmatpush2.bf16.msra.mxu0 %v13446_v44 }
 0x55e   :  { %2296 = vmatprep.subr.bf16.mxu0 %v13447_v32 }
 0x560   :  { %2212 = vmatpush2.bf16.msra.mxu1 %v13448_v8 }
 0x561   :  { %2307 = vmatprep.subr.bf16.mxu1 %v13449_v46  ;;  %2297 = vmatpush2.bf16.msra.mxu0 %v13450_v9  ;;  %v13464_v46 = vld [vmem:[#allocation110_spill] sm:$0xff] }
 0x562   :  { %2348 = vmatprep.subr.bf16.mxu0 %v13451_v45  ;;  %v13485_v45 = vld [vmem:[#allocation80_spill] sm:$0xff]  ;;  %v13486_v9 = vld [vmem:[#allocation82_spill] sm:$0xff] }
 0x563   :  { %2214 = vmatmul.mubr.bf16.vlgmr.msra.gmra.mxu1 %v10175_v51  ;;  %v13462_v51 = vld [vmem:[#allocation108_spill] sm:$0xff] }
 0x564   :  { %2308 = vmatpush1.bf16.msra.mxu1 %v13452_v62  ;;  %v13465_v62 = vld [vmem:[#allocation111_spill] sm:$0xff] }
 0x565   :  { %2309 = vmatprep.subr.bf16.mxu1 %v13453_v41  ;;  %v13466_v41 = vld [vmem:[#allocation112_spill] sm:$0xff] }
 0x568   :  { %2310 = vmatpush1.bf16.msra.mxu1 %v13454_v42  ;;  %v13467_v42 = vld [vmem:[#allocation113_spill] sm:$0xff] }
 0x569   :  { %2311 = vmatprep.subr.bf16.mxu1 %v13455_v18  ;;  %v13468_v18 = vld [vmem:[#allocation114_spill] sm:$0xff] }
 0x56c   :  { %2312 = vmatpush1.bf16.msra.mxu1 %v13456_v15  ;;  %v13469_v15 = vld [vmem:[#allocation115_spill] sm:$0xff] }
 0x56d   :  { %2313 = vmatprep.subr.bf16.mxu1 %v13457_v24  ;;  %v13470_v24 = vld [vmem:[#allocation116_spill] sm:$0xff] }
 0x570   :  { %2314 = vmatpush1.bf16.msra.mxu1 %v13458_v57  ;;  %v13471_v57 = vld [vmem:[#allocation117_spill] sm:$0xff] }
 0x571   :  { %2315 = vmatprep.subr.bf16.mxu1 %v13459_v35  ;;  %v13472_v35 = vld [vmem:[#allocation118_spill] sm:$0xff] }
 0x574   :  { %2316 = vmatpush1.bf16.msra.mxu1 %v13460_v61  ;;  %v13473_v61 = vld [vmem:[#allocation119_spill] sm:$0xff] }
 0x575   :  { %2317 = vmatprep.subr.bf16.mxu1 %v13461_v23  ;;  %v13474_v23 = vld [vmem:[#allocation120_spill] sm:$0xff] }
 0x578   :  { %2318 = vmatpush1.bf16.msra.mxu1 %v13462_v51  ;;  %v13475_v51 = vld [vmem:[#allocation121_spill] sm:$0xff] }
 0x579   :  { %2319 = vmatprep.subr.bf16.mxu1 %v13463_v26  ;;  %v13476_v26 = vld [vmem:[#allocation140_spill] sm:$0xff] }
 0x57c   :  { %2320 = vmatpush1.bf16.msra.mxu1 %v13464_v46  ;;  %v13477_v46 = vld [vmem:[#allocation141_spill] sm:$0xff] }
 0x57d   :  { %2321 = vmatprep.subr.bf16.mxu1 %v13465_v62  ;;  %v13478_v62 = vld [vmem:[#allocation142_spill] sm:$0xff] }
 0x580   :  { %2322 = vmatpush1.bf16.msra.mxu1 %v13466_v41  ;;  %v13479_v41 = vld [vmem:[#allocation143_spill] sm:$0xff] }
 0x581   :  { %2323 = vmatprep.subr.bf16.mxu1 %v13467_v42  ;;  %v13480_v42 = vld [vmem:[#allocation144_spill] sm:$0xff] }
 0x584   :  { %2324 = vmatpush2.bf16.msra.mxu1 %v13468_v18  ;;  %v13481_v18 = vld [vmem:[#allocation145_spill] sm:$0xff] }
 0x585   :  { %2325 = vmatprep.subr.bf16.mxu1 %v13469_v15  ;;  %v13482_v15 = vld [vmem:[#allocation146_spill] sm:$0xff] }
 0x588   :  { %2326 = vmatpush2.bf16.msra.mxu1 %v13470_v24  ;;  %v13483_v24 = vld [vmem:[#allocation41_spill] sm:$0xff] }
 0x589   :  { %2327 = vmatprep.subr.bf16.mxu1 %v13471_v57 }
 0x58c   :  { %2328 = vmatpush2.bf16.msra.mxu1 %v13472_v35 }
 0x58d   :  { %2329 = vmatprep.subr.bf16.mxu1 %v13473_v61 }
 0x590   :  { %2330 = vmatpush2.bf16.msra.mxu1 %v13474_v23 }
 0x591   :  { %2331 = vmatprep.subr.bf16.mxu1 %v13475_v51 }
 0x594   :  { %2332 = vmatpush2.bf16.msra.mxu1 %v13476_v26  ;;  %v13484_v26 = vld [vmem:[#allocation104_spill] sm:$0xff] }
 0x595   :  { %2333 = vmatprep.subr.bf16.mxu1 %v13477_v46 }
 0x598   :  { %2334 = vmatpush2.bf16.msra.mxu1 %v13478_v62 }
 0x599   :  { %2335 = vmatprep.subr.bf16.mxu1 %v13479_v41 }
 0x59c   :  { %2336 = vmatpush2.bf16.msra.mxu1 %v13480_v42 }
 0x59d   :  { %2337 = vmatprep.subr.bf16.mxu1 %v13481_v18 }
 0x5a0   :  { %2338 = vmatpush2.bf16.msra.mxu1 %v13482_v15 }
 0x5a1   :  { %2433 = vmatprep.subr.bf16.mxu1 %v13483_v24 }
 0x5e3   :  { %v2133_v57 = vpop.f32.mrf.mxu1  ;;  %v2174_v35 = vpop.f32.mrf.mxu0 }
 0x5e4   :  { %v2134_v62 = vadd.f32 %v2133_v57, %v13484_v26  ;;  %v2175_v24 = vadd.f32 %v2174_v35, %v9579_v63 }
 0x5e5   :  { %v2135_v61 = vpop.f32.mrf.mxu1  ;;  %v2176_v23 = vpop.f32.mrf.mxu0 }
 0x5e6   :  { %v2136_v41 = vadd.f32 %v2135_v61, %v9568_v47  ;;  %v2222_v42 = vadd.f32 %v2134_v62, %v13485_v45  ;;  %v2177_v32 = vadd.f32 %v2176_v23, %v9582_v7 }
 0x5e7   :  { %v2137_v51 = vpop.f32.mrf.mxu1  ;;  %v2178_v48 = vpop.f32.mrf.mxu0 }
 0x5e8   :  { %v2223_v18 = vadd.f32 %v2136_v41, %v13486_v9  ;;  %v7016_v8 = vmul.f32 -1.442695, %v2222_v42  ;;  %v13487_v51 = vld [vmem:[#allocation81_spill] sm:$0xff] }
 0x5e9   :  { %v2138_v17 = vpop.f32.mrf.mxu1  ;;  %v2179_v46 = vpop.f32.mrf.mxu0  ;;  %v2224_v48 = vadd.f32 %v2175_v24, %v13487_v51 }
 0x5ea   :  { %v7017_v15 = vmul.f32 -1.442695, %v2223_v18  ;;  %7590 = vpow2.f32 %v7016_v8  ;;  %v13488_v17 = vld [vmem:[#allocation83_spill] sm:$0xff] }
 0x5eb   :  { %v2225_v46 = vadd.f32 %v2177_v32, %v13488_v17  ;;  %v7018_v44 = vmul.f32 -1.442695, %v2224_v48 }
 0x5ec   :  { %7592 = vpow2.f32 %v7017_v15 }
 0x5ed   :  { %v7019_v57 = vmul.f32 -1.442695, %v2225_v46  ;;  %7594 = vpow2.f32 %v7018_v44 }
 0x5ef   :  { %7596 = vpow2.f32 %v7019_v57  ;;  %v13490_v57 = vld [vmem:[#allocation85_spill] sm:$0xff] }
 0x5f7   :  { %v7591_v26 = vpop.eup %7590 }
 0x5f8   :  { %v2238_v45 = vadd.f32 1.0, %v7591_v26  ;;  %v13489_v26 = vld [vmem:[#allocation84_spill] sm:$0xff] }
 0x5f9   :  { %v7593_v61 = vpop.eup %7592 }
 0x5fa   :  { %v2239_v9 = vadd.f32 1.0, %v7593_v61  ;;  %7598 = vrcp.f32 %v2238_v45  ;;  %v7595_v8 = vpop.eup %7594 }
 0x5fb   :  { %v2240_v41 = vadd.f32 1.0, %v7595_v8 }
 0x5fc   :  { %7600 = vrcp.f32 %v2239_v9  ;;  %v7597_v62 = vpop.eup %7596 }
 0x5fd   :  { %v2241_v18 = vadd.f32 1.0, %v7597_v62  ;;  %7602 = vrcp.f32 %v2240_v41 }
 0x5ff   :  { %7604 = vrcp.f32 %v2241_v18 }
 0x607   :  { %v7599_v35 = vpop.eup %7598 }
 0x609   :  { %v7601_v44 = vpop.eup %7600 }
 0x60a   :  { %v7603_v45 = vpop.eup %7602 }
 0x60b   :  { %v2256_v8 = vsub.f32 1.0, %v7603_v45 }
 0x60c   :  { %v7605_v9 = vpop.eup %7604 }
 0x60d   :  { %v2261_v18 = vmul.f32 %v7605_v9, %v10169_v13 }
 0x623   :  { %v2215_v42 = vpop.f32.mrf.mxu1 }
 0x624   :  { %v2216_v15 = vadd.f32 %v2215_v42, %v9593_v38  ;;  %v2257_v42 = vsub.f32 1.0, %v7605_v9  ;;  %v10462_v9 = vld [vmem:[#allocation10 + $0x2ac] ss:$24 sps:$4 sm:$0xff]  }
 0x625   :  { %v2217_v23 = vpop.f32.mrf.mxu1  ;;  %13498 = vst [vmem:[#allocation47_spill] sm:$0xff] %v10462_v9 }
 0x626   :  { %v2250_v32 = vmul.f32 %v7599_v35, %v2216_v15  ;;  %v2218_v24 = vadd.f32 %v2217_v23, %v9596_v55  ;;  %v2260_v15 = vmul.f32 %v7603_v45, %v10167_v25  ;;  %v10459_v45 = vld [vmem:[#allocation10 + $0x2d8] ss:$24 sps:$4 sm:$0xff]  }
 0x627   :  { %v2219_v51 = vpop.f32.mrf.mxu1  ;;  %13497 = vst [vmem:[#allocation75_spill] sm:$0xff] %v10459_v45 }
 0x628   :  { %v2252_v48 = vadd.f32 %v2250_v32, %v13489_v26  ;;  %v2251_v17 = vmul.f32 %v7601_v44, %v2218_v24  ;;  %v10304_v26 = vld [vmem:[#allocation10 + $0x150] ss:$24 sps:$4 sm:$0xff]  }
 0x629   :  { %v2220_v46 = vpop.f32.mrf.mxu1 }
 0x62a   :  { %7606 = vtanh.f32 %v2252_v48  ;;  %v2253_v61 = vadd.f32 %v2251_v17, %v13490_v57  ;;  %v10307_v48 = vld [vmem:[#allocation10 + $0x124] ss:$24 sps:$4 sm:$0xff]   ;;  %v10312_v17 = vld [vmem:[#allocation10 + $0x120] ss:$24 sps:$4 sm:$0xff]  }
 0x62b   :  { %v10323_v46 = vld [vmem:[#allocation10 + $0xc4] ss:$24 sps:$4 sm:$0xff]   ;;  %v10453_v57 = vld [vmem:[#allocation10 + $0x8] ss:$24 sps:$4 sm:$0xff]  }
 0x62c   :  { %7608 = vtanh.f32 %v2253_v61  ;;  %v10456_v61 = vld [vmem:[#allocation10 + $0x2dc] ss:$24 sps:$4 sm:$0xff]  }
 0x62d   :  { %13496 = vst [vmem:[#allocation73_spill] sm:$0xff] %v10456_v61 }
 0x637   :  { %v7607_v62 = vpop.eup %7606 }
 0x638   :  { %v2258_v41 = vmul.f32 %v7607_v62, %v2256_v8  ;;  %v10465_v8 = vld [vmem:[#allocation10 + $0x2a8] ss:$24 sps:$4 sm:$0xff]   ;;  %v10468_v62 = vld [vmem:[#allocation10 + $0x27c] ss:$24 sps:$4 sm:$0xff]  }
 0x639   :  { %v7609_v35 = vpop.eup %7608  ;;  %13499 = vst [vmem:[#allocation49_spill] sm:$0xff] %v10465_v8  ;;  %13500 = vst [vmem:[#allocation50_spill] sm:$0xff] %v10468_v62 }
 0x63a   :  { %v2259_v23 = vmul.f32 %v7609_v35, %v2257_v42  ;;  %v10290_v51 = vadd.f32 %v2260_v15, %v2258_v41  ;;  %v10471_v42 = vld [vmem:[#allocation10 + $0x278] ss:$24 sps:$4 sm:$0xff]   ;;  %v10474_v41 = vld [vmem:[#allocation10 + $0x24c] ss:$24 sps:$4 sm:$0xff]   ;;  %v10477_v15 = vld [vmem:[#allocation10 + $0x248] ss:$24 sps:$4 sm:$0xff]  }
 0x63b   :  { %13501 = vst [vmem:[#allocation51_spill] sm:$0xff] %v10471_v42  ;;  %13502 = vst [vmem:[#allocation72_spill] sm:$0xff] %v10474_v41  ;;  %v10480_v35 = vld [vmem:[#allocation10 + $0x21c] ss:$24 sps:$4 sm:$0xff]  }
 0x63c   :  { %v10292_v32 = vadd.f32 %v2261_v18, %v2259_v23  ;;  %v10298_v44 = vpack.c.bf16 %v10290_v51, %v10290_v51  ;;  %13503 = vst [vmem:[#allocation76_spill] sm:$0xff] %v10477_v15  ;;  %13504 = vst [vmem:[#allocation74_spill] sm:$0xff] %v10480_v35  ;;  %v13505_v23 = vld [vmem:[#allocation140_spill] sm:$0xff]  ;;  %v13506_v18 = vld [vmem:[#allocation141_spill] sm:$0xff] }
 0x63e   :  { %v2265_v24 = vpack.c.bf16 %v10292_v32, %v10292_v32 }
 0x640   :  { %2298 = vmatprep.mubr.bf16.mxu0 %v2265_v24  ;;  %2339 = vmatprep.mubr.bf16.mxu1 %v2265_v24 }
 0x641   :  { %2299 = vmatmul.mubr.bf16.vlgmr.msra.gmra.mxu0 %v10298_v44  ;;  %2340 = vmatmul.mubr.bf16.vlgmr.msra.gmra.mxu1 %v10298_v44 }
 0x642   :  { %2349 = vmatpush1.bf16.msra.mxu0 %v9835_v5  ;;  %2380 = vmatprep.mubr.bf16.mxu0 %v2265_v24  ;;  %v10315_v5 = vld [vmem:[#allocation10 + $0xf4] ss:$24 sps:$4 sm:$0xff]   ;;  %v13507_v24 = vld [vmem:[#allocation142_spill] sm:$0xff] }
 0x643   :  { %2350 = vmatprep.subr.bf16.mxu0 %v9838_v52  ;;  %2434 = vmatpush1.bf16.msra.mxu1 %v10304_v26  ;;  %v10320_v52 = vld [vmem:[#allocation10 + $0xf0] ss:$24 sps:$4 sm:$0xff]  }
 0x644   :  { %2435 = vmatprep.subr.bf16.mxu1 %v10307_v48 }
 0x646   :  { %2351 = vmatpush1.bf16.msra.mxu0 %v9843_v43  ;;  %v10328_v43 = vld [vmem:[#allocation10 + $0xc0] ss:$24 sps:$4 sm:$0xff]  }
 0x647   :  { %2352 = vmatprep.subr.bf16.mxu0 %v9846_v58  ;;  %2436 = vmatpush1.bf16.msra.mxu1 %v10312_v17  ;;  %v10331_v58 = vld [vmem:[#allocation10 + $0x94] ss:$24 sps:$4 sm:$0xff]  }
 0x648   :  { %2437 = vmatprep.subr.bf16.mxu1 %v10315_v5 }
 0x64a   :  { %2353 = vmatpush1.bf16.msra.mxu0 %v9851_v12  ;;  %v10336_v12 = vld [vmem:[#allocation10 + $0x90] ss:$24 sps:$4 sm:$0xff]  }
 0x64b   :  { %2354 = vmatprep.subr.bf16.mxu0 %v9854_v20  ;;  %2438 = vmatpush1.bf16.msra.mxu1 %v10320_v52  ;;  %v10339_v20 = vld [vmem:[#allocation10 + $0x64] ss:$24 sps:$4 sm:$0xff]  }
 0x64c   :  { %2439 = vmatprep.subr.bf16.mxu1 %v10323_v46 }
 0x64e   :  { %2355 = vmatpush1.bf16.msra.mxu0 %v9859_v14  ;;  %v10344_v14 = vld [vmem:[#allocation10 + $0x60] ss:$24 sps:$4 sm:$0xff]  }
 0x64f   :  { %2356 = vmatprep.subr.bf16.mxu0 %v9862_v54  ;;  %2440 = vmatpush1.bf16.msra.mxu1 %v10328_v43  ;;  %v10347_v54 = vld [vmem:[#allocation10 + $0x34] ss:$24 sps:$4 sm:$0xff]  }
 0x650   :  { %2441 = vmatprep.subr.bf16.mxu1 %v10331_v58 }
 0x652   :  { %2357 = vmatpush1.bf16.msra.mxu0 %v9867_v50  ;;  %v10352_v50 = vld [vmem:[#allocation10 + $0x30] ss:$24 sps:$4 sm:$0xff]  }
 0x653   :  { %2358 = vmatprep.subr.bf16.mxu0 %v9870_v1  ;;  %2442 = vmatpush1.bf16.msra.mxu1 %v10336_v12  ;;  %v10355_v1 = vld [vmem:[#allocation10 + $0x4] ss:$24 sps:$4 sm:$0xff]  }
 0x654   :  { %2443 = vmatprep.subr.bf16.mxu1 %v10339_v20 }
 0x656   :  { %2359 = vmatpush1.bf16.msra.mxu0 %v9875_v28  ;;  %v10360_v28 = vld [vmem:[#allocation10] ss:$24 sps:$4 sm:$0xff]  }
 0x657   :  { %2360 = vmatprep.subr.bf16.mxu0 %v9878_v60  ;;  %2444 = vmatpush1.bf16.msra.mxu1 %v10344_v14  ;;  %v10363_v60 = vld [vmem:[#allocation10 + $0x2d4] ss:$24 sps:$4 sm:$0xff]  }
 0x658   :  { %2445 = vmatprep.subr.bf16.mxu1 %v10347_v54 }
 0x65a   :  { %2361 = vmatpush1.bf16.msra.mxu0 %v9883_v16  ;;  %v10368_v16 = vld [vmem:[#allocation10 + $0x2d0] ss:$24 sps:$4 sm:$0xff]  }
 0x65b   :  { %2362 = vmatprep.subr.bf16.mxu0 %v9886_v0  ;;  %2446 = vmatpush1.bf16.msra.mxu1 %v10352_v50  ;;  %v10371_v0 = vld [vmem:[#allocation10 + $0x2a4] ss:$24 sps:$4 sm:$0xff]  }
 0x65c   :  { %2447 = vmatprep.subr.bf16.mxu1 %v10355_v1 }
 0x65e   :  { %2363 = vmatpush1.bf16.msra.mxu0 %v9891_v56  ;;  %v10376_v56 = vld [vmem:[#allocation10 + $0x2a0] ss:$24 sps:$4 sm:$0xff]  }
 0x65f   :  { %2364 = vmatprep.subr.bf16.mxu0 %v9894_v59  ;;  %2448 = vmatpush1.bf16.msra.mxu1 %v10360_v28  ;;  %v10379_v59 = vld [vmem:[#allocation10 + $0x274] ss:$24 sps:$4 sm:$0xff]  }
 0x660   :  { %2449 = vmatprep.subr.bf16.mxu1 %v10363_v60 }
 0x662   :  { %2365 = vmatpush2.bf16.msra.mxu0 %v13357_v4  ;;  %v10384_v4 = vld [vmem:[#allocation10 + $0x270] ss:$24 sps:$4 sm:$0xff]  }
 0x663   :  { %2366 = vmatprep.subr.bf16.mxu0 %v13358_v11  ;;  %2450 = vmatpush2.bf16.msra.mxu1 %v10368_v16  ;;  %v13491_v11 = vld [vmem:[#allocation135_spill] sm:$0xff] }
 0x664   :  { %2451 = vmatprep.subr.bf16.mxu1 %v10371_v0 }
 0x666   :  { %2367 = vmatpush2.bf16.msra.mxu0 %v13360_v6  ;;  %v13492_v6 = vld [vmem:[#allocation136_spill] sm:$0xff] }
 0x667   :  { %2368 = vmatprep.subr.bf16.mxu0 %v13425_v22  ;;  %2452 = vmatpush2.bf16.msra.mxu1 %v10376_v56  ;;  %v13493_v22 = vld [vmem:[#allocation137_spill] sm:$0xff] }
 0x668   :  { %2453 = vmatprep.subr.bf16.mxu1 %v10379_v59 }
 0x66a   :  { %2369 = vmatpush2.bf16.msra.mxu0 %v13428_v53  ;;  %v10405_v53 = vld [vmem:[#allocation10 + $0x15c] ss:$24 sps:$4 sm:$0xff]  }
 0x66b   :  { %2370 = vmatprep.subr.bf16.mxu0 %v13429_v31  ;;  %2454 = vmatpush2.bf16.msra.mxu1 %v10384_v4  ;;  %v13494_v31 = vld [vmem:[#allocation138_spill] sm:$0xff] }
 0x66c   :  { %2455 = vmatprep.subr.bf16.mxu1 %v13431_v49  ;;  %v13495_v49 = vld [vmem:[#allocation139_spill] sm:$0xff] }
 0x66e   :  { %2371 = vmatpush2.bf16.msra.mxu0 %v13432_v3  ;;  %v10411_v3 = vld [vmem:[#allocation10 + $0x158] ss:$24 sps:$4 sm:$0xff]  }
 0x66f   :  { %2372 = vmatprep.subr.bf16.mxu0 %v13433_v29  ;;  %2456 = vmatpush2.bf16.msra.mxu1 %v13434_v19  ;;  %v10414_v29 = vld [vmem:[#allocation10 + $0x12c] ss:$24 sps:$4 sm:$0xff]   ;;  %v10417_v19 = vld [vmem:[#allocation10 + $0x128] ss:$24 sps:$4 sm:$0xff]  }
 0x670   :  { %2457 = vmatprep.subr.bf16.mxu1 %v13435_v27  ;;  %v10420_v27 = vld [vmem:[#allocation10 + $0xfc] ss:$24 sps:$4 sm:$0xff]  }
 0x672   :  { %2373 = vmatpush2.bf16.msra.mxu0 %v13436_v30  ;;  %v10423_v30 = vld [vmem:[#allocation10 + $0xf8] ss:$24 sps:$4 sm:$0xff]  }
 0x673   :  { %2374 = vmatprep.subr.bf16.mxu0 %v13437_v34  ;;  %2458 = vmatpush2.bf16.msra.mxu1 %v13438_v33  ;;  %v10426_v34 = vld [vmem:[#allocation10 + $0xcc] ss:$24 sps:$4 sm:$0xff]   ;;  %v10429_v33 = vld [vmem:[#allocation10 + $0xc8] ss:$24 sps:$4 sm:$0xff]  }
 0x674   :  { %2459 = vmatprep.subr.bf16.mxu1 %v13439_v36  ;;  %v10432_v36 = vld [vmem:[#allocation10 + $0x9c] ss:$24 sps:$4 sm:$0xff]  }
 0x676   :  { %2375 = vmatpush2.bf16.msra.mxu0 %v13440_v39  ;;  %v10435_v39 = vld [vmem:[#allocation10 + $0x98] ss:$24 sps:$4 sm:$0xff]  }
 0x677   :  { %2376 = vmatprep.subr.bf16.mxu0 %v13441_v40  ;;  %2460 = vmatpush2.bf16.msra.mxu1 %v13442_v10  ;;  %v10438_v40 = vld [vmem:[#allocation10 + $0x6c] ss:$24 sps:$4 sm:$0xff]   ;;  %v10441_v10 = vld [vmem:[#allocation10 + $0x68] ss:$24 sps:$4 sm:$0xff]  }
 0x678   :  { %2461 = vmatprep.subr.bf16.mxu1 %v13443_v37  ;;  %v10444_v37 = vld [vmem:[#allocation10 + $0x3c] ss:$24 sps:$4 sm:$0xff]  }
 0x67a   :  { %2377 = vmatpush2.bf16.msra.mxu0 %v13444_v21  ;;  %v10447_v21 = vld [vmem:[#allocation10 + $0x38] ss:$24 sps:$4 sm:$0xff]  }
 0x67b   :  { %2378 = vmatprep.subr.bf16.mxu0 %v13445_v2  ;;  %2462 = vmatpush2.bf16.msra.mxu1 %v13491_v11  ;;  %v10450_v2 = vld [vmem:[#allocation10 + $0xc] ss:$24 sps:$4 sm:$0xff]   ;;  %v13509_v11 = vld [vmem:[#allocation144_spill] sm:$0xff] }
 0x67c   :  { %2463 = vmatprep.subr.bf16.mxu1 %v13492_v6  ;;  %v13510_v6 = vld [vmem:[#allocation145_spill] sm:$0xff] }
 0x67e   :  { %2379 = vmatpush2.bf16.msra.mxu0 %v13493_v22  ;;  %v13511_v22 = vld [vmem:[#allocation146_spill] sm:$0xff] }
 0x67f   :  { %2474 = vmatprep.subr.bf16.mxu0 %v10405_v53  ;;  %2464 = vmatpush2.bf16.msra.mxu1 %v13494_v31  ;;  %v7812_v31 = vld [vmem:[#allocation10 + $0x154] ss:$24 sps:$4 sm:$0xff]  }
 0x680   :  { %2515 = vmatprep.subr.bf16.mxu1 %v13495_v49 }
 0x681   :  { %2381 = vmatmul.mubr.bf16.vlgmr.msra.gmra.mxu0 %v10298_v44  ;;  %v13508_v44 = vld [vmem:[#allocation143_spill] sm:$0xff] }
 0x682   :  { %2475 = vmatpush1.bf16.msra.mxu0 %v10411_v3 }
 0x683   :  { %2476 = vmatprep.subr.bf16.mxu0 %v10414_v29 }
 0x686   :  { %2477 = vmatpush1.bf16.msra.mxu0 %v10417_v19 }
 0x687   :  { %2478 = vmatprep.subr.bf16.mxu0 %v10420_v27 }
 0x68a   :  { %2479 = vmatpush1.bf16.msra.mxu0 %v10423_v30 }
 0x68b   :  { %2480 = vmatprep.subr.bf16.mxu0 %v10426_v34 }
 0x68e   :  { %2481 = vmatpush1.bf16.msra.mxu0 %v10429_v33 }
 0x68f   :  { %2482 = vmatprep.subr.bf16.mxu0 %v10432_v36 }
 0x692   :  { %2483 = vmatpush1.bf16.msra.mxu0 %v10435_v39 }
 0x693   :  { %2484 = vmatprep.subr.bf16.mxu0 %v10438_v40 }
 0x696   :  { %2485 = vmatpush1.bf16.msra.mxu0 %v10441_v10 }
 0x697   :  { %2486 = vmatprep.subr.bf16.mxu0 %v10444_v37 }
 0x69a   :  { %2487 = vmatpush1.bf16.msra.mxu0 %v10447_v21 }
 0x69b   :  { %2488 = vmatprep.subr.bf16.mxu0 %v10450_v2 }
 0x69e   :  { %2489 = vmatpush1.bf16.msra.mxu0 %v10453_v57 }
 0x69f   :  { %2490 = vmatprep.subr.bf16.mxu0 %v10456_v61 }
 0x6a2   :  { %2491 = vmatpush2.bf16.msra.mxu0 %v10459_v45 }
 0x6a3   :  { %2492 = vmatprep.subr.bf16.mxu0 %v10462_v9 }
 0x6a6   :  { %2493 = vmatpush2.bf16.msra.mxu0 %v10465_v8  ;;  %v13514_v8 = vld [vmem:[#allocation88_spill] sm:$0xff] }
 0x6a7   :  { %2494 = vmatprep.subr.bf16.mxu0 %v10468_v62  ;;  %v13513_v62 = vld [vmem:[#allocation86_spill] sm:$0xff] }
 0x6aa   :  { %2495 = vmatpush2.bf16.msra.mxu0 %v10471_v42  ;;  %v13512_v42 = vld [vmem:[#allocation104_spill] sm:$0xff] }
 0x6ab   :  { %2496 = vmatprep.subr.bf16.mxu0 %v10474_v41 }
 0x6ae   :  { %2497 = vmatpush2.bf16.msra.mxu0 %v10477_v15 }
 0x6af   :  { %2498 = vmatprep.subr.bf16.mxu0 %v10480_v35 }
 0x6b2   :  { %2499 = vmatpush2.bf16.msra.mxu0 %v13505_v23 }
 0x6b3   :  { %2500 = vmatprep.subr.bf16.mxu0 %v13506_v18 }
 0x6b6   :  { %2501 = vmatpush2.bf16.msra.mxu0 %v13507_v24 }
 0x6b7   :  { %2502 = vmatprep.subr.bf16.mxu0 %v13508_v44 }
 0x6ba   :  { %2503 = vmatpush2.bf16.msra.mxu0 %v13509_v11 }
 0x6bb   :  { %2504 = vmatprep.subr.bf16.mxu0 %v13510_v6 }
 0x6be   :  { %2505 = vmatpush2.bf16.msra.mxu0 %v13511_v22 }
 0x6bf   :  { %2600 = vmatprep.subr.bf16.mxu0 %v7812_v31 }
 0x701   :  { %v2300_v49 = vpop.f32.mrf.mxu0  ;;  %v2341_v25 = vpop.f32.mrf.mxu1 }
 0x702   :  { %v2301_v24 = vadd.f32 %v2300_v49, %v13512_v42  ;;  %v2342_v31 = vadd.f32 %v2341_v25, %v9579_v63 }
 0x703   :  { %v2302_v13 = vpop.f32.mrf.mxu0  ;;  %v2343_v35 = vpop.f32.mrf.mxu1 }
 0x704   :  { %v2303_v44 = vadd.f32 %v2302_v13, %v9568_v47  ;;  %v2389_v11 = vadd.f32 %v2301_v24, %v13513_v62  ;;  %v2344_v45 = vadd.f32 %v2343_v35, %v9582_v7 }
 0x705   :  { %v2304_v15 = vpop.f32.mrf.mxu0  ;;  %v2345_v23 = vpop.f32.mrf.mxu1 }
 0x706   :  { %v2390_v6 = vadd.f32 %v2303_v44, %v13514_v8  ;;  %v7020_v9 = vmul.f32 -1.442695, %v2389_v11  ;;  %v13515_v15 = vld [vmem:[#allocation87_spill] sm:$0xff] }
 0x707   :  { %v2305_v41 = vpop.f32.mrf.mxu0  ;;  %v2346_v18 = vpop.f32.mrf.mxu1  ;;  %v2391_v23 = vadd.f32 %v2342_v31, %v13515_v15 }
 0x708   :  { %v7021_v22 = vmul.f32 -1.442695, %v2390_v6  ;;  %7610 = vpow2.f32 %v7020_v9  ;;  %v13516_v41 = vld [vmem:[#allocation89_spill] sm:$0xff] }
 0x709   :  { %v2392_v18 = vadd.f32 %v2344_v45, %v13516_v41  ;;  %v7022_v61 = vmul.f32 -1.442695, %v2391_v23 }
 0x70a   :  { %7612 = vpow2.f32 %v7021_v22 }
 0x70b   :  { %v7023_v49 = vmul.f32 -1.442695, %v2392_v18  ;;  %7614 = vpow2.f32 %v7022_v61 }
 0x70d   :  { %7616 = vpow2.f32 %v7023_v49  ;;  %v13518_v49 = vld [vmem:[#allocation91_spill] sm:$0xff] }
 0x715   :  { %v7611_v42 = vpop.eup %7610 }
 0x716   :  { %v2405_v62 = vadd.f32 1.0, %v7611_v42  ;;  %v13517_v42 = vld [vmem:[#allocation90_spill] sm:$0xff] }
 0x717   :  { %v7613_v13 = vpop.eup %7612 }
 0x718   :  { %v2406_v8 = vadd.f32 1.0, %v7613_v13  ;;  %7618 = vrcp.f32 %v2405_v62  ;;  %v7615_v9 = vpop.eup %7614 }
 0x719   :  { %v2407_v25 = vadd.f32 1.0, %v7615_v9 }
 0x71a   :  { %7620 = vrcp.f32 %v2406_v8  ;;  %v7617_v24 = vpop.eup %7616 }
 0x71b   :  { %v2408_v11 = vadd.f32 1.0, %v7617_v24  ;;  %7622 = vrcp.f32 %v2407_v25 }
 0x71d   :  { %7624 = vrcp.f32 %v2408_v11 }
 0x725   :  { %v7619_v6 = vpop.eup %7618 }
 0x727   :  { %v7621_v61 = vpop.eup %7620 }
 0x728   :  { %v7623_v62 = vpop.eup %7622 }
 0x729   :  { %v2423_v9 = vsub.f32 1.0, %v7623_v62 }
 0x72a   :  { %v7625_v8 = vpop.eup %7624 }
 0x72b   :  { %v2428_v11 = vmul.f32 %v7625_v8, %v10292_v32 }
 0x741   :  { %v2382_v44 = vpop.f32.mrf.mxu0 }
 0x742   :  { %v2383_v35 = vadd.f32 %v2382_v44, %v9593_v38  ;;  %v2424_v44 = vsub.f32 1.0, %v7625_v8  ;;  %v10609_v8 = vld [vmem:[#allocation10 + $0x220] ss:$24 sps:$4 sm:$0xff]  }
 0x743   :  { %v2384_v22 = vpop.f32.mrf.mxu0 }
 0x744   :  { %v2417_v45 = vmul.f32 %v7619_v6, %v2383_v35  ;;  %v2385_v31 = vadd.f32 %v2384_v22, %v9596_v55  ;;  %v2427_v35 = vmul.f32 %v7623_v62, %v10290_v51  ;;  %v10606_v62 = vld [vmem:[#allocation10 + $0x224] ss:$24 sps:$4 sm:$0xff]  }
 0x745   :  { %v2386_v15 = vpop.f32.mrf.mxu0 }
 0x746   :  { %v2419_v23 = vadd.f32 %v2417_v45, %v13517_v42  ;;  %v2418_v41 = vmul.f32 %v7621_v61, %v2385_v31  ;;  %v10516_v42 = vld [vmem:[#allocation10 + $0x160] ss:$24 sps:$4 sm:$0xff]  }
 0x747   :  { %v2387_v18 = vpop.f32.mrf.mxu0 }
 0x748   :  { %7626 = vtanh.f32 %v2419_v23  ;;  %v2420_v13 = vadd.f32 %v2418_v41, %v13518_v49  ;;  %v10519_v23 = vld [vmem:[#allocation10 + $0x134] ss:$24 sps:$4 sm:$0xff]   ;;  %v10524_v41 = vld [vmem:[#allocation10 + $0x130] ss:$24 sps:$4 sm:$0xff]   ;;  %v10527_v18 = vld [vmem:[#allocation10 + $0x104] ss:$24 sps:$4 sm:$0xff]  }
 0x749   :  { %v10532_v49 = vld [vmem:[#allocation10 + $0x100] ss:$24 sps:$4 sm:$0xff]  }
 0x74a   :  { %7628 = vtanh.f32 %v2420_v13  ;;  %v10535_v13 = vld [vmem:[#allocation10 + $0xd4] ss:$24 sps:$4 sm:$0xff]  }
 0x755   :  { %v7627_v24 = vpop.eup %7626 }
 0x756   :  { %v2425_v25 = vmul.f32 %v7627_v24, %v2423_v9  ;;  %v10612_v9 = vld [vmem:[#allocation10 + $0x1f4] ss:$24 sps:$4 sm:$0xff]   ;;  %v7843_v24 = vld [vmem:[#allocation10 + $0x1e4] ss:$24 sps:$4 sm:$0xff]  }
 0x757   :  { %v7629_v6 = vpop.eup %7628 }
 0x758   :  { %v2426_v22 = vmul.f32 %v7629_v6, %v2424_v44  ;;  %v10504_v15 = vadd.f32 %v2427_v35, %v2425_v25  ;;  %v10615_v44 = vld [vmem:[#allocation10 + $0x1f0] ss:$24 sps:$4 sm:$0xff]   ;;  %v10618_v25 = vld [vmem:[#allocation10 + $0x1c4] ss:$24 sps:$4 sm:$0xff]   ;;  %v7846_v35 = vld [vmem:[#allocation10 + $0x1e0] ss:$24 sps:$4 sm:$0xff]  }
 0x759   :  { %v7847_v6 = vld [vmem:[#allocation10 + $0x1b4] ss:$24 sps:$4 sm:$0xff]  }
 0x75a   :  { %v10506_v45 = vadd.f32 %v2428_v11, %v2426_v22  ;;  %v10512_v61 = vpack.c.bf16 %v10504_v15, %v10504_v15  ;;  %v10621_v22 = vld [vmem:[#allocation10 + $0x1c0] ss:$24 sps:$4 sm:$0xff]   ;;  %v10624_v11 = vld [vmem:[#allocation10 + $0x194] ss:$24 sps:$4 sm:$0xff]  }
 0x75c   :  { %v2432_v31 = vpack.c.bf16 %v10506_v45, %v10506_v45 }
 0x75e   :  { %2465 = vmatprep.mubr.bf16.mxu1 %v2432_v31  ;;  %2506 = vmatprep.mubr.bf16.mxu0 %v2432_v31 }
 0x75f   :  { %2466 = vmatmul.mubr.bf16.vlgmr.msra.gmra.mxu1 %v10512_v61  ;;  %2507 = vmatmul.mubr.bf16.vlgmr.msra.gmra.mxu0 %v10512_v61 }
 0x760   :  { %2516 = vmatpush1.bf16.msra.mxu1 %v10516_v42  ;;  %2547 = vmatprep.mubr.bf16.mxu1 %v2432_v31  ;;  %v7850_v31 = vld [vmem:[#allocation10 + $0x1b0] ss:$24 sps:$4 sm:$0xff]  }
 0x761   :  { %2517 = vmatprep.subr.bf16.mxu1 %v10519_v23  ;;  %2601 = vmatpush1.bf16.msra.mxu0 %v10304_v26  ;;  %v10540_v26 = vld [vmem:[#allocation10 + $0xd0] ss:$24 sps:$4 sm:$0xff]  }
 0x762   :  { %2602 = vmatprep.subr.bf16.mxu0 %v10307_v48  ;;  %v10543_v48 = vld [vmem:[#allocation10 + $0xa4] ss:$24 sps:$4 sm:$0xff]  }
 0x764   :  { %2518 = vmatpush1.bf16.msra.mxu1 %v10524_v41 }
 0x765   :  { %2519 = vmatprep.subr.bf16.mxu1 %v10527_v18  ;;  %2603 = vmatpush1.bf16.msra.mxu0 %v10312_v17  ;;  %v10548_v17 = vld [vmem:[#allocation10 + $0xa0] ss:$24 sps:$4 sm:$0xff]  }
 0x766   :  { %2604 = vmatprep.subr.bf16.mxu0 %v10315_v5  ;;  %v10551_v5 = vld [vmem:[#allocation10 + $0x74] ss:$24 sps:$4 sm:$0xff]  }
 0x768   :  { %2520 = vmatpush1.bf16.msra.mxu1 %v10532_v49 }
 0x769   :  { %2521 = vmatprep.subr.bf16.mxu1 %v10535_v13  ;;  %2605 = vmatpush1.bf16.msra.mxu0 %v10320_v52  ;;  %v10556_v52 = vld [vmem:[#allocation10 + $0x70] ss:$24 sps:$4 sm:$0xff]  }
 0x76a   :  { %2606 = vmatprep.subr.bf16.mxu0 %v10323_v46  ;;  %v10559_v46 = vld [vmem:[#allocation10 + $0x44] ss:$24 sps:$4 sm:$0xff]  }
 0x76c   :  { %2522 = vmatpush1.bf16.msra.mxu1 %v10540_v26 }
 0x76d   :  { %2523 = vmatprep.subr.bf16.mxu1 %v10543_v48  ;;  %2607 = vmatpush1.bf16.msra.mxu0 %v10328_v43  ;;  %v10564_v43 = vld [vmem:[#allocation10 + $0x40] ss:$24 sps:$4 sm:$0xff]  }
 0x76e   :  { %2608 = vmatprep.subr.bf16.mxu0 %v10331_v58  ;;  %v10567_v58 = vld [vmem:[#allocation10 + $0x14] ss:$24 sps:$4 sm:$0xff]  }
 0x770   :  { %2524 = vmatpush1.bf16.msra.mxu1 %v10548_v17 }
 0x771   :  { %2525 = vmatprep.subr.bf16.mxu1 %v10551_v5  ;;  %2609 = vmatpush1.bf16.msra.mxu0 %v10336_v12  ;;  %v10572_v12 = vld [vmem:[#allocation10 + $0x10] ss:$24 sps:$4 sm:$0xff]  }
 0x772   :  { %2610 = vmatprep.subr.bf16.mxu0 %v10339_v20  ;;  %v10575_v20 = vld [vmem:[#allocation10 + $0x2e4] ss:$24 sps:$4 sm:$0xff]  }
 0x774   :  { %2526 = vmatpush1.bf16.msra.mxu1 %v10556_v52 }
 0x775   :  { %2527 = vmatprep.subr.bf16.mxu1 %v10559_v46  ;;  %2611 = vmatpush1.bf16.msra.mxu0 %v10344_v14  ;;  %v10580_v14 = vld [vmem:[#allocation10 + $0x2e0] ss:$24 sps:$4 sm:$0xff]  }
 0x776   :  { %2612 = vmatprep.subr.bf16.mxu0 %v10347_v54  ;;  %v10583_v54 = vld [vmem:[#allocation10 + $0x2b4] ss:$24 sps:$4 sm:$0xff]  }
 0x778   :  { %2528 = vmatpush1.bf16.msra.mxu1 %v10564_v43 }
 0x779   :  { %2529 = vmatprep.subr.bf16.mxu1 %v10567_v58  ;;  %2613 = vmatpush1.bf16.msra.mxu0 %v10352_v50  ;;  %v10588_v50 = vld [vmem:[#allocation10 + $0x2b0] ss:$24 sps:$4 sm:$0xff]  }
 0x77a   :  { %2614 = vmatprep.subr.bf16.mxu0 %v10355_v1  ;;  %v10591_v1 = vld [vmem:[#allocation10 + $0x284] ss:$24 sps:$4 sm:$0xff]  }
 0x77c   :  { %2530 = vmatpush1.bf16.msra.mxu1 %v10572_v12 }
 0x77d   :  { %2531 = vmatprep.subr.bf16.mxu1 %v10575_v20  ;;  %2615 = vmatpush1.bf16.msra.mxu0 %v10360_v28  ;;  %v10596_v28 = vld [vmem:[#allocation10 + $0x280] ss:$24 sps:$4 sm:$0xff]  }
 0x77e   :  { %2616 = vmatprep.subr.bf16.mxu0 %v10363_v60  ;;  %v10599_v60 = vld [vmem:[#allocation10 + $0x254] ss:$24 sps:$4 sm:$0xff]  }
 0x780   :  { %2532 = vmatpush2.bf16.msra.mxu1 %v10580_v14 }
 0x781   :  { %2533 = vmatprep.subr.bf16.mxu1 %v10583_v54  ;;  %2617 = vmatpush2.bf16.msra.mxu0 %v10368_v16  ;;  %v7835_v16 = vld [vmem:[#allocation10 + $0x244] ss:$24 sps:$4 sm:$0xff]  }
 0x782   :  { %2618 = vmatprep.subr.bf16.mxu0 %v10371_v0  ;;  %v10603_v0 = vld [vmem:[#allocation10 + $0x250] ss:$24 sps:$4 sm:$0xff]  }
 0x784   :  { %2534 = vmatpush2.bf16.msra.mxu1 %v10588_v50 }
 0x785   :  { %2535 = vmatprep.subr.bf16.mxu1 %v10591_v1  ;;  %2619 = vmatpush2.bf16.msra.mxu0 %v10376_v56  ;;  %v7838_v56 = vld [vmem:[#allocation10 + $0x240] ss:$24 sps:$4 sm:$0xff]  }
 0x786   :  { %2620 = vmatprep.subr.bf16.mxu0 %v10379_v59  ;;  %v7839_v59 = vld [vmem:[#allocation10 + $0x214] ss:$24 sps:$4 sm:$0xff]  }
 0x788   :  { %2536 = vmatpush2.bf16.msra.mxu1 %v10596_v28 }
 0x789   :  { %2537 = vmatprep.subr.bf16.mxu1 %v10599_v60  ;;  %2621 = vmatpush2.bf16.msra.mxu0 %v10384_v4  ;;  %v7842_v4 = vld [vmem:[#allocation10 + $0x210] ss:$24 sps:$4 sm:$0xff]  }
 0x78a   :  { %2622 = vmatprep.subr.bf16.mxu0 %v7835_v16  ;;  %v7851_v16 = vld [vmem:[#allocation10 + $0x184] ss:$24 sps:$4 sm:$0xff]  }
 0x78c   :  { %2538 = vmatpush2.bf16.msra.mxu1 %v10603_v0 }
 0x78d   :  { %2539 = vmatprep.subr.bf16.mxu1 %v10606_v62  ;;  %2623 = vmatpush2.bf16.msra.mxu0 %v7838_v56  ;;  %v10627_v56 = vld [vmem:[#allocation10 + $0x190] ss:$24 sps:$4 sm:$0xff]  }
 0x78e   :  { %2624 = vmatprep.subr.bf16.mxu0 %v7839_v59  ;;  %v7853_v59 = vld [vmem:[#allocation10 + $0x180] ss:$24 sps:$4 sm:$0xff]  }
 0x790   :  { %2540 = vmatpush2.bf16.msra.mxu1 %v10609_v8 }
 0x791   :  { %2541 = vmatprep.subr.bf16.mxu1 %v10612_v9  ;;  %2625 = vmatpush2.bf16.msra.mxu0 %v7842_v4  ;;  %v7854_v4 = vld [vmem:[#allocation10 + $0x164] ss:$24 sps:$4 sm:$0xff]  }
 0x792   :  { %2626 = vmatprep.subr.bf16.mxu0 %v7843_v24 }
 0x794   :  { %2542 = vmatpush2.bf16.msra.mxu1 %v10615_v44 }
 0x795   :  { %2543 = vmatprep.subr.bf16.mxu1 %v10618_v25  ;;  %2627 = vmatpush2.bf16.msra.mxu0 %v7846_v35 }
 0x796   :  { %2628 = vmatprep.subr.bf16.mxu0 %v7847_v6 }
 0x798   :  { %2544 = vmatpush2.bf16.msra.mxu1 %v10621_v22 }
 0x799   :  { %2545 = vmatprep.subr.bf16.mxu1 %v10624_v11  ;;  %2629 = vmatpush2.bf16.msra.mxu0 %v7850_v31 }
 0x79a   :  { %2630 = vmatprep.subr.bf16.mxu0 %v7851_v16 }
 0x79c   :  { %2546 = vmatpush2.bf16.msra.mxu1 %v10627_v56 }
 0x79d   :  { %2641 = vmatprep.subr.bf16.mxu1 %v10405_v53  ;;  %2631 = vmatpush2.bf16.msra.mxu0 %v7853_v59  ;;  %v13519_v53 = vld [vmem:[#allocation73_spill] sm:$0xff] }
 0x79e   :  { %2682 = vmatprep.subr.bf16.mxu0 %v7854_v4 }
 0x79f   :  { %2548 = vmatmul.mubr.bf16.vlgmr.msra.gmra.mxu1 %v10512_v61 }
 0x7a0   :  { %2642 = vmatpush1.bf16.msra.mxu1 %v10411_v3  ;;  %v13520_v3 = vld [vmem:[#allocation75_spill] sm:$0xff] }
 0x7a1   :  { %2643 = vmatprep.subr.bf16.mxu1 %v10414_v29  ;;  %v13521_v29 = vld [vmem:[#allocation47_spill] sm:$0xff] }
 0x7a4   :  { %2644 = vmatpush1.bf16.msra.mxu1 %v10417_v19  ;;  %v13522_v19 = vld [vmem:[#allocation49_spill] sm:$0xff] }
 0x7a5   :  { %2645 = vmatprep.subr.bf16.mxu1 %v10420_v27  ;;  %v13523_v27 = vld [vmem:[#allocation50_spill] sm:$0xff] }
 0x7a8   :  { %2646 = vmatpush1.bf16.msra.mxu1 %v10423_v30  ;;  %v13524_v30 = vld [vmem:[#allocation51_spill] sm:$0xff] }
 0x7a9   :  { %2647 = vmatprep.subr.bf16.mxu1 %v10426_v34  ;;  %v13525_v34 = vld [vmem:[#allocation72_spill] sm:$0xff] }
 0x7ac   :  { %2648 = vmatpush1.bf16.msra.mxu1 %v10429_v33  ;;  %v13526_v33 = vld [vmem:[#allocation76_spill] sm:$0xff] }
 0x7ad   :  { %2649 = vmatprep.subr.bf16.mxu1 %v10432_v36  ;;  %v13527_v36 = vld [vmem:[#allocation74_spill] sm:$0xff] }
 0x7b0   :  { %2650 = vmatpush1.bf16.msra.mxu1 %v10435_v39  ;;  %v7855_v39 = vld [vmem:[#allocation10 + $0x218] ss:$24 sps:$4 sm:$0xff]  }
 0x7b1   :  { %2651 = vmatprep.subr.bf16.mxu1 %v10438_v40  ;;  %v7856_v40 = vld [vmem:[#allocation10 + $0x1ec] ss:$24 sps:$4 sm:$0xff]  }
 0x7b4   :  { %2652 = vmatpush1.bf16.msra.mxu1 %v10441_v10  ;;  %v7857_v10 = vld [vmem:[#allocation10 + $0x1e8] ss:$24 sps:$4 sm:$0xff]  }
 0x7b5   :  { %2653 = vmatprep.subr.bf16.mxu1 %v10444_v37  ;;  %v7858_v37 = vld [vmem:[#allocation10 + $0x1bc] ss:$24 sps:$4 sm:$0xff]  }
 0x7b8   :  { %2654 = vmatpush1.bf16.msra.mxu1 %v10447_v21  ;;  %v7859_v21 = vld [vmem:[#allocation10 + $0x1b8] ss:$24 sps:$4 sm:$0xff]  }
 0x7b9   :  { %2655 = vmatprep.subr.bf16.mxu1 %v10450_v2  ;;  %v7860_v2 = vld [vmem:[#allocation10 + $0x18c] ss:$24 sps:$4 sm:$0xff]  }
 0x7bc   :  { %2656 = vmatpush1.bf16.msra.mxu1 %v10453_v57  ;;  %v7861_v57 = vld [vmem:[#allocation10 + $0x188] ss:$24 sps:$4 sm:$0xff]  }
 0x7bd   :  { %2657 = vmatprep.subr.bf16.mxu1 %v13519_v53  ;;  %v13528_v53 = vld [vmem:[#allocation104_spill] sm:$0xff] }
 0x7c0   :  { %2658 = vmatpush2.bf16.msra.mxu1 %v13520_v3 }
 0x7c1   :  { %2659 = vmatprep.subr.bf16.mxu1 %v13521_v29 }
 0x7c4   :  { %2660 = vmatpush2.bf16.msra.mxu1 %v13522_v19  ;;  %v13529_v19 = vld [vmem:[#allocation92_spill] sm:$0xff] }
 0x7c5   :  { %2661 = vmatprep.subr.bf16.mxu1 %v13523_v27 }
 0x7c8   :  { %2662 = vmatpush2.bf16.msra.mxu1 %v13524_v30  ;;  %v13530_v30 = vld [vmem:[#allocation94_spill] sm:$0xff] }
 0x7c9   :  { %2663 = vmatprep.subr.bf16.mxu1 %v13525_v34 }
 0x7cc   :  { %2664 = vmatpush2.bf16.msra.mxu1 %v13526_v33 }
 0x7cd   :  { %2665 = vmatprep.subr.bf16.mxu1 %v13527_v36 }
 0x7d0   :  { %2666 = vmatpush2.bf16.msra.mxu1 %v7855_v39 }
 0x7d1   :  { %2667 = vmatprep.subr.bf16.mxu1 %v7856_v40 }
 0x7d4   :  { %2668 = vmatpush2.bf16.msra.mxu1 %v7857_v10  ;;  %v13531_v10 = vld [vmem:[#allocation93_spill] sm:$0xff] }
 0x7d5   :  { %2669 = vmatprep.subr.bf16.mxu1 %v7858_v37 }
 0x7d8   :  { %2670 = vmatpush2.bf16.msra.mxu1 %v7859_v21  ;;  %v13532_v21 = vld [vmem:[#allocation95_spill] sm:$0xff] }
 0x7d9   :  { %2671 = vmatprep.subr.bf16.mxu1 %v7860_v2 }
 0x7dc   :  { %2672 = vmatpush2.bf16.msra.mxu1 %v7861_v57 }
 0x81f   :  { %v2467_v61 = vpop.f32.mrf.mxu1  ;;  %v2508_v24 = vpop.f32.mrf.mxu0 }
 0x820   :  { %v2468_v3 = vadd.f32 %v2467_v61, %v13528_v53  ;;  %v2509_v39 = vadd.f32 %v2508_v24, %v9579_v63 }
 0x821   :  { %v2469_v35 = vpop.f32.mrf.mxu1  ;;  %v2510_v6 = vpop.f32.mrf.mxu0 }
 0x822   :  { %v2470_v29 = vadd.f32 %v2469_v35, %v9568_v47  ;;  %v2556_v27 = vadd.f32 %v2468_v3, %v13529_v19  ;;  %v2511_v40 = vadd.f32 %v2510_v6, %v9582_v7  ;;  %v2558_v37 = vadd.f32 %v2509_v39, %v13531_v10 }
 0x823   :  { %v2471_v31 = vpop.f32.mrf.mxu1  ;;  %v2512_v16 = vpop.f32.mrf.mxu0 }
 0x824   :  { %v2557_v34 = vadd.f32 %v2470_v29, %v13530_v30  ;;  %v7024_v33 = vmul.f32 -1.442695, %v2556_v27  ;;  %v2559_v2 = vadd.f32 %v2511_v40, %v13532_v21  ;;  %v7026_v57 = vmul.f32 -1.442695, %v2558_v37  ;;  %v13533_v40 = vld [vmem:[#allocation96_spill] sm:$0xff] }
 0x825   :  { %v2472_v59 = vpop.f32.mrf.mxu1  ;;  %v2513_v4 = vpop.f32.mrf.mxu0 }
 0x826   :  { %v7025_v36 = vmul.f32 -1.442695, %v2557_v34  ;;  %7630 = vpow2.f32 %v7024_v33  ;;  %v7027_v61 = vmul.f32 -1.442695, %v2559_v2  ;;  %v13534_v2 = vld [vmem:[#allocation97_spill] sm:$0xff] }
 0x828   :  { %7632 = vpow2.f32 %v7025_v36 }
 0x829   :  { %7634 = vpow2.f32 %v7026_v57 }
 0x82a   :  { %7636 = vpow2.f32 %v7027_v61 }
 0x833   :  { %v7631_v31 = vpop.eup %7630 }
 0x834   :  { %v2572_v16 = vadd.f32 1.0, %v7631_v31 }
 0x835   :  { %v7633_v35 = vpop.eup %7632 }
 0x836   :  { %v2573_v59 = vadd.f32 1.0, %v7633_v35  ;;  %7638 = vrcp.f32 %v2572_v16  ;;  %v7635_v4 = vpop.eup %7634 }
 0x837   :  { %v7637_v3 = vpop.eup %7636  ;;  %v2574_v24 = vadd.f32 1.0, %v7635_v4 }
 0x838   :  { %7640 = vrcp.f32 %v2573_v59  ;;  %v2575_v19 = vadd.f32 1.0, %v7637_v3 }
 0x839   :  { %7642 = vrcp.f32 %v2574_v24 }
 0x83a   :  { %7644 = vrcp.f32 %v2575_v19 }
 0x843   :  { %v7639_v27 = vpop.eup %7638 }
 0x845   :  { %v7641_v36 = vpop.eup %7640 }
 0x846   :  { %v7643_v61 = vpop.eup %7642 }
 0x847   :  { %v7645_v31 = vpop.eup %7644  ;;  %v2590_v35 = vsub.f32 1.0, %v7643_v61  ;;  %v2594_v3 = vmul.f32 %v7643_v61, %v10504_v15 }
 0x848   :  { %v2591_v59 = vsub.f32 1.0, %v7645_v31  ;;  %v2595_v19 = vmul.f32 %v7645_v31, %v10506_v45 }
 0x85f   :  { %v2549_v29 = vpop.f32.mrf.mxu1 }
 0x860   :  { %v2550_v6 = vadd.f32 %v2549_v29, %v9593_v38 }
 0x861   :  { %v2551_v30 = vpop.f32.mrf.mxu1 }
 0x862   :  { %v2584_v34 = vmul.f32 %v7639_v27, %v2550_v6  ;;  %v2552_v33 = vadd.f32 %v2551_v30, %v9596_v55 }
 0x863   :  { %v2553_v39 = vpop.f32.mrf.mxu1 }
 0x864   :  { %v2586_v10 = vadd.f32 %v2584_v34, %v13533_v40  ;;  %v2585_v37 = vmul.f32 %v7641_v36, %v2552_v33 }
 0x865   :  { %v2554_v21 = vpop.f32.mrf.mxu1 }
 0x866   :  { %7646 = vtanh.f32 %v2586_v10  ;;  %v2587_v57 = vadd.f32 %v2585_v37, %v13534_v2 }
 0x868   :  { %7648 = vtanh.f32 %v2587_v57  ;;  %v13539_v57 = vld [vmem:[#allocation102_spill] sm:$0xff] }
 0x873   :  { %v7647_v16 = vpop.eup %7646 }
 0x874   :  { %v2592_v4 = vmul.f32 %v7647_v16, %v2590_v35  ;;  %v13540_v35 = vld [vmem:[#allocation36_spill] sm:$0xff] }
 0x875   :  { %v7649_v24 = vpop.eup %7648 }
 0x876   :  { %v2593_v29 = vmul.f32 %v7649_v24, %v2591_v59  ;;  %v10670_v6 = vadd.f32 %v2594_v3, %v2592_v4  ;;  %v13542_v59 = vld [vmem:[#allocation71_spill] sm:$0xff] }
 0x877   :  { %v2867_v4 = vcombine.low %v10290_v51, %v13542_v59  ;;  %v13543_v3 = vld [vmem:[#allocation103_spill] sm:$0xff]  ;;  %v13547_v51 = vld [vmem:[#allocation45_spill] sm:$0xff] }
 0x878   :  { %v10672_v27 = vadd.f32 %v2595_v19, %v2593_v29  ;;  %v2598_v34 = vpack.c.bf16 %v10670_v6, %v10670_v6  ;;  %v13544_v29 = vld [vmem:[#allocation68_spill] sm:$0xff] }
 0x879   :  { %v2842_v19 = vcombine.low %v13544_v29, %v10292_v32  ;;  %v13548_v32 = vld [vmem:[#allocation43_spill] sm:$0xff] }
 0x87a   :  { %v2599_v30 = vpack.c.bf16 %v10672_v27, %v10672_v27 }
 0x87c   :  { %2632 = vmatprep.mubr.bf16.mxu0 %v2599_v30  ;;  %2673 = vmatprep.mubr.bf16.mxu1 %v2599_v30 }
 0x87d   :  { %2633 = vmatmul.mubr.bf16.vlgmr.msra.gmra.mxu0 %v2598_v34  ;;  %2674 = vmatmul.mubr.bf16.vlgmr.msra.gmra.mxu1 %v2598_v34 }
 0x87e   :  { %2683 = vmatpush1.bf16.msra.mxu0 %v10516_v42  ;;  %2714 = vmatprep.mubr.bf16.mxu0 %v2599_v30 }
 0x87f   :  { %2684 = vmatprep.subr.bf16.mxu0 %v10519_v23 }
 0x882   :  { %2685 = vmatpush1.bf16.msra.mxu0 %v10524_v41 }
 0x883   :  { %2686 = vmatprep.subr.bf16.mxu0 %v10527_v18 }
 0x886   :  { %2687 = vmatpush1.bf16.msra.mxu0 %v10532_v49 }
 0x887   :  { %2688 = vmatprep.subr.bf16.mxu0 %v10535_v13 }
 0x88a   :  { %2689 = vmatpush1.bf16.msra.mxu0 %v10540_v26 }
 0x88b   :  { %2690 = vmatprep.subr.bf16.mxu0 %v10543_v48 }
 0x88e   :  { %2691 = vmatpush1.bf16.msra.mxu0 %v10548_v17 }
 0x88f   :  { %2692 = vmatprep.subr.bf16.mxu0 %v10551_v5 }
 0x892   :  { %2693 = vmatpush1.bf16.msra.mxu0 %v10556_v52  ;;  %v13535_v52 = vld [vmem:[#allocation98_spill] sm:$0xff] }
 0x893   :  { %2694 = vmatprep.subr.bf16.mxu0 %v10559_v46 }
 0x896   :  { %2695 = vmatpush1.bf16.msra.mxu0 %v10564_v43  ;;  %v13536_v43 = vld [vmem:[#allocation100_spill] sm:$0xff] }
 0x897   :  { %2696 = vmatprep.subr.bf16.mxu0 %v10567_v58 }
 0x89a   :  { %2697 = vmatpush1.bf16.msra.mxu0 %v10572_v12 }
 0x89b   :  { %2698 = vmatprep.subr.bf16.mxu0 %v10575_v20 }
 0x89e   :  { %2699 = vmatpush2.bf16.msra.mxu0 %v10580_v14 }
 0x89f   :  { %2700 = vmatprep.subr.bf16.mxu0 %v10583_v54 }
 0x8a2   :  { %2701 = vmatpush2.bf16.msra.mxu0 %v10588_v50  ;;  %v13537_v50 = vld [vmem:[#allocation99_spill] sm:$0xff] }
 0x8a3   :  { %2702 = vmatprep.subr.bf16.mxu0 %v10591_v1 }
 0x8a6   :  { %2703 = vmatpush2.bf16.msra.mxu0 %v10596_v28  ;;  %v13538_v28 = vld [vmem:[#allocation101_spill] sm:$0xff] }
 0x8a7   :  { %2704 = vmatprep.subr.bf16.mxu0 %v10599_v60 }
 0x8aa   :  { %2705 = vmatpush2.bf16.msra.mxu0 %v10603_v0 }
 0x8ab   :  { %2706 = vmatprep.subr.bf16.mxu0 %v10606_v62 }
 0x8ae   :  { %2707 = vmatpush2.bf16.msra.mxu0 %v10609_v8 }
 0x8af   :  { %2708 = vmatprep.subr.bf16.mxu0 %v10612_v9 }
 0x8b2   :  { %2709 = vmatpush2.bf16.msra.mxu0 %v10615_v44 }
 0x8b3   :  { %2710 = vmatprep.subr.bf16.mxu0 %v10618_v25 }
 0x8b6   :  { %2711 = vmatpush2.bf16.msra.mxu0 %v10621_v22 }
 0x8b7   :  { %2712 = vmatprep.subr.bf16.mxu0 %v10624_v11 }
 0x8ba   :  { %2713 = vmatpush2.bf16.msra.mxu0 %v10627_v56 }
 0x8bd   :  { %2715 = vmatmul.mubr.bf16.vlgmr.msra.gmra.mxu0 %v2598_v34  ;;  %v13545_v34 = vld [vmem:[#allocation66_spill] sm:$0xff] }
 0x93d   :  { %v2634_v42 = vpop.f32.mrf.mxu0  ;;  %v2675_v23 = vpop.f32.mrf.mxu1 }
 0x93e   :  { %v2635_v17 = vadd.f32 %v2634_v42, %v13528_v53  ;;  %v2676_v14 = vadd.f32 %v2675_v23, %v9579_v63  ;;  %v8738_v63 = vmov 1966171168   ;;  %v2817_v42 = vcombine.low %v13545_v34, %v10506_v45  ;;  %v13546_v23 = vld [vmem:[#allocation69_spill] sm:$0xff] }
 0x93f   :  { %v2636_v41 = vpop.f32.mrf.mxu0  ;;  %v2677_v18 = vpop.f32.mrf.mxu1  ;;  %v2769_v11 = vunpack.c.l.s4 %v8738_v63 }
 0x940   :  { %v2637_v5 = vadd.f32 %v2636_v41, %v9568_v47  ;;  %v2723_v46 = vadd.f32 %v2635_v17, %v13535_v52  ;;  %v2678_v54 = vadd.f32 %v2677_v18, %v9582_v7  ;;  %v2725_v1 = vadd.f32 %v2676_v14, %v13537_v50 }
 0x941   :  { %v2638_v49 = vpop.f32.mrf.mxu0  ;;  %v2679_v13 = vpop.f32.mrf.mxu1  ;;  %v2770_v39 = vunpack.c.0.s8 %v2769_v11  ;;  %v2892_v41 = vcombine.low %v10504_v15, %v13546_v23 }
 0x942   :  { %v2724_v58 = vadd.f32 %v2637_v5, %v13536_v43  ;;  %v7028_v12 = vmul.f32 -1.442695, %v2723_v46  ;;  %v2726_v60 = vadd.f32 %v2678_v54, %v13538_v28  ;;  %v7030_v0 = vmul.f32 -1.442695, %v2725_v1 }
 0x943   :  { %v2639_v26 = vpop.f32.mrf.mxu0  ;;  %v2680_v48 = vpop.f32.mrf.mxu1  ;;  %v10721_v16 = vsub.s32 %v2770_v39, %v13540_v35  ;;  %v2917_v49 = vcombine.low %v10670_v6, %v13547_v51 }
 0x944   :  { %v7029_v20 = vmul.f32 -1.442695, %v2724_v58  ;;  %7650 = vpow2.f32 %v7028_v12  ;;  %v7031_v62 = vmul.f32 -1.442695, %v2726_v60  ;;  %v2792_v26 = vcombine.low %v13548_v32, %v10672_v27  ;;  %v13549_v58 = vld [vmem:[#allocation37_spill] sm:$0xff] }
 0x945   :  { %13541 = vst [vmem:[#allocation77_spill] sm:$0xff] %v10721_v16  ;;  %v2849_v30 = vrot.slane %v2842_v19, %v10721_v16  ;;  %v2824_v45 = vrot.slane %v2817_v42, %v10721_v16  ;;  %v2899_v52 = vrot.slane %v2892_v41, %v10721_v16  ;;  %v2924_v43 = vrot.slane %v2917_v49, %v10721_v16 }
 0x946   :  { %7652 = vpow2.f32 %v7029_v20  ;;  %v13550_v20 = vld [vmem:[#allocation60_spill] sm:$0xff]  ;;  %v2799_v54 = vrot.slane %v2792_v26, %v10721_v16 }
 0x947   :  { %7654 = vpow2.f32 %v7030_v0  ;;  %v2850_v17 = vcombine.high %v2849_v30, %v2849_v30  ;;  %v10742_v5 = vrot.slane %v2849_v30, %v10721_v16  ;;  %v2825_v0 = vcombine.high %v2824_v45, %v2824_v45 }
 0x948   :  { %7656 = vpow2.f32 %v7031_v62  ;;  %v2900_v62 = vcombine.high %v2899_v52, %v2899_v52  ;;  %v10766_v63 = vrot.slane %v2824_v45, %v10721_v16  ;;  %v10769_v11 = vrot.slane %v2899_v52, %v10721_v16 }
 0x949   :  { %v10756_v28 = vrot.slane %v2850_v17, %v10721_v16  ;;  %v3028_v60 = vrot.slane %v10742_v5, %v13549_v58  ;;  %v2807_v35 = vrot.slane %v2799_v54, %v10721_v16 }
 0x94a   :  { %v3012_v19 = vrot.slane %v10766_v63, %v13550_v20 }
 0x94b   :  { %v2988_v51 = vrot.slane %v2807_v35, %v13549_v58  ;;  %v2992_v49 = vrot.slane %v2807_v35, %v13550_v20 }
 0x951   :  { %v7651_v8 = vpop.eup %7650 }
 0x952   :  { %v2739_v9 = vadd.f32 1.0, %v7651_v8  ;;  %v3032_v8 = vrot.slane %v10742_v5, %v13550_v20 }
 0x953   :  { %v7653_v47 = vpop.eup %7652 }
 0x954   :  { %v2740_v44 = vadd.f32 1.0, %v7653_v47  ;;  %7658 = vrcp.f32 %v2739_v9  ;;  %v7655_v25 = vpop.eup %7654 }
 0x955   :  { %v7657_v22 = vpop.eup %7656  ;;  %v2741_v56 = vadd.f32 1.0, %v7655_v25 }
 0x956   :  { %7660 = vrcp.f32 %v2740_v44  ;;  %v2742_v53 = vadd.f32 1.0, %v7657_v22 }
 0x957   :  { %7662 = vrcp.f32 %v2741_v56  ;;  %v2925_v56 = vcombine.high %v2924_v43, %v2924_v43 }
 0x958   :  { %7664 = vrcp.f32 %v2742_v53 }
 0x959   :  { %v10792_v59 = vrot.slane %v2925_v56, %v10721_v16 }
 0x95b   :  { %v3096_v26 = vrot.slane %v10792_v59, %v13549_v58  ;;  %v3100_v17 = vrot.slane %v10792_v59, %v13550_v20 }
 0x961   :  { %v7659_v36 = vpop.eup %7658 }
 0x963   :  { %v7661_v21 = vpop.eup %7660 }
 0x964   :  { %v7663_v48 = vpop.eup %7662 }
 0x965   :  { %v7665_v15 = vpop.eup %7664  ;;  %v2757_v50 = vsub.f32 1.0, %v7663_v48  ;;  %v2761_v47 = vmul.f32 %v7663_v48, %v10670_v6  ;;  %v3036_v6 = vrot.slane %v10756_v28, %v13549_v58 }
 0x966   :  { %v2758_v44 = vsub.f32 1.0, %v7665_v15  ;;  %v2762_v53 = vmul.f32 %v7665_v15, %v10672_v27  ;;  %v13551_v27 = vld [vmem:[#allocation106_spill] sm:$0xff] }
 0x97d   :  { %v2716_v7 = vpop.f32.mrf.mxu0 }
 0x97e   :  { %v2717_v33 = vadd.f32 %v2716_v7, %v9593_v38  ;;  %v2800_v7 = vcombine.high %v2799_v54, %v2799_v54 }
 0x97f   :  { %v2718_v40 = vpop.f32.mrf.mxu0 }
 0x980   :  { %v2751_v10 = vmul.f32 %v7659_v36, %v2717_v33  ;;  %v2719_v37 = vadd.f32 %v2718_v40, %v9596_v55  ;;  %v2874_v55 = vrot.slane %v2867_v4, %v10721_v16  ;;  %v2839_v40 = vrot.slane %v2825_v0, %v10721_v16 }
 0x981   :  { %v2720_v2 = vpop.f32.mrf.mxu0  ;;  %v3008_v4 = vrot.slane %v10766_v63, %v13549_v58 }
 0x982   :  { %v2753_v61 = vadd.f32 %v2751_v10, %v13539_v57  ;;  %v2752_v31 = vmul.f32 %v7661_v21, %v2719_v37  ;;  %v2875_v18 = vcombine.high %v2874_v55, %v2874_v55  ;;  %v10737_v13 = vrot.slane %v2874_v55, %v10721_v16 }
 0x983   :  { %v2721_v38 = vpop.f32.mrf.mxu0  ;;  %v10778_v10 = vrot.slane %v2900_v62, %v10721_v16  ;;  %v3040_v37 = vrot.slane %v10756_v28, %v13550_v20  ;;  %v10783_v21 = vrot.slane %v2924_v43, %v10721_v16  ;;  %v3016_v55 = vrot.slane %v2839_v40, %v13549_v58 }
 0x984   :  { %7666 = vtanh.f32 %v2753_v61  ;;  %v2754_v24 = vadd.f32 %v2752_v31, %v13543_v3  ;;  %v10747_v46 = vrot.slane %v2875_v18, %v10721_v16  ;;  %v3048_v12 = vrot.slane %v10737_v13, %v13549_v58 }
 0x985   :  { %v3052_v14 = vrot.slane %v10737_v13, %v13550_v20  ;;  %v3068_v61 = vrot.slane %v10769_v11, %v13549_v58  ;;  %v3072_v31 = vrot.slane %v10769_v11, %v13550_v20  ;;  %v2814_v38 = vrot.slane %v2800_v7, %v10721_v16 }
 0x986   :  { %7668 = vtanh.f32 %v2754_v24  ;;  %v3056_v22 = vrot.slane %v10747_v46, %v13549_v58  ;;  %v3060_v39 = vrot.slane %v10747_v46, %v13550_v20  ;;  %v13552_v24 = vld [vmem:[#allocation105_spill] sm:$0xff]  ;;  %v3076_v30 = vrot.slane %v10778_v10, %v13549_v58 }
 0x987   :  { %v3080_v34 = vrot.slane %v10778_v10, %v13550_v20  ;;  %v3020_v42 = vrot.slane %v2839_v40, %v13550_v20  ;;  %v3088_v23 = vrot.slane %v10783_v21, %v13549_v58  ;;  %v3092_v32 = vrot.slane %v10783_v21, %v13550_v20 }
 0x988   :  { %v2996_v48 = vrot.slane %v2814_v38, %v13549_v58  ;;  %v3000_v15 = vrot.slane %v2814_v38, %v13550_v20 }
 0x991   :  { %v7667_v1 = vpop.eup %7666 }
 0x992   :  { %v2759_v9 = vmul.f32 %v7667_v1, %v2757_v50 }
 0x993   :  { %v7669_v25 = vpop.eup %7668 }
 0x994   :  { %v2763_v33 = vadd.f32 %v2761_v47, %v2759_v9  ;;  %v2760_v36 = vmul.f32 %v7669_v25, %v2758_v44 }
 0x996   :  { %v2942_v2 = vcombine.low %v2763_v33, %v13551_v27  ;;  %v2764_v57 = vadd.f32 %v2762_v53, %v2760_v36 }
 0x998   :  { %v2949_v3 = vrot.slane %v2942_v2, %v10721_v16  ;;  %v2767_v29 = vcombine.low %v13552_v24, %v2764_v57 }
 0x99a   :  { %v2950_v41 = vcombine.high %v2949_v3, %v2949_v3  ;;  %v2774_v18 = vrot.slane %v2767_v29, %v10721_v16  ;;  %v2957_v45 = vrot.slane %v2949_v3, %v10721_v16 }
 0x99c   :  { %v2775_v52 = vcombine.high %v2774_v18, %v2774_v18  ;;  %v2964_v43 = vrot.slane %v2950_v41, %v10721_v16  ;;  %v2782_v54 = vrot.slane %v2774_v18, %v10721_v16  ;;  %v3108_v0 = vrot.slane %v2957_v45, %v13549_v58 }
 0x99d   :  { %v3112_v62 = vrot.slane %v2957_v45, %v13550_v20 }
 0x99e   :  { %v2789_v50 = vrot.slane %v2775_v52, %v10721_v16  ;;  %v2968_v1 = vrot.slane %v2782_v54, %v13549_v58  ;;  %v2972_v28 = vrot.slane %v2782_v54, %v13550_v20  ;;  %v3116_v44 = vrot.slane %v2964_v43, %v13549_v58 }
 0x99f   :  { %v3120_v25 = vrot.slane %v2964_v43, %v13550_v20 }
 0x9a0   :  { %v2976_v47 = vrot.slane %v2789_v50, %v13549_v58  ;;  %v2980_v9 = vrot.slane %v2789_v50, %v13550_v20  ;;  %v3126_v63 = vsel %vm3125_vm3, %v2968_v1, %v2988_v51  ;;  %v3127_v11 = vsel %vm3125_vm3, %v2972_v28, %v2992_v49 }
 0x9a1   :  { %v3131_v53 = vsel %vm3130_vm4, %v3126_v63, %v3008_v4  ;;  %v3132_v33 = vsel %vm3130_vm4, %v3127_v11, %v3012_v19 }
 0x9a2   :  { %v3128_v56 = vsel %vm3125_vm3, %v2976_v47, %v2996_v48  ;;  %v3129_v7 = vsel %vm3125_vm3, %v2980_v9, %v3000_v15  ;;  %v3136_v10 = vsel %vm3135_vm5, %v3131_v53, %v3028_v60  ;;  %v3137_v21 = vsel %vm3135_vm5, %v3132_v33, %v3032_v8 }
 0x9a3   :  { %v3133_v36 = vsel %vm3130_vm4, %v3128_v56, %v3016_v55  ;;  %v3134_v40 = vsel %vm3130_vm4, %v3129_v7, %v3020_v42  ;;  %v3141_v57 = vsel %vm3140_vm6, %v3136_v10, %v3048_v12  ;;  %v3142_v35 = vsel %vm3140_vm6, %v3137_v21, %v3052_v14 }
 0x9a4   :  { %v3138_v27 = vsel %vm3135_vm5, %v3133_v36, %v3036_v6  ;;  %v3139_v2 = vsel %vm3135_vm5, %v3134_v40, %v3040_v37  ;;  %v3146_v8 = vsel %vm3145_vm7, %v3141_v57, %v3068_v61  ;;  %v3147_v6 = vsel %vm3145_vm7, %v3142_v35, %v3072_v31 }
 0x9a5   :  { %v3143_v5 = vsel %vm3140_vm6, %v3138_v27, %v3056_v22  ;;  %v3144_v60 = vsel %vm3140_vm6, %v3139_v2, %v3060_v39  ;;  %v3150_v14 = vsel %vm422_vm0, %v3146_v8, %v3088_v23  ;;  %v3151_v37 = vsel %vm422_vm0, %v3147_v6, %v3092_v32 }
 0x9a6   :  { %v3148_v12 = vsel %vm3145_vm7, %v3143_v5, %v3076_v30  ;;  %v3149_v13 = vsel %vm3145_vm7, %v3144_v60, %v3080_v34  ;;  %v10875_v46 = vsel %vm3154_vm8, %v3150_v14, %v3108_v0  ;;  %v3156_v39 = vsel %vm3154_vm8, %v3151_v37, %v3112_v62 }
 0x9a7   :  { %v3152_v59 = vsel %vm422_vm0, %v3148_v12, %v3096_v26  ;;  %v3153_v22 = vsel %vm422_vm0, %v3149_v13, %v3100_v17 }
 0x9a8   :  { %v10879_v61 = vsel %vm3154_vm8, %v3152_v59, %v3116_v44  ;;  %v3158_v31 = vsel %vm3154_vm8, %v3153_v22, %v3120_v25 }
 0x9a9   :  { %8716 = dma.done.wait [#allocation6], 12288 }
 0x9aa   :  { %8717 = vsyncadd [#allocation6], 4294955008 }
 0x9ab   :  { %8718 = dma.done.wait [#allocation6 + $0x1], 12288 }
 0x9ac   :  { %8719 = vsyncadd [#allocation6 + $0x1], 4294955008  ;;  %v10882_v4 = vpack.c.bf16 %v3158_v31, %v3156_v39  ;;  %v7862_v38 = vld [vmem:[#allocation2 + $0x154] ss:$24 sps:$4 sm:$0xff]   ;;  %v7866_v24 = vld [vmem:[#allocation2 + $0x150] ss:$24 sps:$4 sm:$0xff]  }
 0x9ad   :  { %v7864_v3 = vld [vmem:[#allocation2 + $0x15c] ss:$24 sps:$4 sm:$0xff]   ;;  %3775 = vmatprep.subr.bf16.mxu1 %v7862_v38  ;;  %v7867_v29 = vld [vmem:[#allocation2 + $0x158] ss:$24 sps:$4 sm:$0xff]   ;;  %v7870_v55 = vld [vmem:[#allocation2 + $0x12c] ss:$24 sps:$4 sm:$0xff]  }
 0x9ae   :  { %3807 = vmatprep.mubr.bf16.mxu1 %v10882_v4  ;;  %3850 = vmatprep.mubr.bf16.mxu0 %v10882_v4  ;;  %v7868_v19 = vld [vmem:[#allocation2 + $0x124] ss:$24 sps:$4 sm:$0xff]   ;;  %v7872_v30 = vld [vmem:[#allocation2 + $0x120] ss:$24 sps:$4 sm:$0xff]   ;;  %v7874_v42 = vld [vmem:[#allocation2 + $0xf4] ss:$24 sps:$4 sm:$0xff]  }
 0x9af   :  { %3818 = vmatprep.subr.bf16.mxu0 %v7864_v3  ;;  %3776 = vmatpush1.bf16.msra.mxu1 %v7866_v24  ;;  %v7873_v34 = vld [vmem:[#allocation2 + $0x128] ss:$24 sps:$4 sm:$0xff]   ;;  %v7876_v23 = vld [vmem:[#allocation2 + $0xfc] ss:$24 sps:$4 sm:$0xff]   ;;  %v7879_v18 = vld [vmem:[#allocation2 + $0xf8] ss:$24 sps:$4 sm:$0xff]  }
 0x9b0   :  { %3819 = vmatpush1.bf16.msra.mxu0 %v7867_v29  ;;  %3777 = vmatprep.subr.bf16.mxu1 %v7868_v19  ;;  %v7878_v41 = vld [vmem:[#allocation2 + $0xf0] ss:$24 sps:$4 sm:$0xff]   ;;  %v7880_v51 = vld [vmem:[#allocation2 + $0xc4] ss:$24 sps:$4 sm:$0xff]   ;;  %v7884_v32 = vld [vmem:[#allocation2 + $0xc0] ss:$24 sps:$4 sm:$0xff]  }
 0x9b1   :  { %3820 = vmatprep.subr.bf16.mxu0 %v7870_v55  ;;  %v7882_v49 = vld [vmem:[#allocation2 + $0xcc] ss:$24 sps:$4 sm:$0xff]   ;;  %v7885_v26 = vld [vmem:[#allocation2 + $0xc8] ss:$24 sps:$4 sm:$0xff]   ;;  %v7888_v17 = vld [vmem:[#allocation2 + $0x9c] ss:$24 sps:$4 sm:$0xff]  }
 0x9b2   :  { %v7886_v48 = vld [vmem:[#allocation2 + $0x94] ss:$24 sps:$4 sm:$0xff]   ;;  %v7890_v45 = vld [vmem:[#allocation2 + $0x90] ss:$24 sps:$4 sm:$0xff]   ;;  %v7892_v15 = vld [vmem:[#allocation2 + $0x64] ss:$24 sps:$4 sm:$0xff]  }
 0x9b3   :  { %3778 = vmatpush1.bf16.msra.mxu1 %v7872_v30  ;;  %v7891_v52 = vld [vmem:[#allocation2 + $0x98] ss:$24 sps:$4 sm:$0xff]   ;;  %v7894_v43 = vld [vmem:[#allocation2 + $0x6c] ss:$24 sps:$4 sm:$0xff]   ;;  %v7897_v50 = vld [vmem:[#allocation2 + $0x68] ss:$24 sps:$4 sm:$0xff]  }
 0x9b4   :  { %3821 = vmatpush1.bf16.msra.mxu0 %v7873_v34  ;;  %3779 = vmatprep.subr.bf16.mxu1 %v7874_v42  ;;  %v7896_v54 = vld [vmem:[#allocation2 + $0x60] ss:$24 sps:$4 sm:$0xff]   ;;  %v7898_v1 = vld [vmem:[#allocation2 + $0x34] ss:$24 sps:$4 sm:$0xff]   ;;  %v7902_v0 = vld [vmem:[#allocation2 + $0x30] ss:$24 sps:$4 sm:$0xff]   ;;  %v10890_v42 = vpack.c.bf16 %v10879_v61, %v10875_v46 }
 0x9b5   :  { %3822 = vmatprep.subr.bf16.mxu0 %v7876_v23  ;;  %v7900_v28 = vld [vmem:[#allocation2 + $0x3c] ss:$24 sps:$4 sm:$0xff]   ;;  %v7903_v62 = vld [vmem:[#allocation2 + $0x38] ss:$24 sps:$4 sm:$0xff]   ;;  %v7906_v9 = vld [vmem:[#allocation2 + $0xc] ss:$24 sps:$4 sm:$0xff]  }
 0x9b6   :  { %v7904_v47 = vld [vmem:[#allocation2 + $0x4] ss:$24 sps:$4 sm:$0xff]   ;;  %v7908_v44 = vld [vmem:[#allocation2] ss:$24 sps:$4 sm:$0xff]   ;;  %v7910_v63 = vld [vmem:[#allocation2 + $0x2d4] ss:$24 sps:$4 sm:$0xff]  }
 0x9b7   :  { %3780 = vmatpush1.bf16.msra.mxu1 %v7878_v41  ;;  %v7909_v25 = vld [vmem:[#allocation2 + $0x8] ss:$24 sps:$4 sm:$0xff]   ;;  %v7912_v11 = vld [vmem:[#allocation2 + $0x2dc] ss:$24 sps:$4 sm:$0xff]   ;;  %v7915_v7 = vld [vmem:[#allocation2 + $0x2d8] ss:$24 sps:$4 sm:$0xff]  }
 0x9b8   :  { %3823 = vmatpush1.bf16.msra.mxu0 %v7879_v18  ;;  %3781 = vmatprep.subr.bf16.mxu1 %v7880_v51  ;;  %v7914_v56 = vld [vmem:[#allocation2 + $0x2d0] ss:$24 sps:$4 sm:$0xff]   ;;  %v7916_v53 = vld [vmem:[#allocation2 + $0x2a4] ss:$24 sps:$4 sm:$0xff]   ;;  %v7920_v36 = vld [vmem:[#allocation2 + $0x2a0] ss:$24 sps:$4 sm:$0xff]  }
 0x9b9   :  { %3824 = vmatprep.subr.bf16.mxu0 %v7882_v49  ;;  %v7918_v33 = vld [vmem:[#allocation2 + $0x2ac] ss:$24 sps:$4 sm:$0xff]   ;;  %v7921_v40 = vld [vmem:[#allocation2 + $0x2a8] ss:$24 sps:$4 sm:$0xff]   ;;  %v7924_v21 = vld [vmem:[#allocation2 + $0x27c] ss:$24 sps:$4 sm:$0xff]  }
 0x9ba   :  { %v7922_v10 = vld [vmem:[#allocation2 + $0x274] ss:$24 sps:$4 sm:$0xff]   ;;  %v7926_v27 = vld [vmem:[#allocation2 + $0x270] ss:$24 sps:$4 sm:$0xff]   ;;  %v7928_v57 = vld [vmem:[#allocation2 + $0x244] ss:$24 sps:$4 sm:$0xff]  }
 0x9bb   :  { %3782 = vmatpush1.bf16.msra.mxu1 %v7884_v32  ;;  %v7927_v2 = vld [vmem:[#allocation2 + $0x278] ss:$24 sps:$4 sm:$0xff]   ;;  %v7930_v35 = vld [vmem:[#allocation2 + $0x24c] ss:$24 sps:$4 sm:$0xff]   ;;  %v7933_v60 = vld [vmem:[#allocation2 + $0x248] ss:$24 sps:$4 sm:$0xff]  }
 0x9bc   :  { %3825 = vmatpush1.bf16.msra.mxu0 %v7885_v26  ;;  %3783 = vmatprep.subr.bf16.mxu1 %v7886_v48  ;;  %v7932_v5 = vld [vmem:[#allocation2 + $0x240] ss:$24 sps:$4 sm:$0xff]   ;;  %v7934_v8 = vld [vmem:[#allocation2 + $0x214] ss:$24 sps:$4 sm:$0xff]   ;;  %v7938_v12 = vld [vmem:[#allocation2 + $0x210] ss:$24 sps:$4 sm:$0xff]  }
 0x9bd   :  { %3826 = vmatprep.subr.bf16.mxu0 %v7888_v17  ;;  %v7936_v6 = vld [vmem:[#allocation2 + $0x21c] ss:$24 sps:$4 sm:$0xff]   ;;  %v7939_v13 = vld [vmem:[#allocation2 + $0x218] ss:$24 sps:$4 sm:$0xff]   ;;  %v7942_v37 = vld [vmem:[#allocation2 + $0x1ec] ss:$24 sps:$4 sm:$0xff]  }
 0x9be   :  { %v7940_v14 = vld [vmem:[#allocation2 + $0x1e4] ss:$24 sps:$4 sm:$0xff]   ;;  %v7944_v59 = vld [vmem:[#allocation2 + $0x1e0] ss:$24 sps:$4 sm:$0xff]   ;;  %v7946_v39 = vld [vmem:[#allocation2 + $0x1b4] ss:$24 sps:$4 sm:$0xff]  }
 0x9bf   :  { %3784 = vmatpush1.bf16.msra.mxu1 %v7890_v45  ;;  %v7945_v22 = vld [vmem:[#allocation2 + $0x1e8] ss:$24 sps:$4 sm:$0xff]   ;;  %v7948_v31 = vld [vmem:[#allocation2 + $0x1bc] ss:$24 sps:$4 sm:$0xff]   ;;  %v7951_v3 = vld [vmem:[#allocation2 + $0x1b8] ss:$24 sps:$4 sm:$0xff]  }
 0x9c0   :  { %3827 = vmatpush1.bf16.msra.mxu0 %v7891_v52  ;;  %3785 = vmatprep.subr.bf16.mxu1 %v7892_v15  ;;  %v7950_v38 = vld [vmem:[#allocation2 + $0x1b0] ss:$24 sps:$4 sm:$0xff]   ;;  %v7952_v24 = vld [vmem:[#allocation2 + $0x184] ss:$24 sps:$4 sm:$0xff]   ;;  %v7956_v19 = vld [vmem:[#allocation2 + $0x180] ss:$24 sps:$4 sm:$0xff]  }
 0x9c1   :  { %3828 = vmatprep.subr.bf16.mxu0 %v7894_v43  ;;  %v7954_v29 = vld [vmem:[#allocation2 + $0x18c] ss:$24 sps:$4 sm:$0xff]   ;;  %v7957_v55 = vld [vmem:[#allocation2 + $0x188] ss:$24 sps:$4 sm:$0xff]   ;;  %v13553_v26 = vmov 0  }
 0x9c2   :  { %v7960_v30 = vld [vmem:[#allocation2 + $0x164] ss:$24 sps:$4 sm:$0xff]   ;;  %v10886_v34 = vld [vmem:[#allocation3 + $0x154] ss:$24 sps:$4 sm:$0xff]   ;;  %v7958_v23 = vld [vmem:[#allocation2 + $0x160] ss:$24 sps:$4 sm:$0xff]  }
 0x9c3   :  { %3786 = vmatpush1.bf16.msra.mxu1 %v7896_v54  ;;  %v10892_v41 = vld [vmem:[#allocation3 + $0x150] ss:$24 sps:$4 sm:$0xff]   ;;  %v7966_v18 = vld [vmem:[#allocation2 + $0x134] ss:$24 sps:$4 sm:$0xff]   ;;  %v10895_v51 = vld [vmem:[#allocation3 + $0x124] ss:$24 sps:$4 sm:$0xff]  }
 0x9c4   :  { %3829 = vmatpush1.bf16.msra.mxu0 %v7897_v50  ;;  %3787 = vmatprep.subr.bf16.mxu1 %v7898_v1  ;;  %v7964_v49 = vld [vmem:[#allocation2 + $0x130] ss:$24 sps:$4 sm:$0xff]   ;;  %v10899_v32 = vld [vmem:[#allocation3 + $0x120] ss:$24 sps:$4 sm:$0xff]   ;;  %v7972_v46 = vld [vmem:[#allocation2 + $0x104] ss:$24 sps:$4 sm:$0xff]  }
 0x9c5   :  { %3830 = vmatprep.subr.bf16.mxu0 %v7900_v28  ;;  %v10903_v61 = vld [vmem:[#allocation3 + $0xf4] ss:$24 sps:$4 sm:$0xff]   ;;  %v7970_v48 = vld [vmem:[#allocation2 + $0x100] ss:$24 sps:$4 sm:$0xff]   ;;  %v10907_v17 = vld [vmem:[#allocation3 + $0xf0] ss:$24 sps:$4 sm:$0xff]  }
 0x9c6   :  { %v7978_v45 = vld [vmem:[#allocation2 + $0xd4] ss:$24 sps:$4 sm:$0xff]   ;;  %v10911_v52 = vld [vmem:[#allocation3 + $0xc4] ss:$24 sps:$4 sm:$0xff]   ;;  %v7976_v15 = vld [vmem:[#allocation2 + $0xd0] ss:$24 sps:$4 sm:$0xff]  }
 0x9c7   :  { %3788 = vmatpush1.bf16.msra.mxu1 %v7902_v0  ;;  %v10913_v43 = vld [vmem:[#allocation3 + $0xc0] ss:$24 sps:$4 sm:$0xff]   ;;  %v10917_v54 = vld [vmem:[#allocation3 + $0x94] ss:$24 sps:$4 sm:$0xff]   ;;  %v10919_v1 = vld [vmem:[#allocation3 + $0x90] ss:$24 sps:$4 sm:$0xff]  }
 0x9c8   :  { %3831 = vmatpush1.bf16.msra.mxu0 %v7903_v62  ;;  %3789 = vmatprep.subr.bf16.mxu1 %v7904_v47  ;;  %v7982_v50 = vld [vmem:[#allocation2 + $0xa0] ss:$24 sps:$4 sm:$0xff]   ;;  %v7990_v28 = vld [vmem:[#allocation2 + $0x74] ss:$24 sps:$4 sm:$0xff]   ;;  %v10923_v0 = vld [vmem:[#allocation3 + $0x64] ss:$24 sps:$4 sm:$0xff]  }
 0x9c9   :  { %3832 = vmatprep.subr.bf16.mxu0 %v7906_v9  ;;  %v7988_v62 = vld [vmem:[#allocation2 + $0x70] ss:$24 sps:$4 sm:$0xff]   ;;  %v10925_v47 = vld [vmem:[#allocation3 + $0x60] ss:$24 sps:$4 sm:$0xff]   ;;  %v7996_v9 = vld [vmem:[#allocation2 + $0x44] ss:$24 sps:$4 sm:$0xff]  }
 0x9ca   :  { %v11076_v16 = vld [vmem:[#allocation3 + $0xc] ss:$24 sps:$4 sm:$0xff]   ;;  %v11132_v20 = vld [vmem:[#allocation3 + $0x250] ss:$24 sps:$4 sm:$0xff]  }
 0x9cb   :  { %3790 = vmatpush1.bf16.msra.mxu1 %v7908_v44  ;;  %v10929_v44 = vld [vmem:[#allocation3 + $0x34] ss:$24 sps:$4 sm:$0xff]   ;;  %13586 = vst [vmem:[#allocation48_spill] sm:$0xff] %v11132_v20 }
 0x9cc   :  { %3833 = vmatpush1.bf16.msra.mxu0 %v7909_v25  ;;  %3791 = vmatprep.subr.bf16.mxu1 %v7910_v63  ;;  %v7994_v25 = vld [vmem:[#allocation2 + $0x40] ss:$24 sps:$4 sm:$0xff]   ;;  %v10931_v63 = vld [vmem:[#allocation3 + $0x30] ss:$24 sps:$4 sm:$0xff]   ;;  %v11150_v58 = vld [vmem:[#allocation3 + $0x1f4] ss:$24 sps:$4 sm:$0xff]  }
 0x9cd   :  { %3834 = vmatprep.subr.bf16.mxu0 %v7912_v11  ;;  %v8002_v11 = vld [vmem:[#allocation2 + $0x14] ss:$24 sps:$4 sm:$0xff]   ;;  %13592 = vst [vmem:[#allocation112_spill] sm:$0xff] %v11150_v58 }
 0x9cf   :  { %3792 = vmatpush2.bf16.msra.mxu1 %v7914_v56  ;;  %v10935_v56 = vld [vmem:[#allocation3 + $0x4] ss:$24 sps:$4 sm:$0xff]  }
 0x9d0   :  { %3835 = vmatpush2.bf16.msra.mxu0 %v7915_v7  ;;  %3793 = vmatprep.subr.bf16.mxu1 %v7916_v53  ;;  %v8000_v7 = vld [vmem:[#allocation2 + $0x10] ss:$24 sps:$4 sm:$0xff]   ;;  %v10938_v53 = vld [vmem:[#allocation3] ss:$24 sps:$4 sm:$0xff]  }
 0x9d1   :  { %3836 = vmatprep.subr.bf16.mxu0 %v7918_v33  ;;  %v8008_v33 = vld [vmem:[#allocation2 + $0x2e4] ss:$24 sps:$4 sm:$0xff]  }
 0x9d3   :  { %3794 = vmatpush2.bf16.msra.mxu1 %v7920_v36  ;;  %v10941_v36 = vld [vmem:[#allocation3 + $0x2d4] ss:$24 sps:$4 sm:$0xff]  }
 0x9d4   :  { %3837 = vmatpush2.bf16.msra.mxu0 %v7921_v40  ;;  %3795 = vmatprep.subr.bf16.mxu1 %v7922_v10  ;;  %v8006_v40 = vld [vmem:[#allocation2 + $0x2e0] ss:$24 sps:$4 sm:$0xff]   ;;  %v10943_v10 = vld [vmem:[#allocation3 + $0x2d0] ss:$24 sps:$4 sm:$0xff]  }
 0x9d5   :  { %3838 = vmatprep.subr.bf16.mxu0 %v7924_v21  ;;  %v8014_v21 = vld [vmem:[#allocation2 + $0x2b4] ss:$24 sps:$4 sm:$0xff]  }
 0x9d7   :  { %3796 = vmatpush2.bf16.msra.mxu1 %v7926_v27  ;;  %v10947_v27 = vld [vmem:[#allocation3 + $0x2a4] ss:$24 sps:$4 sm:$0xff]  }
 0x9d8   :  { %3839 = vmatpush2.bf16.msra.mxu0 %v7927_v2  ;;  %3797 = vmatprep.subr.bf16.mxu1 %v7928_v57  ;;  %v8012_v2 = vld [vmem:[#allocation2 + $0x2b0] ss:$24 sps:$4 sm:$0xff]   ;;  %v10950_v57 = vld [vmem:[#allocation3 + $0x2a0] ss:$24 sps:$4 sm:$0xff]  }
 0x9d9   :  { %3840 = vmatprep.subr.bf16.mxu0 %v7930_v35  ;;  %v8020_v35 = vld [vmem:[#allocation2 + $0x284] ss:$24 sps:$4 sm:$0xff]  }
 0x9db   :  { %3798 = vmatpush2.bf16.msra.mxu1 %v7932_v5  ;;  %v10953_v5 = vld [vmem:[#allocation3 + $0x274] ss:$24 sps:$4 sm:$0xff]  }
 0x9dc   :  { %3841 = vmatpush2.bf16.msra.mxu0 %v7933_v60  ;;  %3799 = vmatprep.subr.bf16.mxu1 %v7934_v8  ;;  %v8018_v60 = vld [vmem:[#allocation2 + $0x280] ss:$24 sps:$4 sm:$0xff]   ;;  %v10955_v8 = vld [vmem:[#allocation3 + $0x270] ss:$24 sps:$4 sm:$0xff]  }
 0x9dd   :  { %3842 = vmatprep.subr.bf16.mxu0 %v7936_v6  ;;  %v8026_v6 = vld [vmem:[#allocation2 + $0x254] ss:$24 sps:$4 sm:$0xff]  }
 0x9df   :  { %3800 = vmatpush2.bf16.msra.mxu1 %v7938_v12  ;;  %v10959_v12 = vld [vmem:[#allocation3 + $0x244] ss:$24 sps:$4 sm:$0xff]  }
 0x9e0   :  { %3843 = vmatpush2.bf16.msra.mxu0 %v7939_v13  ;;  %3801 = vmatprep.subr.bf16.mxu1 %v7940_v14  ;;  %v8024_v13 = vld [vmem:[#allocation2 + $0x250] ss:$24 sps:$4 sm:$0xff]   ;;  %v10962_v14 = vld [vmem:[#allocation3 + $0x240] ss:$24 sps:$4 sm:$0xff]  }
 0x9e1   :  { %3844 = vmatprep.subr.bf16.mxu0 %v7942_v37  ;;  %v8032_v37 = vld [vmem:[#allocation2 + $0x224] ss:$24 sps:$4 sm:$0xff]  }
 0x9e3   :  { %3802 = vmatpush2.bf16.msra.mxu1 %v7944_v59  ;;  %v10965_v59 = vld [vmem:[#allocation3 + $0x214] ss:$24 sps:$4 sm:$0xff]  }
 0x9e4   :  { %3845 = vmatpush2.bf16.msra.mxu0 %v7945_v22  ;;  %3803 = vmatprep.subr.bf16.mxu1 %v7946_v39  ;;  %v8030_v22 = vld [vmem:[#allocation2 + $0x220] ss:$24 sps:$4 sm:$0xff]   ;;  %v10967_v39 = vld [vmem:[#allocation3 + $0x210] ss:$24 sps:$4 sm:$0xff]  }
 0x9e5   :  { %3846 = vmatprep.subr.bf16.mxu0 %v7948_v31  ;;  %v8038_v31 = vld [vmem:[#allocation2 + $0x1f4] ss:$24 sps:$4 sm:$0xff]  }
 0x9e7   :  { %3804 = vmatpush2.bf16.msra.mxu1 %v7950_v38  ;;  %v10971_v38 = vld [vmem:[#allocation3 + $0x1e4] ss:$24 sps:$4 sm:$0xff]  }
 0x9e8   :  { %3847 = vmatpush2.bf16.msra.mxu0 %v7951_v3  ;;  %3805 = vmatprep.subr.bf16.mxu1 %v7952_v24  ;;  %v8036_v3 = vld [vmem:[#allocation2 + $0x1f0] ss:$24 sps:$4 sm:$0xff]   ;;  %v10974_v24 = vld [vmem:[#allocation3 + $0x1e0] ss:$24 sps:$4 sm:$0xff]  }
 0x9e9   :  { %3848 = vmatprep.subr.bf16.mxu0 %v7954_v29  ;;  %13554 = vst [vmem:[#allocation78_spill] sm:$0xff] %v10974_v24  ;;  %v8044_v29 = vld [vmem:[#allocation2 + $0x1c4] ss:$24 sps:$4 sm:$0xff]  }
 0x9eb   :  { %3806 = vmatpush2.bf16.msra.mxu1 %v7956_v19  ;;  %v10977_v19 = vld [vmem:[#allocation3 + $0x1b4] ss:$24 sps:$4 sm:$0xff]  }
 0x9ec   :  { %3849 = vmatpush2.bf16.msra.mxu0 %v7957_v55  ;;  %3861 = vmatprep.subr.bf16.mxu1 %v7960_v30  ;;  %13555 = vst [vmem:[#allocation79_spill] sm:$0xff] %v10977_v19  ;;  %v8042_v55 = vld [vmem:[#allocation2 + $0x1c0] ss:$24 sps:$4 sm:$0xff]   ;;  %v10979_v30 = vld [vmem:[#allocation3 + $0x1b0] ss:$24 sps:$4 sm:$0xff]  }
 0x9ed   :  { %4752 = vmatprep.subr.bf16.mxu0 %v10886_v34  ;;  %13556 = vst [vmem:[#allocation53_spill] sm:$0xff] %v10979_v30 }
 0x9ee   :  { %3808 = vmatmul.mubr.bf16.vlgmr.msra.gmra.mxu1 %v10890_v42 }
 0x9ef   :  { %3851 = vmatmul.mubr.bf16.vlgmr.msra.gmra.mxu0 %v10890_v42  ;;  %3862 = vmatpush1.bf16.msra.mxu1 %v7958_v23  ;;  %v8050_v23 = vld [vmem:[#allocation2 + $0x194] ss:$24 sps:$4 sm:$0xff]  }
 0x9f0   :  { %4753 = vmatpush1.bf16.msra.mxu0 %v10892_v41  ;;  %3863 = vmatprep.subr.bf16.mxu1 %v7966_v18  ;;  %v10983_v18 = vld [vmem:[#allocation3 + $0x184] ss:$24 sps:$4 sm:$0xff]  }
 0x9f1   :  { %4754 = vmatprep.subr.bf16.mxu0 %v10895_v51  ;;  %3893 = vmatprep.mubr.bf16.mxu1 %v10882_v4  ;;  %v7984_v4 = vld [vmem:[#allocation2 + $0xa4] ss:$24 sps:$4 sm:$0xff]   ;;  %13557 = vst [vmem:[#allocation52_spill] sm:$0xff] %v10983_v18 }
 0x9f2   :  { %4784 = vmatprep.mubr.bf16.mxu0 %v13553_v26 }
 0x9f3   :  { %3864 = vmatpush1.bf16.msra.mxu1 %v7964_v49  ;;  %v8048_v49 = vld [vmem:[#allocation2 + $0x190] ss:$24 sps:$4 sm:$0xff]  }
 0x9f4   :  { %4755 = vmatpush1.bf16.msra.mxu0 %v10899_v32  ;;  %3865 = vmatprep.subr.bf16.mxu1 %v7972_v46  ;;  %v10986_v46 = vld [vmem:[#allocation3 + $0x180] ss:$24 sps:$4 sm:$0xff]  }
 0x9f5   :  { %4756 = vmatprep.subr.bf16.mxu0 %v10903_v61  ;;  %13558 = vst [vmem:[#allocation54_spill] sm:$0xff] %v10986_v46 }
 0x9f7   :  { %3866 = vmatpush1.bf16.msra.mxu1 %v7970_v48  ;;  %v10988_v48 = vld [vmem:[#allocation3 + $0x15c] ss:$24 sps:$4 sm:$0xff]  }
 0x9f8   :  { %4757 = vmatpush1.bf16.msra.mxu0 %v10907_v17  ;;  %3867 = vmatprep.subr.bf16.mxu1 %v7978_v45  ;;  %v10991_v45 = vld [vmem:[#allocation3 + $0x164] ss:$24 sps:$4 sm:$0xff]  }
 0x9f9   :  { %4758 = vmatprep.subr.bf16.mxu0 %v10911_v52  ;;  %13559 = vst [vmem:[#allocation64_spill] sm:$0xff] %v10991_v45 }
 0x9fb   :  { %3868 = vmatpush1.bf16.msra.mxu1 %v7976_v15  ;;  %v10994_v15 = vld [vmem:[#allocation3 + $0x158] ss:$24 sps:$4 sm:$0xff]  }
 0x9fc   :  { %4759 = vmatpush1.bf16.msra.mxu0 %v10913_v43  ;;  %3869 = vmatprep.subr.bf16.mxu1 %v7984_v4  ;;  %v10996_v4 = vld [vmem:[#allocation3 + $0x160] ss:$24 sps:$4 sm:$0xff]  }
 0x9fd   :  { %4760 = vmatprep.subr.bf16.mxu0 %v10917_v54  ;;  %13560 = vst [vmem:[#allocation67_spill] sm:$0xff] %v10996_v4 }
 0x9ff   :  { %3870 = vmatpush1.bf16.msra.mxu1 %v7982_v50  ;;  %v11000_v50 = vld [vmem:[#allocation3 + $0x12c] ss:$24 sps:$4 sm:$0xff]  }
 0xa00   :  { %4761 = vmatpush1.bf16.msra.mxu0 %v10919_v1  ;;  %3871 = vmatprep.subr.bf16.mxu1 %v7990_v28  ;;  %v11002_v28 = vld [vmem:[#allocation3 + $0x134] ss:$24 sps:$4 sm:$0xff]  }
 0xa01   :  { %4762 = vmatprep.subr.bf16.mxu0 %v10923_v0  ;;  %13561 = vst [vmem:[#allocation55_spill] sm:$0xff] %v11002_v28 }
 0xa03   :  { %3872 = vmatpush1.bf16.msra.mxu1 %v7988_v62  ;;  %v11008_v62 = vld [vmem:[#allocation3 + $0x128] ss:$24 sps:$4 sm:$0xff]  }
 0xa04   :  { %4763 = vmatpush1.bf16.msra.mxu0 %v10925_v47  ;;  %3873 = vmatprep.subr.bf16.mxu1 %v7996_v9  ;;  %v11010_v9 = vld [vmem:[#allocation3 + $0x130] ss:$24 sps:$4 sm:$0xff]  }
 0xa05   :  { %4764 = vmatprep.subr.bf16.mxu0 %v10929_v44  ;;  %13562 = vst [vmem:[#allocation65_spill] sm:$0xff] %v11010_v9 }
 0xa07   :  { %3874 = vmatpush1.bf16.msra.mxu1 %v7994_v25  ;;  %v11014_v25 = vld [vmem:[#allocation3 + $0xfc] ss:$24 sps:$4 sm:$0xff]  }
 0xa08   :  { %4765 = vmatpush1.bf16.msra.mxu0 %v10931_v63  ;;  %3875 = vmatprep.subr.bf16.mxu1 %v8002_v11  ;;  %v11016_v11 = vld [vmem:[#allocation3 + $0x104] ss:$24 sps:$4 sm:$0xff]  }
 0xa09   :  { %4766 = vmatprep.subr.bf16.mxu0 %v10935_v56  ;;  %13563 = vst [vmem:[#allocation70_spill] sm:$0xff] %v11016_v11 }
 0xa0b   :  { %3876 = vmatpush1.bf16.msra.mxu1 %v8000_v7  ;;  %v11024_v7 = vld [vmem:[#allocation3 + $0x100] ss:$24 sps:$4 sm:$0xff]  }
 0xa0c   :  { %4767 = vmatpush1.bf16.msra.mxu0 %v10938_v53  ;;  %3877 = vmatprep.subr.bf16.mxu1 %v8008_v33  ;;  %13564 = vst [vmem:[#allocation122_spill] sm:$0xff] %v11024_v7  ;;  %v11028_v33 = vld [vmem:[#allocation3 + $0xcc] ss:$24 sps:$4 sm:$0xff]  }
 0xa0d   :  { %4768 = vmatprep.subr.bf16.mxu0 %v10941_v36 }
 0xa0f   :  { %3878 = vmatpush2.bf16.msra.mxu1 %v8006_v40  ;;  %v11030_v40 = vld [vmem:[#allocation3 + $0xd4] ss:$24 sps:$4 sm:$0xff]  }
 0xa10   :  { %4769 = vmatpush2.bf16.msra.mxu0 %v10943_v10  ;;  %3879 = vmatprep.subr.bf16.mxu1 %v8014_v21  ;;  %13565 = vst [vmem:[#allocation123_spill] sm:$0xff] %v11030_v40  ;;  %v11034_v21 = vld [vmem:[#allocation3 + $0xc8] ss:$24 sps:$4 sm:$0xff]  }
 0xa11   :  { %4770 = vmatprep.subr.bf16.mxu0 %v10947_v27 }
 0xa13   :  { %3880 = vmatpush2.bf16.msra.mxu1 %v8012_v2  ;;  %v11036_v2 = vld [vmem:[#allocation3 + $0xd0] ss:$24 sps:$4 sm:$0xff]  }
 0xa14   :  { %4771 = vmatpush2.bf16.msra.mxu0 %v10950_v57  ;;  %3881 = vmatprep.subr.bf16.mxu1 %v8020_v35  ;;  %13566 = vst [vmem:[#allocation124_spill] sm:$0xff] %v11036_v2  ;;  %v11040_v35 = vld [vmem:[#allocation3 + $0x9c] ss:$24 sps:$4 sm:$0xff]  }
 0xa15   :  { %4772 = vmatprep.subr.bf16.mxu0 %v10953_v5 }
 0xa17   :  { %3882 = vmatpush2.bf16.msra.mxu1 %v8018_v60  ;;  %v11042_v60 = vld [vmem:[#allocation3 + $0xa4] ss:$24 sps:$4 sm:$0xff]  }
 0xa18   :  { %4773 = vmatpush2.bf16.msra.mxu0 %v10955_v8  ;;  %3883 = vmatprep.subr.bf16.mxu1 %v8026_v6  ;;  %13567 = vst [vmem:[#allocation125_spill] sm:$0xff] %v11042_v60  ;;  %v11046_v6 = vld [vmem:[#allocation3 + $0x98] ss:$24 sps:$4 sm:$0xff]  }
 0xa19   :  { %4774 = vmatprep.subr.bf16.mxu0 %v10959_v12 }
 0xa1b   :  { %3884 = vmatpush2.bf16.msra.mxu1 %v8024_v13  ;;  %v11048_v13 = vld [vmem:[#allocation3 + $0xa0] ss:$24 sps:$4 sm:$0xff]  }
 0xa1c   :  { %4775 = vmatpush2.bf16.msra.mxu0 %v10962_v14  ;;  %3885 = vmatprep.subr.bf16.mxu1 %v8032_v37  ;;  %13568 = vst [vmem:[#allocation126_spill] sm:$0xff] %v11048_v13  ;;  %v11052_v37 = vld [vmem:[#allocation3 + $0x6c] ss:$24 sps:$4 sm:$0xff]  }
 0xa1d   :  { %4776 = vmatprep.subr.bf16.mxu0 %v10965_v59 }
 0xa1f   :  { %3886 = vmatpush2.bf16.msra.mxu1 %v8030_v22  ;;  %v11054_v22 = vld [vmem:[#allocation3 + $0x74] ss:$24 sps:$4 sm:$0xff]  }
 0xa20   :  { %4777 = vmatpush2.bf16.msra.mxu0 %v10967_v39  ;;  %3887 = vmatprep.subr.bf16.mxu1 %v8038_v31  ;;  %13569 = vst [vmem:[#allocation127_spill] sm:$0xff] %v11054_v22  ;;  %v11058_v31 = vld [vmem:[#allocation3 + $0x68] ss:$24 sps:$4 sm:$0xff]  }
 0xa21   :  { %4778 = vmatprep.subr.bf16.mxu0 %v10971_v38 }
 0xa23   :  { %3888 = vmatpush2.bf16.msra.mxu1 %v8036_v3  ;;  %v11060_v3 = vld [vmem:[#allocation3 + $0x70] ss:$24 sps:$4 sm:$0xff]  }
 0xa24   :  { %4779 = vmatpush2.bf16.msra.mxu0 %v10974_v24  ;;  %3889 = vmatprep.subr.bf16.mxu1 %v8044_v29  ;;  %13570 = vst [vmem:[#allocation128_spill] sm:$0xff] %v11060_v3  ;;  %v11064_v29 = vld [vmem:[#allocation3 + $0x3c] ss:$24 sps:$4 sm:$0xff]  }
 0xa25   :  { %4780 = vmatprep.subr.bf16.mxu0 %v10977_v19  ;;  %v11168_v19 = vld [vmem:[#allocation3 + $0x1c0] ss:$24 sps:$4 sm:$0xff]   ;;  %v11174_v24 = vld [vmem:[#allocation3 + $0x194] ss:$24 sps:$4 sm:$0xff]  }
 0xa27   :  { %3890 = vmatpush2.bf16.msra.mxu1 %v8042_v55  ;;  %v11066_v55 = vld [vmem:[#allocation3 + $0x44] ss:$24 sps:$4 sm:$0xff]  }
 0xa28   :  { %4781 = vmatpush2.bf16.msra.mxu0 %v10979_v30  ;;  %3891 = vmatprep.subr.bf16.mxu1 %v8050_v23  ;;  %13571 = vst [vmem:[#allocation129_spill] sm:$0xff] %v11066_v55  ;;  %v11070_v23 = vld [vmem:[#allocation3 + $0x38] ss:$24 sps:$4 sm:$0xff]   ;;  %v11162_v30 = vld [vmem:[#allocation3 + $0x1c4] ss:$24 sps:$4 sm:$0xff]  }
 0xa29   :  { %4782 = vmatprep.subr.bf16.mxu0 %v10983_v18  ;;  %v11156_v18 = vld [vmem:[#allocation3 + $0x1f0] ss:$24 sps:$4 sm:$0xff]  }
 0xa2b   :  { %3892 = vmatpush2.bf16.msra.mxu1 %v8048_v49  ;;  %v11072_v49 = vld [vmem:[#allocation3 + $0x40] ss:$24 sps:$4 sm:$0xff]  }
 0xa2c   :  { %4783 = vmatpush2.bf16.msra.mxu0 %v10986_v46  ;;  %4793 = vmatprep.subr.bf16.mxu1 %v10988_v48  ;;  %13572 = vst [vmem:[#allocation130_spill] sm:$0xff] %v11072_v49  ;;  %v11144_v46 = vld [vmem:[#allocation3 + $0x220] ss:$24 sps:$4 sm:$0xff]  }
 0xa2d   :  { %4834 = vmatprep.subr.bf16.mxu0 %v10991_v45  ;;  %v11138_v45 = vld [vmem:[#allocation3 + $0x224] ss:$24 sps:$4 sm:$0xff]   ;;  %13590 = vst [vmem:[#allocation110_spill] sm:$0xff] %v11144_v46 }
 0xa2e   :  { %3894 = vmatmul.mubr.bf16.vlgmr.msra.gmra.mxu1 %v10890_v42  ;;  %v11022_v42 = vld [vmem:[#allocation3 + $0xf8] ss:$24 sps:$4 sm:$0xff]   ;;  %13588 = vst [vmem:[#allocation108_spill] sm:$0xff] %v11138_v45 }
 0xa2f   :  { %4785 = vmatmul.mubr.bf16.vlgmr.msra.gmra.mxu0 %v13553_v26  ;;  %4794 = vmatpush1.bf16.msra.mxu1 %v10994_v15 }
 0xa30   :  { %4835 = vmatpush1.bf16.msra.mxu0 %v10996_v4  ;;  %4795 = vmatprep.subr.bf16.mxu1 %v11000_v50  ;;  %v11126_v4 = vld [vmem:[#allocation3 + $0x254] ss:$24 sps:$4 sm:$0xff]  }
 0xa31   :  { %4836 = vmatprep.subr.bf16.mxu0 %v11002_v28  ;;  %4825 = vmatprep.mubr.bf16.mxu1 %v13553_v26  ;;  %v11120_v28 = vld [vmem:[#allocation3 + $0x280] ss:$24 sps:$4 sm:$0xff]   ;;  %13584 = vst [vmem:[#allocation59_spill] sm:$0xff] %v11126_v4 }
 0xa32   :  { %4866 = vmatprep.mubr.bf16.mxu0 %v13553_v26  ;;  %13582 = vst [vmem:[#allocation42_spill] sm:$0xff] %v11120_v28 }
 0xa33   :  { %4796 = vmatpush1.bf16.msra.mxu1 %v11008_v62 }
 0xa34   :  { %4837 = vmatpush1.bf16.msra.mxu0 %v11010_v9  ;;  %4797 = vmatprep.subr.bf16.mxu1 %v11014_v25  ;;  %v11114_v9 = vld [vmem:[#allocation3 + $0x284] ss:$24 sps:$4 sm:$0xff]  }
 0xa35   :  { %4838 = vmatprep.subr.bf16.mxu0 %v11016_v11  ;;  %v11108_v11 = vld [vmem:[#allocation3 + $0x2b0] ss:$24 sps:$4 sm:$0xff]   ;;  %13580 = vst [vmem:[#allocation57_spill] sm:$0xff] %v11114_v9 }
 0xa36   :  { %13578 = vst [vmem:[#allocation38_spill] sm:$0xff] %v11108_v11 }
 0xa37   :  { %4798 = vmatpush1.bf16.msra.mxu1 %v11022_v42 }
 0xa38   :  { %4839 = vmatpush1.bf16.msra.mxu0 %v11024_v7  ;;  %4799 = vmatprep.subr.bf16.mxu1 %v11028_v33  ;;  %v11102_v7 = vld [vmem:[#allocation3 + $0x2b4] ss:$24 sps:$4 sm:$0xff]  }
 0xa39   :  { %4840 = vmatprep.subr.bf16.mxu0 %v11030_v40  ;;  %v11096_v40 = vld [vmem:[#allocation3 + $0x2e0] ss:$24 sps:$4 sm:$0xff]   ;;  %13577 = vst [vmem:[#allocation56_spill] sm:$0xff] %v11102_v7 }
 0xa3a   :  { %13576 = vst [vmem:[#allocation134_spill] sm:$0xff] %v11096_v40 }
 0xa3b   :  { %4800 = vmatpush1.bf16.msra.mxu1 %v11034_v21 }
 0xa3c   :  { %4841 = vmatpush1.bf16.msra.mxu0 %v11036_v2  ;;  %4801 = vmatprep.subr.bf16.mxu1 %v11040_v35  ;;  %v11090_v2 = vld [vmem:[#allocation3 + $0x2e4] ss:$24 sps:$4 sm:$0xff]  }
 0xa3d   :  { %4842 = vmatprep.subr.bf16.mxu0 %v11042_v60  ;;  %v11084_v60 = vld [vmem:[#allocation3 + $0x10] ss:$24 sps:$4 sm:$0xff]   ;;  %13575 = vst [vmem:[#allocation133_spill] sm:$0xff] %v11090_v2 }
 0xa3e   :  { %13574 = vst [vmem:[#allocation132_spill] sm:$0xff] %v11084_v60 }
 0xa3f   :  { %4802 = vmatpush1.bf16.msra.mxu1 %v11046_v6 }
 0xa40   :  { %4843 = vmatpush1.bf16.msra.mxu0 %v11048_v13  ;;  %4803 = vmatprep.subr.bf16.mxu1 %v11052_v37  ;;  %v11078_v13 = vld [vmem:[#allocation3 + $0x14] ss:$24 sps:$4 sm:$0xff]  }
 0xa41   :  { %4844 = vmatprep.subr.bf16.mxu0 %v11054_v22  ;;  %13573 = vst [vmem:[#allocation131_spill] sm:$0xff] %v11078_v13  ;;  %v11082_v22 = vld [vmem:[#allocation3 + $0x8] ss:$24 sps:$4 sm:$0xff]  }
 0xa43   :  { %4804 = vmatpush1.bf16.msra.mxu1 %v11058_v31 }
 0xa44   :  { %4845 = vmatpush1.bf16.msra.mxu0 %v11060_v3  ;;  %4805 = vmatprep.subr.bf16.mxu1 %v11064_v29  ;;  %v11088_v3 = vld [vmem:[#allocation3 + $0x2dc] ss:$24 sps:$4 sm:$0xff]  }
 0xa45   :  { %4846 = vmatprep.subr.bf16.mxu0 %v11066_v55  ;;  %v11094_v55 = vld [vmem:[#allocation3 + $0x2d8] ss:$24 sps:$4 sm:$0xff]  }
 0xa47   :  { %4806 = vmatpush1.bf16.msra.mxu1 %v11070_v23 }
 0xa48   :  { %4847 = vmatpush1.bf16.msra.mxu0 %v11072_v49  ;;  %4807 = vmatprep.subr.bf16.mxu1 %v11076_v16  ;;  %v11100_v49 = vld [vmem:[#allocation3 + $0x2ac] ss:$24 sps:$4 sm:$0xff]  }
 0xa49   :  { %4848 = vmatprep.subr.bf16.mxu0 %v11078_v13  ;;  %v11106_v13 = vld [vmem:[#allocation3 + $0x2a8] ss:$24 sps:$4 sm:$0xff]  }
 0xa4b   :  { %4808 = vmatpush1.bf16.msra.mxu1 %v11082_v22 }
 0xa4c   :  { %4849 = vmatpush1.bf16.msra.mxu0 %v11084_v60  ;;  %4809 = vmatprep.subr.bf16.mxu1 %v11088_v3  ;;  %v11112_v60 = vld [vmem:[#allocation3 + $0x27c] ss:$24 sps:$4 sm:$0xff]  }
 0xa4d   :  { %4850 = vmatprep.subr.bf16.mxu0 %v11090_v2  ;;  %13579 = vst [vmem:[#allocation40_spill] sm:$0xff] %v11112_v60  ;;  %v11118_v2 = vld [vmem:[#allocation3 + $0x278] ss:$24 sps:$4 sm:$0xff]  }
 0xa4e   :  { %13581 = vst [vmem:[#allocation58_spill] sm:$0xff] %v11118_v2 }
 0xa4f   :  { %4810 = vmatpush2.bf16.msra.mxu1 %v11094_v55 }
 0xa50   :  { %4851 = vmatpush2.bf16.msra.mxu0 %v11096_v40  ;;  %4811 = vmatprep.subr.bf16.mxu1 %v11100_v49  ;;  %v11124_v40 = vld [vmem:[#allocation3 + $0x24c] ss:$24 sps:$4 sm:$0xff]  }
 0xa51   :  { %4852 = vmatprep.subr.bf16.mxu0 %v11102_v7  ;;  %13583 = vst [vmem:[#allocation44_spill] sm:$0xff] %v11124_v40  ;;  %v11130_v7 = vld [vmem:[#allocation3 + $0x248] ss:$24 sps:$4 sm:$0xff]  }
 0xa52   :  { %13585 = vst [vmem:[#allocation46_spill] sm:$0xff] %v11130_v7 }
 0xa53   :  { %4812 = vmatpush2.bf16.msra.mxu1 %v11106_v13 }
 0xa54   :  { %4853 = vmatpush2.bf16.msra.mxu0 %v11108_v11  ;;  %4813 = vmatprep.subr.bf16.mxu1 %v11112_v60  ;;  %v11136_v11 = vld [vmem:[#allocation3 + $0x21c] ss:$24 sps:$4 sm:$0xff]  }
 0xa55   :  { %4854 = vmatprep.subr.bf16.mxu0 %v11114_v9  ;;  %13587 = vst [vmem:[#allocation107_spill] sm:$0xff] %v11136_v11  ;;  %v11142_v9 = vld [vmem:[#allocation3 + $0x218] ss:$24 sps:$4 sm:$0xff]  }
 0xa56   :  { %13589 = vst [vmem:[#allocation109_spill] sm:$0xff] %v11142_v9 }
 0xa57   :  { %4814 = vmatpush2.bf16.msra.mxu1 %v11118_v2 }
 0xa58   :  { %4855 = vmatpush2.bf16.msra.mxu0 %v11120_v28  ;;  %4815 = vmatprep.subr.bf16.mxu1 %v11124_v40  ;;  %v11148_v28 = vld [vmem:[#allocation3 + $0x1ec] ss:$24 sps:$4 sm:$0xff]  }
 0xa59   :  { %4856 = vmatprep.subr.bf16.mxu0 %v11126_v4  ;;  %13591 = vst [vmem:[#allocation111_spill] sm:$0xff] %v11148_v28  ;;  %v11154_v4 = vld [vmem:[#allocation3 + $0x1e8] ss:$24 sps:$4 sm:$0xff]  }
 0xa5a   :  { %13593 = vst [vmem:[#allocation113_spill] sm:$0xff] %v11154_v4 }
 0xa5b   :  { %4816 = vmatpush2.bf16.msra.mxu1 %v11130_v7 }
 0xa5c   :  { %4857 = vmatpush2.bf16.msra.mxu0 %v11132_v20  ;;  %4817 = vmatprep.subr.bf16.mxu1 %v11136_v11  ;;  %v11160_v20 = vld [vmem:[#allocation3 + $0x1bc] ss:$24 sps:$4 sm:$0xff]  }
 0xa5d   :  { %4858 = vmatprep.subr.bf16.mxu0 %v11138_v45  ;;  %13594 = vst [vmem:[#allocation114_spill] sm:$0xff] %v11160_v20  ;;  %v11166_v45 = vld [vmem:[#allocation3 + $0x1b8] ss:$24 sps:$4 sm:$0xff]  }
 0xa5e   :  { %13595 = vst [vmem:[#allocation115_spill] sm:$0xff] %v11166_v45 }
 0xa5f   :  { %4818 = vmatpush2.bf16.msra.mxu1 %v11142_v9 }
 0xa60   :  { %4859 = vmatpush2.bf16.msra.mxu0 %v11144_v46  ;;  %4819 = vmatprep.subr.bf16.mxu1 %v11148_v28  ;;  %v11172_v46 = vld [vmem:[#allocation3 + $0x18c] ss:$24 sps:$4 sm:$0xff]  }
 0xa61   :  { %4860 = vmatprep.subr.bf16.mxu0 %v11150_v58  ;;  %13596 = vst [vmem:[#allocation116_spill] sm:$0xff] %v11172_v46  ;;  %v11178_v58 = vld [vmem:[#allocation3 + $0x188] ss:$24 sps:$4 sm:$0xff]  }
 0xa62   :  { %13597 = vst [vmem:[#allocation117_spill] sm:$0xff] %v11178_v58 }
 0xa63   :  { %4820 = vmatpush2.bf16.msra.mxu1 %v11154_v4  ;;  %v11180_v4 = vld [vmem:[#allocation3 + $0x190] ss:$24 sps:$4 sm:$0xff]  }
 0xa64   :  { %4861 = vmatpush2.bf16.msra.mxu0 %v11156_v18  ;;  %4821 = vmatprep.subr.bf16.mxu1 %v11160_v20 }
 0xa65   :  { %4862 = vmatprep.subr.bf16.mxu0 %v11162_v30 }
 0xa67   :  { %4822 = vmatpush2.bf16.msra.mxu1 %v11166_v45 }
 0xa68   :  { %4863 = vmatpush2.bf16.msra.mxu0 %v11168_v19  ;;  %4823 = vmatprep.subr.bf16.mxu1 %v11172_v46 }
 0xa69   :  { %4864 = vmatprep.subr.bf16.mxu0 %v11174_v24 }
 0xa6b   :  { %4824 = vmatpush2.bf16.msra.mxu1 %v11178_v58 }
 0xa6c   :  { %4865 = vmatpush2.bf16.msra.mxu0 %v11180_v4  ;;  %4919 = vmatprep.subr.bf16.mxu1 %v10886_v34 }
 0xa6d   :  { %4960 = vmatprep.subr.bf16.mxu0 %v10988_v48 }
 0xa6e   :  { %4826 = vmatmul.mubr.bf16.vlgmr.msra.gmra.mxu1 %v13553_v26 }
 0xa6f   :  { %4867 = vmatmul.mubr.bf16.vlgmr.msra.gmra.mxu0 %v13553_v26  ;;  %4920 = vmatpush1.bf16.msra.mxu1 %v10892_v41  ;;  %v13598_v41 = vld [vmem:[#allocation78_spill] sm:$0xff] }
 0xa70   :  { %4961 = vmatpush1.bf16.msra.mxu0 %v10994_v15  ;;  %4921 = vmatprep.subr.bf16.mxu1 %v10895_v51  ;;  %v13599_v51 = vld [vmem:[#allocation113_spill] sm:$0xff]  ;;  %v11248_v26 = vld [vmem:[#allocation12] sm:$0x3f] }
 0xa71   :  { %4962 = vmatprep.subr.bf16.mxu0 %v11000_v50 }
 0xa73   :  { %4922 = vmatpush1.bf16.msra.mxu1 %v10899_v32  ;;  %v13600_v32 = vld [vmem:[#allocation79_spill] sm:$0xff] }
 0xa74   :  { %4963 = vmatpush1.bf16.msra.mxu0 %v11008_v62  ;;  %4923 = vmatprep.subr.bf16.mxu1 %v10903_v61  ;;  %v13601_v61 = vld [vmem:[#allocation53_spill] sm:$0xff] }
 0xa75   :  { %4964 = vmatprep.subr.bf16.mxu0 %v11014_v25 }
 0xa77   :  { %4924 = vmatpush1.bf16.msra.mxu1 %v10907_v17  ;;  %v13602_v17 = vld [vmem:[#allocation52_spill] sm:$0xff] }
 0xa78   :  { %4965 = vmatpush1.bf16.msra.mxu0 %v11022_v42  ;;  %4925 = vmatprep.subr.bf16.mxu1 %v10911_v52  ;;  %v13603_v52 = vld [vmem:[#allocation37_spill] sm:$0xff] }
 0xa79   :  { %4966 = vmatprep.subr.bf16.mxu0 %v11028_v33 }
 0xa7b   :  { %4926 = vmatpush1.bf16.msra.mxu1 %v10913_v43  ;;  %v3268_v43 = vrot.slane %v11248_v26, %v13603_v52 }
 0xa7c   :  { %4967 = vmatpush1.bf16.msra.mxu0 %v11034_v21  ;;  %4927 = vmatprep.subr.bf16.mxu1 %v10917_v54  ;;  %v13604_v54 = vld [vmem:[#allocation39_spill] sm:$0xff] }
 0xa7d   :  { %4968 = vmatprep.subr.bf16.mxu0 %v11040_v35 }
 0xa7f   :  { %4928 = vmatpush1.bf16.msra.mxu1 %v10919_v1  ;;  %v3276_v1 = vrot.slane %v11248_v26, %v13604_v54 }
 0xa80   :  { %4969 = vmatpush1.bf16.msra.mxu0 %v11046_v6  ;;  %4929 = vmatprep.subr.bf16.mxu1 %v10923_v0  ;;  %v13605_v0 = vld [vmem:[#allocation54_spill] sm:$0xff] }
 0xa81   :  { %4970 = vmatprep.subr.bf16.mxu0 %v11052_v37 }
 0xa83   :  { %4930 = vmatpush1.bf16.msra.mxu1 %v10925_v47  ;;  %v13606_v47 = vld [vmem:[#allocation64_spill] sm:$0xff] }
 0xa84   :  { %4971 = vmatpush1.bf16.msra.mxu0 %v11058_v31  ;;  %4931 = vmatprep.subr.bf16.mxu1 %v10929_v44 }
 0xa85   :  { %4972 = vmatprep.subr.bf16.mxu0 %v11064_v29 }
 0xa87   :  { %4932 = vmatpush1.bf16.msra.mxu1 %v10931_v63 }
 0xa88   :  { %4973 = vmatpush1.bf16.msra.mxu0 %v11070_v23  ;;  %4933 = vmatprep.subr.bf16.mxu1 %v10935_v56  ;;  %v13607_v56 = vld [vmem:[#allocation61_spill] sm:$0xff] }
 0xa89   :  { %4974 = vmatprep.subr.bf16.mxu0 %v11076_v16 }
 0xa8b   :  { %4934 = vmatpush1.bf16.msra.mxu1 %v10938_v53  ;;  %v3280_v53 = vrot.slane %v11248_v26, %v13607_v56 }
 0xa8c   :  { %4975 = vmatpush1.bf16.msra.mxu0 %v11082_v22  ;;  %4935 = vmatprep.subr.bf16.mxu1 %v10941_v36 }
 0xa8d   :  { %4976 = vmatprep.subr.bf16.mxu0 %v11088_v3 }
 0xa8f   :  { %4936 = vmatpush2.bf16.msra.mxu1 %v10943_v10  ;;  %v13608_v10 = vld [vmem:[#allocation60_spill] sm:$0xff] }
 0xa90   :  { %4977 = vmatpush2.bf16.msra.mxu0 %v11094_v55  ;;  %4937 = vmatprep.subr.bf16.mxu1 %v10947_v27  ;;  %v3272_v27 = vrot.slane %v11248_v26, %v13608_v10 }
 0xa91   :  { %4978 = vmatprep.subr.bf16.mxu0 %v11100_v49 }
 0xa93   :  { %4938 = vmatpush2.bf16.msra.mxu1 %v10950_v57 }
 0xa94   :  { %4979 = vmatpush2.bf16.msra.mxu0 %v11106_v13  ;;  %4939 = vmatprep.subr.bf16.mxu1 %v10953_v5 }
 0xa95   :  { %4980 = vmatprep.subr.bf16.mxu0 %v11112_v60 }
 0xa97   :  { %4940 = vmatpush2.bf16.msra.mxu1 %v10955_v8 }
 0xa98   :  { %4981 = vmatpush2.bf16.msra.mxu0 %v11118_v2  ;;  %4941 = vmatprep.subr.bf16.mxu1 %v10959_v12 }
 0xa99   :  { %4982 = vmatprep.subr.bf16.mxu0 %v11124_v40 }
 0xa9b   :  { %4942 = vmatpush2.bf16.msra.mxu1 %v10962_v14 }
 0xa9c   :  { %4983 = vmatpush2.bf16.msra.mxu0 %v11130_v7  ;;  %4943 = vmatprep.subr.bf16.mxu1 %v10965_v59 }
 0xa9d   :  { %4984 = vmatprep.subr.bf16.mxu0 %v11136_v11 }
 0xa9f   :  { %4944 = vmatpush2.bf16.msra.mxu1 %v10967_v39 }
 0xaa0   :  { %4985 = vmatpush2.bf16.msra.mxu0 %v11142_v9  ;;  %4945 = vmatprep.subr.bf16.mxu1 %v10971_v38 }
 0xaa1   :  { %4986 = vmatprep.subr.bf16.mxu0 %v11148_v28 }
 0xaa3   :  { %4946 = vmatpush2.bf16.msra.mxu1 %v13598_v41 }
 0xaa4   :  { %4987 = vmatpush2.bf16.msra.mxu0 %v13599_v51  ;;  %4947 = vmatprep.subr.bf16.mxu1 %v13600_v32 }
 0xaa5   :  { %4988 = vmatprep.subr.bf16.mxu0 %v11160_v20 }
 0xaa7   :  { %4948 = vmatpush2.bf16.msra.mxu1 %v13601_v61 }
 0xaa8   :  { %4989 = vmatpush2.bf16.msra.mxu0 %v11166_v45  ;;  %4949 = vmatprep.subr.bf16.mxu1 %v13602_v17 }
 0xaa9   :  { %4990 = vmatprep.subr.bf16.mxu0 %v11172_v46 }
 0xaab   :  { %4950 = vmatpush2.bf16.msra.mxu1 %v13605_v0 }
 0xaac   :  { %4991 = vmatpush2.bf16.msra.mxu0 %v11178_v58  ;;  %5001 = vmatprep.subr.bf16.mxu1 %v13606_v47 }
 0xaad   :  { %5086 = vmatprep.subr.bf16.mxu0 %v10886_v34 }
 0xaae   :  { %v3809_v44 = vpop.f32.mrf.mxu1 }
 0xaaf   :  { %v3852_v63 = vpop.f32.mrf.mxu0  ;;  %v11262_v36 = vadd.f32 %v3809_v44, %v3268_v43 }
 0xab0   :  { %v11266_v57 = vadd.f32 %v3852_v63, %v3276_v1  ;;  %v3811_v5 = vpop.f32.mrf.mxu1 }
 0xab1   :  { %v3854_v8 = vpop.f32.mrf.mxu0  ;;  %v3964_v34 = vrot.slane %v11262_v36, 1  ;;  %v11272_v38 = vadd.f32 %v3811_v5, %v3272_v27  ;;  %v4012_v61 = vrot.slane %v11262_v36, 2  ;;  %v4066_v58 = vrot.slane %v11262_v36, 3 }
 0xab2   :  { %v3813_v12 = vpop.f32.mrf.mxu1  ;;  %v11268_v14 = vadd.f32 %v3854_v8, %v3280_v53  ;;  %v3968_v39 = vrot.slane %v11266_v57, 1  ;;  %v4018_v8 = vrot.slane %v11266_v57, 2  ;;  %v4072_v46 = vrot.slane %v11266_v57, 3 }
 0xab3   :  { %v3856_v59 = vpop.f32.mrf.mxu0  ;;  %v11274_v41 = vadd.f32 %v3813_v12, %v3268_v43 }
 0xab4   :  { %v11276_v32 = vadd.f32 %v3856_v59, %v3276_v1  ;;  %v3815_v17 = vpop.f32.mrf.mxu1  ;;  %v3943_v63 = vrot.slane %v11268_v14, 7  ;;  %v3991_v1 = vrot.slane %v11268_v14, 6 }
 0xab5   :  { %v3858_v44 = vpop.f32.mrf.mxu0  ;;  %v11283_v45 = vadd.f32 %v3815_v17, %v3272_v27  ;;  %v11291_v12 = vsel %vm595_vm2, %v11274_v41, %v3964_v34  ;;  %v4013_v20 = vrot.slane %v11274_v41, 1  ;;  %v3985_v17 = vrot.slane %v11272_v38, 6 }
 0xab6   :  { %v11285_v5 = vadd.f32 %v3858_v44, %v3280_v53  ;;  %v3920_v43 = vrot.slane %v11276_v32, 7  ;;  %13609 = vst [vmem:[#allocation118_spill] sm:$0xff] %v11291_v12  ;;  %v11295_v59 = vsel %vm595_vm2, %v11276_v32, %v3968_v39  ;;  %v4019_v51 = vrot.slane %v11276_v32, 1 }
 0xab7   :  { %13610 = vst [vmem:[#allocation119_spill] sm:$0xff] %v11295_v59  ;;  %v4045_v44 = vrot.slane %v11268_v14, 5  ;;  %v3986_v34 = vrot.slane %v11283_v45, 5  ;;  %v11309_v39 = vsel %vm595_vm2, %v4013_v20, %v4012_v61  ;;  %v4040_v9 = vrot.slane %v11283_v45, 4 }
 0xab8   :  { %v11301_v53 = vsel %vm595_vm2, %v3920_v43, %v11266_v57  ;;  %v3944_v27 = vrot.slane %v11285_v5, 6  ;;  %v3992_v12 = vrot.slane %v11285_v5, 5  ;;  %13611 = vst [vmem:[#allocation120_spill] sm:$0xff] %v11309_v39  ;;  %v11312_v59 = vsel %vm595_vm2, %v4019_v51, %v4018_v8 }
 0xab9   :  { %13612 = vst [vmem:[#allocation121_spill] sm:$0xff] %v11312_v59  ;;  %v4039_v43 = vrot.slane %v11272_v38, 5  ;;  %v4046_v11 = vrot.slane %v11285_v5, 4  ;;  %v11321_v7 = vsel %vm595_vm2, %v3986_v34, %v3985_v17  ;;  %v4067_v20 = vrot.slane %v11274_v41, 2 }
 0xaba   :  { %v11315_v28 = vsel %vm595_vm2, %v3944_v27, %v3943_v63  ;;  %13613 = vst [vmem:[#allocation41_spill] sm:$0xff] %v11321_v7  ;;  %v11324_v40 = vsel %vm595_vm2, %v3992_v12, %v3991_v1  ;;  %v4073_v51 = vrot.slane %v11276_v32, 2  ;;  %v4093_v8 = vrot.slane %v11272_v38, 4 }
 0xabb   :  { %13614 = vst [vmem:[#allocation80_spill] sm:$0xff] %v11324_v40  ;;  %v11329_v61 = vsel %vm595_vm2, %v4040_v9, %v4039_v43  ;;  %v11332_v63 = vsel %vm595_vm2, %v4046_v11, %v4045_v44  ;;  %v4094_v27 = vrot.slane %v11283_v45, 3  ;;  %v11337_v17 = vsel %vm595_vm2, %v4067_v20, %v4066_v58 }
 0xabc   :  { %13615 = vst [vmem:[#allocation82_spill] sm:$0xff] %v11329_v61  ;;  %13616 = vst [vmem:[#allocation81_spill] sm:$0xff] %v11332_v63  ;;  %v11340_v1 = vsel %vm595_vm2, %v4073_v51, %v4072_v46  ;;  %v4099_v12 = vrot.slane %v11268_v14, 4  ;;  %v4100_v34 = vrot.slane %v11285_v5, 3  ;;  %v4090_v11 = vrot.slane %v11262_v36, 4 }
 0xabd   :  { %13617 = vst [vmem:[#allocation83_spill] sm:$0xff] %v11337_v17  ;;  %13618 = vst [vmem:[#allocation84_spill] sm:$0xff] %v11340_v1  ;;  %v11345_v9 = vsel %vm595_vm2, %v4094_v27, %v4093_v8  ;;  %v4091_v44 = vrot.slane %v11274_v41, 3  ;;  %v4096_v43 = vrot.slane %v11266_v57, 4  ;;  %v4097_v58 = vrot.slane %v11276_v32, 3 }
 0xabe   :  { %13619 = vst [vmem:[#allocation85_spill] sm:$0xff] %v11345_v9  ;;  %v11351_v63 = vsel %vm595_vm2, %v4100_v34, %v4099_v12  ;;  %v4069_v46 = vrot.slane %v11272_v38, 3  ;;  %v4070_v20 = vrot.slane %v11283_v45, 2  ;;  %v4075_v8 = vrot.slane %v11268_v14, 3 }
 0xabf   :  { %13620 = vst [vmem:[#allocation135_spill] sm:$0xff] %v11351_v63  ;;  %v11357_v51 = vsel %vm595_vm2, %v4091_v44, %v4090_v11  ;;  %v4076_v27 = vrot.slane %v11285_v5, 2  ;;  %v4036_v1 = vrot.slane %v11262_v36, 5  ;;  %v11363_v9 = vsel %vm595_vm2, %v4097_v58, %v4096_v43 }
 0xac0   :  { %13621 = vst [vmem:[#allocation136_spill] sm:$0xff] %v11357_v51  ;;  %13622 = vst [vmem:[#allocation137_spill] sm:$0xff] %v11363_v9  ;;  %v11366_v12 = vsel %vm595_vm2, %v4070_v20, %v4069_v46  ;;  %v4037_v34 = vrot.slane %v11274_v41, 4  ;;  %v4042_v63 = vrot.slane %v11266_v57, 5  ;;  %v4043_v11 = vrot.slane %v11276_v32, 4 }
 0xac1   :  { %13623 = vst [vmem:[#allocation138_spill] sm:$0xff] %v11366_v12  ;;  %v11371_v17 = vsel %vm595_vm2, %v4076_v27, %v4075_v8  ;;  %v4015_v44 = vrot.slane %v11272_v38, 2  ;;  %v4016_v51 = vrot.slane %v11283_v45, 1  ;;  %v4021_v43 = vrot.slane %v11268_v14, 2 }
 0xac2   :  { %13624 = vst [vmem:[#allocation139_spill] sm:$0xff] %v11371_v17  ;;  %v11377_v59 = vsel %vm595_vm2, %v4037_v34, %v4036_v1  ;;  %v4022_v58 = vrot.slane %v11285_v5, 1  ;;  %v3982_v46 = vrot.slane %v11262_v36, 6  ;;  %v11383_v20 = vsel %vm595_vm2, %v4043_v11, %v4042_v63 }
 0xac3   :  { %13625 = vst [vmem:[#allocation140_spill] sm:$0xff] %v11377_v59  ;;  %13626 = vst [vmem:[#allocation141_spill] sm:$0xff] %v11383_v20  ;;  %v11386_v8 = vsel %vm595_vm2, %v4016_v51, %v4015_v44  ;;  %v3983_v27 = vrot.slane %v11274_v41, 5  ;;  %v3988_v17 = vrot.slane %v11266_v57, 6  ;;  %v3989_v1 = vrot.slane %v11276_v32, 5 }
 0xac4   :  { %13627 = vst [vmem:[#allocation142_spill] sm:$0xff] %v11386_v8  ;;  %v11391_v9 = vsel %vm595_vm2, %v4022_v58, %v4021_v43  ;;  %v3966_v34 = vrot.slane %v11272_v38, 1  ;;  %v3970_v59 = vrot.slane %v11268_v14, 1  ;;  %v3934_v63 = vrot.slane %v11262_v36, 7 }
 0xac5   :  { %13628 = vst [vmem:[#allocation143_spill] sm:$0xff] %v11391_v9  ;;  %v11397_v12 = vsel %vm595_vm2, %v3983_v27, %v3982_v46  ;;  %v3935_v51 = vrot.slane %v11274_v41, 6  ;;  %v3940_v11 = vrot.slane %v11266_v57, 7  ;;  %v11403_v44 = vsel %vm595_vm2, %v3989_v1, %v3988_v17 }
 0xac6   :  { %13629 = vst [vmem:[#allocation144_spill] sm:$0xff] %v11397_v12  ;;  %13630 = vst [vmem:[#allocation145_spill] sm:$0xff] %v11403_v44  ;;  %v11407_v43 = vsel %vm595_vm2, %v11283_v45, %v3966_v34  ;;  %v11411_v58 = vsel %vm595_vm2, %v11285_v5, %v3970_v59  ;;  %v3941_v46 = vrot.slane %v11276_v32, 6  ;;  %v3918_v12 = vrot.slane %v11283_v45, 7  ;;  %v13637_v34 = vld [vmem:[#allocation62_spill] sm:$0xff] }
 0xac7   :  { %13631 = vst [vmem:[#allocation146_spill] sm:$0xff] %v11407_v43  ;;  %13632 = vst [vmem:[#allocation86_spill] sm:$0xff] %v11411_v58  ;;  %v11415_v27 = vsel %vm595_vm2, %v3935_v51, %v3934_v63  ;;  %v3922_v57 = vrot.slane %v11285_v5, 7  ;;  %v3284_v32 = vrot.slane %v11248_v26, %v13637_v34  ;;  %v13638_v58 = vld [vmem:[#allocation63_spill] sm:$0xff] }
 0xac8   :  { %13633 = vst [vmem:[#allocation88_spill] sm:$0xff] %v11415_v27  ;;  %v11420_v17 = vsel %vm595_vm2, %v3941_v46, %v3940_v11  ;;  %v11424_v1 = vsel %vm595_vm2, %v3918_v12, %v11272_v38  ;;  %v3288_v5 = vrot.slane %v11248_v26, %v13638_v58 }
 0xac9   :  { %13634 = vst [vmem:[#allocation87_spill] sm:$0xff] %v11420_v17  ;;  %13635 = vst [vmem:[#allocation89_spill] sm:$0xff] %v11424_v1  ;;  %v11428_v59 = vsel %vm595_vm2, %v3922_v57, %v11268_v14 }
 0xaca   :  { %13636 = vst [vmem:[#allocation90_spill] sm:$0xff] %v11428_v59 }
 0xaee   :  { %v3895_v63 = vpop.f32.mrf.mxu1 }
 0xaef   :  { %v4786_v51 = vpop.f32.mrf.mxu0  ;;  %v11432_v27 = vadd.f32 %v3895_v63, %v3284_v32 }
 0xaf0   :  { %v3897_v11 = vpop.f32.mrf.mxu1 }
 0xaf1   :  { %v4788_v46 = vpop.f32.mrf.mxu0  ;;  %v3972_v12 = vrot.slane %v11432_v27, 1  ;;  %v11437_v1 = vadd.f32 %v3897_v11, %v3288_v5  ;;  %v4024_v43 = vrot.slane %v11432_v27, 2  ;;  %v4078_v63 = vrot.slane %v11432_v27, 3 }
 0xaf2   :  { %v3899_v17 = vpop.f32.mrf.mxu1  ;;  %v4102_v26 = vrot.slane %v11432_v27, 4  ;;  %v4048_v20 = vrot.slane %v11432_v27, 5 }
 0xaf3   :  { %v4790_v44 = vpop.f32.mrf.mxu0  ;;  %v11439_v14 = vadd.f32 %v3899_v17, %v3284_v32  ;;  %v3997_v32 = vrot.slane %v11437_v1, 6  ;;  %v4105_v8 = vrot.slane %v11437_v1, 4  ;;  %v4081_v2 = vrot.slane %v11437_v1, 3 }
 0xaf4   :  { %v3901_v57 = vpop.f32.mrf.mxu1 }
 0xaf5   :  { %v4791_v59 = vpop.f32.mrf.mxu0  ;;  %v11442_v9 = vadd.f32 %v3901_v57, %v3288_v5  ;;  %v11449_v44 = vsel %vm595_vm2, %v11439_v14, %v3972_v12  ;;  %v4025_v11 = vrot.slane %v11439_v14, 1  ;;  %v4079_v17 = vrot.slane %v11439_v14, 2 }
 0xaf6   :  { %13639 = vst [vmem:[#allocation91_spill] sm:$0xff] %v11449_v44  ;;  %v4103_v59 = vrot.slane %v11439_v14, 3  ;;  %v4051_v57 = vrot.slane %v11437_v1, 5 }
 0xaf7   :  { %v3998_v5 = vrot.slane %v11442_v9, 5  ;;  %v11459_v61 = vsel %vm595_vm2, %v4025_v11, %v4024_v43  ;;  %v4052_v12 = vrot.slane %v11442_v9, 4  ;;  %v11463_v39 = vsel %vm595_vm2, %v4079_v17, %v4078_v63 }
 0xaf8   :  { %13640 = vst [vmem:[#allocation73_spill] sm:$0xff] %v11459_v61  ;;  %13641 = vst [vmem:[#allocation75_spill] sm:$0xff] %v11463_v39  ;;  %v4106_v44 = vrot.slane %v11442_v9, 3  ;;  %v11470_v7 = vsel %vm595_vm2, %v4103_v59, %v4102_v26  ;;  %v4082_v60 = vrot.slane %v11442_v9, 2  ;;  %v4049_v63 = vrot.slane %v11439_v14, 4 }
 0xaf9   :  { %v11467_v40 = vsel %vm595_vm2, %v3998_v5, %v3997_v32  ;;  %13642 = vst [vmem:[#allocation47_spill] sm:$0xff] %v11470_v7  ;;  %v11475_v43 = vsel %vm595_vm2, %v4052_v12, %v4051_v57  ;;  %v4027_v17 = vrot.slane %v11437_v1, 2  ;;  %v4028_v26 = vrot.slane %v11442_v9, 1  ;;  %v11644_v39 = vld [vmem:[#allocation3 + $0x270] ss:$24 sps:$4 sm:$0xff]  }
 0xafa   :  { %13643 = vst [vmem:[#allocation49_spill] sm:$0xff] %v11475_v43  ;;  %v11478_v11 = vsel %vm595_vm2, %v4106_v44, %v4105_v8  ;;  %v11483_v32 = vsel %vm595_vm2, %v4082_v60, %v4081_v2  ;;  %v3994_v59 = vrot.slane %v11432_v27, 6  ;;  %v3995_v5 = vrot.slane %v11439_v14, 5  ;;  %13679 = vst [vmem:[#allocation100_spill] sm:$0xff] %v11644_v39  ;;  %v11647_v43 = vld [vmem:[#allocation3 + $0x244] ss:$24 sps:$4 sm:$0xff]  }
 0xafb   :  { %13644 = vst [vmem:[#allocation50_spill] sm:$0xff] %v11478_v11  ;;  %13645 = vst [vmem:[#allocation51_spill] sm:$0xff] %v11483_v32  ;;  %v11489_v7 = vsel %vm595_vm2, %v4049_v63, %v4048_v20  ;;  %v3974_v57 = vrot.slane %v11437_v1, 1  ;;  %v3946_v8 = vrot.slane %v11432_v27, 7  ;;  %v3947_v44 = vrot.slane %v11439_v14, 6 }
 0xafc   :  { %13646 = vst [vmem:[#allocation72_spill] sm:$0xff] %v11489_v7  ;;  %v11495_v12 = vsel %vm595_vm2, %v4028_v26, %v4027_v17  ;;  %v11498_v2 = vsel %vm595_vm2, %v3995_v5, %v3994_v59  ;;  %v3926_v60 = vrot.slane %v11442_v9, 7  ;;  %v4240_v7 = vld [vmem:[#allocation13] sm:$0x3f]  ;;  %v3916_v26 = vrot.slane %v11274_v41, 7  ;;  %13680 = vst [vmem:[#allocation99_spill] sm:$0xff] %v11647_v43 }
 0xafd   :  { %13647 = vst [vmem:[#allocation76_spill] sm:$0xff] %v11495_v12  ;;  %13648 = vst [vmem:[#allocation74_spill] sm:$0xff] %v11498_v2  ;;  %v11503_v32 = vsel %vm595_vm2, %v11442_v9, %v3974_v57  ;;  %v11506_v20 = vsel %vm595_vm2, %v3947_v44, %v3946_v8  ;;  %v11513_v17 = vrot.slane %v4240_v7, %v13603_v52  ;;  %v3938_v57 = vrot.slane %v11283_v45, 6  ;;  %v11636_v12 = vld [vmem:[#allocation3 + $0x2a0] ss:$24 sps:$4 sm:$0xff]  }
 0xafe   :  { %13649 = vst [vmem:[#allocation104_spill] sm:$0xff] %v11503_v32  ;;  %13650 = vst [vmem:[#allocation92_spill] sm:$0xff] %v11506_v20  ;;  %v11510_v63 = vsel %vm595_vm2, %v3926_v60, %v11437_v1  ;;  %v11517_v59 = vrot.slane %v4240_v7, %v13608_v10  ;;  %v3917_v8 = vsel %vm595_vm2, %v3916_v26, %v11262_v36  ;;  %v11639_v11 = vld [vmem:[#allocation3 + $0x274] ss:$24 sps:$4 sm:$0xff]   ;;  %v11652_v61 = vld [vmem:[#allocation3 + $0x240] ss:$24 sps:$4 sm:$0xff]  }
 0xaff   :  { %13651 = vst [vmem:[#allocation94_spill] sm:$0xff] %v11510_v63  ;;  %13652 = vst [vmem:[#allocation93_spill] sm:$0xff] %v11513_v17  ;;  %v4787_v5 = vadd.f32 %v4786_v51, %v11513_v17  ;;  %v3937_v63 = vrot.slane %v11272_v38, 7  ;;  %v11527_v51 = vrot.slane %v4240_v7, %v13604_v54  ;;  %v11530_v36 = vrot.slane %v4240_v7, %v13607_v56 }
 0xb00   :  { %v4789_v44 = vadd.f32 %v4788_v46, %v11517_v59  ;;  %13675 = vst [vmem:[#allocation97_spill] sm:$0xff] %v11636_v12  ;;  %13676 = vst [vmem:[#allocation98_spill] sm:$0xff] %v11639_v11 }
 0xb01   :  { %v4875_v60 = vadd.f32 %v4787_v5, %v3917_v8  ;;  %v3939_v52 = vsel %vm595_vm2, %v3938_v57, %v3937_v63  ;;  %13683 = vst [vmem:[#allocation101_spill] sm:$0xff] %v11652_v61 }
 0xb02   :  { %v4876_v20 = vadd.f32 %v4789_v44, %v3939_v52 }
 0xb03   :  { %v7224_v32 = vmul.f32 -1.442695, %v4875_v60 }
 0xb04   :  { %v7225_v41 = vmul.f32 -1.442695, %v4876_v20 }
 0xb05   :  { %8150 = vpow2.f32 %v7224_v32 }
 0xb06   :  { %8152 = vpow2.f32 %v7225_v41  ;;  %v11537_v41 = vrot.slane %v4240_v7, %v13637_v34 }
 0xb12   :  { %v8151_v10 = vpop.eup %8150 }
 0xb13   :  { %v8153_v45 = vpop.eup %8152  ;;  %v4891_v2 = vadd.f32 1.0, %v8151_v10 }
 0xb14   :  { %v4892_v5 = vadd.f32 1.0, %v8153_v45 }
 0xb15   :  { %8154 = vrcp.f32 %v4891_v2  ;;  %v11540_v2 = vrot.slane %v4240_v7, %v13638_v58  ;;  %v3949_v7 = vrot.slane %v11437_v1, 7 }
 0xb16   :  { %8156 = vrcp.f32 %v4892_v5 }
 0xb22   :  { %v8155_v45 = vpop.eup %8154 }
 0xb2e   :  { %v4827_v46 = vpop.f32.mrf.mxu1 }
 0xb2f   :  { %v4868_v26 = vpop.f32.mrf.mxu0  ;;  %v4828_v38 = vadd.f32 %v4827_v46, %v11527_v51  ;;  %v3924_v46 = vrot.slane %v11439_v14, 7 }
 0xb30   :  { %v4829_v52 = vpop.f32.mrf.mxu1 }
 0xb31   :  { %v4870_v63 = vpop.f32.mrf.mxu0  ;;  %v4877_v32 = vadd.f32 %v4828_v38, %v11301_v53  ;;  %v4830_v20 = vadd.f32 %v4829_v52, %v11530_v36  ;;  %v4869_v53 = vadd.f32 %v4868_v26, %v11537_v41  ;;  %v3950_v52 = vrot.slane %v11442_v9, 6 }
 0xb32   :  { %v4831_v57 = vpop.f32.mrf.mxu1  ;;  %v4871_v5 = vadd.f32 %v4870_v63, %v11540_v2 }
 0xb33   :  { %v4872_v54 = vpop.f32.mrf.mxu0  ;;  %v7226_v8 = vmul.f32 -1.442695, %v4877_v32  ;;  %v4878_v10 = vadd.f32 %v4830_v20, %v11315_v28  ;;  %v4903_v38 = vmul.f32 %v8155_v45, %v4869_v53  ;;  %v8157_v28 = vpop.eup %8156  ;;  %v3925_v32 = vsel %vm595_vm2, %v3924_v46, %v11432_v27 }
 0xb34   :  { %v4832_v56 = vpop.f32.mrf.mxu1  ;;  %v4904_v34 = vmul.f32 %v8157_v28, %v4871_v5  ;;  %v3951_v26 = vsel %vm595_vm2, %v3950_v52, %v3949_v7  ;;  %v13655_v52 = vld [vmem:[#allocation67_spill] sm:$0xff]  ;;  %v13658_v7 = vld [vmem:[#allocation70_spill] sm:$0xff] }
 0xb35   :  { %v4873_v44 = vpop.f32.mrf.mxu0  ;;  %8158 = vpow2.f32 %v7226_v8  ;;  %v7227_v60 = vmul.f32 -1.442695, %v4878_v10  ;;  %v4905_v57 = vadd.f32 %v4903_v38, %v3925_v32  ;;  %v13656_v32 = vld [vmem:[#allocation55_spill] sm:$0xff] }
 0xb36   :  { %v4906_v8 = vadd.f32 %v4904_v34, %v3951_v26  ;;  %v11564_v34 = vld [vmem:[#allocation3 + $0x150] ss:$24 sps:$4 sm:$0xff]  }
 0xb37   :  { %8160 = vpow2.f32 %v7227_v60  ;;  %v13659_v26 = vld [vmem:[#allocation122_spill] sm:$0xff] }
 0xb42   :  { %v8159_v20 = vpop.eup %8158 }
 0xb43   :  { %v4893_v58 = vadd.f32 1.0, %v8159_v20  ;;  %v11567_v20 = vld [vmem:[#allocation3 + $0x124] ss:$24 sps:$4 sm:$0xff]  }
 0xb44   :  { %v8161_v54 = vpop.eup %8160 }
 0xb45   :  { %8162 = vrcp.f32 %v4893_v58  ;;  %v4894_v14 = vadd.f32 1.0, %v8161_v54  ;;  %v11572_v58 = vld [vmem:[#allocation3 + $0x120] ss:$24 sps:$4 sm:$0xff]   ;;  %v11575_v54 = vld [vmem:[#allocation3 + $0xf4] ss:$24 sps:$4 sm:$0xff]  }
 0xb46   :  { %8164 = vtanh.f32 %v4905_v57  ;;  %v13657_v57 = vld [vmem:[#allocation65_spill] sm:$0xff] }
 0xb47   :  { %8166 = vrcp.f32 %v4894_v14  ;;  %v13660_v14 = vld [vmem:[#allocation123_spill] sm:$0xff] }
 0xb48   :  { %8168 = vtanh.f32 %v4906_v8  ;;  %v11580_v8 = vld [vmem:[#allocation3 + $0xf0] ss:$24 sps:$4 sm:$0xff]  }
 0xb52   :  { %v8163_v63 = vpop.eup %8162 }
 0xb53   :  { %v8165_v9 = vpop.eup %8164  ;;  %v4909_v10 = vsub.f32 1.0, %v8163_v63  ;;  %v4913_v53 = vmul.f32 0.0, %v8163_v63  ;;  %v11583_v63 = vld [vmem:[#allocation3 + $0xc4] ss:$24 sps:$4 sm:$0xff]  }
 0xb54   :  { %v8167_v56 = vpop.eup %8166 }
 0xb55   :  { %v4910_v27 = vsub.f32 1.0, %v8167_v56  ;;  %v4911_v44 = vmul.f32 %v8165_v9, %v4909_v10  ;;  %v8169_v60 = vpop.eup %8168  ;;  %v4914_v1 = vmul.f32 0.0, %v8167_v56  ;;  %v13661_v9 = vld [vmem:[#allocation124_spill] sm:$0xff]  ;;  %v13662_v10 = vld [vmem:[#allocation125_spill] sm:$0xff] }
 0xb56   :  { %v11588_v56 = vld [vmem:[#allocation3 + $0xc0] ss:$24 sps:$4 sm:$0xff]  }
 0xb57   :  { %v4912_v45 = vmul.f32 %v8169_v60, %v4910_v27  ;;  %v11550_v46 = vadd.f32 %v4913_v53, %v4911_v44  ;;  %v11591_v27 = vld [vmem:[#allocation3 + $0x94] ss:$24 sps:$4 sm:$0xff]   ;;  %v13664_v60 = vld [vmem:[#allocation127_spill] sm:$0xff]  ;;  %v11596_v53 = vld [vmem:[#allocation3 + $0x90] ss:$24 sps:$4 sm:$0xff]  }
 0xb58   :  { %v13663_v44 = vld [vmem:[#allocation126_spill] sm:$0xff] }
 0xb59   :  { %13653 = vst [vmem:[#allocation95_spill] sm:$0xff] %v11550_v46  ;;  %v11552_v5 = vadd.f32 %v4914_v1, %v4912_v45  ;;  %v11558_v28 = vpack.c.bf16 %v11550_v46, %v11550_v46  ;;  %v11599_v45 = vld [vmem:[#allocation3 + $0x64] ss:$24 sps:$4 sm:$0xff]  }
 0xb5a   :  { %v13665_v1 = vld [vmem:[#allocation128_spill] sm:$0xff] }
 0xb5b   :  { %13654 = vst [vmem:[#allocation96_spill] sm:$0xff] %v11552_v5  ;;  %v4918_v38 = vpack.c.bf16 %v11552_v5, %v11552_v5 }
 0xb5d   :  { %4951 = vmatprep.mubr.bf16.mxu1 %v4918_v38  ;;  %4992 = vmatprep.mubr.bf16.mxu0 %v4918_v38 }
 0xb5e   :  { %4952 = vmatmul.mubr.bf16.vlgmr.msra.gmra.mxu1 %v11558_v28  ;;  %4993 = vmatmul.mubr.bf16.vlgmr.msra.gmra.mxu0 %v11558_v28 }
 0xb5f   :  { %5002 = vmatpush1.bf16.msra.mxu1 %v13655_v52  ;;  %5033 = vmatprep.mubr.bf16.mxu1 %v4918_v38  ;;  %v13666_v38 = vld [vmem:[#allocation129_spill] sm:$0xff]  ;;  %v11604_v52 = vld [vmem:[#allocation3 + $0x60] ss:$24 sps:$4 sm:$0xff]  }
 0xb60   :  { %5003 = vmatprep.subr.bf16.mxu1 %v13656_v32  ;;  %5087 = vmatpush1.bf16.msra.mxu0 %v11564_v34  ;;  %v11607_v32 = vld [vmem:[#allocation3 + $0x34] ss:$24 sps:$4 sm:$0xff]  }
 0xb61   :  { %5088 = vmatprep.subr.bf16.mxu0 %v11567_v20 }
 0xb63   :  { %5004 = vmatpush1.bf16.msra.mxu1 %v13657_v57  ;;  %v13667_v57 = vld [vmem:[#allocation130_spill] sm:$0xff] }
 0xb64   :  { %5005 = vmatprep.subr.bf16.mxu1 %v13658_v7  ;;  %5089 = vmatpush1.bf16.msra.mxu0 %v11572_v58  ;;  %v13668_v7 = vld [vmem:[#allocation131_spill] sm:$0xff] }
 0xb65   :  { %5090 = vmatprep.subr.bf16.mxu0 %v11575_v54 }
 0xb67   :  { %5006 = vmatpush1.bf16.msra.mxu1 %v13659_v26  ;;  %v11612_v26 = vld [vmem:[#allocation3 + $0x30] ss:$24 sps:$4 sm:$0xff]  }
 0xb68   :  { %5007 = vmatprep.subr.bf16.mxu1 %v13660_v14  ;;  %5091 = vmatpush1.bf16.msra.mxu0 %v11580_v8  ;;  %v11615_v14 = vld [vmem:[#allocation3 + $0x4] ss:$24 sps:$4 sm:$0xff]  }
 0xb69   :  { %5092 = vmatprep.subr.bf16.mxu0 %v11583_v63 }
 0xb6b   :  { %5008 = vmatpush1.bf16.msra.mxu1 %v13661_v9  ;;  %v13669_v9 = vld [vmem:[#allocation132_spill] sm:$0xff] }
 0xb6c   :  { %5009 = vmatprep.subr.bf16.mxu1 %v13662_v10  ;;  %5093 = vmatpush1.bf16.msra.mxu0 %v11588_v56  ;;  %v13670_v10 = vld [vmem:[#allocation133_spill] sm:$0xff] }
 0xb6d   :  { %5094 = vmatprep.subr.bf16.mxu0 %v11591_v27 }
 0xb6f   :  { %5010 = vmatpush1.bf16.msra.mxu1 %v13663_v44  ;;  %v11620_v44 = vld [vmem:[#allocation3] ss:$24 sps:$4 sm:$0xff]  }
 0xb70   :  { %5011 = vmatprep.subr.bf16.mxu1 %v13664_v60  ;;  %5095 = vmatpush1.bf16.msra.mxu0 %v11596_v53  ;;  %v11623_v60 = vld [vmem:[#allocation3 + $0x2d4] ss:$24 sps:$4 sm:$0xff]  }
 0xb71   :  { %5096 = vmatprep.subr.bf16.mxu0 %v11599_v45 }
 0xb73   :  { %5012 = vmatpush1.bf16.msra.mxu1 %v13665_v1  ;;  %v13671_v1 = vld [vmem:[#allocation134_spill] sm:$0xff] }
 0xb74   :  { %5013 = vmatprep.subr.bf16.mxu1 %v13666_v38  ;;  %5097 = vmatpush1.bf16.msra.mxu0 %v11604_v52  ;;  %v13672_v38 = vld [vmem:[#allocation56_spill] sm:$0xff] }
 0xb75   :  { %5098 = vmatprep.subr.bf16.mxu0 %v11607_v32 }
 0xb77   :  { %5014 = vmatpush1.bf16.msra.mxu1 %v13667_v57  ;;  %v11628_v57 = vld [vmem:[#allocation3 + $0x2d0] ss:$24 sps:$4 sm:$0xff]  }
 0xb78   :  { %5015 = vmatprep.subr.bf16.mxu1 %v13668_v7  ;;  %5099 = vmatpush1.bf16.msra.mxu0 %v11612_v26  ;;  %v11631_v7 = vld [vmem:[#allocation3 + $0x2a4] ss:$24 sps:$4 sm:$0xff]  }
 0xb79   :  { %5100 = vmatprep.subr.bf16.mxu0 %v11615_v14 }
 0xb7b   :  { %5016 = vmatpush1.bf16.msra.mxu1 %v13669_v9  ;;  %v13673_v9 = vld [vmem:[#allocation38_spill] sm:$0xff] }
 0xb7c   :  { %5017 = vmatprep.subr.bf16.mxu1 %v13670_v10  ;;  %5101 = vmatpush1.bf16.msra.mxu0 %v11620_v44  ;;  %v13674_v10 = vld [vmem:[#allocation57_spill] sm:$0xff] }
 0xb7d   :  { %5102 = vmatprep.subr.bf16.mxu0 %v11623_v60 }
 0xb7f   :  { %5018 = vmatpush2.bf16.msra.mxu1 %v13671_v1  ;;  %v13677_v1 = vld [vmem:[#allocation42_spill] sm:$0xff] }
 0xb80   :  { %5019 = vmatprep.subr.bf16.mxu1 %v13672_v38  ;;  %5103 = vmatpush2.bf16.msra.mxu0 %v11628_v57  ;;  %v13678_v38 = vld [vmem:[#allocation59_spill] sm:$0xff] }
 0xb81   :  { %5104 = vmatprep.subr.bf16.mxu0 %v11631_v7 }
 0xb83   :  { %5020 = vmatpush2.bf16.msra.mxu1 %v13673_v9  ;;  %v13681_v9 = vld [vmem:[#allocation48_spill] sm:$0xff] }
 0xb84   :  { %5021 = vmatprep.subr.bf16.mxu1 %v13674_v10  ;;  %5105 = vmatpush2.bf16.msra.mxu0 %v11636_v12  ;;  %v13682_v10 = vld [vmem:[#allocation108_spill] sm:$0xff] }
 0xb85   :  { %5106 = vmatprep.subr.bf16.mxu0 %v11639_v11  ;;  %v11655_v11 = vld [vmem:[#allocation3 + $0x214] ss:$24 sps:$4 sm:$0xff]  }
 0xb86   :  { %13684 = vst [vmem:[#allocation102_spill] sm:$0xff] %v11655_v11 }
 0xb87   :  { %5022 = vmatpush2.bf16.msra.mxu1 %v13677_v1  ;;  %v13685_v1 = vld [vmem:[#allocation110_spill] sm:$0xff] }
 0xb88   :  { %5023 = vmatprep.subr.bf16.mxu1 %v13678_v38  ;;  %5107 = vmatpush2.bf16.msra.mxu0 %v11644_v39  ;;  %v13686_v38 = vld [vmem:[#allocation112_spill] sm:$0xff]  ;;  %v11660_v39 = vld [vmem:[#allocation3 + $0x210] ss:$24 sps:$4 sm:$0xff]  }
 0xb89   :  { %5108 = vmatprep.subr.bf16.mxu0 %v11647_v43  ;;  %13687 = vst [vmem:[#allocation36_spill] sm:$0xff] %v11660_v39  ;;  %v11663_v43 = vld [vmem:[#allocation3 + $0x1e4] ss:$24 sps:$4 sm:$0xff]  }
 0xb8a   :  { %13688 = vst [vmem:[#allocation71_spill] sm:$0xff] %v11663_v43 }
 0xb8b   :  { %5024 = vmatpush2.bf16.msra.mxu1 %v13681_v9  ;;  %v11668_v9 = vld [vmem:[#allocation3 + $0x1e0] ss:$24 sps:$4 sm:$0xff]  }
 0xb8c   :  { %5025 = vmatprep.subr.bf16.mxu1 %v13682_v10  ;;  %5109 = vmatpush2.bf16.msra.mxu0 %v11652_v61  ;;  %13689 = vst [vmem:[#allocation103_spill] sm:$0xff] %v11668_v9  ;;  %v11671_v10 = vld [vmem:[#allocation3 + $0x1b4] ss:$24 sps:$4 sm:$0xff]  }
 0xb8d   :  { %5110 = vmatprep.subr.bf16.mxu0 %v11655_v11  ;;  %13690 = vst [vmem:[#allocation68_spill] sm:$0xff] %v11671_v10 }
 0xb8f   :  { %5026 = vmatpush2.bf16.msra.mxu1 %v13685_v1  ;;  %v11676_v1 = vld [vmem:[#allocation3 + $0x1b0] ss:$24 sps:$4 sm:$0xff]  }
 0xb90   :  { %5027 = vmatprep.subr.bf16.mxu1 %v13686_v38  ;;  %5111 = vmatpush2.bf16.msra.mxu0 %v11660_v39  ;;  %13691 = vst [vmem:[#allocation66_spill] sm:$0xff] %v11676_v1  ;;  %v11679_v38 = vld [vmem:[#allocation3 + $0x184] ss:$24 sps:$4 sm:$0xff]  }
 0xb91   :  { %5112 = vmatprep.subr.bf16.mxu0 %v11663_v43  ;;  %13692 = vst [vmem:[#allocation69_spill] sm:$0xff] %v11679_v38 }
 0xb93   :  { %5028 = vmatpush2.bf16.msra.mxu1 %v11156_v18  ;;  %v13696_v18 = vld [vmem:[#allocation46_spill] sm:$0xff] }
 0xb94   :  { %5029 = vmatprep.subr.bf16.mxu1 %v11162_v30  ;;  %5113 = vmatpush2.bf16.msra.mxu0 %v11668_v9  ;;  %v13695_v30 = vld [vmem:[#allocation44_spill] sm:$0xff] }
 0xb95   :  { %5114 = vmatprep.subr.bf16.mxu0 %v11671_v10 }
 0xb97   :  { %5030 = vmatpush2.bf16.msra.mxu1 %v11168_v19  ;;  %v13694_v19 = vld [vmem:[#allocation58_spill] sm:$0xff] }
 0xb98   :  { %5031 = vmatprep.subr.bf16.mxu1 %v11174_v24  ;;  %5115 = vmatpush2.bf16.msra.mxu0 %v11676_v1  ;;  %v13693_v24 = vld [vmem:[#allocation40_spill] sm:$0xff] }
 0xb99   :  { %5116 = vmatprep.subr.bf16.mxu0 %v11679_v38 }
 0xb9b   :  { %5032 = vmatpush2.bf16.msra.mxu1 %v11180_v4  ;;  %v13700_v4 = vld [vmem:[#allocation113_spill] sm:$0xff] }
 0xb9c   :  { %5127 = vmatprep.subr.bf16.mxu1 %v10988_v48  ;;  %5117 = vmatpush2.bf16.msra.mxu0 %v13605_v0  ;;  %v13697_v48 = vld [vmem:[#allocation107_spill] sm:$0xff]  ;;  %v13707_v0 = vld [vmem:[#allocation41_spill] sm:$0xff] }
 0xb9d   :  { %5168 = vmatprep.subr.bf16.mxu0 %v13606_v47 }
 0xb9e   :  { %5034 = vmatmul.mubr.bf16.vlgmr.msra.gmra.mxu1 %v11558_v28 }
 0xb9f   :  { %5128 = vmatpush1.bf16.msra.mxu1 %v10994_v15  ;;  %v13699_v15 = vld [vmem:[#allocation111_spill] sm:$0xff] }
 0xba0   :  { %5129 = vmatprep.subr.bf16.mxu1 %v11000_v50  ;;  %v13701_v50 = vld [vmem:[#allocation114_spill] sm:$0xff] }
 0xba3   :  { %5130 = vmatpush1.bf16.msra.mxu1 %v11008_v62  ;;  %v13702_v62 = vld [vmem:[#allocation115_spill] sm:$0xff] }
 0xba4   :  { %5131 = vmatprep.subr.bf16.mxu1 %v11014_v25  ;;  %v13703_v25 = vld [vmem:[#allocation116_spill] sm:$0xff] }
 0xba7   :  { %5132 = vmatpush1.bf16.msra.mxu1 %v11022_v42  ;;  %v13704_v42 = vld [vmem:[#allocation117_spill] sm:$0xff] }
 0xba8   :  { %5133 = vmatprep.subr.bf16.mxu1 %v11028_v33  ;;  %v11718_v33 = vld [vmem:[#allocation3 + $0x154] ss:$24 sps:$4 sm:$0xff]  }
 0xba9   :  { %13705 = vst [vmem:[#allocation45_spill] sm:$0xff] %v11718_v33 }
 0xbab   :  { %5134 = vmatpush1.bf16.msra.mxu1 %v11034_v21 }
 0xbac   :  { %5135 = vmatprep.subr.bf16.mxu1 %v11040_v35 }
 0xbaf   :  { %5136 = vmatpush1.bf16.msra.mxu1 %v11046_v6 }
 0xbb0   :  { %5137 = vmatprep.subr.bf16.mxu1 %v11052_v37 }
 0xbb3   :  { %5138 = vmatpush1.bf16.msra.mxu1 %v11058_v31 }
 0xbb4   :  { %5139 = vmatprep.subr.bf16.mxu1 %v11064_v29 }
 0xbb7   :  { %5140 = vmatpush1.bf16.msra.mxu1 %v11070_v23  ;;  %v13706_v23 = vld [vmem:[#allocation118_spill] sm:$0xff] }
 0xbb8   :  { %5141 = vmatprep.subr.bf16.mxu1 %v11076_v16  ;;  %v13698_v16 = vld [vmem:[#allocation109_spill] sm:$0xff] }
 0xbbb   :  { %5142 = vmatpush1.bf16.msra.mxu1 %v11082_v22 }
 0xbbc   :  { %5143 = vmatprep.subr.bf16.mxu1 %v11088_v3 }
 0xbbf   :  { %5144 = vmatpush2.bf16.msra.mxu1 %v11094_v55 }
 0xbc0   :  { %5145 = vmatprep.subr.bf16.mxu1 %v11100_v49 }
 0xbc3   :  { %5146 = vmatpush2.bf16.msra.mxu1 %v11106_v13 }
 0xbc4   :  { %5147 = vmatprep.subr.bf16.mxu1 %v13693_v24 }
 0xbc7   :  { %5148 = vmatpush2.bf16.msra.mxu1 %v13694_v19 }
 0xbc8   :  { %5149 = vmatprep.subr.bf16.mxu1 %v13695_v30 }
 0xbcb   :  { %5150 = vmatpush2.bf16.msra.mxu1 %v13696_v18  ;;  %v13708_v18 = vld [vmem:[#allocation119_spill] sm:$0xff] }
 0xbcc   :  { %5151 = vmatprep.subr.bf16.mxu1 %v13697_v48 }
 0xbcf   :  { %5152 = vmatpush2.bf16.msra.mxu1 %v13698_v16  ;;  %v13709_v16 = vld [vmem:[#allocation80_spill] sm:$0xff] }
 0xbd0   :  { %5153 = vmatprep.subr.bf16.mxu1 %v13699_v15 }
 0xbd3   :  { %5154 = vmatpush2.bf16.msra.mxu1 %v13700_v4 }
 0xbd4   :  { %5155 = vmatprep.subr.bf16.mxu1 %v13701_v50 }
 0xbd7   :  { %5156 = vmatpush2.bf16.msra.mxu1 %v13702_v62 }
 0xbd8   :  { %5157 = vmatprep.subr.bf16.mxu1 %v13703_v25 }
 0xbdb   :  { %5158 = vmatpush2.bf16.msra.mxu1 %v13704_v42 }
 0xbdc   :  { %5253 = vmatprep.subr.bf16.mxu1 %v11718_v33 }
 0xc1e   :  { %v4953_v21 = vpop.f32.mrf.mxu1  ;;  %v4994_v35 = vpop.f32.mrf.mxu0 }
 0xc1f   :  { %v4954_v29 = vadd.f32 %v4953_v21, %v11513_v17  ;;  %v4995_v19 = vadd.f32 %v4994_v35, %v11527_v51 }
 0xc20   :  { %v4955_v6 = vpop.f32.mrf.mxu1  ;;  %v4996_v13 = vpop.f32.mrf.mxu0 }
 0xc21   :  { %v4956_v55 = vadd.f32 %v4955_v6, %v11517_v59  ;;  %v5042_v49 = vadd.f32 %v4954_v29, %v13706_v23  ;;  %v4997_v30 = vadd.f32 %v4996_v13, %v11530_v36  ;;  %v5044_v48 = vadd.f32 %v4995_v19, %v13708_v18 }
 0xc22   :  { %v4957_v37 = vpop.f32.mrf.mxu1  ;;  %v4998_v22 = vpop.f32.mrf.mxu0 }
 0xc23   :  { %v5043_v47 = vadd.f32 %v4956_v55, %v13707_v0  ;;  %v7228_v28 = vmul.f32 -1.442695, %v5042_v49  ;;  %v5045_v15 = vadd.f32 %v4997_v30, %v13709_v16  ;;  %v7230_v4 = vmul.f32 -1.442695, %v5044_v48 }
 0xc24   :  { %v4958_v31 = vpop.f32.mrf.mxu1  ;;  %v4999_v3 = vpop.f32.mrf.mxu0 }
 0xc25   :  { %v7229_v24 = vmul.f32 -1.442695, %v5043_v47  ;;  %8170 = vpow2.f32 %v7228_v28  ;;  %v7231_v50 = vmul.f32 -1.442695, %v5045_v15  ;;  %v13710_v47 = vld [vmem:[#allocation91_spill] sm:$0xff] }
 0xc27   :  { %8172 = vpow2.f32 %v7229_v24 }
 0xc28   :  { %8174 = vpow2.f32 %v7230_v4 }
 0xc29   :  { %8176 = vpow2.f32 %v7231_v50 }
 0xc32   :  { %v8171_v62 = vpop.eup %8170 }
 0xc33   :  { %v5058_v42 = vadd.f32 1.0, %v8171_v62 }
 0xc34   :  { %v8173_v25 = vpop.eup %8172 }
 0xc35   :  { %v5059_v21 = vadd.f32 1.0, %v8173_v25  ;;  %8178 = vrcp.f32 %v5058_v42  ;;  %v8175_v6 = vpop.eup %8174 }
 0xc36   :  { %v8177_v37 = vpop.eup %8176  ;;  %v5060_v35 = vadd.f32 1.0, %v8175_v6 }
 0xc37   :  { %8180 = vrcp.f32 %v5059_v21  ;;  %v5061_v31 = vadd.f32 1.0, %v8177_v37 }
 0xc38   :  { %8182 = vrcp.f32 %v5060_v35 }
 0xc39   :  { %8184 = vrcp.f32 %v5061_v31  ;;  %v11750_v31 = vld [vmem:[#allocation3 + $0x134] ss:$24 sps:$4 sm:$0xff]  }
 0xc42   :  { %v8179_v3 = vpop.eup %8178 }
 0xc44   :  { %v8181_v49 = vpop.eup %8180 }
 0xc45   :  { %v8183_v18 = vpop.eup %8182 }
 0xc46   :  { %v8185_v48 = vpop.eup %8184  ;;  %v5076_v16 = vsub.f32 1.0, %v8183_v18  ;;  %v5080_v62 = vmul.f32 %v8183_v18, %v11550_v46  ;;  %v11803_v18 = vld [vmem:[#allocation3 + $0x10] ss:$24 sps:$4 sm:$0xff]  }
 0xc47   :  { %v5077_v4 = vsub.f32 1.0, %v8185_v48  ;;  %v5081_v21 = vmul.f32 %v8185_v48, %v11552_v5  ;;  %v11806_v48 = vld [vmem:[#allocation3 + $0x2e4] ss:$24 sps:$4 sm:$0xff]   ;;  %v11835_v46 = vld [vmem:[#allocation3 + $0x250] ss:$24 sps:$4 sm:$0xff]  }
 0xc48   :  { %13719 = vst [vmem:[#allocation53_spill] sm:$0xff] %v11835_v46  ;;  %v11838_v5 = vld [vmem:[#allocation3 + $0x224] ss:$24 sps:$4 sm:$0xff]  }
 0xc49   :  { %13720 = vst [vmem:[#allocation52_spill] sm:$0xff] %v11838_v5 }
 0xc5e   :  { %v5035_v22 = vpop.f32.mrf.mxu1 }
 0xc5f   :  { %v5036_v13 = vadd.f32 %v5035_v22, %v11537_v41  ;;  %v11747_v22 = vld [vmem:[#allocation3 + $0x160] ss:$24 sps:$4 sm:$0xff]  }
 0xc60   :  { %v5037_v29 = vpop.f32.mrf.mxu1 }
 0xc61   :  { %v5070_v55 = vmul.f32 %v8179_v3, %v5036_v13  ;;  %v5038_v23 = vadd.f32 %v5037_v29, %v11540_v2  ;;  %v11755_v13 = vld [vmem:[#allocation3 + $0x130] ss:$24 sps:$4 sm:$0xff]   ;;  %v11758_v3 = vld [vmem:[#allocation3 + $0x104] ss:$24 sps:$4 sm:$0xff]   ;;  %v11763_v29 = vld [vmem:[#allocation3 + $0x100] ss:$24 sps:$4 sm:$0xff]  }
 0xc62   :  { %v5039_v0 = vpop.f32.mrf.mxu1 }
 0xc63   :  { %v5072_v28 = vadd.f32 %v5070_v55, %v13710_v47  ;;  %v5071_v24 = vmul.f32 %v8181_v49, %v5038_v23  ;;  %v11766_v55 = vld [vmem:[#allocation3 + $0xd4] ss:$24 sps:$4 sm:$0xff]   ;;  %v11771_v23 = vld [vmem:[#allocation3 + $0xd0] ss:$24 sps:$4 sm:$0xff]   ;;  %v11774_v49 = vld [vmem:[#allocation3 + $0xa4] ss:$24 sps:$4 sm:$0xff]  }
 0xc64   :  { %v5040_v19 = vpop.f32.mrf.mxu1  ;;  %v11779_v0 = vld [vmem:[#allocation3 + $0xa0] ss:$24 sps:$4 sm:$0xff]   ;;  %v11782_v47 = vld [vmem:[#allocation3 + $0x74] ss:$24 sps:$4 sm:$0xff]  }
 0xc65   :  { %8186 = vtanh.f32 %v5072_v28  ;;  %v5073_v30 = vadd.f32 %v5071_v24, %v11467_v40  ;;  %v11787_v28 = vld [vmem:[#allocation3 + $0x70] ss:$24 sps:$4 sm:$0xff]   ;;  %v11790_v24 = vld [vmem:[#allocation3 + $0x44] ss:$24 sps:$4 sm:$0xff]   ;;  %v11795_v19 = vld [vmem:[#allocation3 + $0x40] ss:$24 sps:$4 sm:$0xff]  }
 0xc67   :  { %8188 = vtanh.f32 %v5073_v30  ;;  %v11798_v30 = vld [vmem:[#allocation3 + $0x14] ss:$24 sps:$4 sm:$0xff]  }
 0xc72   :  { %v8187_v15 = vpop.eup %8186 }
 0xc73   :  { %v5078_v50 = vmul.f32 %v8187_v15, %v5076_v16  ;;  %v11811_v16 = vld [vmem:[#allocation3 + $0x2e0] ss:$24 sps:$4 sm:$0xff]   ;;  %v11814_v15 = vld [vmem:[#allocation3 + $0x2b4] ss:$24 sps:$4 sm:$0xff]  }
 0xc74   :  { %v8189_v25 = vpop.eup %8188 }
 0xc75   :  { %v5079_v42 = vmul.f32 %v8189_v25, %v5077_v4  ;;  %v11735_v6 = vadd.f32 %v5080_v62, %v5078_v50  ;;  %v11819_v4 = vld [vmem:[#allocation3 + $0x2b0] ss:$24 sps:$4 sm:$0xff]   ;;  %v11822_v50 = vld [vmem:[#allocation3 + $0x284] ss:$24 sps:$4 sm:$0xff]   ;;  %v11827_v25 = vld [vmem:[#allocation3 + $0x280] ss:$24 sps:$4 sm:$0xff]  }
 0xc76   :  { %13713 = vst [vmem:[#allocation105_spill] sm:$0xff] %v11822_v50  ;;  %v13714_v62 = vld [vmem:[#allocation98_spill] sm:$0xff]  ;;  %13715 = vst [vmem:[#allocation78_spill] sm:$0xff] %v11827_v25 }
 0xc77   :  { %13711 = vst [vmem:[#allocation43_spill] sm:$0xff] %v11735_v6  ;;  %v11737_v37 = vadd.f32 %v5081_v21, %v5079_v42  ;;  %v11743_v35 = vpack.c.bf16 %v11735_v6, %v11735_v6  ;;  %v11830_v42 = vld [vmem:[#allocation3 + $0x254] ss:$24 sps:$4 sm:$0xff]   ;;  %v13717_v21 = vld [vmem:[#allocation100_spill] sm:$0xff] }
 0xc78   :  { %13716 = vst [vmem:[#allocation79_spill] sm:$0xff] %v11830_v42 }
 0xc79   :  { %13712 = vst [vmem:[#allocation106_spill] sm:$0xff] %v11737_v37  ;;  %v5085_v40 = vpack.c.bf16 %v11737_v37, %v11737_v37 }
 0xc7b   :  { %5118 = vmatprep.mubr.bf16.mxu0 %v5085_v40  ;;  %5159 = vmatprep.mubr.bf16.mxu1 %v5085_v40 }
 0xc7c   :  { %5119 = vmatmul.mubr.bf16.vlgmr.msra.gmra.mxu0 %v11743_v35  ;;  %5160 = vmatmul.mubr.bf16.vlgmr.msra.gmra.mxu1 %v11743_v35 }
 0xc7d   :  { %5169 = vmatpush1.bf16.msra.mxu0 %v11747_v22  ;;  %5200 = vmatprep.mubr.bf16.mxu0 %v5085_v40  ;;  %v13718_v40 = vld [vmem:[#allocation99_spill] sm:$0xff] }
 0xc7e   :  { %5170 = vmatprep.subr.bf16.mxu0 %v11750_v31  ;;  %5254 = vmatpush1.bf16.msra.mxu1 %v11564_v34 }
 0xc7f   :  { %5255 = vmatprep.subr.bf16.mxu1 %v11567_v20 }
 0xc81   :  { %5171 = vmatpush1.bf16.msra.mxu0 %v11755_v13 }
 0xc82   :  { %5172 = vmatprep.subr.bf16.mxu0 %v11758_v3  ;;  %5256 = vmatpush1.bf16.msra.mxu1 %v11572_v58 }
 0xc83   :  { %5257 = vmatprep.subr.bf16.mxu1 %v11575_v54 }
 0xc85   :  { %5173 = vmatpush1.bf16.msra.mxu0 %v11763_v29 }
 0xc86   :  { %5174 = vmatprep.subr.bf16.mxu0 %v11766_v55  ;;  %5258 = vmatpush1.bf16.msra.mxu1 %v11580_v8 }
 0xc87   :  { %5259 = vmatprep.subr.bf16.mxu1 %v11583_v63 }
 0xc89   :  { %5175 = vmatpush1.bf16.msra.mxu0 %v11771_v23 }
 0xc8a   :  { %5176 = vmatprep.subr.bf16.mxu0 %v11774_v49  ;;  %5260 = vmatpush1.bf16.msra.mxu1 %v11588_v56 }
 0xc8b   :  { %5261 = vmatprep.subr.bf16.mxu1 %v11591_v27 }
 0xc8d   :  { %5177 = vmatpush1.bf16.msra.mxu0 %v11779_v0 }
 0xc8e   :  { %5178 = vmatprep.subr.bf16.mxu0 %v11782_v47  ;;  %5262 = vmatpush1.bf16.msra.mxu1 %v11596_v53 }
 0xc8f   :  { %5263 = vmatprep.subr.bf16.mxu1 %v11599_v45 }
 0xc91   :  { %5179 = vmatpush1.bf16.msra.mxu0 %v11787_v28 }
 0xc92   :  { %5180 = vmatprep.subr.bf16.mxu0 %v11790_v24  ;;  %5264 = vmatpush1.bf16.msra.mxu1 %v11604_v52 }
 0xc93   :  { %5265 = vmatprep.subr.bf16.mxu1 %v11607_v32 }
 0xc95   :  { %5181 = vmatpush1.bf16.msra.mxu0 %v11795_v19 }
 0xc96   :  { %5182 = vmatprep.subr.bf16.mxu0 %v11798_v30  ;;  %5266 = vmatpush1.bf16.msra.mxu1 %v11612_v26 }
 0xc97   :  { %5267 = vmatprep.subr.bf16.mxu1 %v11615_v14 }
 0xc99   :  { %5183 = vmatpush1.bf16.msra.mxu0 %v11803_v18 }
 0xc9a   :  { %5184 = vmatprep.subr.bf16.mxu0 %v11806_v48  ;;  %5268 = vmatpush1.bf16.msra.mxu1 %v11620_v44 }
 0xc9b   :  { %5269 = vmatprep.subr.bf16.mxu1 %v11623_v60 }
 0xc9d   :  { %5185 = vmatpush2.bf16.msra.mxu0 %v11811_v16 }
 0xc9e   :  { %5186 = vmatprep.subr.bf16.mxu0 %v11814_v15  ;;  %5270 = vmatpush2.bf16.msra.mxu1 %v11628_v57 }
 0xc9f   :  { %5271 = vmatprep.subr.bf16.mxu1 %v11631_v7 }
 0xca1   :  { %5187 = vmatpush2.bf16.msra.mxu0 %v11819_v4 }
 0xca2   :  { %5188 = vmatprep.subr.bf16.mxu0 %v11822_v50  ;;  %5272 = vmatpush2.bf16.msra.mxu1 %v11636_v12 }
 0xca3   :  { %5273 = vmatprep.subr.bf16.mxu1 %v13714_v62 }
 0xca5   :  { %5189 = vmatpush2.bf16.msra.mxu0 %v11827_v25  ;;  %v11843_v25 = vld [vmem:[#allocation3 + $0x220] ss:$24 sps:$4 sm:$0xff]  }
 0xca6   :  { %5190 = vmatprep.subr.bf16.mxu0 %v11830_v42  ;;  %5274 = vmatpush2.bf16.msra.mxu1 %v13717_v21  ;;  %13721 = vst [vmem:[#allocation39_spill] sm:$0xff] %v11843_v25  ;;  %v11846_v42 = vld [vmem:[#allocation3 + $0x1f4] ss:$24 sps:$4 sm:$0xff]  }
 0xca7   :  { %5275 = vmatprep.subr.bf16.mxu1 %v13718_v40  ;;  %13722 = vst [vmem:[#allocation54_spill] sm:$0xff] %v11846_v42  ;;  %v13763_v40 = vld [vmem:[#allocation82_spill] sm:$0xff] }
 0xca9   :  { %5191 = vmatpush2.bf16.msra.mxu0 %v11835_v46  ;;  %v11851_v46 = vld [vmem:[#allocation3 + $0x1f0] ss:$24 sps:$4 sm:$0xff]  }
 0xcaa   :  { %5192 = vmatprep.subr.bf16.mxu0 %v11838_v5  ;;  %5276 = vmatpush2.bf16.msra.mxu1 %v11652_v61  ;;  %13723 = vst [vmem:[#allocation64_spill] sm:$0xff] %v11851_v46  ;;  %v11854_v5 = vld [vmem:[#allocation3 + $0x1c4] ss:$24 sps:$4 sm:$0xff]  }
 0xcab   :  { %5277 = vmatprep.subr.bf16.mxu1 %v11655_v11  ;;  %13724 = vst [vmem:[#allocation61_spill] sm:$0xff] %v11854_v5  ;;  %v13762_v61 = vld [vmem:[#allocation120_spill] sm:$0xff] }
 0xcad   :  { %5193 = vmatpush2.bf16.msra.mxu0 %v11843_v25  ;;  %v11859_v25 = vld [vmem:[#allocation3 + $0x1c0] ss:$24 sps:$4 sm:$0xff]  }
 0xcae   :  { %5194 = vmatprep.subr.bf16.mxu0 %v11846_v42  ;;  %5278 = vmatpush2.bf16.msra.mxu1 %v11660_v39  ;;  %13725 = vst [vmem:[#allocation62_spill] sm:$0xff] %v11859_v25  ;;  %v11862_v42 = vld [vmem:[#allocation3 + $0x194] ss:$24 sps:$4 sm:$0xff]  }
 0xcaf   :  { %5279 = vmatprep.subr.bf16.mxu1 %v11663_v43  ;;  %13726 = vst [vmem:[#allocation63_spill] sm:$0xff] %v11862_v42 }
 0xcb1   :  { %5195 = vmatpush2.bf16.msra.mxu0 %v11851_v46  ;;  %v11867_v46 = vld [vmem:[#allocation3 + $0x190] ss:$24 sps:$4 sm:$0xff]  }
 0xcb2   :  { %5196 = vmatprep.subr.bf16.mxu0 %v11854_v5  ;;  %5280 = vmatpush2.bf16.msra.mxu1 %v11668_v9  ;;  %13727 = vst [vmem:[#allocation67_spill] sm:$0xff] %v11867_v46  ;;  %v11870_v5 = vld [vmem:[#allocation3 + $0x15c] ss:$24 sps:$4 sm:$0xff]  }
 0xcb3   :  { %5281 = vmatprep.subr.bf16.mxu1 %v11671_v10  ;;  %13728 = vst [vmem:[#allocation55_spill] sm:$0xff] %v11870_v5  ;;  %v11873_v10 = vld [vmem:[#allocation3 + $0x180] ss:$24 sps:$4 sm:$0xff]  }
 0xcb4   :  { %13729 = vst [vmem:[#allocation65_spill] sm:$0xff] %v11873_v10 }
 0xcb5   :  { %5197 = vmatpush2.bf16.msra.mxu0 %v11859_v25  ;;  %v11876_v25 = vld [vmem:[#allocation3 + $0x164] ss:$24 sps:$4 sm:$0xff]  }
 0xcb6   :  { %5198 = vmatprep.subr.bf16.mxu0 %v11862_v42  ;;  %5282 = vmatpush2.bf16.msra.mxu1 %v11676_v1  ;;  %13730 = vst [vmem:[#allocation70_spill] sm:$0xff] %v11876_v25  ;;  %v11880_v1 = vld [vmem:[#allocation3 + $0x158] ss:$24 sps:$4 sm:$0xff]  }
 0xcb7   :  { %5283 = vmatprep.subr.bf16.mxu1 %v11679_v38  ;;  %13731 = vst [vmem:[#allocation122_spill] sm:$0xff] %v11880_v1  ;;  %v11883_v38 = vld [vmem:[#allocation3 + $0x12c] ss:$24 sps:$4 sm:$0xff]  }
 0xcb8   :  { %13732 = vst [vmem:[#allocation123_spill] sm:$0xff] %v11883_v38 }
 0xcb9   :  { %5199 = vmatpush2.bf16.msra.mxu0 %v11867_v46  ;;  %v11886_v46 = vld [vmem:[#allocation3 + $0x128] ss:$24 sps:$4 sm:$0xff]  }
 0xcba   :  { %5294 = vmatprep.subr.bf16.mxu0 %v11870_v5  ;;  %5284 = vmatpush2.bf16.msra.mxu1 %v11873_v10  ;;  %13733 = vst [vmem:[#allocation124_spill] sm:$0xff] %v11886_v46  ;;  %v11889_v5 = vld [vmem:[#allocation3 + $0xfc] ss:$24 sps:$4 sm:$0xff]   ;;  %v11892_v10 = vld [vmem:[#allocation3 + $0xf8] ss:$24 sps:$4 sm:$0xff]  }
 0xcbb   :  { %5335 = vmatprep.subr.bf16.mxu1 %v11876_v25  ;;  %13734 = vst [vmem:[#allocation125_spill] sm:$0xff] %v11889_v5  ;;  %13735 = vst [vmem:[#allocation126_spill] sm:$0xff] %v11892_v10 }
 0xcbc   :  { %5201 = vmatmul.mubr.bf16.vlgmr.msra.gmra.mxu0 %v11743_v35  ;;  %v11895_v35 = vld [vmem:[#allocation3 + $0xcc] ss:$24 sps:$4 sm:$0xff]  }
 0xcbd   :  { %5295 = vmatpush1.bf16.msra.mxu0 %v11880_v1  ;;  %13736 = vst [vmem:[#allocation127_spill] sm:$0xff] %v11895_v35  ;;  %v11898_v1 = vld [vmem:[#allocation3 + $0xc8] ss:$24 sps:$4 sm:$0xff]  }
 0xcbe   :  { %5296 = vmatprep.subr.bf16.mxu0 %v11883_v38  ;;  %13737 = vst [vmem:[#allocation128_spill] sm:$0xff] %v11898_v1  ;;  %v11901_v38 = vld [vmem:[#allocation3 + $0x9c] ss:$24 sps:$4 sm:$0xff]  }
 0xcbf   :  { %13738 = vst [vmem:[#allocation129_spill] sm:$0xff] %v11901_v38 }
 0xcc1   :  { %5297 = vmatpush1.bf16.msra.mxu0 %v11886_v46  ;;  %v11904_v46 = vld [vmem:[#allocation3 + $0x98] ss:$24 sps:$4 sm:$0xff]  }
 0xcc2   :  { %5298 = vmatprep.subr.bf16.mxu0 %v11889_v5  ;;  %13739 = vst [vmem:[#allocation130_spill] sm:$0xff] %v11904_v46  ;;  %v11907_v5 = vld [vmem:[#allocation3 + $0x6c] ss:$24 sps:$4 sm:$0xff]  }
 0xcc3   :  { %13740 = vst [vmem:[#allocation131_spill] sm:$0xff] %v11907_v5 }
 0xcc5   :  { %5299 = vmatpush1.bf16.msra.mxu0 %v11892_v10  ;;  %v11910_v10 = vld [vmem:[#allocation3 + $0x68] ss:$24 sps:$4 sm:$0xff]  }
 0xcc6   :  { %5300 = vmatprep.subr.bf16.mxu0 %v11895_v35  ;;  %13741 = vst [vmem:[#allocation132_spill] sm:$0xff] %v11910_v10  ;;  %v11913_v35 = vld [vmem:[#allocation3 + $0x3c] ss:$24 sps:$4 sm:$0xff]  }
 0xcc7   :  { %13742 = vst [vmem:[#allocation133_spill] sm:$0xff] %v11913_v35 }
 0xcc9   :  { %5301 = vmatpush1.bf16.msra.mxu0 %v11898_v1  ;;  %v11916_v1 = vld [vmem:[#allocation3 + $0x38] ss:$24 sps:$4 sm:$0xff]  }
 0xcca   :  { %5302 = vmatprep.subr.bf16.mxu0 %v11901_v38  ;;  %13743 = vst [vmem:[#allocation134_spill] sm:$0xff] %v11916_v1  ;;  %v11919_v38 = vld [vmem:[#allocation3 + $0xc] ss:$24 sps:$4 sm:$0xff]  }
 0xccb   :  { %13744 = vst [vmem:[#allocation56_spill] sm:$0xff] %v11919_v38 }
 0xccd   :  { %5303 = vmatpush1.bf16.msra.mxu0 %v11904_v46  ;;  %v11922_v46 = vld [vmem:[#allocation3 + $0x8] ss:$24 sps:$4 sm:$0xff]  }
 0xcce   :  { %5304 = vmatprep.subr.bf16.mxu0 %v11907_v5  ;;  %13745 = vst [vmem:[#allocation38_spill] sm:$0xff] %v11922_v46  ;;  %v11925_v5 = vld [vmem:[#allocation3 + $0x2dc] ss:$24 sps:$4 sm:$0xff]  }
 0xccf   :  { %13746 = vst [vmem:[#allocation57_spill] sm:$0xff] %v11925_v5 }
 0xcd1   :  { %5305 = vmatpush1.bf16.msra.mxu0 %v11910_v10  ;;  %v11928_v10 = vld [vmem:[#allocation3 + $0x2d8] ss:$24 sps:$4 sm:$0xff]  }
 0xcd2   :  { %5306 = vmatprep.subr.bf16.mxu0 %v11913_v35  ;;  %13747 = vst [vmem:[#allocation42_spill] sm:$0xff] %v11928_v10  ;;  %v11931_v35 = vld [vmem:[#allocation3 + $0x2ac] ss:$24 sps:$4 sm:$0xff]  }
 0xcd3   :  { %13748 = vst [vmem:[#allocation59_spill] sm:$0xff] %v11931_v35 }
 0xcd5   :  { %5307 = vmatpush1.bf16.msra.mxu0 %v11916_v1  ;;  %v11934_v1 = vld [vmem:[#allocation3 + $0x2a8] ss:$24 sps:$4 sm:$0xff]  }
 0xcd6   :  { %5308 = vmatprep.subr.bf16.mxu0 %v11919_v38  ;;  %13749 = vst [vmem:[#allocation48_spill] sm:$0xff] %v11934_v1  ;;  %v11937_v38 = vld [vmem:[#allocation3 + $0x27c] ss:$24 sps:$4 sm:$0xff]  }
 0xcd7   :  { %13750 = vst [vmem:[#allocation108_spill] sm:$0xff] %v11937_v38 }
 0xcd9   :  { %5309 = vmatpush1.bf16.msra.mxu0 %v11922_v46  ;;  %v11940_v46 = vld [vmem:[#allocation3 + $0x278] ss:$24 sps:$4 sm:$0xff]  }
 0xcda   :  { %5310 = vmatprep.subr.bf16.mxu0 %v11925_v5  ;;  %13751 = vst [vmem:[#allocation110_spill] sm:$0xff] %v11940_v46  ;;  %v11943_v5 = vld [vmem:[#allocation3 + $0x24c] ss:$24 sps:$4 sm:$0xff]  }
 0xcdb   :  { %13752 = vst [vmem:[#allocation112_spill] sm:$0xff] %v11943_v5 }
 0xcdd   :  { %5311 = vmatpush2.bf16.msra.mxu0 %v11928_v10  ;;  %v11946_v10 = vld [vmem:[#allocation3 + $0x248] ss:$24 sps:$4 sm:$0xff]  }
 0xcde   :  { %5312 = vmatprep.subr.bf16.mxu0 %v11931_v35  ;;  %13753 = vst [vmem:[#allocation40_spill] sm:$0xff] %v11946_v10  ;;  %v11949_v35 = vld [vmem:[#allocation3 + $0x21c] ss:$24 sps:$4 sm:$0xff]  }
 0xcdf   :  { %13754 = vst [vmem:[#allocation58_spill] sm:$0xff] %v11949_v35 }
 0xce1   :  { %5313 = vmatpush2.bf16.msra.mxu0 %v11934_v1  ;;  %v11952_v1 = vld [vmem:[#allocation3 + $0x218] ss:$24 sps:$4 sm:$0xff]  }
 0xce2   :  { %5314 = vmatprep.subr.bf16.mxu0 %v11937_v38  ;;  %13755 = vst [vmem:[#allocation44_spill] sm:$0xff] %v11952_v1  ;;  %v11955_v38 = vld [vmem:[#allocation3 + $0x1ec] ss:$24 sps:$4 sm:$0xff]  }
 0xce3   :  { %13756 = vst [vmem:[#allocation46_spill] sm:$0xff] %v11955_v38 }
 0xce5   :  { %5315 = vmatpush2.bf16.msra.mxu0 %v11940_v46  ;;  %v11958_v46 = vld [vmem:[#allocation3 + $0x1e8] ss:$24 sps:$4 sm:$0xff]  }
 0xce6   :  { %5316 = vmatprep.subr.bf16.mxu0 %v11943_v5  ;;  %13757 = vst [vmem:[#allocation107_spill] sm:$0xff] %v11958_v46  ;;  %v11961_v5 = vld [vmem:[#allocation3 + $0x1bc] ss:$24 sps:$4 sm:$0xff]  }
 0xce7   :  { %13758 = vst [vmem:[#allocation109_spill] sm:$0xff] %v11961_v5 }
 0xce9   :  { %5317 = vmatpush2.bf16.msra.mxu0 %v11946_v10  ;;  %v11964_v10 = vld [vmem:[#allocation3 + $0x1b8] ss:$24 sps:$4 sm:$0xff]  }
 0xcea   :  { %5318 = vmatprep.subr.bf16.mxu0 %v11949_v35  ;;  %13759 = vst [vmem:[#allocation111_spill] sm:$0xff] %v11964_v10  ;;  %v11967_v35 = vld [vmem:[#allocation3 + $0x18c] ss:$24 sps:$4 sm:$0xff]  }
 0xceb   :  { %13760 = vst [vmem:[#allocation113_spill] sm:$0xff] %v11967_v35 }
 0xced   :  { %5319 = vmatpush2.bf16.msra.mxu0 %v11952_v1  ;;  %v11970_v1 = vld [vmem:[#allocation3 + $0x188] ss:$24 sps:$4 sm:$0xff]  }
 0xcee   :  { %5320 = vmatprep.subr.bf16.mxu0 %v11955_v38  ;;  %13761 = vst [vmem:[#allocation114_spill] sm:$0xff] %v11970_v1 }
 0xcf1   :  { %5321 = vmatpush2.bf16.msra.mxu0 %v11958_v46 }
 0xcf2   :  { %5322 = vmatprep.subr.bf16.mxu0 %v11961_v5 }
 0xcf5   :  { %5323 = vmatpush2.bf16.msra.mxu0 %v11964_v10 }
 0xcf6   :  { %5324 = vmatprep.subr.bf16.mxu0 %v11967_v35 }
 0xcf9   :  { %5325 = vmatpush2.bf16.msra.mxu0 %v11970_v1 }
 0xcfa   :  { %5420 = vmatprep.subr.bf16.mxu0 %v11718_v33 }
 0xd3c   :  { %v5120_v38 = vpop.f32.mrf.mxu0  ;;  %v5161_v46 = vpop.f32.mrf.mxu1 }
 0xd3d   :  { %v5121_v10 = vadd.f32 %v5120_v38, %v11513_v17  ;;  %v5162_v33 = vadd.f32 %v5161_v46, %v11527_v51 }
 0xd3e   :  { %v5122_v25 = vpop.f32.mrf.mxu0  ;;  %v5163_v42 = vpop.f32.mrf.mxu1 }
 0xd3f   :  { %v5123_v11 = vadd.f32 %v5122_v25, %v11517_v59  ;;  %v5209_v35 = vadd.f32 %v5121_v10, %v13762_v61  ;;  %v5164_v12 = vadd.f32 %v5163_v42, %v11530_v36 }
 0xd40   :  { %v5124_v9 = vpop.f32.mrf.mxu0  ;;  %v5165_v5 = vpop.f32.mrf.mxu1 }
 0xd41   :  { %v5210_v21 = vadd.f32 %v5123_v11, %v13763_v40  ;;  %v7232_v62 = vmul.f32 -1.442695, %v5209_v35  ;;  %v13764_v9 = vld [vmem:[#allocation121_spill] sm:$0xff] }
 0xd42   :  { %v5125_v43 = vpop.f32.mrf.mxu0  ;;  %v5166_v39 = vpop.f32.mrf.mxu1  ;;  %v5211_v5 = vadd.f32 %v5162_v33, %v13764_v9 }
 0xd43   :  { %v7233_v1 = vmul.f32 -1.442695, %v5210_v21  ;;  %8190 = vpow2.f32 %v7232_v62  ;;  %v13765_v43 = vld [vmem:[#allocation81_spill] sm:$0xff] }
 0xd44   :  { %v5212_v39 = vadd.f32 %v5164_v12, %v13765_v43  ;;  %v7234_v50 = vmul.f32 -1.442695, %v5211_v5 }
 0xd45   :  { %8192 = vpow2.f32 %v7233_v1 }
 0xd46   :  { %v7235_v38 = vmul.f32 -1.442695, %v5212_v39  ;;  %8194 = vpow2.f32 %v7234_v50 }
 0xd48   :  { %8196 = vpow2.f32 %v7235_v38  ;;  %v13767_v38 = vld [vmem:[#allocation49_spill] sm:$0xff] }
 0xd50   :  { %v8191_v17 = vpop.eup %8190 }
 0xd51   :  { %v5225_v61 = vadd.f32 1.0, %v8191_v17  ;;  %v13766_v17 = vld [vmem:[#allocation73_spill] sm:$0xff] }
 0xd52   :  { %v8193_v25 = vpop.eup %8192 }
 0xd53   :  { %v5226_v11 = vadd.f32 1.0, %v8193_v25  ;;  %8198 = vrcp.f32 %v5225_v61  ;;  %v8195_v10 = vpop.eup %8194 }
 0xd54   :  { %v5227_v46 = vadd.f32 1.0, %v8195_v10 }
 0xd55   :  { %8200 = vrcp.f32 %v5226_v11  ;;  %v8197_v62 = vpop.eup %8196 }
 0xd56   :  { %v5228_v21 = vadd.f32 1.0, %v8197_v62  ;;  %8202 = vrcp.f32 %v5227_v46 }
 0xd58   :  { %8204 = vrcp.f32 %v5228_v21 }
 0xd60   :  { %v8199_v33 = vpop.eup %8198 }
 0xd62   :  { %v8201_v50 = vpop.eup %8200 }
 0xd63   :  { %v8203_v61 = vpop.eup %8202 }
 0xd64   :  { %v5243_v10 = vsub.f32 1.0, %v8203_v61 }
 0xd65   :  { %v8205_v11 = vpop.eup %8204 }
 0xd66   :  { %v5248_v21 = vmul.f32 %v8205_v11, %v11737_v37  ;;  %v13788_v37 = vld [vmem:[#allocation68_spill] sm:$0xff] }
 0xd7c   :  { %v5202_v1 = vpop.f32.mrf.mxu0 }
 0xd7d   :  { %v5203_v42 = vadd.f32 %v5202_v1, %v11537_v41  ;;  %v5244_v1 = vsub.f32 1.0, %v8205_v11  ;;  %v13777_v11 = vld [vmem:[#allocation53_spill] sm:$0xff] }
 0xd7e   :  { %v5204_v40 = vpop.f32.mrf.mxu0 }
 0xd7f   :  { %v5237_v12 = vmul.f32 %v8199_v33, %v5203_v42  ;;  %v5205_v35 = vadd.f32 %v5204_v40, %v11540_v2  ;;  %v5247_v42 = vmul.f32 %v8203_v61, %v11735_v6  ;;  %v13776_v61 = vld [vmem:[#allocation99_spill] sm:$0xff] }
 0xd80   :  { %v5206_v9 = vpop.f32.mrf.mxu0  ;;  %v13787_v6 = vld [vmem:[#allocation103_spill] sm:$0xff] }
 0xd81   :  { %v5239_v5 = vadd.f32 %v5237_v12, %v13766_v17  ;;  %v5238_v43 = vmul.f32 %v8201_v50, %v5205_v35  ;;  %v13770_v17 = vld [vmem:[#allocation105_spill] sm:$0xff] }
 0xd82   :  { %v5207_v39 = vpop.f32.mrf.mxu0 }
 0xd83   :  { %8206 = vtanh.f32 %v5239_v5  ;;  %v5240_v25 = vadd.f32 %v5238_v43, %v13767_v38  ;;  %v13771_v5 = vld [vmem:[#allocation97_spill] sm:$0xff]  ;;  %v13772_v43 = vld [vmem:[#allocation98_spill] sm:$0xff]  ;;  %v13774_v38 = vld [vmem:[#allocation79_spill] sm:$0xff] }
 0xd84   :  { %v13773_v39 = vld [vmem:[#allocation78_spill] sm:$0xff] }
 0xd85   :  { %8208 = vtanh.f32 %v5240_v25  ;;  %v13775_v25 = vld [vmem:[#allocation100_spill] sm:$0xff] }
 0xd90   :  { %v8207_v62 = vpop.eup %8206 }
 0xd91   :  { %v5245_v46 = vmul.f32 %v8207_v62, %v5243_v10  ;;  %v13778_v10 = vld [vmem:[#allocation52_spill] sm:$0xff]  ;;  %v13779_v62 = vld [vmem:[#allocation101_spill] sm:$0xff] }
 0xd92   :  { %v8209_v33 = vpop.eup %8208 }
 0xd93   :  { %v5246_v40 = vmul.f32 %v8209_v33, %v5244_v1  ;;  %v11988_v9 = vadd.f32 %v5247_v42, %v5245_v46  ;;  %v13780_v1 = vld [vmem:[#allocation102_spill] sm:$0xff]  ;;  %v13781_v46 = vld [vmem:[#allocation39_spill] sm:$0xff]  ;;  %v13783_v33 = vld [vmem:[#allocation36_spill] sm:$0xff] }
 0xd94   :  { %v13782_v42 = vld [vmem:[#allocation54_spill] sm:$0xff] }
 0xd95   :  { %13768 = vst [vmem:[#allocation115_spill] sm:$0xff] %v11988_v9  ;;  %v11990_v12 = vadd.f32 %v5248_v21, %v5246_v40  ;;  %v11996_v50 = vpack.c.bf16 %v11988_v9, %v11988_v9  ;;  %v13784_v40 = vld [vmem:[#allocation71_spill] sm:$0xff]  ;;  %v13785_v21 = vld [vmem:[#allocation64_spill] sm:$0xff] }
 0xd97   :  { %13769 = vst [vmem:[#allocation116_spill] sm:$0xff] %v11990_v12  ;;  %v5252_v35 = vpack.c.bf16 %v11990_v12, %v11990_v12 }
 0xd99   :  { %5285 = vmatprep.mubr.bf16.mxu1 %v5252_v35  ;;  %5326 = vmatprep.mubr.bf16.mxu0 %v5252_v35 }
 0xd9a   :  { %5286 = vmatmul.mubr.bf16.vlgmr.msra.gmra.mxu1 %v11996_v50  ;;  %5327 = vmatmul.mubr.bf16.vlgmr.msra.gmra.mxu0 %v11996_v50 }
 0xd9b   :  { %5336 = vmatpush1.bf16.msra.mxu1 %v11747_v22  ;;  %5367 = vmatprep.mubr.bf16.mxu1 %v5252_v35  ;;  %v13786_v35 = vld [vmem:[#allocation61_spill] sm:$0xff] }
 0xd9c   :  { %5337 = vmatprep.subr.bf16.mxu1 %v11750_v31  ;;  %5421 = vmatpush1.bf16.msra.mxu0 %v11564_v34 }
 0xd9d   :  { %5422 = vmatprep.subr.bf16.mxu0 %v11567_v20 }
 0xd9f   :  { %5338 = vmatpush1.bf16.msra.mxu1 %v11755_v13 }
 0xda0   :  { %5339 = vmatprep.subr.bf16.mxu1 %v11758_v3  ;;  %5423 = vmatpush1.bf16.msra.mxu0 %v11572_v58 }
 0xda1   :  { %5424 = vmatprep.subr.bf16.mxu0 %v11575_v54 }
 0xda3   :  { %5340 = vmatpush1.bf16.msra.mxu1 %v11763_v29 }
 0xda4   :  { %5341 = vmatprep.subr.bf16.mxu1 %v11766_v55  ;;  %5425 = vmatpush1.bf16.msra.mxu0 %v11580_v8 }
 0xda5   :  { %5426 = vmatprep.subr.bf16.mxu0 %v11583_v63 }
 0xda7   :  { %5342 = vmatpush1.bf16.msra.mxu1 %v11771_v23 }
 0xda8   :  { %5343 = vmatprep.subr.bf16.mxu1 %v11774_v49  ;;  %5427 = vmatpush1.bf16.msra.mxu0 %v11588_v56 }
 0xda9   :  { %5428 = vmatprep.subr.bf16.mxu0 %v11591_v27 }
 0xdab   :  { %5344 = vmatpush1.bf16.msra.mxu1 %v11779_v0 }
 0xdac   :  { %5345 = vmatprep.subr.bf16.mxu1 %v11782_v47  ;;  %5429 = vmatpush1.bf16.msra.mxu0 %v11596_v53 }
 0xdad   :  { %5430 = vmatprep.subr.bf16.mxu0 %v11599_v45 }
 0xdaf   :  { %5346 = vmatpush1.bf16.msra.mxu1 %v11787_v28 }
 0xdb0   :  { %5347 = vmatprep.subr.bf16.mxu1 %v11790_v24  ;;  %5431 = vmatpush1.bf16.msra.mxu0 %v11604_v52 }
 0xdb1   :  { %5432 = vmatprep.subr.bf16.mxu0 %v11607_v32 }
 0xdb3   :  { %5348 = vmatpush1.bf16.msra.mxu1 %v11795_v19 }
 0xdb4   :  { %5349 = vmatprep.subr.bf16.mxu1 %v11798_v30  ;;  %5433 = vmatpush1.bf16.msra.mxu0 %v11612_v26 }
 0xdb5   :  { %5434 = vmatprep.subr.bf16.mxu0 %v11615_v14 }
 0xdb7   :  { %5350 = vmatpush1.bf16.msra.mxu1 %v11803_v18 }
 0xdb8   :  { %5351 = vmatprep.subr.bf16.mxu1 %v11806_v48  ;;  %5435 = vmatpush1.bf16.msra.mxu0 %v11620_v44 }
 0xdb9   :  { %5436 = vmatprep.subr.bf16.mxu0 %v11623_v60 }
 0xdbb   :  { %5352 = vmatpush2.bf16.msra.mxu1 %v11811_v16 }
 0xdbc   :  { %5353 = vmatprep.subr.bf16.mxu1 %v11814_v15  ;;  %5437 = vmatpush2.bf16.msra.mxu0 %v11628_v57 }
 0xdbd   :  { %5438 = vmatprep.subr.bf16.mxu0 %v11631_v7 }
 0xdbf   :  { %5354 = vmatpush2.bf16.msra.mxu1 %v11819_v4 }
 0xdc0   :  { %5355 = vmatprep.subr.bf16.mxu1 %v13770_v17  ;;  %5439 = vmatpush2.bf16.msra.mxu0 %v13771_v5 }
 0xdc1   :  { %5440 = vmatprep.subr.bf16.mxu0 %v13772_v43 }
 0xdc3   :  { %5356 = vmatpush2.bf16.msra.mxu1 %v13773_v39  ;;  %v13831_v39 = vld [vmem:[#allocation85_spill] sm:$0xff] }
 0xdc4   :  { %5357 = vmatprep.subr.bf16.mxu1 %v13774_v38  ;;  %5441 = vmatpush2.bf16.msra.mxu0 %v13775_v25  ;;  %v13829_v25 = vld [vmem:[#allocation93_spill] sm:$0xff]  ;;  %v13830_v38 = vld [vmem:[#allocation83_spill] sm:$0xff] }
 0xdc5   :  { %5442 = vmatprep.subr.bf16.mxu0 %v13776_v61 }
 0xdc7   :  { %5358 = vmatpush2.bf16.msra.mxu1 %v13777_v11 }
 0xdc8   :  { %5359 = vmatprep.subr.bf16.mxu1 %v13778_v10  ;;  %5443 = vmatpush2.bf16.msra.mxu0 %v13779_v62  ;;  %v13789_v10 = vld [vmem:[#allocation62_spill] sm:$0xff]  ;;  %v13790_v62 = vld [vmem:[#allocation63_spill] sm:$0xff] }
 0xdc9   :  { %5444 = vmatprep.subr.bf16.mxu0 %v13780_v1  ;;  %v13791_v1 = vld [vmem:[#allocation66_spill] sm:$0xff] }
 0xdcb   :  { %5360 = vmatpush2.bf16.msra.mxu1 %v13781_v46  ;;  %v13792_v46 = vld [vmem:[#allocation69_spill] sm:$0xff] }
 0xdcc   :  { %5361 = vmatprep.subr.bf16.mxu1 %v13782_v42  ;;  %5445 = vmatpush2.bf16.msra.mxu0 %v13783_v33  ;;  %v13793_v42 = vld [vmem:[#allocation67_spill] sm:$0xff] }
 0xdcd   :  { %5446 = vmatprep.subr.bf16.mxu0 %v13784_v40  ;;  %v13794_v33 = vld [vmem:[#allocation55_spill] sm:$0xff]  ;;  %v13795_v40 = vld [vmem:[#allocation65_spill] sm:$0xff] }
 0xdcf   :  { %5362 = vmatpush2.bf16.msra.mxu1 %v13785_v21  ;;  %v13796_v21 = vld [vmem:[#allocation70_spill] sm:$0xff] }
 0xdd0   :  { %5363 = vmatprep.subr.bf16.mxu1 %v13786_v35  ;;  %5447 = vmatpush2.bf16.msra.mxu0 %v13787_v6  ;;  %v13797_v6 = vld [vmem:[#allocation122_spill] sm:$0xff] }
 0xdd1   :  { %5448 = vmatprep.subr.bf16.mxu0 %v13788_v37  ;;  %v13798_v37 = vld [vmem:[#allocation123_spill] sm:$0xff] }
 0xdd3   :  { %5364 = vmatpush2.bf16.msra.mxu1 %v13789_v10  ;;  %v13799_v10 = vld [vmem:[#allocation124_spill] sm:$0xff] }
 0xdd4   :  { %5365 = vmatprep.subr.bf16.mxu1 %v13790_v62  ;;  %5449 = vmatpush2.bf16.msra.mxu0 %v13791_v1  ;;  %v13800_v62 = vld [vmem:[#allocation125_spill] sm:$0xff]  ;;  %v13801_v1 = vld [vmem:[#allocation126_spill] sm:$0xff] }
 0xdd5   :  { %5450 = vmatprep.subr.bf16.mxu0 %v13792_v46  ;;  %v13802_v46 = vld [vmem:[#allocation127_spill] sm:$0xff] }
 0xdd7   :  { %5366 = vmatpush2.bf16.msra.mxu1 %v13793_v42  ;;  %v13803_v42 = vld [vmem:[#allocation128_spill] sm:$0xff] }
 0xdd8   :  { %5461 = vmatprep.subr.bf16.mxu1 %v13794_v33  ;;  %5451 = vmatpush2.bf16.msra.mxu0 %v13795_v40  ;;  %v13804_v33 = vld [vmem:[#allocation129_spill] sm:$0xff]  ;;  %v13805_v40 = vld [vmem:[#allocation130_spill] sm:$0xff] }
 0xdd9   :  { %5502 = vmatprep.subr.bf16.mxu0 %v13796_v21  ;;  %v13806_v21 = vld [vmem:[#allocation131_spill] sm:$0xff] }
 0xdda   :  { %5368 = vmatmul.mubr.bf16.vlgmr.msra.gmra.mxu1 %v11996_v50  ;;  %v13807_v50 = vld [vmem:[#allocation132_spill] sm:$0xff] }
 0xddb   :  { %5462 = vmatpush1.bf16.msra.mxu1 %v13797_v6  ;;  %v13808_v6 = vld [vmem:[#allocation133_spill] sm:$0xff] }
 0xddc   :  { %5463 = vmatprep.subr.bf16.mxu1 %v13798_v37  ;;  %v13809_v37 = vld [vmem:[#allocation134_spill] sm:$0xff] }
 0xddf   :  { %5464 = vmatpush1.bf16.msra.mxu1 %v13799_v10  ;;  %v13810_v10 = vld [vmem:[#allocation56_spill] sm:$0xff] }
 0xde0   :  { %5465 = vmatprep.subr.bf16.mxu1 %v13800_v62  ;;  %v13811_v62 = vld [vmem:[#allocation38_spill] sm:$0xff] }
 0xde3   :  { %5466 = vmatpush1.bf16.msra.mxu1 %v13801_v1  ;;  %v13812_v1 = vld [vmem:[#allocation57_spill] sm:$0xff] }
 0xde4   :  { %5467 = vmatprep.subr.bf16.mxu1 %v13802_v46  ;;  %v13813_v46 = vld [vmem:[#allocation42_spill] sm:$0xff] }
 0xde7   :  { %5468 = vmatpush1.bf16.msra.mxu1 %v13803_v42  ;;  %v13814_v42 = vld [vmem:[#allocation59_spill] sm:$0xff] }
 0xde8   :  { %5469 = vmatprep.subr.bf16.mxu1 %v13804_v33  ;;  %v13815_v33 = vld [vmem:[#allocation48_spill] sm:$0xff] }
 0xdeb   :  { %5470 = vmatpush1.bf16.msra.mxu1 %v13805_v40  ;;  %v13816_v40 = vld [vmem:[#allocation108_spill] sm:$0xff] }
 0xdec   :  { %5471 = vmatprep.subr.bf16.mxu1 %v13806_v21  ;;  %v13817_v21 = vld [vmem:[#allocation110_spill] sm:$0xff] }
 0xdef   :  { %5472 = vmatpush1.bf16.msra.mxu1 %v13807_v50  ;;  %v13818_v50 = vld [vmem:[#allocation112_spill] sm:$0xff] }
 0xdf0   :  { %5473 = vmatprep.subr.bf16.mxu1 %v13808_v6  ;;  %v13819_v6 = vld [vmem:[#allocation40_spill] sm:$0xff] }
 0xdf3   :  { %5474 = vmatpush1.bf16.msra.mxu1 %v13809_v37  ;;  %v13820_v37 = vld [vmem:[#allocation58_spill] sm:$0xff] }
 0xdf4   :  { %5475 = vmatprep.subr.bf16.mxu1 %v13810_v10  ;;  %v13821_v10 = vld [vmem:[#allocation44_spill] sm:$0xff] }
 0xdf7   :  { %5476 = vmatpush1.bf16.msra.mxu1 %v13811_v62  ;;  %v13822_v62 = vld [vmem:[#allocation46_spill] sm:$0xff] }
 0xdf8   :  { %5477 = vmatprep.subr.bf16.mxu1 %v13812_v1  ;;  %v13823_v1 = vld [vmem:[#allocation107_spill] sm:$0xff] }
 0xdfb   :  { %5478 = vmatpush2.bf16.msra.mxu1 %v13813_v46  ;;  %v13824_v46 = vld [vmem:[#allocation109_spill] sm:$0xff] }
 0xdfc   :  { %5479 = vmatprep.subr.bf16.mxu1 %v13814_v42  ;;  %v13825_v42 = vld [vmem:[#allocation111_spill] sm:$0xff] }
 0xdff   :  { %5480 = vmatpush2.bf16.msra.mxu1 %v13815_v33  ;;  %v13826_v33 = vld [vmem:[#allocation113_spill] sm:$0xff] }
 0xe00   :  { %5481 = vmatprep.subr.bf16.mxu1 %v13816_v40  ;;  %v13827_v40 = vld [vmem:[#allocation114_spill] sm:$0xff] }
 0xe03   :  { %5482 = vmatpush2.bf16.msra.mxu1 %v13817_v21  ;;  %v13828_v21 = vld [vmem:[#allocation45_spill] sm:$0xff] }
 0xe04   :  { %5483 = vmatprep.subr.bf16.mxu1 %v13818_v50 }
 0xe07   :  { %5484 = vmatpush2.bf16.msra.mxu1 %v13819_v6 }
 0xe08   :  { %5485 = vmatprep.subr.bf16.mxu1 %v13820_v37 }
 0xe0b   :  { %5486 = vmatpush2.bf16.msra.mxu1 %v13821_v10 }
 0xe0c   :  { %5487 = vmatprep.subr.bf16.mxu1 %v13822_v62 }
 0xe0f   :  { %5488 = vmatpush2.bf16.msra.mxu1 %v13823_v1 }
 0xe10   :  { %5489 = vmatprep.subr.bf16.mxu1 %v13824_v46 }
 0xe13   :  { %5490 = vmatpush2.bf16.msra.mxu1 %v13825_v42 }
 0xe14   :  { %5491 = vmatprep.subr.bf16.mxu1 %v13826_v33 }
 0xe17   :  { %5492 = vmatpush2.bf16.msra.mxu1 %v13827_v40 }
 0xe18   :  { %5587 = vmatprep.subr.bf16.mxu1 %v13828_v21 }
 0xe5a   :  { %v5287_v50 = vpop.f32.mrf.mxu1  ;;  %v5328_v6 = vpop.f32.mrf.mxu0 }
 0xe5b   :  { %v5288_v1 = vadd.f32 %v5287_v50, %v13829_v25  ;;  %v5329_v21 = vadd.f32 %v5328_v6, %v11527_v51 }
 0xe5c   :  { %v5289_v35 = vpop.f32.mrf.mxu1  ;;  %v5330_v37 = vpop.f32.mrf.mxu0 }
 0xe5d   :  { %v5290_v46 = vadd.f32 %v5289_v35, %v11517_v59  ;;  %v5376_v42 = vadd.f32 %v5288_v1, %v13830_v38  ;;  %v5331_v5 = vadd.f32 %v5330_v37, %v11530_v36 }
 0xe5e   :  { %v5291_v11 = vpop.f32.mrf.mxu1  ;;  %v5332_v10 = vpop.f32.mrf.mxu0 }
 0xe5f   :  { %v5377_v33 = vadd.f32 %v5290_v46, %v13831_v39  ;;  %v7236_v43 = vmul.f32 -1.442695, %v5376_v42  ;;  %v13832_v11 = vld [vmem:[#allocation84_spill] sm:$0xff] }
 0xe60   :  { %v5292_v61 = vpop.f32.mrf.mxu1  ;;  %v5333_v62 = vpop.f32.mrf.mxu0  ;;  %v5378_v10 = vadd.f32 %v5329_v21, %v13832_v11 }
 0xe61   :  { %v7237_v40 = vmul.f32 -1.442695, %v5377_v33  ;;  %8210 = vpow2.f32 %v7236_v43  ;;  %v13833_v61 = vld [vmem:[#allocation135_spill] sm:$0xff] }
 0xe62   :  { %v5379_v62 = vadd.f32 %v5331_v5, %v13833_v61  ;;  %v7238_v17 = vmul.f32 -1.442695, %v5378_v10 }
 0xe63   :  { %8212 = vpow2.f32 %v7237_v40 }
 0xe64   :  { %v7239_v50 = vmul.f32 -1.442695, %v5379_v62  ;;  %8214 = vpow2.f32 %v7238_v17 }
 0xe66   :  { %8216 = vpow2.f32 %v7239_v50  ;;  %v13835_v50 = vld [vmem:[#allocation50_spill] sm:$0xff] }
 0xe6e   :  { %v8211_v25 = vpop.eup %8210 }
 0xe6f   :  { %v5392_v38 = vadd.f32 1.0, %v8211_v25  ;;  %v13834_v25 = vld [vmem:[#allocation75_spill] sm:$0xff] }
 0xe70   :  { %v8213_v35 = vpop.eup %8212 }
 0xe71   :  { %v5393_v39 = vadd.f32 1.0, %v8213_v35  ;;  %8218 = vrcp.f32 %v5392_v38  ;;  %v8215_v43 = vpop.eup %8214 }
 0xe72   :  { %v5394_v6 = vadd.f32 1.0, %v8215_v43 }
 0xe73   :  { %8220 = vrcp.f32 %v5393_v39  ;;  %v8217_v1 = vpop.eup %8216 }
 0xe74   :  { %v5395_v42 = vadd.f32 1.0, %v8217_v1  ;;  %8222 = vrcp.f32 %v5394_v6 }
 0xe76   :  { %8224 = vrcp.f32 %v5395_v42 }
 0xe7e   :  { %v8219_v33 = vpop.eup %8218 }
 0xe80   :  { %v8221_v17 = vpop.eup %8220 }
 0xe81   :  { %v8223_v38 = vpop.eup %8222 }
 0xe82   :  { %v5410_v43 = vsub.f32 1.0, %v8223_v38 }
 0xe83   :  { %v8225_v39 = vpop.eup %8224 }
 0xe84   :  { %v5415_v42 = vmul.f32 %v8225_v39, %v11990_v12  ;;  %v13884_v12 = vld [vmem:[#allocation112_spill] sm:$0xff] }
 0xe9a   :  { %v5369_v46 = vpop.f32.mrf.mxu1 }
 0xe9b   :  { %v5370_v37 = vadd.f32 %v5369_v46, %v11537_v41  ;;  %v5411_v46 = vsub.f32 1.0, %v8225_v39  ;;  %v13861_v39 = vld [vmem:[#allocation65_spill] sm:$0xff] }
 0xe9c   :  { %v5371_v40 = vpop.f32.mrf.mxu1 }
 0xe9d   :  { %v5404_v5 = vmul.f32 %v8219_v33, %v5370_v37  ;;  %v5372_v21 = vadd.f32 %v5371_v40, %v11540_v2  ;;  %v5414_v37 = vmul.f32 %v8223_v38, %v11988_v9  ;;  %v13860_v38 = vld [vmem:[#allocation55_spill] sm:$0xff]  ;;  %v13885_v9 = vld [vmem:[#allocation40_spill] sm:$0xff] }
 0xe9e   :  { %v5373_v11 = vpop.f32.mrf.mxu1 }
 0xe9f   :  { %v5406_v10 = vadd.f32 %v5404_v5, %v13834_v25  ;;  %v5405_v61 = vmul.f32 %v8221_v17, %v5372_v21  ;;  %v13854_v25 = vld [vmem:[#allocation68_spill] sm:$0xff] }
 0xea0   :  { %v5374_v62 = vpop.f32.mrf.mxu1 }
 0xea1   :  { %8226 = vtanh.f32 %v5406_v10  ;;  %v5407_v35 = vadd.f32 %v5405_v61, %v13835_v50  ;;  %v13855_v10 = vld [vmem:[#allocation62_spill] sm:$0xff]  ;;  %v13856_v61 = vld [vmem:[#allocation63_spill] sm:$0xff]  ;;  %v13858_v50 = vld [vmem:[#allocation69_spill] sm:$0xff] }
 0xea2   :  { %v13857_v62 = vld [vmem:[#allocation66_spill] sm:$0xff] }
 0xea3   :  { %8228 = vtanh.f32 %v5407_v35  ;;  %v13859_v35 = vld [vmem:[#allocation67_spill] sm:$0xff] }
 0xeae   :  { %v8227_v1 = vpop.eup %8226 }
 0xeaf   :  { %v5412_v6 = vmul.f32 %v8227_v1, %v5410_v43  ;;  %v13862_v43 = vld [vmem:[#allocation70_spill] sm:$0xff] }
 0xeb0   :  { %v8229_v33 = vpop.eup %8228  ;;  %v13863_v1 = vld [vmem:[#allocation122_spill] sm:$0xff] }
 0xeb1   :  { %v5413_v40 = vmul.f32 %v8229_v33, %v5411_v46  ;;  %v12111_v11 = vadd.f32 %v5414_v37, %v5412_v6  ;;  %v13864_v46 = vld [vmem:[#allocation123_spill] sm:$0xff]  ;;  %v13865_v6 = vld [vmem:[#allocation124_spill] sm:$0xff]  ;;  %v13866_v37 = vld [vmem:[#allocation125_spill] sm:$0xff] }
 0xeb2   :  { %v13867_v33 = vld [vmem:[#allocation126_spill] sm:$0xff] }
 0xeb3   :  { %v12113_v5 = vadd.f32 %v5415_v42, %v5413_v40  ;;  %v12119_v17 = vpack.c.bf16 %v12111_v11, %v12111_v11  ;;  %v13868_v40 = vld [vmem:[#allocation127_spill] sm:$0xff]  ;;  %v13869_v42 = vld [vmem:[#allocation128_spill] sm:$0xff] }
 0xeb5   :  { %v5419_v21 = vpack.c.bf16 %v12113_v5, %v12113_v5 }
 0xeb7   :  { %5452 = vmatprep.mubr.bf16.mxu0 %v5419_v21  ;;  %5493 = vmatprep.mubr.bf16.mxu1 %v5419_v21 }
 0xeb8   :  { %5453 = vmatmul.mubr.bf16.vlgmr.msra.gmra.mxu0 %v12119_v17  ;;  %5494 = vmatmul.mubr.bf16.vlgmr.msra.gmra.mxu1 %v12119_v17 }
 0xeb9   :  { %5503 = vmatpush1.bf16.msra.mxu0 %v11747_v22  ;;  %5534 = vmatprep.mubr.bf16.mxu0 %v5419_v21  ;;  %v13870_v21 = vld [vmem:[#allocation129_spill] sm:$0xff] }
 0xeba   :  { %5504 = vmatprep.subr.bf16.mxu0 %v11750_v31  ;;  %5588 = vmatpush1.bf16.msra.mxu1 %v11564_v34  ;;  %v13836_v34 = vld [vmem:[#allocation105_spill] sm:$0xff] }
 0xebb   :  { %5589 = vmatprep.subr.bf16.mxu1 %v11567_v20  ;;  %v13837_v20 = vld [vmem:[#allocation97_spill] sm:$0xff] }
 0xebd   :  { %5505 = vmatpush1.bf16.msra.mxu0 %v11755_v13 }
 0xebe   :  { %5506 = vmatprep.subr.bf16.mxu0 %v11758_v3  ;;  %5590 = vmatpush1.bf16.msra.mxu1 %v11572_v58  ;;  %v13838_v58 = vld [vmem:[#allocation98_spill] sm:$0xff] }
 0xebf   :  { %5591 = vmatprep.subr.bf16.mxu1 %v11575_v54  ;;  %v13839_v54 = vld [vmem:[#allocation78_spill] sm:$0xff] }
 0xec1   :  { %5507 = vmatpush1.bf16.msra.mxu0 %v11763_v29 }
 0xec2   :  { %5508 = vmatprep.subr.bf16.mxu0 %v11766_v55  ;;  %5592 = vmatpush1.bf16.msra.mxu1 %v11580_v8  ;;  %v13840_v8 = vld [vmem:[#allocation79_spill] sm:$0xff] }
 0xec3   :  { %5593 = vmatprep.subr.bf16.mxu1 %v11583_v63  ;;  %v13841_v63 = vld [vmem:[#allocation100_spill] sm:$0xff] }
 0xec5   :  { %5509 = vmatpush1.bf16.msra.mxu0 %v11771_v23 }
 0xec6   :  { %5510 = vmatprep.subr.bf16.mxu0 %v11774_v49  ;;  %5594 = vmatpush1.bf16.msra.mxu1 %v11588_v56  ;;  %v13842_v56 = vld [vmem:[#allocation99_spill] sm:$0xff] }
 0xec7   :  { %5595 = vmatprep.subr.bf16.mxu1 %v11591_v27  ;;  %v13843_v27 = vld [vmem:[#allocation53_spill] sm:$0xff] }
 0xec9   :  { %5511 = vmatpush1.bf16.msra.mxu0 %v11779_v0 }
 0xeca   :  { %5512 = vmatprep.subr.bf16.mxu0 %v11782_v47  ;;  %5596 = vmatpush1.bf16.msra.mxu1 %v11596_v53  ;;  %v13844_v53 = vld [vmem:[#allocation52_spill] sm:$0xff] }
 0xecb   :  { %5597 = vmatprep.subr.bf16.mxu1 %v11599_v45  ;;  %v13845_v45 = vld [vmem:[#allocation101_spill] sm:$0xff] }
 0xecd   :  { %5513 = vmatpush1.bf16.msra.mxu0 %v11787_v28 }
 0xece   :  { %5514 = vmatprep.subr.bf16.mxu0 %v11790_v24  ;;  %5598 = vmatpush1.bf16.msra.mxu1 %v11604_v52  ;;  %v13846_v52 = vld [vmem:[#allocation102_spill] sm:$0xff] }
 0xecf   :  { %5599 = vmatprep.subr.bf16.mxu1 %v11607_v32  ;;  %v13847_v32 = vld [vmem:[#allocation39_spill] sm:$0xff] }
 0xed1   :  { %5515 = vmatpush1.bf16.msra.mxu0 %v11795_v19 }
 0xed2   :  { %5516 = vmatprep.subr.bf16.mxu0 %v11798_v30  ;;  %5600 = vmatpush1.bf16.msra.mxu1 %v11612_v26  ;;  %v13848_v26 = vld [vmem:[#allocation54_spill] sm:$0xff] }
 0xed3   :  { %5601 = vmatprep.subr.bf16.mxu1 %v11615_v14  ;;  %v13849_v14 = vld [vmem:[#allocation36_spill] sm:$0xff] }
 0xed5   :  { %5517 = vmatpush1.bf16.msra.mxu0 %v11803_v18 }
 0xed6   :  { %5518 = vmatprep.subr.bf16.mxu0 %v11806_v48  ;;  %5602 = vmatpush1.bf16.msra.mxu1 %v11620_v44  ;;  %v13850_v44 = vld [vmem:[#allocation71_spill] sm:$0xff] }
 0xed7   :  { %5603 = vmatprep.subr.bf16.mxu1 %v11623_v60  ;;  %v13851_v60 = vld [vmem:[#allocation64_spill] sm:$0xff] }
 0xed9   :  { %5519 = vmatpush2.bf16.msra.mxu0 %v11811_v16 }
 0xeda   :  { %5520 = vmatprep.subr.bf16.mxu0 %v11814_v15  ;;  %5604 = vmatpush2.bf16.msra.mxu1 %v11628_v57  ;;  %v13852_v57 = vld [vmem:[#allocation61_spill] sm:$0xff] }
 0xedb   :  { %5605 = vmatprep.subr.bf16.mxu1 %v11631_v7  ;;  %v13853_v7 = vld [vmem:[#allocation103_spill] sm:$0xff] }
 0xedd   :  { %5521 = vmatpush2.bf16.msra.mxu0 %v11819_v4 }
 0xede   :  { %5522 = vmatprep.subr.bf16.mxu0 %v13836_v34  ;;  %5606 = vmatpush2.bf16.msra.mxu1 %v13837_v20  ;;  %v13871_v20 = vld [vmem:[#allocation130_spill] sm:$0xff] }
 0xedf   :  { %5607 = vmatprep.subr.bf16.mxu1 %v13838_v58  ;;  %v13872_v58 = vld [vmem:[#allocation131_spill] sm:$0xff] }
 0xee1   :  { %5523 = vmatpush2.bf16.msra.mxu0 %v13839_v54 }
 0xee2   :  { %5524 = vmatprep.subr.bf16.mxu0 %v13840_v8  ;;  %5608 = vmatpush2.bf16.msra.mxu1 %v13841_v63  ;;  %v13874_v63 = vld [vmem:[#allocation133_spill] sm:$0xff] }
 0xee3   :  { %5609 = vmatprep.subr.bf16.mxu1 %v13842_v56  ;;  %v13875_v56 = vld [vmem:[#allocation134_spill] sm:$0xff] }
 0xee5   :  { %5525 = vmatpush2.bf16.msra.mxu0 %v13843_v27 }
 0xee6   :  { %5526 = vmatprep.subr.bf16.mxu0 %v13844_v53  ;;  %5610 = vmatpush2.bf16.msra.mxu1 %v13845_v45  ;;  %v13876_v45 = vld [vmem:[#allocation56_spill] sm:$0xff] }
 0xee7   :  { %5611 = vmatprep.subr.bf16.mxu1 %v13846_v52  ;;  %v13877_v52 = vld [vmem:[#allocation38_spill] sm:$0xff] }
 0xee9   :  { %5527 = vmatpush2.bf16.msra.mxu0 %v13847_v32 }
 0xeea   :  { %5528 = vmatprep.subr.bf16.mxu0 %v13848_v26  ;;  %5612 = vmatpush2.bf16.msra.mxu1 %v13849_v14  ;;  %v13878_v14 = vld [vmem:[#allocation57_spill] sm:$0xff] }
 0xeeb   :  { %5613 = vmatprep.subr.bf16.mxu1 %v13850_v44  ;;  %v13879_v44 = vld [vmem:[#allocation42_spill] sm:$0xff] }
 0xeed   :  { %5529 = vmatpush2.bf16.msra.mxu0 %v13851_v60 }
 0xeee   :  { %5530 = vmatprep.subr.bf16.mxu0 %v13852_v57  ;;  %5614 = vmatpush2.bf16.msra.mxu1 %v13853_v7  ;;  %v13880_v7 = vld [vmem:[#allocation59_spill] sm:$0xff] }
 0xeef   :  { %5615 = vmatprep.subr.bf16.mxu1 %v13854_v25  ;;  %v13881_v25 = vld [vmem:[#allocation48_spill] sm:$0xff] }
 0xef1   :  { %5531 = vmatpush2.bf16.msra.mxu0 %v13855_v10 }
 0xef2   :  { %5532 = vmatprep.subr.bf16.mxu0 %v13856_v61  ;;  %5616 = vmatpush2.bf16.msra.mxu1 %v13857_v62  ;;  %v13882_v62 = vld [vmem:[#allocation108_spill] sm:$0xff] }
 0xef3   :  { %5617 = vmatprep.subr.bf16.mxu1 %v13858_v50  ;;  %v13883_v50 = vld [vmem:[#allocation110_spill] sm:$0xff] }
 0xef5   :  { %5533 = vmatpush2.bf16.msra.mxu0 %v13859_v35 }
 0xef6   :  { %5628 = vmatprep.subr.bf16.mxu0 %v13860_v38  ;;  %5618 = vmatpush2.bf16.msra.mxu1 %v13861_v39 }
 0xef7   :  { %5669 = vmatprep.subr.bf16.mxu1 %v13862_v43 }
 0xef8   :  { %5535 = vmatmul.mubr.bf16.vlgmr.msra.gmra.mxu0 %v12119_v17  ;;  %v13873_v17 = vld [vmem:[#allocation132_spill] sm:$0xff] }
 0xef9   :  { %5629 = vmatpush1.bf16.msra.mxu0 %v13863_v1 }
 0xefa   :  { %5630 = vmatprep.subr.bf16.mxu0 %v13864_v46 }
 0xefd   :  { %5631 = vmatpush1.bf16.msra.mxu0 %v13865_v6 }
 0xefe   :  { %5632 = vmatprep.subr.bf16.mxu0 %v13866_v37 }
 0xf01   :  { %5633 = vmatpush1.bf16.msra.mxu0 %v13867_v33 }
 0xf02   :  { %5634 = vmatprep.subr.bf16.mxu0 %v13868_v40 }
 0xf05   :  { %5635 = vmatpush1.bf16.msra.mxu0 %v13869_v42  ;;  %v13897_v42 = vld [vmem:[#allocation138_spill] sm:$0xff] }
 0xf06   :  { %5636 = vmatprep.subr.bf16.mxu0 %v13870_v21  ;;  %v13896_v21 = vld [vmem:[#allocation136_spill] sm:$0xff] }
 0xf09   :  { %5637 = vmatpush1.bf16.msra.mxu0 %v13871_v20  ;;  %v13895_v20 = vld [vmem:[#allocation93_spill] sm:$0xff] }
 0xf0a   :  { %5638 = vmatprep.subr.bf16.mxu0 %v13872_v58 }
 0xf0d   :  { %5639 = vmatpush1.bf16.msra.mxu0 %v13873_v17 }
 0xf0e   :  { %5640 = vmatprep.subr.bf16.mxu0 %v13874_v63 }
 0xf11   :  { %5641 = vmatpush1.bf16.msra.mxu0 %v13875_v56  ;;  %v13886_v56 = vld [vmem:[#allocation58_spill] sm:$0xff] }
 0xf12   :  { %5642 = vmatprep.subr.bf16.mxu0 %v13876_v45  ;;  %v13887_v45 = vld [vmem:[#allocation44_spill] sm:$0xff] }
 0xf15   :  { %5643 = vmatpush1.bf16.msra.mxu0 %v13877_v52  ;;  %v13888_v52 = vld [vmem:[#allocation46_spill] sm:$0xff] }
 0xf16   :  { %5644 = vmatprep.subr.bf16.mxu0 %v13878_v14  ;;  %v13889_v14 = vld [vmem:[#allocation107_spill] sm:$0xff] }
 0xf19   :  { %5645 = vmatpush2.bf16.msra.mxu0 %v13879_v44  ;;  %v13890_v44 = vld [vmem:[#allocation109_spill] sm:$0xff] }
 0xf1a   :  { %5646 = vmatprep.subr.bf16.mxu0 %v13880_v7  ;;  %v13891_v7 = vld [vmem:[#allocation111_spill] sm:$0xff] }
 0xf1d   :  { %5647 = vmatpush2.bf16.msra.mxu0 %v13881_v25  ;;  %v13892_v25 = vld [vmem:[#allocation113_spill] sm:$0xff] }
 0xf1e   :  { %5648 = vmatprep.subr.bf16.mxu0 %v13882_v62  ;;  %v13893_v62 = vld [vmem:[#allocation114_spill] sm:$0xff] }
 0xf21   :  { %5649 = vmatpush2.bf16.msra.mxu0 %v13883_v50  ;;  %v13894_v50 = vld [vmem:[#allocation45_spill] sm:$0xff] }
 0xf22   :  { %5650 = vmatprep.subr.bf16.mxu0 %v13884_v12 }
 0xf25   :  { %5651 = vmatpush2.bf16.msra.mxu0 %v13885_v9 }
 0xf26   :  { %5652 = vmatprep.subr.bf16.mxu0 %v13886_v56 }
 0xf29   :  { %5653 = vmatpush2.bf16.msra.mxu0 %v13887_v45 }
 0xf2a   :  { %5654 = vmatprep.subr.bf16.mxu0 %v13888_v52 }
 0xf2d   :  { %5655 = vmatpush2.bf16.msra.mxu0 %v13889_v14 }
 0xf2e   :  { %5656 = vmatprep.subr.bf16.mxu0 %v13890_v44 }
 0xf31   :  { %5657 = vmatpush2.bf16.msra.mxu0 %v13891_v7 }
 0xf32   :  { %5658 = vmatprep.subr.bf16.mxu0 %v13892_v25 }
 0xf35   :  { %5659 = vmatpush2.bf16.msra.mxu0 %v13893_v62 }
 0xf36   :  { %5754 = vmatprep.subr.bf16.mxu0 %v13894_v50 }
 0xf78   :  { %v5454_v12 = vpop.f32.mrf.mxu0  ;;  %v5495_v9 = vpop.f32.mrf.mxu1 }
 0xf79   :  { %v5455_v14 = vadd.f32 %v5454_v12, %v13895_v20  ;;  %v5496_v50 = vadd.f32 %v5495_v9, %v11527_v51 }
 0xf7a   :  { %v5456_v63 = vpop.f32.mrf.mxu0  ;;  %v5497_v56 = vpop.f32.mrf.mxu1 }
 0xf7b   :  { %v5457_v44 = vadd.f32 %v5456_v63, %v11517_v59  ;;  %v5543_v7 = vadd.f32 %v5455_v14, %v13896_v21  ;;  %v5498_v33 = vadd.f32 %v5497_v56, %v11530_v36 }
 0xf7c   :  { %v5458_v17 = vpop.f32.mrf.mxu0  ;;  %v5499_v45 = vpop.f32.mrf.mxu1 }
 0xf7d   :  { %v5544_v25 = vadd.f32 %v5457_v44, %v13897_v42  ;;  %v7240_v40 = vmul.f32 -1.442695, %v5543_v7  ;;  %v13898_v17 = vld [vmem:[#allocation137_spill] sm:$0xff] }
 0xf7e   :  { %v5459_v58 = vpop.f32.mrf.mxu0  ;;  %v5500_v52 = vpop.f32.mrf.mxu1  ;;  %v5545_v45 = vadd.f32 %v5496_v50, %v13898_v17 }
 0xf7f   :  { %v7241_v62 = vmul.f32 -1.442695, %v5544_v25  ;;  %8230 = vpow2.f32 %v7240_v40  ;;  %v13899_v58 = vld [vmem:[#allocation139_spill] sm:$0xff] }
 0xf80   :  { %v5546_v52 = vadd.f32 %v5498_v33, %v13899_v58  ;;  %v7242_v37 = vmul.f32 -1.442695, %v5545_v45 }
 0xf81   :  { %8232 = vpow2.f32 %v7241_v62 }
 0xf82   :  { %v7243_v12 = vmul.f32 -1.442695, %v5546_v52  ;;  %8234 = vpow2.f32 %v7242_v37 }
 0xf84   :  { %8236 = vpow2.f32 %v7243_v12  ;;  %v13901_v12 = vld [vmem:[#allocation51_spill] sm:$0xff] }
 0xf8c   :  { %v8231_v20 = vpop.eup %8230 }
 0xf8d   :  { %v5559_v21 = vadd.f32 1.0, %v8231_v20  ;;  %v13900_v20 = vld [vmem:[#allocation47_spill] sm:$0xff] }
 0xf8e   :  { %v8233_v63 = vpop.eup %8232 }
 0xf8f   :  { %v5560_v42 = vadd.f32 1.0, %v8233_v63  ;;  %8238 = vrcp.f32 %v5559_v21  ;;  %v8235_v40 = vpop.eup %8234 }
 0xf90   :  { %v5561_v9 = vadd.f32 1.0, %v8235_v40 }
 0xf91   :  { %8240 = vrcp.f32 %v5560_v42  ;;  %v8237_v14 = vpop.eup %8236 }
 0xf92   :  { %v5562_v7 = vadd.f32 1.0, %v8237_v14  ;;  %8242 = vrcp.f32 %v5561_v9 }
 0xf94   :  { %8244 = vrcp.f32 %v5562_v7 }
 0xf9c   :  { %v8239_v25 = vpop.eup %8238 }
 0xf9e   :  { %v8241_v37 = vpop.eup %8240 }
 0xf9f   :  { %v8243_v21 = vpop.eup %8242 }
 0xfa0   :  { %v5577_v40 = vsub.f32 1.0, %v8243_v21 }
 0xfa1   :  { %v8245_v42 = vpop.eup %8244 }
 0xfa2   :  { %v5582_v7 = vmul.f32 %v8245_v42, %v12113_v5 }
 0xfb8   :  { %v5536_v44 = vpop.f32.mrf.mxu0 }
 0xfb9   :  { %v5537_v56 = vadd.f32 %v5536_v44, %v11537_v41  ;;  %v5578_v44 = vsub.f32 1.0, %v8245_v42  ;;  %v13916_v42 = vld [vmem:[#allocation59_spill] sm:$0xff] }
 0xfba   :  { %v5538_v62 = vpop.f32.mrf.mxu0 }
 0xfbb   :  { %v5571_v33 = vmul.f32 %v8239_v25, %v5537_v56  ;;  %v5539_v50 = vadd.f32 %v5538_v62, %v11540_v2  ;;  %v5581_v56 = vmul.f32 %v8243_v21, %v12111_v11  ;;  %v13915_v21 = vld [vmem:[#allocation42_spill] sm:$0xff] }
 0xfbc   :  { %v5540_v17 = vpop.f32.mrf.mxu0 }
 0xfbd   :  { %v5573_v45 = vadd.f32 %v5571_v33, %v13900_v20  ;;  %v5572_v58 = vmul.f32 %v8241_v37, %v5539_v50  ;;  %v12248_v20 = vld [vmem:[#allocation3 + $0x150] ss:$24 sps:$4 sm:$0xff]  }
 0xfbe   :  { %v5541_v52 = vpop.f32.mrf.mxu0 }
 0xfbf   :  { %8246 = vtanh.f32 %v5573_v45  ;;  %v5574_v63 = vadd.f32 %v5572_v58, %v13901_v12  ;;  %v12251_v45 = vld [vmem:[#allocation3 + $0x124] ss:$24 sps:$4 sm:$0xff]   ;;  %v12256_v58 = vld [vmem:[#allocation3 + $0x120] ss:$24 sps:$4 sm:$0xff]   ;;  %v13913_v12 = vld [vmem:[#allocation38_spill] sm:$0xff] }
 0xfc0   :  { %v12267_v52 = vld [vmem:[#allocation3 + $0xc4] ss:$24 sps:$4 sm:$0xff]  }
 0xfc1   :  { %8248 = vtanh.f32 %v5574_v63  ;;  %v13914_v63 = vld [vmem:[#allocation57_spill] sm:$0xff] }
 0xfcc   :  { %v8247_v14 = vpop.eup %8246 }
 0xfcd   :  { %v5579_v9 = vmul.f32 %v8247_v14, %v5577_v40  ;;  %v13917_v40 = vld [vmem:[#allocation48_spill] sm:$0xff] }
 0xfce   :  { %v8249_v25 = vpop.eup %8248  ;;  %v13918_v14 = vld [vmem:[#allocation108_spill] sm:$0xff] }
 0xfcf   :  { %v5580_v62 = vmul.f32 %v8249_v25, %v5578_v44  ;;  %v12234_v17 = vadd.f32 %v5581_v56, %v5579_v9  ;;  %v13919_v44 = vld [vmem:[#allocation110_spill] sm:$0xff]  ;;  %v13920_v9 = vld [vmem:[#allocation112_spill] sm:$0xff] }
 0xfd0   :  { %v13921_v56 = vld [vmem:[#allocation40_spill] sm:$0xff]  ;;  %v13922_v25 = vld [vmem:[#allocation58_spill] sm:$0xff] }
 0xfd1   :  { %v12236_v33 = vadd.f32 %v5582_v7, %v5580_v62  ;;  %v12242_v37 = vpack.c.bf16 %v12234_v17, %v12234_v17  ;;  %v13923_v62 = vld [vmem:[#allocation44_spill] sm:$0xff]  ;;  %v13924_v7 = vld [vmem:[#allocation46_spill] sm:$0xff] }
 0xfd3   :  { %v5586_v50 = vpack.c.bf16 %v12236_v33, %v12236_v33 }
 0xfd5   :  { %5619 = vmatprep.mubr.bf16.mxu1 %v5586_v50  ;;  %5660 = vmatprep.mubr.bf16.mxu0 %v5586_v50 }
 0xfd6   :  { %5620 = vmatmul.mubr.bf16.vlgmr.msra.gmra.mxu1 %v12242_v37  ;;  %5661 = vmatmul.mubr.bf16.vlgmr.msra.gmra.mxu0 %v12242_v37 }
 0xfd7   :  { %5670 = vmatpush1.bf16.msra.mxu1 %v11747_v22  ;;  %5701 = vmatprep.mubr.bf16.mxu1 %v5586_v50  ;;  %v12259_v22 = vld [vmem:[#allocation3 + $0xf4] ss:$24 sps:$4 sm:$0xff]   ;;  %v13925_v50 = vld [vmem:[#allocation107_spill] sm:$0xff] }
 0xfd8   :  { %5671 = vmatprep.subr.bf16.mxu1 %v11750_v31  ;;  %5755 = vmatpush1.bf16.msra.mxu0 %v12248_v20  ;;  %v12264_v31 = vld [vmem:[#allocation3 + $0xf0] ss:$24 sps:$4 sm:$0xff]  }
 0xfd9   :  { %5756 = vmatprep.subr.bf16.mxu0 %v12251_v45 }
 0xfdb   :  { %5672 = vmatpush1.bf16.msra.mxu1 %v11755_v13  ;;  %v12272_v13 = vld [vmem:[#allocation3 + $0xc0] ss:$24 sps:$4 sm:$0xff]  }
 0xfdc   :  { %5673 = vmatprep.subr.bf16.mxu1 %v11758_v3  ;;  %5757 = vmatpush1.bf16.msra.mxu0 %v12256_v58  ;;  %v12275_v3 = vld [vmem:[#allocation3 + $0x94] ss:$24 sps:$4 sm:$0xff]  }
 0xfdd   :  { %5758 = vmatprep.subr.bf16.mxu0 %v12259_v22 }
 0xfdf   :  { %5674 = vmatpush1.bf16.msra.mxu1 %v11763_v29  ;;  %v12280_v29 = vld [vmem:[#allocation3 + $0x90] ss:$24 sps:$4 sm:$0xff]  }
 0xfe0   :  { %5675 = vmatprep.subr.bf16.mxu1 %v11766_v55  ;;  %5759 = vmatpush1.bf16.msra.mxu0 %v12264_v31  ;;  %v12283_v55 = vld [vmem:[#allocation3 + $0x64] ss:$24 sps:$4 sm:$0xff]  }
 0xfe1   :  { %5760 = vmatprep.subr.bf16.mxu0 %v12267_v52 }
 0xfe3   :  { %5676 = vmatpush1.bf16.msra.mxu1 %v11771_v23  ;;  %v12288_v23 = vld [vmem:[#allocation3 + $0x60] ss:$24 sps:$4 sm:$0xff]  }
 0xfe4   :  { %5677 = vmatprep.subr.bf16.mxu1 %v11774_v49  ;;  %5761 = vmatpush1.bf16.msra.mxu0 %v12272_v13  ;;  %v12291_v49 = vld [vmem:[#allocation3 + $0x34] ss:$24 sps:$4 sm:$0xff]  }
 0xfe5   :  { %5762 = vmatprep.subr.bf16.mxu0 %v12275_v3 }
 0xfe7   :  { %5678 = vmatpush1.bf16.msra.mxu1 %v11779_v0  ;;  %v12296_v0 = vld [vmem:[#allocation3 + $0x30] ss:$24 sps:$4 sm:$0xff]  }
 0xfe8   :  { %5679 = vmatprep.subr.bf16.mxu1 %v11782_v47  ;;  %5763 = vmatpush1.bf16.msra.mxu0 %v12280_v29  ;;  %v12299_v47 = vld [vmem:[#allocation3 + $0x4] ss:$24 sps:$4 sm:$0xff]  }
 0xfe9   :  { %5764 = vmatprep.subr.bf16.mxu0 %v12283_v55 }
 0xfeb   :  { %5680 = vmatpush1.bf16.msra.mxu1 %v11787_v28  ;;  %v12304_v28 = vld [vmem:[#allocation3] ss:$24 sps:$4 sm:$0xff]  }
 0xfec   :  { %5681 = vmatprep.subr.bf16.mxu1 %v11790_v24  ;;  %5765 = vmatpush1.bf16.msra.mxu0 %v12288_v23  ;;  %v12307_v24 = vld [vmem:[#allocation3 + $0x2d4] ss:$24 sps:$4 sm:$0xff]  }
 0xfed   :  { %5766 = vmatprep.subr.bf16.mxu0 %v12291_v49 }
 0xfef   :  { %5682 = vmatpush1.bf16.msra.mxu1 %v11795_v19  ;;  %v12312_v19 = vld [vmem:[#allocation3 + $0x2d0] ss:$24 sps:$4 sm:$0xff]  }
 0xff0   :  { %5683 = vmatprep.subr.bf16.mxu1 %v11798_v30  ;;  %5767 = vmatpush1.bf16.msra.mxu0 %v12296_v0  ;;  %v12315_v30 = vld [vmem:[#allocation3 + $0x2a4] ss:$24 sps:$4 sm:$0xff]  }
 0xff1   :  { %5768 = vmatprep.subr.bf16.mxu0 %v12299_v47 }
 0xff3   :  { %5684 = vmatpush1.bf16.msra.mxu1 %v11803_v18  ;;  %v12320_v18 = vld [vmem:[#allocation3 + $0x2a0] ss:$24 sps:$4 sm:$0xff]  }
 0xff4   :  { %5685 = vmatprep.subr.bf16.mxu1 %v11806_v48  ;;  %5769 = vmatpush1.bf16.msra.mxu0 %v12304_v28  ;;  %v12323_v48 = vld [vmem:[#allocation3 + $0x274] ss:$24 sps:$4 sm:$0xff]  }
 0xff5   :  { %5770 = vmatprep.subr.bf16.mxu0 %v12307_v24 }
 0xff7   :  { %5686 = vmatpush2.bf16.msra.mxu1 %v11811_v16  ;;  %v12328_v16 = vld [vmem:[#allocation3 + $0x270] ss:$24 sps:$4 sm:$0xff]  }
 0xff8   :  { %5687 = vmatprep.subr.bf16.mxu1 %v11814_v15  ;;  %5771 = vmatpush2.bf16.msra.mxu0 %v12312_v19  ;;  %v12331_v15 = vld [vmem:[#allocation3 + $0x244] ss:$24 sps:$4 sm:$0xff]  }
 0xff9   :  { %5772 = vmatprep.subr.bf16.mxu0 %v12315_v30 }
 0xffb   :  { %5688 = vmatpush2.bf16.msra.mxu1 %v11819_v4  ;;  %v12336_v4 = vld [vmem:[#allocation3 + $0x240] ss:$24 sps:$4 sm:$0xff]  }
 0xffc   :  { %5689 = vmatprep.subr.bf16.mxu1 %v13836_v34  ;;  %5773 = vmatpush2.bf16.msra.mxu0 %v12320_v18  ;;  %v12339_v34 = vld [vmem:[#allocation3 + $0x214] ss:$24 sps:$4 sm:$0xff]  }
 0xffd   :  { %5774 = vmatprep.subr.bf16.mxu0 %v12323_v48 }
 0xfff   :  { %5690 = vmatpush2.bf16.msra.mxu1 %v13839_v54  ;;  %v12344_v54 = vld [vmem:[#allocation3 + $0x210] ss:$24 sps:$4 sm:$0xff]  }
0x1000   :  { %5691 = vmatprep.subr.bf16.mxu1 %v13840_v8  ;;  %5775 = vmatpush2.bf16.msra.mxu0 %v12328_v16  ;;  %v12347_v8 = vld [vmem:[#allocation3 + $0x1e4] ss:$24 sps:$4 sm:$0xff]  }
0x1001   :  { %5776 = vmatprep.subr.bf16.mxu0 %v12331_v15 }
0x1003   :  { %5692 = vmatpush2.bf16.msra.mxu1 %v13843_v27  ;;  %v12352_v27 = vld [vmem:[#allocation3 + $0x1e0] ss:$24 sps:$4 sm:$0xff]  }
0x1004   :  { %5693 = vmatprep.subr.bf16.mxu1 %v13844_v53  ;;  %5777 = vmatpush2.bf16.msra.mxu0 %v12336_v4  ;;  %v12355_v53 = vld [vmem:[#allocation3 + $0x1b4] ss:$24 sps:$4 sm:$0xff]  }
0x1005   :  { %5778 = vmatprep.subr.bf16.mxu0 %v12339_v34 }
0x1007   :  { %5694 = vmatpush2.bf16.msra.mxu1 %v13847_v32  ;;  %v12360_v32 = vld [vmem:[#allocation3 + $0x1b0] ss:$24 sps:$4 sm:$0xff]  }
0x1008   :  { %5695 = vmatprep.subr.bf16.mxu1 %v13848_v26  ;;  %5779 = vmatpush2.bf16.msra.mxu0 %v12344_v54  ;;  %v12363_v26 = vld [vmem:[#allocation3 + $0x184] ss:$24 sps:$4 sm:$0xff]  }
0x1009   :  { %5780 = vmatprep.subr.bf16.mxu0 %v12347_v8 }
0x100b   :  { %5696 = vmatpush2.bf16.msra.mxu1 %v13851_v60  ;;  %v13902_v60 = vld [vmem:[#allocation125_spill] sm:$0xff] }
0x100c   :  { %5697 = vmatprep.subr.bf16.mxu1 %v13852_v57  ;;  %5781 = vmatpush2.bf16.msra.mxu0 %v12352_v27  ;;  %v13903_v57 = vld [vmem:[#allocation126_spill] sm:$0xff] }
0x100d   :  { %5782 = vmatprep.subr.bf16.mxu0 %v12355_v53 }
0x100f   :  { %5698 = vmatpush2.bf16.msra.mxu1 %v13855_v10  ;;  %v13904_v10 = vld [vmem:[#allocation127_spill] sm:$0xff] }
0x1010   :  { %5699 = vmatprep.subr.bf16.mxu1 %v13856_v61  ;;  %5783 = vmatpush2.bf16.msra.mxu0 %v12360_v32  ;;  %v13905_v61 = vld [vmem:[#allocation128_spill] sm:$0xff] }
0x1011   :  { %5784 = vmatprep.subr.bf16.mxu0 %v12363_v26 }
0x1013   :  { %5700 = vmatpush2.bf16.msra.mxu1 %v13859_v35  ;;  %v13906_v35 = vld [vmem:[#allocation129_spill] sm:$0xff] }
0x1014   :  { %5795 = vmatprep.subr.bf16.mxu1 %v13860_v38  ;;  %5785 = vmatpush2.bf16.msra.mxu0 %v13861_v39  ;;  %v13907_v38 = vld [vmem:[#allocation130_spill] sm:$0xff]  ;;  %v13908_v39 = vld [vmem:[#allocation131_spill] sm:$0xff] }
0x1015   :  { %5836 = vmatprep.subr.bf16.mxu0 %v13862_v43  ;;  %v13909_v43 = vld [vmem:[#allocation132_spill] sm:$0xff] }
0x1016   :  { %5702 = vmatmul.mubr.bf16.vlgmr.msra.gmra.mxu1 %v12242_v37  ;;  %v13926_v37 = vld [vmem:[#allocation109_spill] sm:$0xff] }
0x1017   :  { %5796 = vmatpush1.bf16.msra.mxu1 %v13863_v1  ;;  %v13910_v1 = vld [vmem:[#allocation133_spill] sm:$0xff] }
0x1018   :  { %5797 = vmatprep.subr.bf16.mxu1 %v13864_v46  ;;  %v13911_v46 = vld [vmem:[#allocation134_spill] sm:$0xff] }
0x101b   :  { %5798 = vmatpush1.bf16.msra.mxu1 %v13865_v6  ;;  %v13912_v6 = vld [vmem:[#allocation56_spill] sm:$0xff] }
0x101c   :  { %5799 = vmatprep.subr.bf16.mxu1 %v13902_v60  ;;  %v13927_v60 = vld [vmem:[#allocation111_spill] sm:$0xff] }
0x101f   :  { %5800 = vmatpush1.bf16.msra.mxu1 %v13903_v57  ;;  %v13928_v57 = vld [vmem:[#allocation113_spill] sm:$0xff] }
0x1020   :  { %5801 = vmatprep.subr.bf16.mxu1 %v13904_v10  ;;  %v13929_v10 = vld [vmem:[#allocation114_spill] sm:$0xff] }
0x1023   :  { %5802 = vmatpush1.bf16.msra.mxu1 %v13905_v61  ;;  %v8436_v61 = vld [vmem:[#allocation3 + $0x154] ss:$24 sps:$4 sm:$0xff]  }
0x1024   :  { %5803 = vmatprep.subr.bf16.mxu1 %v13906_v35 }
0x1027   :  { %5804 = vmatpush1.bf16.msra.mxu1 %v13907_v38 }
0x1028   :  { %5805 = vmatprep.subr.bf16.mxu1 %v13908_v39 }
0x102b   :  { %5806 = vmatpush1.bf16.msra.mxu1 %v13909_v43 }
0x102c   :  { %5807 = vmatprep.subr.bf16.mxu1 %v13910_v1 }
0x102f   :  { %5808 = vmatpush1.bf16.msra.mxu1 %v13911_v46 }
0x1030   :  { %5809 = vmatprep.subr.bf16.mxu1 %v13912_v6 }
0x1033   :  { %5810 = vmatpush1.bf16.msra.mxu1 %v13913_v12 }
0x1034   :  { %5811 = vmatprep.subr.bf16.mxu1 %v13914_v63  ;;  %v13930_v63 = vld [vmem:[#allocation93_spill] sm:$0xff] }
0x1037   :  { %5812 = vmatpush2.bf16.msra.mxu1 %v13915_v21 }
0x1038   :  { %5813 = vmatprep.subr.bf16.mxu1 %v13916_v42 }
0x103b   :  { %5814 = vmatpush2.bf16.msra.mxu1 %v13917_v40  ;;  %v13931_v40 = vld [vmem:[#allocation140_spill] sm:$0xff] }
0x103c   :  { %5815 = vmatprep.subr.bf16.mxu1 %v13918_v14 }
0x103f   :  { %5816 = vmatpush2.bf16.msra.mxu1 %v13919_v44  ;;  %v13932_v44 = vld [vmem:[#allocation142_spill] sm:$0xff] }
0x1040   :  { %5817 = vmatprep.subr.bf16.mxu1 %v13920_v9 }
0x1043   :  { %5818 = vmatpush2.bf16.msra.mxu1 %v13921_v56 }
0x1044   :  { %5819 = vmatprep.subr.bf16.mxu1 %v13922_v25 }
0x1047   :  { %5820 = vmatpush2.bf16.msra.mxu1 %v13923_v62 }
0x1048   :  { %5821 = vmatprep.subr.bf16.mxu1 %v13924_v7 }
0x104b   :  { %5822 = vmatpush2.bf16.msra.mxu1 %v13925_v50  ;;  %v13933_v50 = vld [vmem:[#allocation141_spill] sm:$0xff] }
0x104c   :  { %5823 = vmatprep.subr.bf16.mxu1 %v13926_v37 }
0x104f   :  { %5824 = vmatpush2.bf16.msra.mxu1 %v13927_v60  ;;  %v13934_v60 = vld [vmem:[#allocation143_spill] sm:$0xff] }
0x1050   :  { %5825 = vmatprep.subr.bf16.mxu1 %v13928_v57 }
0x1053   :  { %5826 = vmatpush2.bf16.msra.mxu1 %v13929_v10 }
0x1054   :  { %5921 = vmatprep.subr.bf16.mxu1 %v8436_v61 }
0x1096   :  { %v5621_v35 = vpop.f32.mrf.mxu1  ;;  %v5662_v38 = vpop.f32.mrf.mxu0 }
0x1097   :  { %v5622_v21 = vadd.f32 %v5621_v35, %v13930_v63  ;;  %v5663_v62 = vadd.f32 %v5662_v38, %v11527_v51 }
0x1098   :  { %v5623_v39 = vpop.f32.mrf.mxu1  ;;  %v5664_v43 = vpop.f32.mrf.mxu0 }
0x1099   :  { %v5624_v42 = vadd.f32 %v5623_v39, %v11517_v59  ;;  %v5710_v14 = vadd.f32 %v5622_v21, %v13931_v40  ;;  %v5665_v7 = vadd.f32 %v5664_v43, %v11530_v36  ;;  %v5712_v37 = vadd.f32 %v5663_v62, %v13933_v50  ;;  %v13935_v62 = vld [vmem:[#allocation72_spill] sm:$0xff] }
0x109a   :  { %v5625_v1 = vpop.f32.mrf.mxu1  ;;  %v5666_v46 = vpop.f32.mrf.mxu0 }
0x109b   :  { %v5711_v9 = vadd.f32 %v5624_v42, %v13932_v44  ;;  %v7244_v56 = vmul.f32 -1.442695, %v5710_v14  ;;  %v5713_v57 = vadd.f32 %v5665_v7, %v13934_v60  ;;  %v7246_v10 = vmul.f32 -1.442695, %v5712_v37  ;;  %v13936_v60 = vld [vmem:[#allocation76_spill] sm:$0xff] }
0x109c   :  { %v5626_v6 = vpop.f32.mrf.mxu1  ;;  %v5667_v12 = vpop.f32.mrf.mxu0 }
0x109d   :  { %v7245_v25 = vmul.f32 -1.442695, %v5711_v9  ;;  %8250 = vpow2.f32 %v7244_v56  ;;  %v7247_v61 = vmul.f32 -1.442695, %v5713_v57 }
0x109f   :  { %8252 = vpow2.f32 %v7245_v25 }
0x10a0   :  { %8254 = vpow2.f32 %v7246_v10 }
0x10a1   :  { %8256 = vpow2.f32 %v7247_v61 }
0x10aa   :  { %v8251_v35 = vpop.eup %8250 }
0x10ab   :  { %v5726_v1 = vadd.f32 1.0, %v8251_v35 }
0x10ac   :  { %v8253_v39 = vpop.eup %8252 }
0x10ad   :  { %v5727_v46 = vadd.f32 1.0, %v8253_v39  ;;  %8258 = vrcp.f32 %v5726_v1  ;;  %v8255_v6 = vpop.eup %8254 }
0x10ae   :  { %v8257_v12 = vpop.eup %8256  ;;  %v5728_v38 = vadd.f32 1.0, %v8255_v6 }
0x10af   :  { %8260 = vrcp.f32 %v5727_v46  ;;  %v5729_v42 = vadd.f32 1.0, %v8257_v12 }
0x10b0   :  { %8262 = vrcp.f32 %v5728_v38 }
0x10b1   :  { %8264 = vrcp.f32 %v5729_v42 }
0x10ba   :  { %v8259_v40 = vpop.eup %8258 }
0x10bc   :  { %v8261_v56 = vpop.eup %8260 }
0x10bd   :  { %v8263_v10 = vpop.eup %8262 }
0x10be   :  { %v8265_v61 = vpop.eup %8264  ;;  %v5744_v35 = vsub.f32 1.0, %v8263_v10  ;;  %v5748_v6 = vmul.f32 %v8263_v10, %v12234_v17  ;;  %v8477_v10 = vld [vmem:[#allocation3 + $0xc8] ss:$24 sps:$4 sm:$0xff]  }
0x10bf   :  { %v5745_v1 = vsub.f32 1.0, %v8265_v61 }
0x10d6   :  { %v5703_v21 = vpop.f32.mrf.mxu1 }
0x10d7   :  { %v5704_v43 = vadd.f32 %v5703_v21, %v11537_v41  ;;  %v5749_v21 = vmul.f32 %v8265_v61, %v12236_v33  ;;  %v8478_v61 = vld [vmem:[#allocation3 + $0x9c] ss:$24 sps:$4 sm:$0xff]  }
0x10d8   :  { %v5705_v14 = vpop.f32.mrf.mxu1 }
0x10d9   :  { %v5738_v44 = vmul.f32 %v8259_v40, %v5704_v43  ;;  %v5706_v9 = vadd.f32 %v5705_v14, %v11540_v2 }
0x10da   :  { %v5707_v25 = vpop.f32.mrf.mxu1 }
0x10db   :  { %v5740_v7 = vadd.f32 %v5738_v44, %v13935_v62  ;;  %v5739_v50 = vmul.f32 %v8261_v56, %v5706_v9  ;;  %v12428_v44 = vld [vmem:[#allocation3 + $0x160] ss:$24 sps:$4 sm:$0xff]   ;;  %v12431_v9 = vld [vmem:[#allocation3 + $0x134] ss:$24 sps:$4 sm:$0xff]   ;;  %v12436_v56 = vld [vmem:[#allocation3 + $0x130] ss:$24 sps:$4 sm:$0xff]  }
0x10dc   :  { %v5708_v37 = vpop.f32.mrf.mxu1  ;;  %v12439_v25 = vld [vmem:[#allocation3 + $0x104] ss:$24 sps:$4 sm:$0xff]   ;;  %v12444_v62 = vld [vmem:[#allocation3 + $0x100] ss:$24 sps:$4 sm:$0xff]  }
0x10dd   :  { %8266 = vtanh.f32 %v5740_v7  ;;  %v5741_v57 = vadd.f32 %v5739_v50, %v13936_v60  ;;  %v12447_v7 = vld [vmem:[#allocation3 + $0xd4] ss:$24 sps:$4 sm:$0xff]   ;;  %v8471_v50 = vld [vmem:[#allocation3 + $0x158] ss:$24 sps:$4 sm:$0xff]   ;;  %v8473_v60 = vld [vmem:[#allocation3 + $0x128] ss:$24 sps:$4 sm:$0xff]  }
0x10de   :  { %v8472_v37 = vld [vmem:[#allocation3 + $0x12c] ss:$24 sps:$4 sm:$0xff]  }
0x10df   :  { %8268 = vtanh.f32 %v5741_v57  ;;  %v8476_v57 = vld [vmem:[#allocation3 + $0xcc] ss:$24 sps:$4 sm:$0xff]  }
0x10ea   :  { %v8267_v39 = vpop.eup %8266 }
0x10eb   :  { %v5746_v46 = vmul.f32 %v8267_v39, %v5744_v35  ;;  %v8479_v35 = vld [vmem:[#allocation3 + $0x98] ss:$24 sps:$4 sm:$0xff]   ;;  %v8480_v39 = vld [vmem:[#allocation3 + $0x6c] ss:$24 sps:$4 sm:$0xff]  }
0x10ec   :  { %v8269_v12 = vpop.eup %8268 }
0x10ed   :  { %v5747_v38 = vmul.f32 %v8269_v12, %v5745_v1  ;;  %v12416_v42 = vadd.f32 %v5748_v6, %v5746_v46  ;;  %v8481_v1 = vld [vmem:[#allocation3 + $0x68] ss:$24 sps:$4 sm:$0xff]   ;;  %v8482_v46 = vld [vmem:[#allocation3 + $0x3c] ss:$24 sps:$4 sm:$0xff]   ;;  %v8483_v6 = vld [vmem:[#allocation3 + $0x38] ss:$24 sps:$4 sm:$0xff]  }
0x10ee   :  { %v8484_v12 = vld [vmem:[#allocation3 + $0xc] ss:$24 sps:$4 sm:$0xff]  }
0x10ef   :  { %v12418_v43 = vadd.f32 %v5749_v21, %v5747_v38  ;;  %v12424_v14 = vpack.c.bf16 %v12416_v42, %v12416_v42  ;;  %v8485_v38 = vld [vmem:[#allocation3 + $0x8] ss:$24 sps:$4 sm:$0xff]   ;;  %v8486_v21 = vld [vmem:[#allocation3 + $0x2dc] ss:$24 sps:$4 sm:$0xff]  }
0x10f1   :  { %v5753_v40 = vpack.c.bf16 %v12418_v43, %v12418_v43 }
0x10f3   :  { %5786 = vmatprep.mubr.bf16.mxu0 %v5753_v40  ;;  %5827 = vmatprep.mubr.bf16.mxu1 %v5753_v40 }
0x10f4   :  { %5787 = vmatmul.mubr.bf16.vlgmr.msra.gmra.mxu0 %v12424_v14  ;;  %5828 = vmatmul.mubr.bf16.vlgmr.msra.gmra.mxu1 %v12424_v14 }
0x10f5   :  { %5837 = vmatpush1.bf16.msra.mxu0 %v12428_v44  ;;  %5868 = vmatprep.mubr.bf16.mxu0 %v5753_v40  ;;  %v8487_v40 = vld [vmem:[#allocation3 + $0x2d8] ss:$24 sps:$4 sm:$0xff]  }
0x10f6   :  { %5838 = vmatprep.subr.bf16.mxu0 %v12431_v9  ;;  %5922 = vmatpush1.bf16.msra.mxu1 %v12248_v20  ;;  %v12452_v20 = vld [vmem:[#allocation3 + $0xd0] ss:$24 sps:$4 sm:$0xff]  }
0x10f7   :  { %5923 = vmatprep.subr.bf16.mxu1 %v12251_v45  ;;  %v12455_v45 = vld [vmem:[#allocation3 + $0xa4] ss:$24 sps:$4 sm:$0xff]  }
0x10f9   :  { %5839 = vmatpush1.bf16.msra.mxu0 %v12436_v56 }
0x10fa   :  { %5840 = vmatprep.subr.bf16.mxu0 %v12439_v25  ;;  %5924 = vmatpush1.bf16.msra.mxu1 %v12256_v58  ;;  %v12460_v58 = vld [vmem:[#allocation3 + $0xa0] ss:$24 sps:$4 sm:$0xff]  }
0x10fb   :  { %5925 = vmatprep.subr.bf16.mxu1 %v12259_v22  ;;  %v12463_v22 = vld [vmem:[#allocation3 + $0x74] ss:$24 sps:$4 sm:$0xff]  }
0x10fd   :  { %5841 = vmatpush1.bf16.msra.mxu0 %v12444_v62 }
0x10fe   :  { %5842 = vmatprep.subr.bf16.mxu0 %v12447_v7  ;;  %5926 = vmatpush1.bf16.msra.mxu1 %v12264_v31  ;;  %v12468_v31 = vld [vmem:[#allocation3 + $0x70] ss:$24 sps:$4 sm:$0xff]  }
0x10ff   :  { %5927 = vmatprep.subr.bf16.mxu1 %v12267_v52  ;;  %v12471_v52 = vld [vmem:[#allocation3 + $0x44] ss:$24 sps:$4 sm:$0xff]  }
0x1101   :  { %5843 = vmatpush1.bf16.msra.mxu0 %v12452_v20 }
0x1102   :  { %5844 = vmatprep.subr.bf16.mxu0 %v12455_v45  ;;  %5928 = vmatpush1.bf16.msra.mxu1 %v12272_v13  ;;  %v12476_v13 = vld [vmem:[#allocation3 + $0x40] ss:$24 sps:$4 sm:$0xff]  }
0x1103   :  { %5929 = vmatprep.subr.bf16.mxu1 %v12275_v3  ;;  %v12479_v3 = vld [vmem:[#allocation3 + $0x14] ss:$24 sps:$4 sm:$0xff]  }
0x1105   :  { %5845 = vmatpush1.bf16.msra.mxu0 %v12460_v58 }
0x1106   :  { %5846 = vmatprep.subr.bf16.mxu0 %v12463_v22  ;;  %5930 = vmatpush1.bf16.msra.mxu1 %v12280_v29  ;;  %v12484_v29 = vld [vmem:[#allocation3 + $0x10] ss:$24 sps:$4 sm:$0xff]  }
0x1107   :  { %5931 = vmatprep.subr.bf16.mxu1 %v12283_v55  ;;  %v12487_v55 = vld [vmem:[#allocation3 + $0x2e4] ss:$24 sps:$4 sm:$0xff]  }
0x1109   :  { %5847 = vmatpush1.bf16.msra.mxu0 %v12468_v31 }
0x110a   :  { %5848 = vmatprep.subr.bf16.mxu0 %v12471_v52  ;;  %5932 = vmatpush1.bf16.msra.mxu1 %v12288_v23  ;;  %v12492_v23 = vld [vmem:[#allocation3 + $0x2e0] ss:$24 sps:$4 sm:$0xff]  }
0x110b   :  { %5933 = vmatprep.subr.bf16.mxu1 %v12291_v49  ;;  %v12495_v49 = vld [vmem:[#allocation3 + $0x2b4] ss:$24 sps:$4 sm:$0xff]  }
0x110d   :  { %5849 = vmatpush1.bf16.msra.mxu0 %v12476_v13 }
0x110e   :  { %5850 = vmatprep.subr.bf16.mxu0 %v12479_v3  ;;  %5934 = vmatpush1.bf16.msra.mxu1 %v12296_v0  ;;  %v12500_v0 = vld [vmem:[#allocation3 + $0x2b0] ss:$24 sps:$4 sm:$0xff]  }
0x110f   :  { %5935 = vmatprep.subr.bf16.mxu1 %v12299_v47  ;;  %v12503_v47 = vld [vmem:[#allocation3 + $0x284] ss:$24 sps:$4 sm:$0xff]  }
0x1111   :  { %5851 = vmatpush1.bf16.msra.mxu0 %v12484_v29 }
0x1112   :  { %5852 = vmatprep.subr.bf16.mxu0 %v12487_v55  ;;  %5936 = vmatpush1.bf16.msra.mxu1 %v12304_v28  ;;  %v12508_v28 = vld [vmem:[#allocation3 + $0x280] ss:$24 sps:$4 sm:$0xff]  }
0x1113   :  { %5937 = vmatprep.subr.bf16.mxu1 %v12307_v24  ;;  %v12511_v24 = vld [vmem:[#allocation3 + $0x254] ss:$24 sps:$4 sm:$0xff]  }
0x1115   :  { %5853 = vmatpush2.bf16.msra.mxu0 %v12492_v23 }
0x1116   :  { %5854 = vmatprep.subr.bf16.mxu0 %v12495_v49  ;;  %5938 = vmatpush2.bf16.msra.mxu1 %v12312_v19  ;;  %v12516_v19 = vld [vmem:[#allocation3 + $0x250] ss:$24 sps:$4 sm:$0xff]  }
0x1117   :  { %5939 = vmatprep.subr.bf16.mxu1 %v12315_v30  ;;  %v12519_v30 = vld [vmem:[#allocation3 + $0x224] ss:$24 sps:$4 sm:$0xff]  }
0x1119   :  { %5855 = vmatpush2.bf16.msra.mxu0 %v12500_v0 }
0x111a   :  { %5856 = vmatprep.subr.bf16.mxu0 %v12503_v47  ;;  %5940 = vmatpush2.bf16.msra.mxu1 %v12320_v18  ;;  %v12524_v18 = vld [vmem:[#allocation3 + $0x220] ss:$24 sps:$4 sm:$0xff]  }
0x111b   :  { %5941 = vmatprep.subr.bf16.mxu1 %v12323_v48  ;;  %v12527_v48 = vld [vmem:[#allocation3 + $0x1f4] ss:$24 sps:$4 sm:$0xff]  }
0x111d   :  { %5857 = vmatpush2.bf16.msra.mxu0 %v12508_v28 }
0x111e   :  { %5858 = vmatprep.subr.bf16.mxu0 %v12511_v24  ;;  %5942 = vmatpush2.bf16.msra.mxu1 %v12328_v16  ;;  %v12532_v16 = vld [vmem:[#allocation3 + $0x1f0] ss:$24 sps:$4 sm:$0xff]  }
0x111f   :  { %5943 = vmatprep.subr.bf16.mxu1 %v12331_v15  ;;  %v12535_v15 = vld [vmem:[#allocation3 + $0x1c4] ss:$24 sps:$4 sm:$0xff]  }
0x1121   :  { %5859 = vmatpush2.bf16.msra.mxu0 %v12516_v19 }
0x1122   :  { %5860 = vmatprep.subr.bf16.mxu0 %v12519_v30  ;;  %5944 = vmatpush2.bf16.msra.mxu1 %v12336_v4  ;;  %v12540_v4 = vld [vmem:[#allocation3 + $0x1c0] ss:$24 sps:$4 sm:$0xff]  }
0x1123   :  { %5945 = vmatprep.subr.bf16.mxu1 %v12339_v34  ;;  %v12543_v34 = vld [vmem:[#allocation3 + $0x194] ss:$24 sps:$4 sm:$0xff]  }
0x1125   :  { %5861 = vmatpush2.bf16.msra.mxu0 %v12524_v18 }
0x1126   :  { %5862 = vmatprep.subr.bf16.mxu0 %v12527_v48  ;;  %5946 = vmatpush2.bf16.msra.mxu1 %v12344_v54  ;;  %v12548_v54 = vld [vmem:[#allocation3 + $0x190] ss:$24 sps:$4 sm:$0xff]  }
0x1127   :  { %5947 = vmatprep.subr.bf16.mxu1 %v12347_v8  ;;  %v8468_v8 = vld [vmem:[#allocation3 + $0x15c] ss:$24 sps:$4 sm:$0xff]  }
0x1129   :  { %5863 = vmatpush2.bf16.msra.mxu0 %v12532_v16 }
0x112a   :  { %5864 = vmatprep.subr.bf16.mxu0 %v12535_v15  ;;  %5948 = vmatpush2.bf16.msra.mxu1 %v12352_v27  ;;  %v8469_v27 = vld [vmem:[#allocation3 + $0x180] ss:$24 sps:$4 sm:$0xff]  }
0x112b   :  { %5949 = vmatprep.subr.bf16.mxu1 %v12355_v53  ;;  %v8470_v53 = vld [vmem:[#allocation3 + $0x164] ss:$24 sps:$4 sm:$0xff]  }
0x112d   :  { %5865 = vmatpush2.bf16.msra.mxu0 %v12540_v4 }
0x112e   :  { %5866 = vmatprep.subr.bf16.mxu0 %v12543_v34  ;;  %5950 = vmatpush2.bf16.msra.mxu1 %v12360_v32  ;;  %v8474_v32 = vld [vmem:[#allocation3 + $0xfc] ss:$24 sps:$4 sm:$0xff]  }
0x112f   :  { %5951 = vmatprep.subr.bf16.mxu1 %v12363_v26  ;;  %v8475_v26 = vld [vmem:[#allocation3 + $0xf8] ss:$24 sps:$4 sm:$0xff]  }
0x1131   :  { %5867 = vmatpush2.bf16.msra.mxu0 %v12548_v54 }
0x1132   :  { %5962 = vmatprep.subr.bf16.mxu0 %v8468_v8  ;;  %5952 = vmatpush2.bf16.msra.mxu1 %v8469_v27  ;;  %v8489_v8 = vld [vmem:[#allocation3 + $0x2a8] ss:$24 sps:$4 sm:$0xff]   ;;  %v8490_v27 = vld [vmem:[#allocation3 + $0x27c] ss:$24 sps:$4 sm:$0xff]  }
0x1133   :  { %6003 = vmatprep.subr.bf16.mxu1 %v8470_v53  ;;  %v8491_v53 = vld [vmem:[#allocation3 + $0x278] ss:$24 sps:$4 sm:$0xff]  }
0x1134   :  { %5869 = vmatmul.mubr.bf16.vlgmr.msra.gmra.mxu0 %v12424_v14  ;;  %v8488_v14 = vld [vmem:[#allocation3 + $0x2ac] ss:$24 sps:$4 sm:$0xff]  }
0x1135   :  { %5963 = vmatpush1.bf16.msra.mxu0 %v8471_v50  ;;  %v8492_v50 = vld [vmem:[#allocation3 + $0x24c] ss:$24 sps:$4 sm:$0xff]  }
0x1136   :  { %5964 = vmatprep.subr.bf16.mxu0 %v8472_v37  ;;  %v8493_v37 = vld [vmem:[#allocation3 + $0x248] ss:$24 sps:$4 sm:$0xff]  }
0x1139   :  { %5965 = vmatpush1.bf16.msra.mxu0 %v8473_v60  ;;  %v8494_v60 = vld [vmem:[#allocation3 + $0x21c] ss:$24 sps:$4 sm:$0xff]  }
0x113a   :  { %5966 = vmatprep.subr.bf16.mxu0 %v8474_v32  ;;  %v8495_v32 = vld [vmem:[#allocation3 + $0x218] ss:$24 sps:$4 sm:$0xff]  }
0x113d   :  { %5967 = vmatpush1.bf16.msra.mxu0 %v8475_v26  ;;  %v8496_v26 = vld [vmem:[#allocation3 + $0x1ec] ss:$24 sps:$4 sm:$0xff]  }
0x113e   :  { %5968 = vmatprep.subr.bf16.mxu0 %v8476_v57  ;;  %v8497_v57 = vld [vmem:[#allocation3 + $0x1e8] ss:$24 sps:$4 sm:$0xff]  }
0x1141   :  { %5969 = vmatpush1.bf16.msra.mxu0 %v8477_v10  ;;  %v8498_v10 = vld [vmem:[#allocation3 + $0x1bc] ss:$24 sps:$4 sm:$0xff]  }
0x1142   :  { %5970 = vmatprep.subr.bf16.mxu0 %v8478_v61  ;;  %v8499_v61 = vld [vmem:[#allocation3 + $0x1b8] ss:$24 sps:$4 sm:$0xff]  }
0x1145   :  { %5971 = vmatpush1.bf16.msra.mxu0 %v8479_v35  ;;  %v8500_v35 = vld [vmem:[#allocation3 + $0x18c] ss:$24 sps:$4 sm:$0xff]  }
0x1146   :  { %5972 = vmatprep.subr.bf16.mxu0 %v8480_v39  ;;  %v8501_v39 = vld [vmem:[#allocation3 + $0x188] ss:$24 sps:$4 sm:$0xff]  }
0x1149   :  { %5973 = vmatpush1.bf16.msra.mxu0 %v8481_v1 }
0x114a   :  { %5974 = vmatprep.subr.bf16.mxu0 %v8482_v46 }
0x114d   :  { %5975 = vmatpush1.bf16.msra.mxu0 %v8483_v6 }
0x114e   :  { %5976 = vmatprep.subr.bf16.mxu0 %v8484_v12 }
0x1151   :  { %5977 = vmatpush1.bf16.msra.mxu0 %v8485_v38 }
0x1152   :  { %5978 = vmatprep.subr.bf16.mxu0 %v8486_v21 }
0x1155   :  { %5979 = vmatpush2.bf16.msra.mxu0 %v8487_v40 }
0x1156   :  { %5980 = vmatprep.subr.bf16.mxu0 %v8488_v14 }
0x1159   :  { %5981 = vmatpush2.bf16.msra.mxu0 %v8489_v8 }
0x115a   :  { %5982 = vmatprep.subr.bf16.mxu0 %v8490_v27 }
0x115d   :  { %5983 = vmatpush2.bf16.msra.mxu0 %v8491_v53  ;;  %v13937_v53 = vld [vmem:[#allocation144_spill] sm:$0xff] }
0x115e   :  { %5984 = vmatprep.subr.bf16.mxu0 %v8492_v50 }
0x1161   :  { %5985 = vmatpush2.bf16.msra.mxu0 %v8493_v37  ;;  %v13938_v37 = vld [vmem:[#allocation146_spill] sm:$0xff] }
0x1162   :  { %5986 = vmatprep.subr.bf16.mxu0 %v8494_v60 }
0x1165   :  { %5987 = vmatpush2.bf16.msra.mxu0 %v8495_v32 }
0x1166   :  { %5988 = vmatprep.subr.bf16.mxu0 %v8496_v26 }
0x1169   :  { %5989 = vmatpush2.bf16.msra.mxu0 %v8497_v57 }
0x116a   :  { %5990 = vmatprep.subr.bf16.mxu0 %v8498_v10 }
0x116d   :  { %5991 = vmatpush2.bf16.msra.mxu0 %v8499_v61  ;;  %v13939_v61 = vld [vmem:[#allocation145_spill] sm:$0xff] }
0x116e   :  { %5992 = vmatprep.subr.bf16.mxu0 %v8500_v35 }
0x1171   :  { %5993 = vmatpush2.bf16.msra.mxu0 %v8501_v39  ;;  %v13940_v39 = vld [vmem:[#allocation86_spill] sm:$0xff] }
0x11b4   :  { %v5788_v1 = vpop.f32.mrf.mxu0  ;;  %v5829_v46 = vpop.f32.mrf.mxu1 }
0x11b5   :  { %v5789_v8 = vadd.f32 %v5788_v1, %v13930_v63  ;;  %v5830_v57 = vadd.f32 %v5829_v46, %v11527_v51 }
0x11b6   :  { %v5790_v6 = vpop.f32.mrf.mxu0  ;;  %v5831_v12 = vpop.f32.mrf.mxu1 }
0x11b7   :  { %v5791_v27 = vadd.f32 %v5790_v6, %v11517_v59  ;;  %v5877_v50 = vadd.f32 %v5789_v8, %v13937_v53  ;;  %v5832_v10 = vadd.f32 %v5831_v12, %v11530_v36  ;;  %v5879_v35 = vadd.f32 %v5830_v57, %v13939_v61 }
0x11b8   :  { %v5792_v38 = vpop.f32.mrf.mxu0  ;;  %v5833_v21 = vpop.f32.mrf.mxu1 }
0x11b9   :  { %v5878_v60 = vadd.f32 %v5791_v27, %v13938_v37  ;;  %v7248_v32 = vmul.f32 -1.442695, %v5877_v50  ;;  %v5880_v38 = vadd.f32 %v5832_v10, %v13940_v39  ;;  %v7250_v21 = vmul.f32 -1.442695, %v5879_v35  ;;  %v13941_v35 = vld [vmem:[#allocation74_spill] sm:$0xff] }
0x11ba   :  { %v5793_v40 = vpop.f32.mrf.mxu0  ;;  %v5834_v14 = vpop.f32.mrf.mxu1 }
0x11bb   :  { %v7249_v26 = vmul.f32 -1.442695, %v5878_v60  ;;  %8270 = vpow2.f32 %v7248_v32  ;;  %v7251_v1 = vmul.f32 -1.442695, %v5880_v38 }
0x11bd   :  { %8272 = vpow2.f32 %v7249_v26 }
0x11be   :  { %8274 = vpow2.f32 %v7250_v21 }
0x11bf   :  { %8276 = vpow2.f32 %v7251_v1  ;;  %v13942_v1 = vld [vmem:[#allocation104_spill] sm:$0xff] }
0x11c8   :  { %v8271_v40 = vpop.eup %8270 }
0x11c9   :  { %v5893_v14 = vadd.f32 1.0, %v8271_v40 }
0x11ca   :  { %v8273_v6 = vpop.eup %8272 }
0x11cb   :  { %v5894_v8 = vadd.f32 1.0, %v8273_v6  ;;  %8278 = vrcp.f32 %v5893_v14  ;;  %v8275_v27 = vpop.eup %8274 }
0x11cc   :  { %v8277_v53 = vpop.eup %8276  ;;  %v5895_v46 = vadd.f32 1.0, %v8275_v27 }
0x11cd   :  { %8280 = vrcp.f32 %v5894_v8  ;;  %v5896_v37 = vadd.f32 1.0, %v8277_v53 }
0x11ce   :  { %8282 = vrcp.f32 %v5895_v46 }
0x11cf   :  { %8284 = vrcp.f32 %v5896_v37 }
0x11d8   :  { %v8279_v60 = vpop.eup %8278 }
0x11da   :  { %v8281_v10 = vpop.eup %8280 }
0x11db   :  { %v8283_v6 = vpop.eup %8282 }
0x11dc   :  { %v8285_v14 = vpop.eup %8284  ;;  %v5911_v8 = vsub.f32 1.0, %v8283_v6 }
0x11dd   :  { %v5912_v53 = vsub.f32 1.0, %v8285_v14  ;;  %v5916_v37 = vmul.f32 %v8285_v14, %v12418_v43 }
0x11f4   :  { %v5870_v50 = vpop.f32.mrf.mxu0 }
0x11f5   :  { %v5871_v12 = vadd.f32 %v5870_v50, %v11537_v41  ;;  %v5915_v50 = vmul.f32 %v8283_v6, %v12416_v42 }
0x11f6   :  { %v5872_v32 = vpop.f32.mrf.mxu0 }
0x11f7   :  { %v5905_v26 = vmul.f32 %v8279_v60, %v5871_v12  ;;  %v5873_v57 = vadd.f32 %v5872_v32, %v11540_v2 }
0x11f8   :  { %v5874_v61 = vpop.f32.mrf.mxu0 }
0x11f9   :  { %v5907_v39 = vadd.f32 %v5905_v26, %v13941_v35  ;;  %v5906_v38 = vmul.f32 %v8281_v10, %v5873_v57 }
0x11fa   :  { %v5875_v21 = vpop.f32.mrf.mxu0 }
0x11fb   :  { %8286 = vtanh.f32 %v5907_v39  ;;  %v5908_v40 = vadd.f32 %v5906_v38, %v13942_v1  ;;  %v13947_v1 = vld [vmem:[#allocation92_spill] sm:$0xff] }
0x11fd   :  { %8288 = vtanh.f32 %v5908_v40 }
0x1208   :  { %v8287_v27 = vpop.eup %8286 }
0x1209   :  { %v5913_v46 = vmul.f32 %v8287_v27, %v5911_v8  ;;  %v13948_v8 = vld [vmem:[#allocation94_spill] sm:$0xff] }
0x120a   :  { %v8289_v12 = vpop.eup %8288 }
0x120b   :  { %v5914_v60 = vmul.f32 %v8289_v12, %v5912_v53  ;;  %v12566_v32 = vadd.f32 %v5915_v50, %v5913_v46  ;;  %v6188_v53 = vcombine.low %v12234_v17, %v12113_v5  ;;  %v13949_v46 = vld [vmem:[#allocation77_spill] sm:$0xff]  ;;  %v13950_v12 = vld [vmem:[#allocation115_spill] sm:$0xff]  ;;  %v13952_v5 = vld [vmem:[#allocation106_spill] sm:$0xff] }
0x120d   :  { %v12568_v26 = vadd.f32 %v5916_v37, %v5914_v60  ;;  %v5919_v10 = vpack.c.bf16 %v12566_v32, %v12566_v32  ;;  %v6195_v50 = vrot.slane %v6188_v53, %v13949_v46  ;;  %v6138_v60 = vcombine.low %v13950_v12, %v12418_v43  ;;  %v13951_v37 = vld [vmem:[#allocation116_spill] sm:$0xff] }
0x120e   :  { %v6238_v17 = vcombine.low %v12566_v32, %v13952_v5 }
0x120f   :  { %v5920_v57 = vpack.c.bf16 %v12568_v26, %v12568_v26 }
0x1211   :  { %5953 = vmatprep.mubr.bf16.mxu1 %v5920_v57  ;;  %5994 = vmatprep.mubr.bf16.mxu0 %v5920_v57 }
0x1212   :  { %5954 = vmatmul.mubr.bf16.vlgmr.msra.gmra.mxu1 %v5919_v10  ;;  %5995 = vmatmul.mubr.bf16.vlgmr.msra.gmra.mxu0 %v5919_v10 }
0x1213   :  { %6004 = vmatpush1.bf16.msra.mxu1 %v12428_v44  ;;  %6035 = vmatprep.mubr.bf16.mxu1 %v5920_v57  ;;  %v6213_v57 = vcombine.low %v12416_v42, %v13951_v37 }
0x1214   :  { %6005 = vmatprep.subr.bf16.mxu1 %v12431_v9 }
0x1217   :  { %6006 = vmatpush1.bf16.msra.mxu1 %v12436_v56 }
0x1218   :  { %6007 = vmatprep.subr.bf16.mxu1 %v12439_v25 }
0x121b   :  { %6008 = vmatpush1.bf16.msra.mxu1 %v12444_v62 }
0x121c   :  { %6009 = vmatprep.subr.bf16.mxu1 %v12447_v7 }
0x121f   :  { %6010 = vmatpush1.bf16.msra.mxu1 %v12452_v20 }
0x1220   :  { %6011 = vmatprep.subr.bf16.mxu1 %v12455_v45 }
0x1223   :  { %6012 = vmatpush1.bf16.msra.mxu1 %v12460_v58 }
0x1224   :  { %6013 = vmatprep.subr.bf16.mxu1 %v12463_v22 }
0x1227   :  { %6014 = vmatpush1.bf16.msra.mxu1 %v12468_v31  ;;  %v13943_v31 = vld [vmem:[#allocation88_spill] sm:$0xff] }
0x1228   :  { %6015 = vmatprep.subr.bf16.mxu1 %v12471_v52 }
0x122b   :  { %6016 = vmatpush1.bf16.msra.mxu1 %v12476_v13  ;;  %v13944_v13 = vld [vmem:[#allocation89_spill] sm:$0xff] }
0x122c   :  { %6017 = vmatprep.subr.bf16.mxu1 %v12479_v3 }
0x122f   :  { %6018 = vmatpush1.bf16.msra.mxu1 %v12484_v29 }
0x1230   :  { %6019 = vmatprep.subr.bf16.mxu1 %v12487_v55 }
0x1233   :  { %6020 = vmatpush2.bf16.msra.mxu1 %v12492_v23 }
0x1234   :  { %6021 = vmatprep.subr.bf16.mxu1 %v12495_v49 }
0x1237   :  { %6022 = vmatpush2.bf16.msra.mxu1 %v12500_v0  ;;  %v13945_v0 = vld [vmem:[#allocation87_spill] sm:$0xff] }
0x1238   :  { %6023 = vmatprep.subr.bf16.mxu1 %v12503_v47 }
0x123b   :  { %6024 = vmatpush2.bf16.msra.mxu1 %v12508_v28  ;;  %v13946_v28 = vld [vmem:[#allocation90_spill] sm:$0xff] }
0x123c   :  { %6025 = vmatprep.subr.bf16.mxu1 %v12511_v24 }
0x123f   :  { %6026 = vmatpush2.bf16.msra.mxu1 %v12516_v19 }
0x1240   :  { %6027 = vmatprep.subr.bf16.mxu1 %v12519_v30 }
0x1243   :  { %6028 = vmatpush2.bf16.msra.mxu1 %v12524_v18 }
0x1244   :  { %6029 = vmatprep.subr.bf16.mxu1 %v12527_v48 }
0x1247   :  { %6030 = vmatpush2.bf16.msra.mxu1 %v12532_v16 }
0x1248   :  { %6031 = vmatprep.subr.bf16.mxu1 %v12535_v15 }
0x124b   :  { %6032 = vmatpush2.bf16.msra.mxu1 %v12540_v4 }
0x124c   :  { %6033 = vmatprep.subr.bf16.mxu1 %v12543_v34 }
0x124f   :  { %6034 = vmatpush2.bf16.msra.mxu1 %v12548_v54 }
0x1252   :  { %6036 = vmatmul.mubr.bf16.vlgmr.msra.gmra.mxu1 %v5919_v10 }
0x12d2   :  { %v5955_v44 = vpop.f32.mrf.mxu1  ;;  %v5996_v9 = vpop.f32.mrf.mxu0 }
0x12d3   :  { %v5956_v58 = vadd.f32 %v5955_v44, %v13930_v63  ;;  %v5997_v23 = vadd.f32 %v5996_v9, %v11527_v51  ;;  %v6196_v44 = vcombine.high %v6195_v50, %v6195_v50  ;;  %v12628_v9 = vrot.slane %v6195_v50, %v13949_v46 }
0x12d4   :  { %v5957_v56 = vpop.f32.mrf.mxu1  ;;  %v5998_v25 = vpop.f32.mrf.mxu0 }
0x12d5   :  { %v5958_v22 = vadd.f32 %v5957_v56, %v11517_v59  ;;  %v6044_v52 = vadd.f32 %v5956_v58, %v13943_v31  ;;  %v5999_v49 = vadd.f32 %v5998_v25, %v11530_v36  ;;  %v6046_v47 = vadd.f32 %v5997_v23, %v13945_v0  ;;  %v13954_v58 = vld [vmem:[#allocation37_spill] sm:$0xff]  ;;  %v13955_v31 = vld [vmem:[#allocation60_spill] sm:$0xff] }
0x12d6   :  { %v5959_v62 = vpop.f32.mrf.mxu1  ;;  %v6000_v7 = vpop.f32.mrf.mxu0  ;;  %v6220_v25 = vrot.slane %v6213_v57, %v13949_v46 }
0x12d7   :  { %v6045_v3 = vadd.f32 %v5958_v22, %v13944_v13  ;;  %v7252_v29 = vmul.f32 -1.442695, %v6044_v52  ;;  %v6047_v24 = vadd.f32 %v5999_v49, %v13946_v28  ;;  %v7254_v19 = vmul.f32 -1.442695, %v6046_v47  ;;  %v13953_v62 = vld [vmem:[#allocation43_spill] sm:$0xff] }
0x12d8   :  { %v5960_v20 = vpop.f32.mrf.mxu1  ;;  %v6001_v45 = vpop.f32.mrf.mxu0  ;;  %v6113_v43 = vcombine.low %v13953_v62, %v12568_v26  ;;  %v6369_v22 = vrot.slane %v12628_v9, %v13954_v58  ;;  %v6373_v52 = vrot.slane %v12628_v9, %v13955_v31  ;;  %v6245_v13 = vrot.slane %v6238_v17, %v13949_v46 }
0x12d9   :  { %v7253_v55 = vmul.f32 -1.442695, %v6045_v3  ;;  %8290 = vpow2.f32 %v7252_v29  ;;  %v7255_v63 = vmul.f32 -1.442695, %v6047_v24  ;;  %v12640_v45 = vrot.slane %v6196_v44, %v13949_v46 }
0x12da   :  { %v6221_v47 = vcombine.high %v6220_v25, %v6220_v25  ;;  %v6120_v28 = vrot.slane %v6113_v43, %v13949_v46 }
0x12db   :  { %8292 = vpow2.f32 %v7253_v55 }
0x12dc   :  { %8294 = vpow2.f32 %v7254_v19 }
0x12dd   :  { %8296 = vpow2.f32 %v7255_v63 }
0x12e6   :  { %v8291_v30 = vpop.eup %8290 }
0x12e7   :  { %v6060_v18 = vadd.f32 1.0, %v8291_v30 }
0x12e8   :  { %v8293_v59 = vpop.eup %8292 }
0x12e9   :  { %v6061_v48 = vadd.f32 1.0, %v8293_v59  ;;  %8298 = vrcp.f32 %v6060_v18  ;;  %v8295_v16 = vpop.eup %8294  ;;  %v6377_v59 = vrot.slane %v12640_v45, %v13954_v58 }
0x12ea   :  { %v8297_v15 = vpop.eup %8296  ;;  %v6062_v51 = vadd.f32 1.0, %v8295_v16  ;;  %v6381_v16 = vrot.slane %v12640_v45, %v13955_v31 }
0x12eb   :  { %8300 = vrcp.f32 %v6061_v48  ;;  %v6063_v34 = vadd.f32 1.0, %v8297_v15  ;;  %v12663_v48 = vrot.slane %v6220_v25, %v13949_v46  ;;  %v6246_v15 = vcombine.high %v6245_v13, %v6245_v13 }
0x12ec   :  { %8302 = vrcp.f32 %v6062_v51  ;;  %v13956_v51 = vld [vmem:[#allocation96_spill] sm:$0xff] }
0x12ed   :  { %8304 = vrcp.f32 %v6063_v34  ;;  %v6260_v53 = vrot.slane %v6246_v15, %v13949_v46 }
0x12ef   :  { %v6417_v62 = vrot.slane %v6260_v53, %v13954_v58  ;;  %v6421_v43 = vrot.slane %v6260_v53, %v13955_v31 }
0x12f6   :  { %v8299_v54 = vpop.eup %8298 }
0x12f8   :  { %v8301_v38 = vpop.eup %8300 }
0x12f9   :  { %v8303_v10 = vpop.eup %8302 }
0x12fa   :  { %v8305_v56 = vpop.eup %8304  ;;  %v6078_v42 = vsub.f32 1.0, %v8303_v10  ;;  %v6082_v3 = vmul.f32 %v8303_v10, %v12566_v32 }
0x12fb   :  { %v6079_v55 = vsub.f32 1.0, %v8305_v56  ;;  %v6083_v19 = vmul.f32 %v8305_v56, %v12568_v26 }
0x1312   :  { %v6037_v4 = vpop.f32.mrf.mxu1 }
0x1313   :  { %v6038_v36 = vadd.f32 %v6037_v4, %v11537_v41  ;;  %v6163_v41 = vcombine.low %v12111_v11, %v12236_v33  ;;  %v6145_v33 = vrot.slane %v6138_v60, %v13949_v46 }
0x1314   :  { %v6039_v61 = vpop.f32.mrf.mxu1 }
0x1315   :  { %v6072_v35 = vmul.f32 %v8299_v54, %v6038_v36  ;;  %v6040_v39 = vadd.f32 %v6039_v61, %v11540_v2  ;;  %v6170_v2 = vrot.slane %v6163_v41, %v13949_v46  ;;  %v6146_v0 = vcombine.high %v6145_v33, %v6145_v33 }
0x1316   :  { %v6041_v21 = vpop.f32.mrf.mxu1  ;;  %v6153_v18 = vrot.slane %v6145_v33, %v13949_v46  ;;  %v6235_v54 = vrot.slane %v6221_v47, %v13949_v46  ;;  %v6121_v61 = vcombine.high %v6120_v28, %v6120_v28 }
0x1317   :  { %v6074_v40 = vadd.f32 %v6072_v35, %v13947_v1  ;;  %v6073_v6 = vmul.f32 %v8301_v38, %v6040_v39  ;;  %v6171_v11 = vcombine.high %v6170_v2, %v6170_v2  ;;  %v12637_v7 = vrot.slane %v6170_v2, %v13949_v46  ;;  %v13957_v21 = vld [vmem:[#allocation95_spill] sm:$0xff] }
0x1318   :  { %v6042_v14 = vpop.f32.mrf.mxu1  ;;  %v6160_v36 = vrot.slane %v6146_v0, %v13949_v46  ;;  %v6253_v39 = vrot.slane %v6245_v13, %v13949_v46  ;;  %v6397_v12 = vrot.slane %v6235_v54, %v13954_v58  ;;  %v6401_v60 = vrot.slane %v6235_v54, %v13955_v31 }
0x1319   :  { %8306 = vtanh.f32 %v6074_v40  ;;  %v6075_v27 = vadd.f32 %v6073_v6, %v13948_v8  ;;  %v12649_v49 = vrot.slane %v6171_v11, %v13949_v46  ;;  %v6349_v24 = vrot.slane %v12637_v7, %v13954_v58 }
0x131a   :  { %v6353_v32 = vrot.slane %v12637_v7, %v13955_v31  ;;  %v6329_v40 = vrot.slane %v6153_v18, %v13954_v58  ;;  %v6389_v6 = vrot.slane %v12663_v48, %v13954_v58  ;;  %v6393_v14 = vrot.slane %v12663_v48, %v13955_v31 }
0x131b   :  { %8308 = vtanh.f32 %v6075_v27  ;;  %v6357_v34 = vrot.slane %v12649_v49, %v13954_v58  ;;  %v6361_v35 = vrot.slane %v12649_v49, %v13955_v31  ;;  %v6128_v8 = vrot.slane %v6120_v28, %v13949_v46 }
0x131c   :  { %v6333_v27 = vrot.slane %v6153_v18, %v13955_v31  ;;  %v6337_v2 = vrot.slane %v6160_v36, %v13954_v58  ;;  %v6135_v37 = vrot.slane %v6121_v61, %v13949_v46  ;;  %v6341_v57 = vrot.slane %v6160_v36, %v13955_v31 }
0x131d   :  { %v6409_v10 = vrot.slane %v6253_v39, %v13954_v58  ;;  %v6309_v17 = vrot.slane %v6128_v8, %v13954_v58  ;;  %v6413_v56 = vrot.slane %v6253_v39, %v13955_v31  ;;  %v6313_v25 = vrot.slane %v6128_v8, %v13955_v31 }
0x131e   :  { %v6321_v13 = vrot.slane %v6135_v37, %v13955_v31 }
0x1326   :  { %v8307_v20 = vpop.eup %8306 }
0x1327   :  { %v6080_v29 = vmul.f32 %v8307_v20, %v6078_v42  ;;  %v6317_v20 = vrot.slane %v6135_v37, %v13954_v58 }
0x1328   :  { %v8309_v23 = vpop.eup %8308 }
0x1329   :  { %v12655_v63 = vadd.f32 %v6082_v3, %v6080_v29  ;;  %v6081_v30 = vmul.f32 %v8309_v23, %v6079_v55 }
0x132b   :  { %v6263_v26 = vcombine.low %v12655_v63, %v13956_v51  ;;  %v12669_v4 = vadd.f32 %v6083_v19, %v6081_v30 }
0x132d   :  { %v6270_v38 = vrot.slane %v6263_v26, %v13949_v46  ;;  %v6088_v1 = vcombine.low %v13957_v21, %v12669_v4 }
0x132f   :  { %v6271_v41 = vcombine.high %v6270_v38, %v6270_v38  ;;  %v6095_v50 = vrot.slane %v6088_v1, %v13949_v46  ;;  %v6278_v44 = vrot.slane %v6270_v38, %v13949_v46 }
0x1331   :  { %v6096_v5 = vcombine.high %v6095_v50, %v6095_v50  ;;  %v6285_v11 = vrot.slane %v6271_v41, %v13949_v46  ;;  %v6103_v33 = vrot.slane %v6095_v50, %v13949_v46  ;;  %v6429_v55 = vrot.slane %v6278_v44, %v13954_v58 }
0x1332   :  { %v6433_v23 = vrot.slane %v6278_v44, %v13955_v31 }
0x1333   :  { %v6110_v42 = vrot.slane %v6096_v5, %v13949_v46  ;;  %v6289_v3 = vrot.slane %v6103_v33, %v13954_v58  ;;  %v6293_v29 = vrot.slane %v6103_v33, %v13955_v31  ;;  %v6437_v47 = vrot.slane %v6285_v11, %v13954_v58 }
0x1334   :  { %v6441_v46 = vrot.slane %v6285_v11, %v13955_v31 }
0x1335   :  { %v6297_v49 = vrot.slane %v6110_v42, %v13954_v58  ;;  %v6301_v0 = vrot.slane %v6110_v42, %v13955_v31  ;;  %v6446_v28 = vsel %vm3125_vm3, %v6289_v3, %v6309_v17  ;;  %v6447_v19 = vsel %vm3125_vm3, %v6293_v29, %v6313_v25 }
0x1336   :  { %v6450_v48 = vsel %vm3130_vm4, %v6446_v28, %v6329_v40  ;;  %v6451_v15 = vsel %vm3130_vm4, %v6447_v19, %v6333_v27 }
0x1337   :  { %v6448_v30 = vsel %vm3125_vm3, %v6297_v49, %v6317_v20  ;;  %v6449_v18 = vsel %vm3125_vm3, %v6301_v0, %v6321_v13  ;;  %v6454_v36 = vsel %vm3135_vm5, %v6450_v48, %v6349_v24  ;;  %v6455_v54 = vsel %vm3135_vm5, %v6451_v15, %v6353_v32 }
0x1338   :  { %v6452_v51 = vsel %vm3130_vm4, %v6448_v30, %v6337_v2  ;;  %v6453_v26 = vsel %vm3130_vm4, %v6449_v18, %v6341_v57  ;;  %v6458_v38 = vsel %vm3140_vm6, %v6454_v36, %v6369_v22  ;;  %v6459_v21 = vsel %vm3140_vm6, %v6455_v54, %v6373_v52 }
0x1339   :  { %v6456_v61 = vsel %vm3135_vm5, %v6452_v51, %v6357_v34  ;;  %v6457_v39 = vsel %vm3135_vm5, %v6453_v26, %v6361_v35  ;;  %v6462_v32 = vsel %vm3145_vm7, %v6458_v38, %v6389_v6  ;;  %v6463_v34 = vsel %vm3145_vm7, %v6459_v21, %v6393_v14 }
0x133a   :  { %v6460_v7 = vsel %vm3140_vm6, %v6456_v61, %v6377_v59  ;;  %v6461_v24 = vsel %vm3140_vm6, %v6457_v39, %v6381_v16  ;;  %v6466_v1 = vsel %vm422_vm0, %v6462_v32, %v6409_v10  ;;  %v6467_v9 = vsel %vm422_vm0, %v6463_v34, %v6413_v56 }
0x133b   :  { %v6464_v35 = vsel %vm3145_vm7, %v6460_v7, %v6397_v12  ;;  %v6465_v22 = vsel %vm3145_vm7, %v6461_v24, %v6401_v60  ;;  %v6470_v58 = vsel %vm3154_vm8, %v6466_v1, %v6429_v55  ;;  %v6471_v52 = vsel %vm3154_vm8, %v6467_v9, %v6433_v23 }
0x133c   :  { %v6468_v31 = vsel %vm422_vm0, %v6464_v35, %v6417_v62  ;;  %v6469_v45 = vsel %vm422_vm0, %v6465_v22, %v6421_v43  ;;  %6474 = vst [vmem:[#allocation17] sm:$0xff] %v6470_v58  ;;  %6475 = vst [vmem:[#allocation17 + $0x8] sm:$0xff] %v6471_v52 }
0x133d   :  { %v6472_v59 = vsel %vm3154_vm8, %v6468_v31, %v6437_v47  ;;  %v6473_v16 = vsel %vm3154_vm8, %v6469_v45, %v6441_v46 }
0x133e   :  { %6476 = vst [vmem:[#allocation17 + $0x10] sm:$0xff] %v6472_v59  ;;  %6477 = vst [vmem:[#allocation17 + $0x18] sm:$0xff] %v6473_v16 }
0x133f   :  { %8720 = dma.done.wait [#allocation6 + $0x2], 2048 }
0x1340   :  { %8721 = vsyncadd [#allocation6 + $0x2], 4294965248 }
0x1341   :  { %8722 = dma.done.wait [#allocation6 + $0x3], 1024 }
0x1342   :  { %8723 = vsyncadd [#allocation6 + $0x3], 4294966272  ;;  %v6486_v40 = vpack.c.bf16 %v12669_v4, %v12669_v4  ;;  %v8502_v6 = vld [vmem:[#allocation4 + $0x78] sm:$0xff]   ;;  %v8504_v8 = vld [vmem:[#allocation4 + $0x70] sm:$0xff]   ;;  %v6485_v17 = vpack.c.bf16 %v12655_v63, %v12655_v63  ;;  %v8739_v3 = vmov 0.0   ;;  %vm8740_vm9 = vmmov 0  }
0x1343   :  { %v8503_v14 = vld [vmem:[#allocation4 + $0x38] sm:$0xff]   ;;  %7288 = vmatprep.subr.bf16.mxu0 %v8502_v6  ;;  %v8505_v27 = vld [vmem:[#allocation4 + $0x30] sm:$0xff]   ;;  %v8506_v53 = vld [vmem:[#allocation4 + $0x68] sm:$0xff]   ;;  %vm6807_vm10 = vcmask 517120  }
0x1344   :  { %6654 = vmatprep.mubr.bf16.mxu0 %v6486_v40  ;;  %7289 = vmatpush3.bf16.msra.mxu0 %v8503_v14  ;;  %v8507_v41 = vld [vmem:[#allocation4 + $0x28] sm:$0xff]   ;;  %v8508_v50 = vld [vmem:[#allocation4 + $0x60] sm:$0xff]   ;;  %v8510_v12 = vld [vmem:[#allocation4 + $0x58] sm:$0xff]  }
0x1345   :  { %7290 = vmatprep.subr.bf16.mxu0 %v8504_v8  ;;  %v8509_v2 = vld [vmem:[#allocation4 + $0x20] sm:$0xff]   ;;  %v8511_v60 = vld [vmem:[#allocation4 + $0x18] sm:$0xff]   ;;  %v8512_v4 = vld [vmem:[#allocation4 + $0x50] sm:$0xff]  }
0x1346   :  { %v8513_v37 = vld [vmem:[#allocation4 + $0x10] sm:$0xff]   ;;  %v8514_v57 = vld [vmem:[#allocation4 + $0x48] sm:$0xff]   ;;  %v8516_v44 = vld [vmem:[#allocation4 + $0x40] sm:$0xff]  }
0x1347   :  { %v8515_v10 = vld [vmem:[#allocation4 + $0x8] sm:$0xff]   ;;  %v8517_v5 = vld [vmem:[#allocation4] sm:$0xff]   ;;  %v8518_v13 = vld [vmem:[#allocation5 + $0x38] sm:$0xff]  }
0x1348   :  { %7291 = vmatpush3.bf16.msra.mxu0 %v8505_v27  ;;  %v7256_v33 = vld [vmem:[%s12785_s7] ss:$0 sm:$0xff]  ;;  %v8519_v0 = vld [vmem:[#allocation5 + $0x30] sm:$0xff]   ;;  %v8520_v47 = vld [vmem:[#allocation5 + $0x28] sm:$0xff]  }
0x1349   :  { %7292 = vmatprep.subr.bf16.mxu0 %v8506_v53  ;;  %v8521_v46 = vld [vmem:[#allocation5 + $0x20] sm:$0xff]   ;;  %v8522_v28 = vld [vmem:[#allocation5 + $0x18] sm:$0xff]   ;;  %v8523_v19 = vld [vmem:[#allocation5 + $0x10] sm:$0xff]  }
0x134a   :  { %v8524_v30 = vld [vmem:[#allocation5 + $0x8] sm:$0xff]   ;;  %v8525_v18 = vld [vmem:[#allocation5] sm:$0xff]   ;;  %v7275_v24 = vld [vmem:[#allocation15] ss:$0 sm:$0xff] }
0x134b   :  { %v7273_v36 = vld [vmem:[%s12786_s8] ss:$0 sm:$0xff]  ;;  %s8741_s8 = smov [#allocation17]  }
0x134c   :  { %7293 = vmatpush3.bf16.msra.mxu0 %v8507_v41  ;;  %v7274_v61 = vld [vmem:[%s12787_s9] ss:$0 sm:$0xff]  ;;  %s6830_s5 = sshll.u32 %s8741_s8, 4  ;;  %s6831_s5 = int_to_ptr.vmem [resolvable:$true] %s6830_s5 }
0x134d   :  { %7294 = vmatprep.subr.bf16.mxu0 %v8508_v50  ;;  %s8670_s9 = scalar_lea.vmem %s6831_s5, 512  ;;  %p8675_p8 = scmp.lt.s32.totalorder %s6831_s5, %s6831_s5 }
0x134e   :  { %p8671_p7 = scmp.ne.s32.totalorder %s6831_s5, %s8670_s9  ;;  %p8676_p9 = scmp.lt.s32.totalorder %s8670_s9, %s8670_s9 }
0x1350   :  { %7295 = vmatpush3.bf16.msra.mxu0 %v8509_v2  ;;  %p8677_p10 = por %p8676_p9, %p8675_p8 }
0x1351   :  { %7296 = vmatprep.subr.bf16.mxu0 %v8510_v12 }
0x1352   :  { %p8678_p11 = pnand %p8677_p10, %p8671_p7 }
0x1354   :  { %7297 = vmatpush3.bf16.msra.mxu0 %v8511_v60 }
0x1355   :  { %7298 = vmatprep.subr.bf16.mxu0 %v8512_v4 }
0x1358   :  { %7299 = vmatpush3.bf16.msra.mxu0 %v8513_v37 }
0x1359   :  { %7300 = vmatprep.subr.bf16.mxu0 %v8514_v57 }
0x135c   :  { %7301 = vmatpush3.bf16.msra.mxu0 %v8515_v10 }
0x135d   :  { %7302 = vmatprep.subr.bf16.mxu0 %v8516_v44 }
0x1360   :  { %7303 = vmatpush3.bf16.msra.mxu0 %v8517_v5 }
0x1361   :  { %7319 = vmatprep.subr.bf16.mxu0 %v8739_v3 }
0x1363   :  { %6655 = vmatmul.mubr.bf16.vlgmr.msra.gmra.mxu0 %v6485_v17 }
0x1364   :  { %7320 = vmatpush3.bf16.msra.mxu0 %v8518_v13  ;;  %7335 = vmatprep.mubr.msk.bf16.mxu0 %vm8740_vm9, %v8739_v3 }
0x1365   :  { %7321 = vmatprep.subr.bf16.mxu0 %v8739_v3 }
0x1368   :  { %7322 = vmatpush3.bf16.msra.mxu0 %v8519_v0 }
0x1369   :  { %7323 = vmatprep.subr.bf16.mxu0 %v8739_v3 }
0x136c   :  { %7324 = vmatpush3.bf16.msra.mxu0 %v8520_v47 }
0x136d   :  { %7325 = vmatprep.subr.bf16.mxu0 %v8739_v3 }
0x1370   :  { %7326 = vmatpush3.bf16.msra.mxu0 %v8521_v46 }
0x1371   :  { %7327 = vmatprep.subr.bf16.mxu0 %v8739_v3 }
0x1374   :  { %7328 = vmatpush3.bf16.msra.mxu0 %v8522_v28 }
0x1375   :  { %7329 = vmatprep.subr.bf16.mxu0 %v8739_v3 }
0x1378   :  { %7330 = vmatpush3.bf16.msra.mxu0 %v8523_v19 }
0x1379   :  { %7331 = vmatprep.subr.bf16.mxu0 %v8739_v3 }
0x137c   :  { %7332 = vmatpush3.bf16.msra.mxu0 %v8524_v30 }
0x137d   :  { %7333 = vmatprep.subr.bf16.mxu0 %v8739_v3 }
0x1380   :  { %7334 = vmatpush3.bf16.msra.mxu0 %v8525_v18 }
0x1423   :  { %v7304_v56 = vpop.f32.mrf.mxu0 }
0x1425   :  { %v7305_v11 = vpop.f32.mrf.mxu0 }
0x1426   :  { %v7306_v25 = vadd.f32 %v7305_v11, %v7304_v56 }
0x1427   :  { %v7307_v62 = vpop.f32.mrf.mxu0 }
0x1428   :  { %v6657_v43 = vadd.f32 %v7306_v25, %v7256_v33 }
0x1429   :  { %v7308_v42 = vpop.f32.mrf.mxu0 }
0x142a   :  { %v6662_v20 = vsel %vm3130_vm4, %v6657_v43, 0.0 }
0x142b   :  { %6663 = vadd.xlane.f32.xlu0 %v6662_v20 }
0x14b4   :  { %v6664_v63 = vpop.xlane.xlu0 %6663 }
0x14b5   :  { %v6666_v29 = vmul.f32 0.0078125, %v6664_v63 }
0x14b7   :  { %v6667_v55 = vsub.f32 %v6657_v43, %v6666_v29 }
0x14b9   :  { %v6668_v23 = vmul.f32 %v6667_v55, %v6667_v55 }
0x14bb   :  { %v6669_v49 = vsel %vm3130_vm4, %v6668_v23, 0.0 }
0x14bc   :  { %6670 = vadd.xlane.f32.xlu0 %v6669_v49 }
0x1545   :  { %v6671_v48 = vpop.xlane.xlu0 %6670 }
0x1546   :  { %v6672_v15 = vmul.f32 0.0078125, %v6671_v48 }
0x1548   :  { %v6673_v51 = vadd.f32 1e-05, %v6672_v15 }
0x154a   :  { %8526 = vrsqrt.f32 %v6673_v51 }
0x1557   :  { %v8527_v26 = vpop.eup %8526 }
0x1558   :  { %v6675_v54 = vmul.f32 %v8527_v26, %v6667_v55 }
0x155a   :  { %v6683_v39 = vmul.f32 %v7273_v36, %v6675_v54 }
0x155c   :  { %v6691_v38 = vadd.f32 %v7274_v61, %v6683_v39 }
0x155e   :  { %v6692_v21 = vmax.f32 %v6691_v38, 0.0 }
0x1560   :  { %v6693_v7 = vpack.c.bf16 %v6692_v21, %v6692_v21 }
0x1562   :  { %7336 = vmatmul.mubr.bf16.vlgmr.msra.gmra.mxu0 %v6693_v7 }
0x1622   :  { %v6799_v32 = vpop.f32.mrf.mxu0 }
0x1623   :  { %v6800_v34 = vadd.f32 %v7275_v24, %v6799_v32 }
0x1624   :  { %v7337_v35 = vpop.f32.mrf.mxu0 }
0x1625   :  { %v6805_v22 = vmul.f32 14.285714, %v6800_v34 }
0x1626   :  { %v6802_v1 = vpop.f32.mrf.mxu0 }
0x1627   :  { %v6806_v9 = vmul.f32 %v6805_v22, %v6805_v22 }
0x1628   :  { %v7338_v31 = vpop.f32.mrf.mxu0 }
0x1629   :  { %v6808_v45 = vsel %vm6807_vm10, %v6806_v9, 0.0 }
0x162a   :  { %6809 = vadd.xlane.f32.xlu1 %v6808_v45 }
0x162b   :  { %8681 = shalt.err (!%p8678_p11)
}
0x162c   :  { %s8742_s27 = smov 256   ;;  %s8743_s17 = smov 16  }
0x162d   :  { %6836 = dma.vmem_to_hbm [thread:$0]  %s6831_s5, 512, %s12794_s16, [#allocation18], %s8742_s27, %s8742_s27, %s8743_s17  }
0x162e   :  { %s8744_s10 = smov [#allocation16]  }
0x162f   :  { %s6821_s13 = sshll.u32 %s8744_s10, 4  ;;  %s6822_s13 = int_to_ptr.vmem [resolvable:$true] %s6821_s13 }
0x1630   :  { %s8690_s20 = scalar_lea.vmem %s6822_s13, 32  ;;  %p8695_p13 = scmp.lt.s32.totalorder %s6822_s13, %s6822_s13 }
0x1631   :  { %p8691_p12 = scmp.ne.s32.totalorder %s6822_s13, %s8690_s20  ;;  %p8696_p0 = scmp.lt.s32.totalorder %s8690_s20, %s8690_s20 }
0x1633   :  { %p8697_p1 = por %p8696_p0, %p8695_p13 }
0x1635   :  { %p8698_p2 = pnand %p8697_p1, %p8691_p12 }
0x16b3   :  { %v6810_v58 = vpop.xlane.xlu1 %6809 }
0x16b4   :  { %v6811_v52 = vmax.f32 %v6810_v58, 1e-24 }
0x16b6   :  { %8528 = vrsqrt.f32 %v6811_v52 }
0x16c3   :  { %v8529_v59 = vpop.eup %8528 }
0x16c4   :  { %v6813_v16 = vmul.f32 %v8529_v59, %v6805_v22 }
0x16c6   :  { %6814 = vst.msk [vmem:[#allocation16] sm:$0x3] %vm6807_vm10, %v6813_v16 }
0x16c7   :  { %8701 = shalt.err (!%p8698_p2)
}
0x16c8   :  { %6824 = dma.vmem_to_hbm [thread:$0]  %s6822_s13, 32, %s12793_s15, [#allocation9]  }
0x16c9   :  { %8724 = dma.done.wait [#allocation9], 32  }
0x16ca   :  { %8725 = vsyncadd [#allocation9], 4294967264 }
0x16cb   :  { %8726 = dma.done.wait [#allocation18], 512  }
0x16cc   :  { %8727 = vsyncadd [#allocation18], 4294966784 }
0x16cd   :  { %6843 = vsyncpa [#allocation8], 1 }
0x16ce   :  { %6844 = vsyncpa [#allocation11], 1 }
0x16cf   :  { %6845 = vsyncpa [#allocation14], 1 }
0x16d0   :  { %6846 = vsyncpa [#allocation9], 1 }
0x16d1   :  { %6847 = vsyncpa [#allocation18], 1 }
0x16d2   :  { %6848 = vsyncmov [#allocation6] }
0x16d5   :  { %s6849_s16 = vpop.sfrf %6848 }
0x16d6   :  { %p7284_p3 = scmp.ne.s32.totalorder %s6849_s16, 0 }
0x16d8   :  { %6853 = shalt.err (%p7284_p3)  }
0x16d9   :  { %6855 = vsyncmov [#allocation6 + $0x1] }
0x16dc   :  { %s6856_s3 = vpop.sfrf %6855 }
0x16dd   :  { %p7285_p4 = scmp.ne.s32.totalorder %s6856_s3, 0 }
0x16df   :  { %6860 = shalt.err (%p7285_p4)  }
0x16e0   :  { %6862 = vsyncmov [#allocation6 + $0x2] }
0x16e3   :  { %s6863_s22 = vpop.sfrf %6862 }
0x16e4   :  { %p7286_p5 = scmp.ne.s32.totalorder %s6863_s22, 0 }
0x16e6   :  { %6867 = shalt.err (%p7286_p5)  }
0x16e7   :  { %6869 = vsyncmov [#allocation6 + $0x3] }
0x16ea   :  { %s6870_s15 = vpop.sfrf %6869 }
0x16eb   :  { %p7287_p6 = scmp.ne.s32.totalorder %s6870_s15, 0 }
0x16ed   :  { %6874 = shalt.err (%p7287_p6)  }

</bundles_post_ra>
